<compile_context>
chip_gen: v5e
topology: v5e:2x2
jax: 0.10.0
libtpu: 0.0.40
codegen_flags: <defaults>
</compile_context>

<pallas_src>
import functools

import jax
import jax.numpy as jnp
from jax.experimental import pallas as pl
from jax.experimental.pallas import tpu as pltpu

LANE = 128  # TPU lane width; each gate is padded to a full lane block.


def _lstm_recurrence_kernel(xproj_ref, whh0_ref, w1_ref, b1_ref, h2_ref):
    """Two-layer LSTM recurrence, fully unrolled over the static seq length.

    xproj_ref : (S, B, 4*Hp)  layer-0 input projection (+ layer-0 bias), gate-padded
    whh0_ref  : (Hp, 4*Hp)    layer-0 recurrent weight, gate/row padded
    w1_ref    : (2*Hp, 4*Hp)  layer-1 fused [W_ih1; W_hh1], gate/row padded
    b1_ref    : (1, 4*Hp)     layer-1 bias (b_ih1 + b_hh1), gate padded
    h2_ref    : (B, Hp)       final layer-1 hidden state (lanes >= H are zero)
    """
    seq, batch, gdim = xproj_ref.shape
    hp = gdim // 4

    # Hoisted once: JAX does not CSE broadcast_in_dim inside the unrolled loop.
    b1 = jnp.broadcast_to(b1_ref[...], (batch, gdim))

    def gates_to_hc(gates, c):
        # Gate blocks are 128-lane aligned -> pure vreg selection, no relayout.
        i_g = jax.nn.sigmoid(gates[:, 0 * hp:1 * hp])
        f_g = jax.nn.sigmoid(gates[:, 1 * hp:2 * hp])
        g_g = jnp.tanh(gates[:, 2 * hp:3 * hp])
        o_g = jax.nn.sigmoid(gates[:, 3 * hp:4 * hp])
        c_new = f_g * c + i_g * g_g
        h_new = o_g * jnp.tanh(c_new)
        return h_new, c_new

    zeros = jnp.zeros((batch, hp), jnp.float32)
    h1, c1, h2, c2 = zeros, zeros, zeros, zeros

    # seq is a small static trip count; full unrolling is intentional
    # (equivalent to lax.fori_loop(..., unroll=True), static indexing).
    for t in range(seq):
        # Layer 0: input projection precomputed; only the recurrent matmul here.
        g0 = xproj_ref[t] + jnp.dot(h1, whh0_ref[...],
                                    preferred_element_type=jnp.float32)
        h1, c1 = gates_to_hc(g0, c1)
        # Dropout between layers skipped (eval semantics).
        # Layer 1: one fused matmul over the concatenated [h1, h2].
        hcat = jnp.concatenate([h1, h2], axis=-1)
        g1 = jnp.dot(hcat, w1_ref[...],
                     preferred_element_type=jnp.float32) + b1
        h2, c2 = gates_to_hc(g1, c2)

    h2_ref[...] = h2


def _pad_gates(a, h, hp):
    """(..., 4*h) -> (..., 4*hp): zero-pad each gate block from h to hp lanes."""
    lead = a.shape[:-1]
    a = a.reshape(lead + (4, h))
    pad = [(0, 0)] * len(lead) + [(0, 0), (0, hp - h)]
    return jnp.pad(a, pad).reshape(lead + (4 * hp,))


def _pad_rows(a, rows):
    return jnp.pad(a, ((0, rows - a.shape[0]), (0, 0)))


@functools.partial(jax.jit, static_argnames=("output_steps",))
def multi_step_lstm_forward(x, params, output_steps):
    """x: (batch, seq, input_size) float32 — PyTorch batch_first convention."""
    batch, seq, input_size = x.shape
    hidden = params["whh0"].shape[-1]
    hp = ((hidden + LANE - 1) // LANE) * LANE          # 32 -> 128

    x = x.astype(jnp.float32)
    x_tm = jnp.transpose(x, (1, 0, 2))                 # (S, B, I)

    # Layer-0 input projection hoisted out of the recurrence: one batched matmul.
    b0 = params["bih0"] + params["bhh0"]               # (4H,)
    xproj = jnp.dot(x_tm, params["wih0"].T) + b0       # (S, B, 4H)
    xproj = _pad_gates(xproj, hidden, hp)              # (S, B, 4*Hp)

    # Layer-0 recurrent weight: (Hp, 4*Hp), zero rows/cols beyond H.
    whh0_p = _pad_rows(_pad_gates(params["whh0"].T, hidden, hp), hp)

    # Layer-1 fused weight for [h1, h2]: (2*Hp, 4*Hp).
    w1_ih = _pad_rows(_pad_gates(params["wih1"].T, hidden, hp), hp)
    w1_hh = _pad_rows(_pad_gates(params["whh1"].T, hidden, hp), hp)
    w1_p = jnp.concatenate([w1_ih, w1_hh], axis=0)

    b1_p = _pad_gates((params["bih1"] + params["bhh1"]).reshape(1, 4 * hidden),
                      hidden, hp)                      # (1, 4*Hp)

    h2_full = pl.pallas_call(
        _lstm_recurrence_kernel,
        out_shape=jax.ShapeDtypeStruct((batch, hp), jnp.float32),
        in_specs=[pl.BlockSpec(memory_space=pltpu.MemorySpace.VMEM)] * 4,
        out_specs=pl.BlockSpec(memory_space=pltpu.MemorySpace.VMEM),
    )(xproj, whh0_p, w1_p, b1_p)

    # FC head (hidden -> 64 -> output_steps*2) runs once on the final hidden
    # state, in plain JAX per the performance review (lane-sparse out_dim).
    h2 = h2_full[:, :hidden]
    z = jnp.maximum(h2 @ params["w_fc1"].T + params["b_fc1"], 0.0)
    y = z @ params["w_fc2"].T + params["b_fc2"]
    return y.reshape(-1, output_steps, 2)


def init_params(key, input_size, hidden_size, output_steps):
    ks = jax.random.split(key, 12)
    bound = 1.0 / jnp.sqrt(jnp.float32(hidden_size))

    def u(k, shape):
        return jax.random.uniform(k, shape, jnp.float32, -bound, bound)

    return dict(
        wih0=u(ks[0], (4 * hidden_size, input_size)),
        whh0=u(ks[1], (4 * hidden_size, hidden_size)),
        bih0=u(ks[2], (4 * hidden_size,)),
        bhh0=u(ks[3], (4 * hidden_size,)),
        wih1=u(ks[4], (4 * hidden_size, hidden_size)),
        whh1=u(ks[5], (4 * hidden_size, hidden_size)),
        bih1=u(ks[6], (4 * hidden_size,)),
        bhh1=u(ks[7], (4 * hidden_size,)),
        w_fc1=u(ks[8], (64, hidden_size)),
        b_fc1=u(ks[9], (64,)),
        w_fc2=u(ks[10], (output_steps * 2, 64)),
        b_fc2=u(ks[11], (output_steps * 2,)),
    )


def reference_forward(x, params, output_steps):
    """Pure-JAX reference (eval-mode, matches PyTorch LSTM semantics)."""
    batch, seq, _ = x.shape
    hidden = params["whh0"].shape[-1]

    def step(carry, x_t):
        h1, c1, h2, c2 = carry

        def cell(xin, h, c, wih, whh, bih, bhh):
            gates = xin @ wih.T + h @ whh.T + bih + bhh
            i_g = jax.nn.sigmoid(gates[:, 0 * hidden:1 * hidden])
            f_g = jax.nn.sigmoid(gates[:, 1 * hidden:2 * hidden])
            g_g = jnp.tanh(gates[:, 2 * hidden:3 * hidden])
            o_g = jax.nn.sigmoid(gates[:, 3 * hidden:4 * hidden])
            c_new = f_g * c + i_g * g_g
            h_new = o_g * jnp.tanh(c_new)
            return h_new, c_new

        h1, c1 = cell(x_t, h1, c1, params["wih0"], params["whh0"],
                      params["bih0"], params["bhh0"])
        h2, c2 = cell(h1, h2, c2, params["wih1"], params["whh1"],
                      params["bih1"], params["bhh1"])
        return (h1, c1, h2, c2), None

    z = jnp.zeros((batch, hidden), jnp.float32)
    (h1, c1, h2, c2), _ = jax.lax.scan(step, (z, z, z, z),
                                       jnp.transpose(x, (1, 0, 2)))
    y = jnp.maximum(h2 @ params["w_fc1"].T + params["b_fc1"], 0.0)
    y = y @ params["w_fc2"].T + params["b_fc2"]
    return y.reshape(-1, output_steps, 2)


if __name__ == "__main__":
    batch, seq, input_size = 2, 8, 4
    hidden_size, output_steps = 32, 3

    key = jax.random.PRNGKey(0)
    kx, kp = jax.random.split(key)
    x = jax.random.normal(kx, (batch, seq, input_size), jnp.float32)
    params = init_params(kp, input_size, hidden_size, output_steps)

    out = multi_step_lstm_forward(x, params, output_steps)
    out = jax.block_until_ready(out)

    ref = reference_forward(x, params, output_steps)
    assert out.shape == (batch, output_steps, 2), out.shape
    assert jnp.allclose(out, ref, atol=1e-5, rtol=1e-5), (
        f"max abs err = {jnp.max(jnp.abs(out - ref))}")

    print("KERNEL_OK")
</pallas_src>

<mosaic_0001>
module attributes {stable_mosaic.version = 11 : i64} {
  func.func @_lstm_recurrence_kernel(%arg0: memref<8x2x512xf32, #tpu.memory_space<vmem>>, %arg1: memref<128x512xf32, #tpu.memory_space<vmem>>, %arg2: memref<256x512xf32, #tpu.memory_space<vmem>>, %arg3: memref<1x512xf32, #tpu.memory_space<vmem>>, %arg4: memref<2x128xf32, #tpu.memory_space<vmem>>) attributes {dimension_semantics = [], scalar_prefetch = 0 : i64, scratch_operands = 0 : i64, tpu.core_type = #tpu.core_type<tc>} {
    %c0 = arith.constant 0 : index
    %c0_0 = arith.constant 0 : index
    %0 = vector.load %arg3[%c0, %c0_0] : memref<1x512xf32, #tpu.memory_space<vmem>>, vector<1x512xf32>
    %1 = vector.shape_cast %0 : vector<1x512xf32> to vector<1x512xf32>
    %2 = vector.broadcast %1 : vector<1x512xf32> to vector<2x512xf32>
    %cst = arith.constant 0.000000e+00 : f32
    %3 = vector.broadcast %cst : f32 to vector<2x128xf32>
    %c0_1 = arith.constant 0 : index
    %c0_2 = arith.constant 0 : index
    %c0_3 = arith.constant 0 : index
    %4 = vector.load %arg0[%c0_1, %c0_2, %c0_3] : memref<8x2x512xf32, #tpu.memory_space<vmem>>, vector<1x2x512xf32>
    %5 = vector.shape_cast %4 : vector<1x2x512xf32> to vector<2x512xf32>
    %c0_4 = arith.constant 0 : index
    %c0_5 = arith.constant 0 : index
    %6 = vector.load %arg1[%c0_4, %c0_5] : memref<128x512xf32, #tpu.memory_space<vmem>>, vector<128x512xf32>
    %cst_6 = arith.constant dense<0.000000e+00> : vector<2x512xf32>
    %7 = tpu.matmul %3, %6, %cst_6 {dimension_numbers = #tpu.dot_dimension_numbers<[1], [0], [0], [1], [0, 0, 1, 1], [], []>} : vector<2x128xf32>, vector<128x512xf32>, vector<2x512xf32> -> vector<2x512xf32>
    %8 = arith.addf %5, %7 : vector<2x512xf32>
    %9 = vector.extract_strided_slice %8 {offsets = [0, 0], sizes = [2, 128], strides = [1, 1]} : vector<2x512xf32> to vector<2x128xf32>
    %10 = arith.negf %9 : vector<2x128xf32>
    %11 = math.exp %10 : vector<2x128xf32>
    %cst_7 = arith.constant 1.000000e+00 : f32
    %12 = vector.broadcast %cst_7 : f32 to vector<2x128xf32>
    %13 = arith.addf %12, %11 : vector<2x128xf32>
    %14 = arith.divf %12, %13 : vector<2x128xf32>
    %15 = vector.extract_strided_slice %8 {offsets = [0, 128], sizes = [2, 128], strides = [1, 1]} : vector<2x512xf32> to vector<2x128xf32>
    %16 = arith.negf %15 : vector<2x128xf32>
    %17 = math.exp %16 : vector<2x128xf32>
    %cst_8 = arith.constant 1.000000e+00 : f32
    %18 = vector.broadcast %cst_8 : f32 to vector<2x128xf32>
    %19 = arith.addf %18, %17 : vector<2x128xf32>
    %20 = arith.divf %18, %19 : vector<2x128xf32>
    %21 = vector.extract_strided_slice %8 {offsets = [0, 256], sizes = [2, 128], strides = [1, 1]} : vector<2x512xf32> to vector<2x128xf32>
    %22 = math.tanh %21 : vector<2x128xf32>
    %23 = vector.extract_strided_slice %8 {offsets = [0, 384], sizes = [2, 128], strides = [1, 1]} : vector<2x512xf32> to vector<2x128xf32>
    %24 = arith.negf %23 : vector<2x128xf32>
    %25 = math.exp %24 : vector<2x128xf32>
    %cst_9 = arith.constant 1.000000e+00 : f32
    %26 = vector.broadcast %cst_9 : f32 to vector<2x128xf32>
    %27 = arith.addf %26, %25 : vector<2x128xf32>
    %28 = arith.divf %26, %27 : vector<2x128xf32>
    %29 = arith.mulf %20, %3 : vector<2x128xf32>
    %30 = arith.mulf %14, %22 : vector<2x128xf32>
    %31 = arith.addf %29, %30 : vector<2x128xf32>
    %32 = math.tanh %31 : vector<2x128xf32>
    %33 = arith.mulf %28, %32 : vector<2x128xf32>
    %34 = tpu.concatenate %33, %3 in 1 : vector<2x128xf32>, vector<2x128xf32> -> vector<2x256xf32>
    %c0_10 = arith.constant 0 : index
    %c0_11 = arith.constant 0 : index
    %35 = vector.load %arg2[%c0_10, %c0_11] : memref<256x512xf32, #tpu.memory_space<vmem>>, vector<256x512xf32>
    %cst_12 = arith.constant dense<0.000000e+00> : vector<2x512xf32>
    %36 = tpu.matmul %34, %35, %cst_12 {dimension_numbers = #tpu.dot_dimension_numbers<[1], [0], [0], [1], [0, 0, 1, 1], [], []>} : vector<2x256xf32>, vector<256x512xf32>, vector<2x512xf32> -> vector<2x512xf32>
    %37 = arith.addf %36, %2 : vector<2x512xf32>
    %38 = vector.extract_strided_slice %37 {offsets = [0, 0], sizes = [2, 128], strides = [1, 1]} : vector<2x512xf32> to vector<2x128xf32>
    %39 = arith.negf %38 : vector<2x128xf32>
    %40 = math.exp %39 : vector<2x128xf32>
    %cst_13 = arith.constant 1.000000e+00 : f32
    %41 = vector.broadcast %cst_13 : f32 to vector<2x128xf32>
    %42 = arith.addf %41, %40 : vector<2x128xf32>
    %43 = arith.divf %41, %42 : vector<2x128xf32>
    %44 = vector.extract_strided_slice %37 {offsets = [0, 128], sizes = [2, 128], strides = [1, 1]} : vector<2x512xf32> to vector<2x128xf32>
    %45 = arith.negf %44 : vector<2x128xf32>
    %46 = math.exp %45 : vector<2x128xf32>
    %cst_14 = arith.constant 1.000000e+00 : f32
    %47 = vector.broadcast %cst_14 : f32 to vector<2x128xf32>
    %48 = arith.addf %47, %46 : vector<2x128xf32>
    %49 = arith.divf %47, %48 : vector<2x128xf32>
    %50 = vector.extract_strided_slice %37 {offsets = [0, 256], sizes = [2, 128], strides = [1, 1]} : vector<2x512xf32> to vector<2x128xf32>
    %51 = math.tanh %50 : vector<2x128xf32>
    %52 = vector.extract_strided_slice %37 {offsets = [0, 384], sizes = [2, 128], strides = [1, 1]} : vector<2x512xf32> to vector<2x128xf32>
    %53 = arith.negf %52 : vector<2x128xf32>
    %54 = math.exp %53 : vector<2x128xf32>
    %cst_15 = arith.constant 1.000000e+00 : f32
    %55 = vector.broadcast %cst_15 : f32 to vector<2x128xf32>
    %56 = arith.addf %55, %54 : vector<2x128xf32>
    %57 = arith.divf %55, %56 : vector<2x128xf32>
    %58 = arith.mulf %49, %3 : vector<2x128xf32>
    %59 = arith.mulf %43, %51 : vector<2x128xf32>
    %60 = arith.addf %58, %59 : vector<2x128xf32>
    %61 = math.tanh %60 : vector<2x128xf32>
    %62 = arith.mulf %57, %61 : vector<2x128xf32>
    %c1 = arith.constant 1 : index
    %c0_16 = arith.constant 0 : index
    %c0_17 = arith.constant 0 : index
    %63 = vector.load %arg0[%c1, %c0_16, %c0_17] : memref<8x2x512xf32, #tpu.memory_space<vmem>>, vector<1x2x512xf32>
    %64 = vector.shape_cast %63 : vector<1x2x512xf32> to vector<2x512xf32>
    %c0_18 = arith.constant 0 : index
    %c0_19 = arith.constant 0 : index
    %65 = vector.load %arg1[%c0_18, %c0_19] : memref<128x512xf32, #tpu.memory_space<vmem>>, vector<128x512xf32>
    %cst_20 = arith.constant dense<0.000000e+00> : vector<2x512xf32>
    %66 = tpu.matmul %33, %65, %cst_20 {dimension_numbers = #tpu.dot_dimension_numbers<[1], [0], [0], [1], [0, 0, 1, 1], [], []>} : vector<2x128xf32>, vector<128x512xf32>, vector<2x512xf32> -> vector<2x512xf32>
    %67 = arith.addf %64, %66 : vector<2x512xf32>
    %68 = vector.extract_strided_slice %67 {offsets = [0, 0], sizes = [2, 128], strides = [1, 1]} : vector<2x512xf32> to vector<2x128xf32>
    %69 = arith.negf %68 : vector<2x128xf32>
    %70 = math.exp %69 : vector<2x128xf32>
    %cst_21 = arith.constant 1.000000e+00 : f32
    %71 = vector.broadcast %cst_21 : f32 to vector<2x128xf32>
    %72 = arith.addf %71, %70 : vector<2x128xf32>
    %73 = arith.divf %71, %72 : vector<2x128xf32>
    %74 = vector.extract_strided_slice %67 {offsets = [0, 128], sizes = [2, 128], strides = [1, 1]} : vector<2x512xf32> to vector<2x128xf32>
    %75 = arith.negf %74 : vector<2x128xf32>
    %76 = math.exp %75 : vector<2x128xf32>
    %cst_22 = arith.constant 1.000000e+00 : f32
    %77 = vector.broadcast %cst_22 : f32 to vector<2x128xf32>
    %78 = arith.addf %77, %76 : vector<2x128xf32>
    %79 = arith.divf %77, %78 : vector<2x128xf32>
    %80 = vector.extract_strided_slice %67 {offsets = [0, 256], sizes = [2, 128], strides = [1, 1]} : vector<2x512xf32> to vector<2x128xf32>
    %81 = math.tanh %80 : vector<2x128xf32>
    %82 = vector.extract_strided_slice %67 {offsets = [0, 384], sizes = [2, 128], strides = [1, 1]} : vector<2x512xf32> to vector<2x128xf32>
    %83 = arith.negf %82 : vector<2x128xf32>
    %84 = math.exp %83 : vector<2x128xf32>
    %cst_23 = arith.constant 1.000000e+00 : f32
    %85 = vector.broadcast %cst_23 : f32 to vector<2x128xf32>
    %86 = arith.addf %85, %84 : vector<2x128xf32>
    %87 = arith.divf %85, %86 : vector<2x128xf32>
    %88 = arith.mulf %79, %31 : vector<2x128xf32>
    %89 = arith.mulf %73, %81 : vector<2x128xf32>
    %90 = arith.addf %88, %89 : vector<2x128xf32>
    %91 = math.tanh %90 : vector<2x128xf32>
    %92 = arith.mulf %87, %91 : vector<2x128xf32>
    %93 = tpu.concatenate %92, %62 in 1 : vector<2x128xf32>, vector<2x128xf32> -> vector<2x256xf32>
    %c0_24 = arith.constant 0 : index
    %c0_25 = arith.constant 0 : index
    %94 = vector.load %arg2[%c0_24, %c0_25] : memref<256x512xf32, #tpu.memory_space<vmem>>, vector<256x512xf32>
    %cst_26 = arith.constant dense<0.000000e+00> : vector<2x512xf32>
    %95 = tpu.matmul %93, %94, %cst_26 {dimension_numbers = #tpu.dot_dimension_numbers<[1], [0], [0], [1], [0, 0, 1, 1], [], []>} : vector<2x256xf32>, vector<256x512xf32>, vector<2x512xf32> -> vector<2x512xf32>
    %96 = arith.addf %95, %2 : vector<2x512xf32>
    %97 = vector.extract_strided_slice %96 {offsets = [0, 0], sizes = [2, 128], strides = [1, 1]} : vector<2x512xf32> to vector<2x128xf32>
    %98 = arith.negf %97 : vector<2x128xf32>
    %99 = math.exp %98 : vector<2x128xf32>
    %cst_27 = arith.constant 1.000000e+00 : f32
    %100 = vector.broadcast %cst_27 : f32 to vector<2x128xf32>
    %101 = arith.addf %100, %99 : vector<2x128xf32>
    %102 = arith.divf %100, %101 : vector<2x128xf32>
    %103 = vector.extract_strided_slice %96 {offsets = [0, 128], sizes = [2, 128], strides = [1, 1]} : vector<2x512xf32> to vector<2x128xf32>
    %104 = arith.negf %103 : vector<2x128xf32>
    %105 = math.exp %104 : vector<2x128xf32>
    %cst_28 = arith.constant 1.000000e+00 : f32
    %106 = vector.broadcast %cst_28 : f32 to vector<2x128xf32>
    %107 = arith.addf %106, %105 : vector<2x128xf32>
    %108 = arith.divf %106, %107 : vector<2x128xf32>
    %109 = vector.extract_strided_slice %96 {offsets = [0, 256], sizes = [2, 128], strides = [1, 1]} : vector<2x512xf32> to vector<2x128xf32>
    %110 = math.tanh %109 : vector<2x128xf32>
    %111 = vector.extract_strided_slice %96 {offsets = [0, 384], sizes = [2, 128], strides = [1, 1]} : vector<2x512xf32> to vector<2x128xf32>
    %112 = arith.negf %111 : vector<2x128xf32>
    %113 = math.exp %112 : vector<2x128xf32>
    %cst_29 = arith.constant 1.000000e+00 : f32
    %114 = vector.broadcast %cst_29 : f32 to vector<2x128xf32>
    %115 = arith.addf %114, %113 : vector<2x128xf32>
    %116 = arith.divf %114, %115 : vector<2x128xf32>
    %117 = arith.mulf %108, %60 : vector<2x128xf32>
    %118 = arith.mulf %102, %110 : vector<2x128xf32>
    %119 = arith.addf %117, %118 : vector<2x128xf32>
    %120 = math.tanh %119 : vector<2x128xf32>
    %121 = arith.mulf %116, %120 : vector<2x128xf32>
    %c2 = arith.constant 2 : index
    %c0_30 = arith.constant 0 : index
    %c0_31 = arith.constant 0 : index
    %122 = vector.load %arg0[%c2, %c0_30, %c0_31] : memref<8x2x512xf32, #tpu.memory_space<vmem>>, vector<1x2x512xf32>
    %123 = vector.shape_cast %122 : vector<1x2x512xf32> to vector<2x512xf32>
    %c0_32 = arith.constant 0 : index
    %c0_33 = arith.constant 0 : index
    %124 = vector.load %arg1[%c0_32, %c0_33] : memref<128x512xf32, #tpu.memory_space<vmem>>, vector<128x512xf32>
    %cst_34 = arith.constant dense<0.000000e+00> : vector<2x512xf32>
    %125 = tpu.matmul %92, %124, %cst_34 {dimension_numbers = #tpu.dot_dimension_numbers<[1], [0], [0], [1], [0, 0, 1, 1], [], []>} : vector<2x128xf32>, vector<128x512xf32>, vector<2x512xf32> -> vector<2x512xf32>
    %126 = arith.addf %123, %125 : vector<2x512xf32>
    %127 = vector.extract_strided_slice %126 {offsets = [0, 0], sizes = [2, 128], strides = [1, 1]} : vector<2x512xf32> to vector<2x128xf32>
    %128 = arith.negf %127 : vector<2x128xf32>
    %129 = math.exp %128 : vector<2x128xf32>
    %cst_35 = arith.constant 1.000000e+00 : f32
    %130 = vector.broadcast %cst_35 : f32 to vector<2x128xf32>
    %131 = arith.addf %130, %129 : vector<2x128xf32>
    %132 = arith.divf %130, %131 : vector<2x128xf32>
    %133 = vector.extract_strided_slice %126 {offsets = [0, 128], sizes = [2, 128], strides = [1, 1]} : vector<2x512xf32> to vector<2x128xf32>
    %134 = arith.negf %133 : vector<2x128xf32>
    %135 = math.exp %134 : vector<2x128xf32>
    %cst_36 = arith.constant 1.000000e+00 : f32
    %136 = vector.broadcast %cst_36 : f32 to vector<2x128xf32>
    %137 = arith.addf %136, %135 : vector<2x128xf32>
    %138 = arith.divf %136, %137 : vector<2x128xf32>
    %139 = vector.extract_strided_slice %126 {offsets = [0, 256], sizes = [2, 128], strides = [1, 1]} : vector<2x512xf32> to vector<2x128xf32>
    %140 = math.tanh %139 : vector<2x128xf32>
    %141 = vector.extract_strided_slice %126 {offsets = [0, 384], sizes = [2, 128], strides = [1, 1]} : vector<2x512xf32> to vector<2x128xf32>
    %142 = arith.negf %141 : vector<2x128xf32>
    %143 = math.exp %142 : vector<2x128xf32>
    %cst_37 = arith.constant 1.000000e+00 : f32
    %144 = vector.broadcast %cst_37 : f32 to vector<2x128xf32>
    %145 = arith.addf %144, %143 : vector<2x128xf32>
    %146 = arith.divf %144, %145 : vector<2x128xf32>
    %147 = arith.mulf %138, %90 : vector<2x128xf32>
    %148 = arith.mulf %132, %140 : vector<2x128xf32>
    %149 = arith.addf %147, %148 : vector<2x128xf32>
    %150 = math.tanh %149 : vector<2x128xf32>
    %151 = arith.mulf %146, %150 : vector<2x128xf32>
    %152 = tpu.concatenate %151, %121 in 1 : vector<2x128xf32>, vector<2x128xf32> -> vector<2x256xf32>
    %c0_38 = arith.constant 0 : index
    %c0_39 = arith.constant 0 : index
    %153 = vector.load %arg2[%c0_38, %c0_39] : memref<256x512xf32, #tpu.memory_space<vmem>>, vector<256x512xf32>
    %cst_40 = arith.constant dense<0.000000e+00> : vector<2x512xf32>
    %154 = tpu.matmul %152, %153, %cst_40 {dimension_numbers = #tpu.dot_dimension_numbers<[1], [0], [0], [1], [0, 0, 1, 1], [], []>} : vector<2x256xf32>, vector<256x512xf32>, vector<2x512xf32> -> vector<2x512xf32>
    %155 = arith.addf %154, %2 : vector<2x512xf32>
    %156 = vector.extract_strided_slice %155 {offsets = [0, 0], sizes = [2, 128], strides = [1, 1]} : vector<2x512xf32> to vector<2x128xf32>
    %157 = arith.negf %156 : vector<2x128xf32>
    %158 = math.exp %157 : vector<2x128xf32>
    %cst_41 = arith.constant 1.000000e+00 : f32
    %159 = vector.broadcast %cst_41 : f32 to vector<2x128xf32>
    %160 = arith.addf %159, %158 : vector<2x128xf32>
    %161 = arith.divf %159, %160 : vector<2x128xf32>
    %162 = vector.extract_strided_slice %155 {offsets = [0, 128], sizes = [2, 128], strides = [1, 1]} : vector<2x512xf32> to vector<2x128xf32>
    %163 = arith.negf %162 : vector<2x128xf32>
    %164 = math.exp %163 : vector<2x128xf32>
    %cst_42 = arith.constant 1.000000e+00 : f32
    %165 = vector.broadcast %cst_42 : f32 to vector<2x128xf32>
    %166 = arith.addf %165, %164 : vector<2x128xf32>
    %167 = arith.divf %165, %166 : vector<2x128xf32>
    %168 = vector.extract_strided_slice %155 {offsets = [0, 256], sizes = [2, 128], strides = [1, 1]} : vector<2x512xf32> to vector<2x128xf32>
    %169 = math.tanh %168 : vector<2x128xf32>
    %170 = vector.extract_strided_slice %155 {offsets = [0, 384], sizes = [2, 128], strides = [1, 1]} : vector<2x512xf32> to vector<2x128xf32>
    %171 = arith.negf %170 : vector<2x128xf32>
    %172 = math.exp %171 : vector<2x128xf32>
    %cst_43 = arith.constant 1.000000e+00 : f32
    %173 = vector.broadcast %cst_43 : f32 to vector<2x128xf32>
    %174 = arith.addf %173, %172 : vector<2x128xf32>
    %175 = arith.divf %173, %174 : vector<2x128xf32>
    %176 = arith.mulf %167, %119 : vector<2x128xf32>
    %177 = arith.mulf %161, %169 : vector<2x128xf32>
    %178 = arith.addf %176, %177 : vector<2x128xf32>
    %179 = math.tanh %178 : vector<2x128xf32>
    %180 = arith.mulf %175, %179 : vector<2x128xf32>
    %c3 = arith.constant 3 : index
    %c0_44 = arith.constant 0 : index
    %c0_45 = arith.constant 0 : index
    %181 = vector.load %arg0[%c3, %c0_44, %c0_45] : memref<8x2x512xf32, #tpu.memory_space<vmem>>, vector<1x2x512xf32>
    %182 = vector.shape_cast %181 : vector<1x2x512xf32> to vector<2x512xf32>
    %c0_46 = arith.constant 0 : index
    %c0_47 = arith.constant 0 : index
    %183 = vector.load %arg1[%c0_46, %c0_47] : memref<128x512xf32, #tpu.memory_space<vmem>>, vector<128x512xf32>
    %cst_48 = arith.constant dense<0.000000e+00> : vector<2x512xf32>
    %184 = tpu.matmul %151, %183, %cst_48 {dimension_numbers = #tpu.dot_dimension_numbers<[1], [0], [0], [1], [0, 0, 1, 1], [], []>} : vector<2x128xf32>, vector<128x512xf32>, vector<2x512xf32> -> vector<2x512xf32>
    %185 = arith.addf %182, %184 : vector<2x512xf32>
    %186 = vector.extract_strided_slice %185 {offsets = [0, 0], sizes = [2, 128], strides = [1, 1]} : vector<2x512xf32> to vector<2x128xf32>
    %187 = arith.negf %186 : vector<2x128xf32>
    %188 = math.exp %187 : vector<2x128xf32>
    %cst_49 = arith.constant 1.000000e+00 : f32
    %189 = vector.broadcast %cst_49 : f32 to vector<2x128xf32>
    %190 = arith.addf %189, %188 : vector<2x128xf32>
    %191 = arith.divf %189, %190 : vector<2x128xf32>
    %192 = vector.extract_strided_slice %185 {offsets = [0, 128], sizes = [2, 128], strides = [1, 1]} : vector<2x512xf32> to vector<2x128xf32>
    %193 = arith.negf %192 : vector<2x128xf32>
    %194 = math.exp %193 : vector<2x128xf32>
    %cst_50 = arith.constant 1.000000e+00 : f32
    %195 = vector.broadcast %cst_50 : f32 to vector<2x128xf32>
    %196 = arith.addf %195, %194 : vector<2x128xf32>
    %197 = arith.divf %195, %196 : vector<2x128xf32>
    %198 = vector.extract_strided_slice %185 {offsets = [0, 256], sizes = [2, 128], strides = [1, 1]} : vector<2x512xf32> to vector<2x128xf32>
    %199 = math.tanh %198 : vector<2x128xf32>
    %200 = vector.extract_strided_slice %185 {offsets = [0, 384], sizes = [2, 128], strides = [1, 1]} : vector<2x512xf32> to vector<2x128xf32>
    %201 = arith.negf %200 : vector<2x128xf32>
    %202 = math.exp %201 : vector<2x128xf32>
    %cst_51 = arith.constant 1.000000e+00 : f32
    %203 = vector.broadcast %cst_51 : f32 to vector<2x128xf32>
    %204 = arith.addf %203, %202 : vector<2x128xf32>
    %205 = arith.divf %203, %204 : vector<2x128xf32>
    %206 = arith.mulf %197, %149 : vector<2x128xf32>
    %207 = arith.mulf %191, %199 : vector<2x128xf32>
    %208 = arith.addf %206, %207 : vector<2x128xf32>
    %209 = math.tanh %208 : vector<2x128xf32>
    %210 = arith.mulf %205, %209 : vector<2x128xf32>
    %211 = tpu.concatenate %210, %180 in 1 : vector<2x128xf32>, vector<2x128xf32> -> vector<2x256xf32>
    %c0_52 = arith.constant 0 : index
    %c0_53 = arith.constant 0 : index
    %212 = vector.load %arg2[%c0_52, %c0_53] : memref<256x512xf32, #tpu.memory_space<vmem>>, vector<256x512xf32>
    %cst_54 = arith.constant dense<0.000000e+00> : vector<2x512xf32>
    %213 = tpu.matmul %211, %212, %cst_54 {dimension_numbers = #tpu.dot_dimension_numbers<[1], [0], [0], [1], [0, 0, 1, 1], [], []>} : vector<2x256xf32>, vector<256x512xf32>, vector<2x512xf32> -> vector<2x512xf32>
    %214 = arith.addf %213, %2 : vector<2x512xf32>
    %215 = vector.extract_strided_slice %214 {offsets = [0, 0], sizes = [2, 128], strides = [1, 1]} : vector<2x512xf32> to vector<2x128xf32>
    %216 = arith.negf %215 : vector<2x128xf32>
    %217 = math.exp %216 : vector<2x128xf32>
    %cst_55 = arith.constant 1.000000e+00 : f32
    %218 = vector.broadcast %cst_55 : f32 to vector<2x128xf32>
    %219 = arith.addf %218, %217 : vector<2x128xf32>
    %220 = arith.divf %218, %219 : vector<2x128xf32>
    %221 = vector.extract_strided_slice %214 {offsets = [0, 128], sizes = [2, 128], strides = [1, 1]} : vector<2x512xf32> to vector<2x128xf32>
    %222 = arith.negf %221 : vector<2x128xf32>
    %223 = math.exp %222 : vector<2x128xf32>
    %cst_56 = arith.constant 1.000000e+00 : f32
    %224 = vector.broadcast %cst_56 : f32 to vector<2x128xf32>
    %225 = arith.addf %224, %223 : vector<2x128xf32>
    %226 = arith.divf %224, %225 : vector<2x128xf32>
    %227 = vector.extract_strided_slice %214 {offsets = [0, 256], sizes = [2, 128], strides = [1, 1]} : vector<2x512xf32> to vector<2x128xf32>
    %228 = math.tanh %227 : vector<2x128xf32>
    %229 = vector.extract_strided_slice %214 {offsets = [0, 384], sizes = [2, 128], strides = [1, 1]} : vector<2x512xf32> to vector<2x128xf32>
    %230 = arith.negf %229 : vector<2x128xf32>
    %231 = math.exp %230 : vector<2x128xf32>
    %cst_57 = arith.constant 1.000000e+00 : f32
    %232 = vector.broadcast %cst_57 : f32 to vector<2x128xf32>
    %233 = arith.addf %232, %231 : vector<2x128xf32>
    %234 = arith.divf %232, %233 : vector<2x128xf32>
    %235 = arith.mulf %226, %178 : vector<2x128xf32>
    %236 = arith.mulf %220, %228 : vector<2x128xf32>
    %237 = arith.addf %235, %236 : vector<2x128xf32>
    %238 = math.tanh %237 : vector<2x128xf32>
    %239 = arith.mulf %234, %238 : vector<2x128xf32>
    %c4 = arith.constant 4 : index
    %c0_58 = arith.constant 0 : index
    %c0_59 = arith.constant 0 : index
    %240 = vector.load %arg0[%c4, %c0_58, %c0_59] : memref<8x2x512xf32, #tpu.memory_space<vmem>>, vector<1x2x512xf32>
    %241 = vector.shape_cast %240 : vector<1x2x512xf32> to vector<2x512xf32>
    %c0_60 = arith.constant 0 : index
    %c0_61 = arith.constant 0 : index
    %242 = vector.load %arg1[%c0_60, %c0_61] : memref<128x512xf32, #tpu.memory_space<vmem>>, vector<128x512xf32>
    %cst_62 = arith.constant dense<0.000000e+00> : vector<2x512xf32>
    %243 = tpu.matmul %210, %242, %cst_62 {dimension_numbers = #tpu.dot_dimension_numbers<[1], [0], [0], [1], [0, 0, 1, 1], [], []>} : vector<2x128xf32>, vector<128x512xf32>, vector<2x512xf32> -> vector<2x512xf32>
    %244 = arith.addf %241, %243 : vector<2x512xf32>
    %245 = vector.extract_strided_slice %244 {offsets = [0, 0], sizes = [2, 128], strides = [1, 1]} : vector<2x512xf32> to vector<2x128xf32>
    %246 = arith.negf %245 : vector<2x128xf32>
    %247 = math.exp %246 : vector<2x128xf32>
    %cst_63 = arith.constant 1.000000e+00 : f32
    %248 = vector.broadcast %cst_63 : f32 to vector<2x128xf32>
    %249 = arith.addf %248, %247 : vector<2x128xf32>
    %250 = arith.divf %248, %249 : vector<2x128xf32>
    %251 = vector.extract_strided_slice %244 {offsets = [0, 128], sizes = [2, 128], strides = [1, 1]} : vector<2x512xf32> to vector<2x128xf32>
    %252 = arith.negf %251 : vector<2x128xf32>
    %253 = math.exp %252 : vector<2x128xf32>
    %cst_64 = arith.constant 1.000000e+00 : f32
    %254 = vector.broadcast %cst_64 : f32 to vector<2x128xf32>
    %255 = arith.addf %254, %253 : vector<2x128xf32>
    %256 = arith.divf %254, %255 : vector<2x128xf32>
    %257 = vector.extract_strided_slice %244 {offsets = [0, 256], sizes = [2, 128], strides = [1, 1]} : vector<2x512xf32> to vector<2x128xf32>
    %258 = math.tanh %257 : vector<2x128xf32>
    %259 = vector.extract_strided_slice %244 {offsets = [0, 384], sizes = [2, 128], strides = [1, 1]} : vector<2x512xf32> to vector<2x128xf32>
    %260 = arith.negf %259 : vector<2x128xf32>
    %261 = math.exp %260 : vector<2x128xf32>
    %cst_65 = arith.constant 1.000000e+00 : f32
    %262 = vector.broadcast %cst_65 : f32 to vector<2x128xf32>
    %263 = arith.addf %262, %261 : vector<2x128xf32>
    %264 = arith.divf %262, %263 : vector<2x128xf32>
    %265 = arith.mulf %256, %208 : vector<2x128xf32>
    %266 = arith.mulf %250, %258 : vector<2x128xf32>
    %267 = arith.addf %265, %266 : vector<2x128xf32>
    %268 = math.tanh %267 : vector<2x128xf32>
    %269 = arith.mulf %264, %268 : vector<2x128xf32>
    %270 = tpu.concatenate %269, %239 in 1 : vector<2x128xf32>, vector<2x128xf32> -> vector<2x256xf32>
    %c0_66 = arith.constant 0 : index
    %c0_67 = arith.constant 0 : index
    %271 = vector.load %arg2[%c0_66, %c0_67] : memref<256x512xf32, #tpu.memory_space<vmem>>, vector<256x512xf32>
    %cst_68 = arith.constant dense<0.000000e+00> : vector<2x512xf32>
    %272 = tpu.matmul %270, %271, %cst_68 {dimension_numbers = #tpu.dot_dimension_numbers<[1], [0], [0], [1], [0, 0, 1, 1], [], []>} : vector<2x256xf32>, vector<256x512xf32>, vector<2x512xf32> -> vector<2x512xf32>
    %273 = arith.addf %272, %2 : vector<2x512xf32>
    %274 = vector.extract_strided_slice %273 {offsets = [0, 0], sizes = [2, 128], strides = [1, 1]} : vector<2x512xf32> to vector<2x128xf32>
    %275 = arith.negf %274 : vector<2x128xf32>
    %276 = math.exp %275 : vector<2x128xf32>
    %cst_69 = arith.constant 1.000000e+00 : f32
    %277 = vector.broadcast %cst_69 : f32 to vector<2x128xf32>
    %278 = arith.addf %277, %276 : vector<2x128xf32>
    %279 = arith.divf %277, %278 : vector<2x128xf32>
    %280 = vector.extract_strided_slice %273 {offsets = [0, 128], sizes = [2, 128], strides = [1, 1]} : vector<2x512xf32> to vector<2x128xf32>
    %281 = arith.negf %280 : vector<2x128xf32>
    %282 = math.exp %281 : vector<2x128xf32>
    %cst_70 = arith.constant 1.000000e+00 : f32
    %283 = vector.broadcast %cst_70 : f32 to vector<2x128xf32>
    %284 = arith.addf %283, %282 : vector<2x128xf32>
    %285 = arith.divf %283, %284 : vector<2x128xf32>
    %286 = vector.extract_strided_slice %273 {offsets = [0, 256], sizes = [2, 128], strides = [1, 1]} : vector<2x512xf32> to vector<2x128xf32>
    %287 = math.tanh %286 : vector<2x128xf32>
    %288 = vector.extract_strided_slice %273 {offsets = [0, 384], sizes = [2, 128], strides = [1, 1]} : vector<2x512xf32> to vector<2x128xf32>
    %289 = arith.negf %288 : vector<2x128xf32>
    %290 = math.exp %289 : vector<2x128xf32>
    %cst_71 = arith.constant 1.000000e+00 : f32
    %291 = vector.broadcast %cst_71 : f32 to vector<2x128xf32>
    %292 = arith.addf %291, %290 : vector<2x128xf32>
    %293 = arith.divf %291, %292 : vector<2x128xf32>
    %294 = arith.mulf %285, %237 : vector<2x128xf32>
    %295 = arith.mulf %279, %287 : vector<2x128xf32>
    %296 = arith.addf %294, %295 : vector<2x128xf32>
    %297 = math.tanh %296 : vector<2x128xf32>
    %298 = arith.mulf %293, %297 : vector<2x128xf32>
    %c5 = arith.constant 5 : index
    %c0_72 = arith.constant 0 : index
    %c0_73 = arith.constant 0 : index
    %299 = vector.load %arg0[%c5, %c0_72, %c0_73] : memref<8x2x512xf32, #tpu.memory_space<vmem>>, vector<1x2x512xf32>
    %300 = vector.shape_cast %299 : vector<1x2x512xf32> to vector<2x512xf32>
    %c0_74 = arith.constant 0 : index
    %c0_75 = arith.constant 0 : index
    %301 = vector.load %arg1[%c0_74, %c0_75] : memref<128x512xf32, #tpu.memory_space<vmem>>, vector<128x512xf32>
    %cst_76 = arith.constant dense<0.000000e+00> : vector<2x512xf32>
    %302 = tpu.matmul %269, %301, %cst_76 {dimension_numbers = #tpu.dot_dimension_numbers<[1], [0], [0], [1], [0, 0, 1, 1], [], []>} : vector<2x128xf32>, vector<128x512xf32>, vector<2x512xf32> -> vector<2x512xf32>
    %303 = arith.addf %300, %302 : vector<2x512xf32>
    %304 = vector.extract_strided_slice %303 {offsets = [0, 0], sizes = [2, 128], strides = [1, 1]} : vector<2x512xf32> to vector<2x128xf32>
    %305 = arith.negf %304 : vector<2x128xf32>
    %306 = math.exp %305 : vector<2x128xf32>
    %cst_77 = arith.constant 1.000000e+00 : f32
    %307 = vector.broadcast %cst_77 : f32 to vector<2x128xf32>
    %308 = arith.addf %307, %306 : vector<2x128xf32>
    %309 = arith.divf %307, %308 : vector<2x128xf32>
    %310 = vector.extract_strided_slice %303 {offsets = [0, 128], sizes = [2, 128], strides = [1, 1]} : vector<2x512xf32> to vector<2x128xf32>
    %311 = arith.negf %310 : vector<2x128xf32>
    %312 = math.exp %311 : vector<2x128xf32>
    %cst_78 = arith.constant 1.000000e+00 : f32
    %313 = vector.broadcast %cst_78 : f32 to vector<2x128xf32>
    %314 = arith.addf %313, %312 : vector<2x128xf32>
    %315 = arith.divf %313, %314 : vector<2x128xf32>
    %316 = vector.extract_strided_slice %303 {offsets = [0, 256], sizes = [2, 128], strides = [1, 1]} : vector<2x512xf32> to vector<2x128xf32>
    %317 = math.tanh %316 : vector<2x128xf32>
    %318 = vector.extract_strided_slice %303 {offsets = [0, 384], sizes = [2, 128], strides = [1, 1]} : vector<2x512xf32> to vector<2x128xf32>
    %319 = arith.negf %318 : vector<2x128xf32>
    %320 = math.exp %319 : vector<2x128xf32>
    %cst_79 = arith.constant 1.000000e+00 : f32
    %321 = vector.broadcast %cst_79 : f32 to vector<2x128xf32>
    %322 = arith.addf %321, %320 : vector<2x128xf32>
    %323 = arith.divf %321, %322 : vector<2x128xf32>
    %324 = arith.mulf %315, %267 : vector<2x128xf32>
    %325 = arith.mulf %309, %317 : vector<2x128xf32>
    %326 = arith.addf %324, %325 : vector<2x128xf32>
    %327 = math.tanh %326 : vector<2x128xf32>
    %328 = arith.mulf %323, %327 : vector<2x128xf32>
    %329 = tpu.concatenate %328, %298 in 1 : vector<2x128xf32>, vector<2x128xf32> -> vector<2x256xf32>
    %c0_80 = arith.constant 0 : index
    %c0_81 = arith.constant 0 : index
    %330 = vector.load %arg2[%c0_80, %c0_81] : memref<256x512xf32, #tpu.memory_space<vmem>>, vector<256x512xf32>
    %cst_82 = arith.constant dense<0.000000e+00> : vector<2x512xf32>
    %331 = tpu.matmul %329, %330, %cst_82 {dimension_numbers = #tpu.dot_dimension_numbers<[1], [0], [0], [1], [0, 0, 1, 1], [], []>} : vector<2x256xf32>, vector<256x512xf32>, vector<2x512xf32> -> vector<2x512xf32>
    %332 = arith.addf %331, %2 : vector<2x512xf32>
    %333 = vector.extract_strided_slice %332 {offsets = [0, 0], sizes = [2, 128], strides = [1, 1]} : vector<2x512xf32> to vector<2x128xf32>
    %334 = arith.negf %333 : vector<2x128xf32>
    %335 = math.exp %334 : vector<2x128xf32>
    %cst_83 = arith.constant 1.000000e+00 : f32
    %336 = vector.broadcast %cst_83 : f32 to vector<2x128xf32>
    %337 = arith.addf %336, %335 : vector<2x128xf32>
    %338 = arith.divf %336, %337 : vector<2x128xf32>
    %339 = vector.extract_strided_slice %332 {offsets = [0, 128], sizes = [2, 128], strides = [1, 1]} : vector<2x512xf32> to vector<2x128xf32>
    %340 = arith.negf %339 : vector<2x128xf32>
    %341 = math.exp %340 : vector<2x128xf32>
    %cst_84 = arith.constant 1.000000e+00 : f32
    %342 = vector.broadcast %cst_84 : f32 to vector<2x128xf32>
    %343 = arith.addf %342, %341 : vector<2x128xf32>
    %344 = arith.divf %342, %343 : vector<2x128xf32>
    %345 = vector.extract_strided_slice %332 {offsets = [0, 256], sizes = [2, 128], strides = [1, 1]} : vector<2x512xf32> to vector<2x128xf32>
    %346 = math.tanh %345 : vector<2x128xf32>
    %347 = vector.extract_strided_slice %332 {offsets = [0, 384], sizes = [2, 128], strides = [1, 1]} : vector<2x512xf32> to vector<2x128xf32>
    %348 = arith.negf %347 : vector<2x128xf32>
    %349 = math.exp %348 : vector<2x128xf32>
    %cst_85 = arith.constant 1.000000e+00 : f32
    %350 = vector.broadcast %cst_85 : f32 to vector<2x128xf32>
    %351 = arith.addf %350, %349 : vector<2x128xf32>
    %352 = arith.divf %350, %351 : vector<2x128xf32>
    %353 = arith.mulf %344, %296 : vector<2x128xf32>
    %354 = arith.mulf %338, %346 : vector<2x128xf32>
    %355 = arith.addf %353, %354 : vector<2x128xf32>
    %356 = math.tanh %355 : vector<2x128xf32>
    %357 = arith.mulf %352, %356 : vector<2x128xf32>
    %c6 = arith.constant 6 : index
    %c0_86 = arith.constant 0 : index
    %c0_87 = arith.constant 0 : index
    %358 = vector.load %arg0[%c6, %c0_86, %c0_87] : memref<8x2x512xf32, #tpu.memory_space<vmem>>, vector<1x2x512xf32>
    %359 = vector.shape_cast %358 : vector<1x2x512xf32> to vector<2x512xf32>
    %c0_88 = arith.constant 0 : index
    %c0_89 = arith.constant 0 : index
    %360 = vector.load %arg1[%c0_88, %c0_89] : memref<128x512xf32, #tpu.memory_space<vmem>>, vector<128x512xf32>
    %cst_90 = arith.constant dense<0.000000e+00> : vector<2x512xf32>
    %361 = tpu.matmul %328, %360, %cst_90 {dimension_numbers = #tpu.dot_dimension_numbers<[1], [0], [0], [1], [0, 0, 1, 1], [], []>} : vector<2x128xf32>, vector<128x512xf32>, vector<2x512xf32> -> vector<2x512xf32>
    %362 = arith.addf %359, %361 : vector<2x512xf32>
    %363 = vector.extract_strided_slice %362 {offsets = [0, 0], sizes = [2, 128], strides = [1, 1]} : vector<2x512xf32> to vector<2x128xf32>
    %364 = arith.negf %363 : vector<2x128xf32>
    %365 = math.exp %364 : vector<2x128xf32>
    %cst_91 = arith.constant 1.000000e+00 : f32
    %366 = vector.broadcast %cst_91 : f32 to vector<2x128xf32>
    %367 = arith.addf %366, %365 : vector<2x128xf32>
    %368 = arith.divf %366, %367 : vector<2x128xf32>
    %369 = vector.extract_strided_slice %362 {offsets = [0, 128], sizes = [2, 128], strides = [1, 1]} : vector<2x512xf32> to vector<2x128xf32>
    %370 = arith.negf %369 : vector<2x128xf32>
    %371 = math.exp %370 : vector<2x128xf32>
    %cst_92 = arith.constant 1.000000e+00 : f32
    %372 = vector.broadcast %cst_92 : f32 to vector<2x128xf32>
    %373 = arith.addf %372, %371 : vector<2x128xf32>
    %374 = arith.divf %372, %373 : vector<2x128xf32>
    %375 = vector.extract_strided_slice %362 {offsets = [0, 256], sizes = [2, 128], strides = [1, 1]} : vector<2x512xf32> to vector<2x128xf32>
    %376 = math.tanh %375 : vector<2x128xf32>
    %377 = vector.extract_strided_slice %362 {offsets = [0, 384], sizes = [2, 128], strides = [1, 1]} : vector<2x512xf32> to vector<2x128xf32>
    %378 = arith.negf %377 : vector<2x128xf32>
    %379 = math.exp %378 : vector<2x128xf32>
    %cst_93 = arith.constant 1.000000e+00 : f32
    %380 = vector.broadcast %cst_93 : f32 to vector<2x128xf32>
    %381 = arith.addf %380, %379 : vector<2x128xf32>
    %382 = arith.divf %380, %381 : vector<2x128xf32>
    %383 = arith.mulf %374, %326 : vector<2x128xf32>
    %384 = arith.mulf %368, %376 : vector<2x128xf32>
    %385 = arith.addf %383, %384 : vector<2x128xf32>
    %386 = math.tanh %385 : vector<2x128xf32>
    %387 = arith.mulf %382, %386 : vector<2x128xf32>
    %388 = tpu.concatenate %387, %357 in 1 : vector<2x128xf32>, vector<2x128xf32> -> vector<2x256xf32>
    %c0_94 = arith.constant 0 : index
    %c0_95 = arith.constant 0 : index
    %389 = vector.load %arg2[%c0_94, %c0_95] : memref<256x512xf32, #tpu.memory_space<vmem>>, vector<256x512xf32>
    %cst_96 = arith.constant dense<0.000000e+00> : vector<2x512xf32>
    %390 = tpu.matmul %388, %389, %cst_96 {dimension_numbers = #tpu.dot_dimension_numbers<[1], [0], [0], [1], [0, 0, 1, 1], [], []>} : vector<2x256xf32>, vector<256x512xf32>, vector<2x512xf32> -> vector<2x512xf32>
    %391 = arith.addf %390, %2 : vector<2x512xf32>
    %392 = vector.extract_strided_slice %391 {offsets = [0, 0], sizes = [2, 128], strides = [1, 1]} : vector<2x512xf32> to vector<2x128xf32>
    %393 = arith.negf %392 : vector<2x128xf32>
    %394 = math.exp %393 : vector<2x128xf32>
    %cst_97 = arith.constant 1.000000e+00 : f32
    %395 = vector.broadcast %cst_97 : f32 to vector<2x128xf32>
    %396 = arith.addf %395, %394 : vector<2x128xf32>
    %397 = arith.divf %395, %396 : vector<2x128xf32>
    %398 = vector.extract_strided_slice %391 {offsets = [0, 128], sizes = [2, 128], strides = [1, 1]} : vector<2x512xf32> to vector<2x128xf32>
    %399 = arith.negf %398 : vector<2x128xf32>
    %400 = math.exp %399 : vector<2x128xf32>
    %cst_98 = arith.constant 1.000000e+00 : f32
    %401 = vector.broadcast %cst_98 : f32 to vector<2x128xf32>
    %402 = arith.addf %401, %400 : vector<2x128xf32>
    %403 = arith.divf %401, %402 : vector<2x128xf32>
    %404 = vector.extract_strided_slice %391 {offsets = [0, 256], sizes = [2, 128], strides = [1, 1]} : vector<2x512xf32> to vector<2x128xf32>
    %405 = math.tanh %404 : vector<2x128xf32>
    %406 = vector.extract_strided_slice %391 {offsets = [0, 384], sizes = [2, 128], strides = [1, 1]} : vector<2x512xf32> to vector<2x128xf32>
    %407 = arith.negf %406 : vector<2x128xf32>
    %408 = math.exp %407 : vector<2x128xf32>
    %cst_99 = arith.constant 1.000000e+00 : f32
    %409 = vector.broadcast %cst_99 : f32 to vector<2x128xf32>
    %410 = arith.addf %409, %408 : vector<2x128xf32>
    %411 = arith.divf %409, %410 : vector<2x128xf32>
    %412 = arith.mulf %403, %355 : vector<2x128xf32>
    %413 = arith.mulf %397, %405 : vector<2x128xf32>
    %414 = arith.addf %412, %413 : vector<2x128xf32>
    %415 = math.tanh %414 : vector<2x128xf32>
    %416 = arith.mulf %411, %415 : vector<2x128xf32>
    %c7 = arith.constant 7 : index
    %c0_100 = arith.constant 0 : index
    %c0_101 = arith.constant 0 : index
    %417 = vector.load %arg0[%c7, %c0_100, %c0_101] : memref<8x2x512xf32, #tpu.memory_space<vmem>>, vector<1x2x512xf32>
    %418 = vector.shape_cast %417 : vector<1x2x512xf32> to vector<2x512xf32>
    %c0_102 = arith.constant 0 : index
    %c0_103 = arith.constant 0 : index
    %419 = vector.load %arg1[%c0_102, %c0_103] : memref<128x512xf32, #tpu.memory_space<vmem>>, vector<128x512xf32>
    %cst_104 = arith.constant dense<0.000000e+00> : vector<2x512xf32>
    %420 = tpu.matmul %387, %419, %cst_104 {dimension_numbers = #tpu.dot_dimension_numbers<[1], [0], [0], [1], [0, 0, 1, 1], [], []>} : vector<2x128xf32>, vector<128x512xf32>, vector<2x512xf32> -> vector<2x512xf32>
    %421 = arith.addf %418, %420 : vector<2x512xf32>
    %422 = vector.extract_strided_slice %421 {offsets = [0, 0], sizes = [2, 128], strides = [1, 1]} : vector<2x512xf32> to vector<2x128xf32>
    %423 = arith.negf %422 : vector<2x128xf32>
    %424 = math.exp %423 : vector<2x128xf32>
    %cst_105 = arith.constant 1.000000e+00 : f32
    %425 = vector.broadcast %cst_105 : f32 to vector<2x128xf32>
    %426 = arith.addf %425, %424 : vector<2x128xf32>
    %427 = arith.divf %425, %426 : vector<2x128xf32>
    %428 = vector.extract_strided_slice %421 {offsets = [0, 128], sizes = [2, 128], strides = [1, 1]} : vector<2x512xf32> to vector<2x128xf32>
    %429 = arith.negf %428 : vector<2x128xf32>
    %430 = math.exp %429 : vector<2x128xf32>
    %cst_106 = arith.constant 1.000000e+00 : f32
    %431 = vector.broadcast %cst_106 : f32 to vector<2x128xf32>
    %432 = arith.addf %431, %430 : vector<2x128xf32>
    %433 = arith.divf %431, %432 : vector<2x128xf32>
    %434 = vector.extract_strided_slice %421 {offsets = [0, 256], sizes = [2, 128], strides = [1, 1]} : vector<2x512xf32> to vector<2x128xf32>
    %435 = math.tanh %434 : vector<2x128xf32>
    %436 = vector.extract_strided_slice %421 {offsets = [0, 384], sizes = [2, 128], strides = [1, 1]} : vector<2x512xf32> to vector<2x128xf32>
    %437 = arith.negf %436 : vector<2x128xf32>
    %438 = math.exp %437 : vector<2x128xf32>
    %cst_107 = arith.constant 1.000000e+00 : f32
    %439 = vector.broadcast %cst_107 : f32 to vector<2x128xf32>
    %440 = arith.addf %439, %438 : vector<2x128xf32>
    %441 = arith.divf %439, %440 : vector<2x128xf32>
    %442 = arith.mulf %433, %385 : vector<2x128xf32>
    %443 = arith.mulf %427, %435 : vector<2x128xf32>
    %444 = arith.addf %442, %443 : vector<2x128xf32>
    %445 = math.tanh %444 : vector<2x128xf32>
    %446 = arith.mulf %441, %445 : vector<2x128xf32>
    %447 = tpu.concatenate %446, %416 in 1 : vector<2x128xf32>, vector<2x128xf32> -> vector<2x256xf32>
    %c0_108 = arith.constant 0 : index
    %c0_109 = arith.constant 0 : index
    %448 = vector.load %arg2[%c0_108, %c0_109] : memref<256x512xf32, #tpu.memory_space<vmem>>, vector<256x512xf32>
    %cst_110 = arith.constant dense<0.000000e+00> : vector<2x512xf32>
    %449 = tpu.matmul %447, %448, %cst_110 {dimension_numbers = #tpu.dot_dimension_numbers<[1], [0], [0], [1], [0, 0, 1, 1], [], []>} : vector<2x256xf32>, vector<256x512xf32>, vector<2x512xf32> -> vector<2x512xf32>
    %450 = arith.addf %449, %2 : vector<2x512xf32>
    %451 = vector.extract_strided_slice %450 {offsets = [0, 0], sizes = [2, 128], strides = [1, 1]} : vector<2x512xf32> to vector<2x128xf32>
    %452 = arith.negf %451 : vector<2x128xf32>
    %453 = math.exp %452 : vector<2x128xf32>
    %cst_111 = arith.constant 1.000000e+00 : f32
    %454 = vector.broadcast %cst_111 : f32 to vector<2x128xf32>
    %455 = arith.addf %454, %453 : vector<2x128xf32>
    %456 = arith.divf %454, %455 : vector<2x128xf32>
    %457 = vector.extract_strided_slice %450 {offsets = [0, 128], sizes = [2, 128], strides = [1, 1]} : vector<2x512xf32> to vector<2x128xf32>
    %458 = arith.negf %457 : vector<2x128xf32>
    %459 = math.exp %458 : vector<2x128xf32>
    %cst_112 = arith.constant 1.000000e+00 : f32
    %460 = vector.broadcast %cst_112 : f32 to vector<2x128xf32>
    %461 = arith.addf %460, %459 : vector<2x128xf32>
    %462 = arith.divf %460, %461 : vector<2x128xf32>
    %463 = vector.extract_strided_slice %450 {offsets = [0, 256], sizes = [2, 128], strides = [1, 1]} : vector<2x512xf32> to vector<2x128xf32>
    %464 = math.tanh %463 : vector<2x128xf32>
    %465 = vector.extract_strided_slice %450 {offsets = [0, 384], sizes = [2, 128], strides = [1, 1]} : vector<2x512xf32> to vector<2x128xf32>
    %466 = arith.negf %465 : vector<2x128xf32>
    %467 = math.exp %466 : vector<2x128xf32>
    %cst_113 = arith.constant 1.000000e+00 : f32
    %468 = vector.broadcast %cst_113 : f32 to vector<2x128xf32>
    %469 = arith.addf %468, %467 : vector<2x128xf32>
    %470 = arith.divf %468, %469 : vector<2x128xf32>
    %471 = arith.mulf %462, %414 : vector<2x128xf32>
    %472 = arith.mulf %456, %464 : vector<2x128xf32>
    %473 = arith.addf %471, %472 : vector<2x128xf32>
    %474 = math.tanh %473 : vector<2x128xf32>
    %475 = arith.mulf %470, %474 : vector<2x128xf32>
    %c0_114 = arith.constant 0 : index
    %c0_115 = arith.constant 0 : index
    %476 = vector.load %arg4[%c0_114, %c0_115] : memref<2x128xf32, #tpu.memory_space<vmem>>, vector<2x128xf32>
    tpu.vector_store %arg4[%c0_114, %c0_115], %475 {strides = array<i32>} : memref<2x128xf32, #tpu.memory_space<vmem>>, vector<2x128xf32>,
    return
  }
}

</mosaic_0001>

<bundles_post_ra>
// kernel: multi_step_lstm_forward.1
= control target key start
LH: loop header
LB: loop body
LE: loop exit
PB: predicated region body
PF: predicated region fallthrough
CT: control target
= control target key end

     0   :  { %v10066_v63 = vmov 0.0   ;;  %vm179_vm0 = vcmask 1041408   ;;  %vm181_vm1 = vcmask 1045508   ;;  %vm183_vm2 = vcmask 1043456   ;;  %s10061_s1 = inlined_call_operand.vmem [shape: f32[128,512], index: 1, kind: input, shape index: {}]   ;;  %s10062_s2 = inlined_call_operand.vmem [shape: f32[256,512], index: 2, kind: input, shape index: {}]   ;;  %s10063_s0 = inlined_call_operand.vmem [shape: f32[8,2,512], index: 0, kind: input, shape index: {}]   ;;  %s10064_s3 = inlined_call_operand.vmem [shape: f32[1,512], index: 3, kind: input, shape index: {}]   ;;  %s10065_s4 = inlined_call_operand.vmem [shape: f32[2,128], index: 4, kind: output, shape index: {}]  }
   0x1   :  { %v90_v0 = vld [vmem:[%s10061_s1 + $0x1f0] sm:$0xff]  ;;  %v4258_v1 = vld [vmem:[%s10061_s1 + $0x1f8] sm:$0xff]  ;;  %v4280_v6 = vld [vmem:[%s10061_s1 + $0x1e8] sm:$0xff] }
   0x2   :  { %v86_v2 = vld [vmem:[%s10061_s1 + $0x1d0] sm:$0xff]  ;;  %132 = vmatpush.msra.mxu2 %v90_v0  ;;  %152 = vmatpush.msra.mxu3 %v4258_v1  ;;  %v4267_v3 = vld [vmem:[%s10061_s1 + $0x1d8] sm:$0xff]  ;;  %v88_v7 = vld [vmem:[%s10061_s1 + $0x1e0] sm:$0xff] }
   0x3   :  { %v82_v4 = vld [vmem:[%s10061_s1 + $0x1b0] sm:$0xff]  ;;  %v4275_v5 = vld [vmem:[%s10061_s1 + $0x1b8] sm:$0xff]  ;;  %v4289_v8 = vld [vmem:[%s10061_s1 + $0x1c8] sm:$0xff]  ;;  %112 = vmatpush.msra.mxu1 %v4280_v6  ;;  %92 = vmatpush.msra.mxu0 %v88_v7 }
   0x4   :  { %133 = vmatpush.msra.mxu2 %v86_v2  ;;  %153 = vmatpush.msra.mxu3 %v4267_v3  ;;  %v78_v9 = vld [vmem:[%s10061_s1 + $0x190] sm:$0xff]  ;;  %v4298_v10 = vld [vmem:[%s10061_s1 + $0x198] sm:$0xff]  ;;  %v84_v11 = vld [vmem:[%s10061_s1 + $0x1c0] sm:$0xff] }
   0x5   :  { %v4307_v12 = vld [vmem:[%s10061_s1 + $0x1a8] sm:$0xff]  ;;  %v80_v13 = vld [vmem:[%s10061_s1 + $0x1a0] sm:$0xff]  ;;  %113 = vmatpush.msra.mxu1 %v4289_v8  ;;  %v74_v14 = vld [vmem:[%s10061_s1 + $0x170] sm:$0xff]  ;;  %93 = vmatpush.msra.mxu0 %v84_v11 }
   0x6   :  { %134 = vmatpush.msra.mxu2 %v82_v4  ;;  %154 = vmatpush.msra.mxu3 %v4275_v5  ;;  %v4319_v15 = vld [vmem:[%s10061_s1 + $0x178] sm:$0xff]  ;;  %v4325_v16 = vld [vmem:[%s10061_s1 + $0x188] sm:$0xff]  ;;  %v76_v17 = vld [vmem:[%s10061_s1 + $0x180] sm:$0xff] }
   0x7   :  { %114 = vmatpush.msra.mxu1 %v4307_v12  ;;  %v70_v18 = vld [vmem:[%s10061_s1 + $0x150] sm:$0xff]  ;;  %v4337_v19 = vld [vmem:[%s10061_s1 + $0x158] sm:$0xff]  ;;  %94 = vmatpush.msra.mxu0 %v80_v13  ;;  %v4343_v20 = vld [vmem:[%s10061_s1 + $0x168] sm:$0xff] }
   0x8   :  { %135 = vmatpush.msra.mxu2 %v78_v9  ;;  %155 = vmatpush.msra.mxu3 %v4298_v10  ;;  %v72_v21 = vld [vmem:[%s10061_s1 + $0x160] sm:$0xff]  ;;  %v66_v22 = vld [vmem:[%s10061_s1 + $0x130] sm:$0xff]  ;;  %v4355_v23 = vld [vmem:[%s10061_s1 + $0x138] sm:$0xff] }
   0x9   :  { %115 = vmatpush.msra.mxu1 %v4325_v16  ;;  %95 = vmatpush.msra.mxu0 %v76_v17  ;;  %v4361_v24 = vld [vmem:[%s10061_s1 + $0x148] sm:$0xff]  ;;  %v68_v25 = vld [vmem:[%s10061_s1 + $0x140] sm:$0xff]  ;;  %v62_v26 = vld [vmem:[%s10061_s1 + $0x110] sm:$0xff] }
   0xa   :  { %136 = vmatpush.msra.mxu2 %v74_v14  ;;  %156 = vmatpush.msra.mxu3 %v4319_v15  ;;  %v4373_v27 = vld [vmem:[%s10061_s1 + $0x118] sm:$0xff]  ;;  %v4379_v28 = vld [vmem:[%s10061_s1 + $0x128] sm:$0xff]  ;;  %v4384_v29 = vld [vmem:[%s10061_s1 + $0x120] sm:$0xff] }
   0xb   :  { %116 = vmatpush.msra.mxu1 %v4343_v20  ;;  %96 = vmatpush.msra.mxu0 %v72_v21  ;;  %10592 = vst [vmem:[#allocation2_spill] sm:$0xff] %v4384_v29  ;;  %v58_v30 = vld [vmem:[%s10061_s1 + $0xf0] sm:$0xff]  ;;  %v4393_v31 = vld [vmem:[%s10061_s1 + $0xf8] sm:$0xff]  ;;  %v4399_v32 = vld [vmem:[%s10061_s1 + $0x108] sm:$0xff] }
   0xc   :  { %137 = vmatpush.msra.mxu2 %v70_v18  ;;  %157 = vmatpush.msra.mxu3 %v4337_v19  ;;  %v4404_v33 = vld [vmem:[%s10061_s1 + $0x100] sm:$0xff]  ;;  %v54_v34 = vld [vmem:[%s10061_s1 + $0xd0] sm:$0xff]  ;;  %v4413_v35 = vld [vmem:[%s10061_s1 + $0xd8] sm:$0xff] }
   0xd   :  { %117 = vmatpush.msra.mxu1 %v4361_v24  ;;  %97 = vmatpush.msra.mxu0 %v68_v25  ;;  %10593 = vst [vmem:[#allocation3_spill] sm:$0xff] %v4404_v33  ;;  %v4420_v36 = vld [vmem:[%s10061_s1 + $0xe8] sm:$0xff]  ;;  %v4425_v37 = vld [vmem:[%s10061_s1 + $0xe0] sm:$0xff]  ;;  %v4431_v38 = vld [vmem:[%s10061_s1 + $0xb0] sm:$0xff] }
   0xe   :  { %138 = vmatpush.msra.mxu2 %v66_v22  ;;  %158 = vmatpush.msra.mxu3 %v4355_v23  ;;  %10594 = vst [vmem:[#allocation4_spill] sm:$0xff] %v4425_v37  ;;  %v4436_v39 = vld [vmem:[%s10061_s1 + $0xb8] sm:$0xff]  ;;  %v4443_v40 = vld [vmem:[%s10061_s1 + $0xc8] sm:$0xff]  ;;  %v4448_v41 = vld [vmem:[%s10061_s1 + $0xc0] sm:$0xff] }
   0xf   :  { %118 = vmatpush.msra.mxu1 %v4379_v28  ;;  %98 = vmatpush.msra.mxu0 %v4384_v29  ;;  %10595 = vst [vmem:[#allocation5_spill] sm:$0xff] %v4431_v38  ;;  %v4454_v42 = vld [vmem:[%s10061_s1 + $0x90] sm:$0xff]  ;;  %v4459_v43 = vld [vmem:[%s10061_s1 + $0x98] sm:$0xff]  ;;  %v4467_v44 = vld [vmem:[%s10061_s1 + $0xa8] sm:$0xff] }
  0x10   :  { %139 = vmatpush.msra.mxu2 %v62_v26  ;;  %159 = vmatpush.msra.mxu3 %v4373_v27  ;;  %10596 = vst [vmem:[#allocation6_spill] sm:$0xff] %v4448_v41  ;;  %v4472_v45 = vld [vmem:[%s10061_s1 + $0xa0] sm:$0xff]  ;;  %v4478_v46 = vld [vmem:[%s10061_s1 + $0x70] sm:$0xff]  ;;  %v4483_v47 = vld [vmem:[%s10061_s1 + $0x78] sm:$0xff] }
  0x11   :  { %119 = vmatpush.msra.mxu1 %v4399_v32  ;;  %99 = vmatpush.msra.mxu0 %v4404_v33  ;;  %10597 = vst [vmem:[#allocation7_spill] sm:$0xff] %v4454_v42  ;;  %v4491_v48 = vld [vmem:[%s10061_s1 + $0x88] sm:$0xff]  ;;  %v4496_v49 = vld [vmem:[%s10061_s1 + $0x80] sm:$0xff]  ;;  %v4502_v50 = vld [vmem:[%s10061_s1 + $0x50] sm:$0xff] }
  0x12   :  { %140 = vmatpush.msra.mxu2 %v58_v30  ;;  %160 = vmatpush.msra.mxu3 %v4393_v31  ;;  %10598 = vst [vmem:[#allocation8_spill] sm:$0xff] %v4472_v45  ;;  %v4507_v51 = vld [vmem:[%s10061_s1 + $0x58] sm:$0xff]  ;;  %v4515_v52 = vld [vmem:[%s10061_s1 + $0x68] sm:$0xff]  ;;  %v4520_v53 = vld [vmem:[%s10061_s1 + $0x60] sm:$0xff] }
  0x13   :  { %120 = vmatpush.msra.mxu1 %v4420_v36  ;;  %100 = vmatpush.msra.mxu0 %v4425_v37  ;;  %10599 = vst [vmem:[#allocation9_spill] sm:$0xff] %v4478_v46  ;;  %v4526_v54 = vld [vmem:[%s10061_s1 + $0x30] sm:$0xff]  ;;  %v4531_v55 = vld [vmem:[%s10061_s1 + $0x38] sm:$0xff]  ;;  %v4539_v56 = vld [vmem:[%s10061_s1 + $0x48] sm:$0xff] }
  0x14   :  { %141 = vmatpush.msra.mxu2 %v54_v34  ;;  %161 = vmatpush.msra.mxu3 %v4413_v35  ;;  %10600 = vst [vmem:[#allocation10_spill] sm:$0xff] %v4496_v49  ;;  %v4544_v57 = vld [vmem:[%s10061_s1 + $0x40] sm:$0xff]  ;;  %v4550_v58 = vld [vmem:[%s10061_s1 + $0x10] sm:$0xff]  ;;  %v4555_v59 = vld [vmem:[%s10061_s1 + $0x18] sm:$0xff] }
  0x15   :  { %121 = vmatpush.msra.mxu1 %v4443_v40  ;;  %101 = vmatpush.msra.mxu0 %v4448_v41  ;;  %10601 = vst [vmem:[#allocation11_spill] sm:$0xff] %v4502_v50  ;;  %v4565_v60 = vld [vmem:[%s10061_s1 + $0x28] sm:$0xff]  ;;  %v4570_v61 = vld [vmem:[%s10061_s1 + $0x20] sm:$0xff]  ;;  %v4851_v29 = vld [vmem:[%s10062_s2 + $0x3f8] sm:$0xff] }
  0x16   :  { %142 = vmatpush.msra.mxu2 %v4431_v38  ;;  %162 = vmatpush.msra.mxu3 %v4436_v39  ;;  %10602 = vst [vmem:[#allocation12_spill] sm:$0xff] %v4520_v53  ;;  %v4577_v62 = vld [vmem:[%s10062_s2 + $0x3e8] sm:$0xff]  ;;  %v4589_v2 = vld [vmem:[%s10061_s1] sm:$0xff] }
  0x17   :  { %122 = vmatpush.msra.mxu1 %v4467_v44  ;;  %102 = vmatpush.msra.mxu0 %v4472_v45  ;;  %10603 = vst [vmem:[#allocation13_spill] sm:$0xff] %v4526_v54  ;;  %v4584_v0 = vld [vmem:[%s10061_s1 + $0x8] sm:$0xff]  ;;  %v4596_v4 = vld [vmem:[%s10062_s2 + $0x3e0] sm:$0xff] }
  0x18   :  { %143 = vmatpush.msra.mxu2 %v4454_v42  ;;  %163 = vmatpush.msra.mxu3 %v4459_v43  ;;  %10604 = vst [vmem:[#allocation14_spill] sm:$0xff] %v4544_v57  ;;  %v4602_v7 = vld [vmem:[%s10062_s2 + $0x3c8] sm:$0xff]  ;;  %v4609_v9 = vld [vmem:[%s10062_s2 + $0x1e0] sm:$0xff] }
  0x19   :  { %123 = vmatpush.msra.mxu1 %v4491_v48  ;;  %103 = vmatpush.msra.mxu0 %v4496_v49  ;;  %10605 = vst [vmem:[#allocation15_spill] sm:$0xff] %v4550_v58  ;;  %v4614_v11 = vld [vmem:[%s10062_s2 + $0x1e8] sm:$0xff]  ;;  %v4621_v13 = vld [vmem:[%s10062_s2 + $0x3c0] sm:$0xff] }
  0x1a   :  { %144 = vmatpush.msra.mxu2 %v4478_v46  ;;  %164 = vmatpush.msra.mxu3 %v4483_v47  ;;  %10606 = vst [vmem:[#allocation16_spill] sm:$0xff] %v4570_v61  ;;  %v4626_v14 = vld [vmem:[%s10062_s2 + $0x3a8] sm:$0xff]  ;;  %v4633_v17 = vld [vmem:[%s10062_s2 + $0x1c0] sm:$0xff] }
  0x1b   :  { %124 = vmatpush.msra.mxu1 %v4515_v52  ;;  %104 = vmatpush.msra.mxu0 %v4520_v53  ;;  %10607 = vst [vmem:[#allocation17_spill] sm:$0xff] %v4589_v2  ;;  %v4638_v18 = vld [vmem:[%s10062_s2 + $0x1c8] sm:$0xff]  ;;  %v4643_v21 = vld [vmem:[%s10062_s2 + $0x3a0] sm:$0xff] }
  0x1c   :  { %145 = vmatpush.msra.mxu2 %v4502_v50  ;;  %165 = vmatpush.msra.mxu3 %v4507_v51  ;;  %10608 = vst [vmem:[#allocation18_spill] sm:$0xff] %v4609_v9  ;;  %v4648_v22 = vld [vmem:[%s10062_s2 + $0x388] sm:$0xff]  ;;  %v4657_v25 = vld [vmem:[%s10062_s2 + $0x1a0] sm:$0xff] }
  0x1d   :  { %125 = vmatpush.msra.mxu1 %v4539_v56  ;;  %105 = vmatpush.msra.mxu0 %v4544_v57  ;;  %10609 = vst [vmem:[#allocation19_spill] sm:$0xff] %v4614_v11  ;;  %v4662_v26 = vld [vmem:[%s10062_s2 + $0x1a8] sm:$0xff]  ;;  %v4667_v30 = vld [vmem:[%s10062_s2 + $0x380] sm:$0xff] }
  0x1e   :  { %146 = vmatpush.msra.mxu2 %v4526_v54  ;;  %166 = vmatpush.msra.mxu3 %v4531_v55  ;;  %10610 = vst [vmem:[#allocation20_spill] sm:$0xff] %v4633_v17  ;;  %v4672_v34 = vld [vmem:[%s10062_s2 + $0x368] sm:$0xff]  ;;  %v4791_v57 = vld [vmem:[%s10062_s2 + $0x2a0] sm:$0xff] }
  0x1f   :  { %126 = vmatpush.msra.mxu1 %v4565_v60  ;;  %106 = vmatpush.msra.mxu0 %v4570_v61  ;;  %10611 = vst [vmem:[#allocation21_spill] sm:$0xff] %v4638_v18  ;;  %v4734_v54 = vld [vmem:[%s10062_s2 + $0x148] sm:$0xff]  ;;  %v4753_v61 = vld [vmem:[%s10062_s2 + $0x300] sm:$0xff] }
  0x20   :  { %147 = vmatpush.msra.mxu2 %v4550_v58  ;;  %167 = vmatpush.msra.mxu3 %v4555_v59  ;;  %10612 = vst [vmem:[#allocation22_spill] sm:$0xff] %v4657_v25  ;;  %v4710_v58 = vld [vmem:[%s10062_s2 + $0x168] sm:$0xff]  ;;  %v4803_v53 = vld [vmem:[%s10062_s2 + $0x280] sm:$0xff] }
  0x21   :  { %148 = vmatmul.f32.vlgmr.msra.gmra.mxu2 %v10066_v63  ;;  %168 = vmatmul.f32.vlgmr.msra.gmra.mxu3 %v10066_v63  ;;  %10613 = vst [vmem:[#allocation23_spill] sm:$0xff] %v4662_v26  ;;  %v4758_v50 = vld [vmem:[%s10062_s2 + $0x2e8] sm:$0xff]  ;;  %v4815_v49 = vld [vmem:[%s10062_s2 + $0x260] sm:$0xff] }
  0x22   :  { %445 = vmatpush.msrb.mxu3 %v4577_v62  ;;  %127 = vmatpush.msra.mxu1 %v4584_v0  ;;  %10617 = vst [vmem:[#allocation27_spill] sm:$0xff] %v4710_v58  ;;  %v4796_v46 = vld [vmem:[%s10062_s2 + $0x288] sm:$0xff]  ;;  %v4827_v45 = vld [vmem:[%s10062_s2 + $0x240] sm:$0xff] }
  0x23   :  { %107 = vmatpush.msra.mxu0 %v4589_v2  ;;  %128 = vmatmul.f32.vlgmr.msra.gmra.mxu1 %v10066_v63  ;;  %v4729_v2 = vld [vmem:[%s10062_s2 + $0x140] sm:$0xff]  ;;  %10619 = vst [vmem:[#allocation29_spill] sm:$0xff] %v4734_v54  ;;  %v4808_v42 = vld [vmem:[%s10062_s2 + $0x268] sm:$0xff] }
  0x24   :  { %108 = vmatmul.f32.vlgmr.msra.gmra.mxu0 %v10066_v63  ;;  %405 = vmatpush.msrb.mxu1 %v4596_v4  ;;  %v4681_v63 = vld [vmem:[%s10062_s2 + $0x180] sm:$0xff]  ;;  %10618 = vst [vmem:[#allocation28_spill] sm:$0xff] %v4729_v2  ;;  %v4820_v38 = vld [vmem:[%s10062_s2 + $0x248] sm:$0xff] }
  0x25   :  { %446 = vmatpush.msrb.mxu3 %v4602_v7  ;;  %385 = vmatpush.msrb.mxu0 %v4609_v9  ;;  %10614 = vst [vmem:[#allocation24_spill] sm:$0xff] %v4681_v63  ;;  %v4705_v9 = vld [vmem:[%s10062_s2 + $0x160] sm:$0xff]  ;;  %v4832_v41 = vld [vmem:[%s10062_s2 + $0x228] sm:$0xff] }
  0x26   :  { %425 = vmatpush.msrb.mxu2 %v4614_v11  ;;  %406 = vmatpush.msrb.mxu1 %v4621_v13  ;;  %v4686_v11 = vld [vmem:[%s10062_s2 + $0x188] sm:$0xff]  ;;  %10616 = vst [vmem:[#allocation26_spill] sm:$0xff] %v4705_v9  ;;  %v4839_v37 = vld [vmem:[%s10062_s2 + $0x220] sm:$0xff] }
  0x27   :  { %447 = vmatpush.msrb.mxu3 %v4626_v14  ;;  %386 = vmatpush.msrb.mxu0 %v4633_v17  ;;  %10615 = vst [vmem:[#allocation25_spill] sm:$0xff] %v4686_v11  ;;  %v4691_v17 = vld [vmem:[%s10062_s2 + $0x360] sm:$0xff]  ;;  %v4844_v33 = vld [vmem:[%s10062_s2 + $0x208] sm:$0xff] }
  0x28   :  { %426 = vmatpush.msrb.mxu2 %v4638_v18  ;;  %407 = vmatpush.msrb.mxu1 %v4643_v21  ;;  %v4696_v18 = vld [vmem:[%s10062_s2 + $0x348] sm:$0xff]  ;;  %10620 = vst [vmem:[#allocation30_spill] sm:$0xff] %v4808_v42 }
  0x29   :  { %448 = vmatpush.msrb.mxu3 %v4648_v22  ;;  %387 = vmatpush.msrb.mxu0 %v4657_v25  ;;  %v4715_v25 = vld [vmem:[%s10062_s2 + $0x340] sm:$0xff]  ;;  %10621 = vst [vmem:[#allocation31_spill] sm:$0xff] %v4820_v38 }
  0x2a   :  { %427 = vmatpush.msrb.mxu2 %v4662_v26  ;;  %408 = vmatpush.msrb.mxu1 %v4667_v30  ;;  %v4720_v26 = vld [vmem:[%s10062_s2 + $0x328] sm:$0xff]  ;;  %10622 = vst [vmem:[#allocation32_spill] sm:$0xff] %v4827_v45 }
  0x2b   :  { %449 = vmatpush.msrb.mxu3 %v4672_v34  ;;  %388 = vmatpush.msrb.mxu0 %v4681_v63  ;;  %v4739_v63 = vld [vmem:[%s10062_s2 + $0x320] sm:$0xff]  ;;  %10623 = vst [vmem:[#allocation33_spill] sm:$0xff] %v4832_v41 }
  0x2c   :  { %428 = vmatpush.msrb.mxu2 %v4686_v11  ;;  %409 = vmatpush.msrb.mxu1 %v4691_v17  ;;  %v4744_v11 = vld [vmem:[%s10062_s2 + $0x308] sm:$0xff]  ;;  %10624 = vst [vmem:[#allocation34_spill] sm:$0xff] %v4839_v37 }
  0x2d   :  { %450 = vmatpush.msrb.mxu3 %v4696_v18  ;;  %389 = vmatpush.msrb.mxu0 %v4705_v9  ;;  %v4772_v9 = vld [vmem:[%s10062_s2 + $0x2c8] sm:$0xff]  ;;  %10625 = vst [vmem:[#allocation35_spill] sm:$0xff] %v4844_v33 }
  0x2e   :  { %429 = vmatpush.msrb.mxu2 %v4710_v58  ;;  %410 = vmatpush.msrb.mxu1 %v4715_v25  ;;  %v4767_v58 = vld [vmem:[%s10062_s2 + $0x2e0] sm:$0xff]  ;;  %10626 = vst [vmem:[#allocation36_spill] sm:$0xff] %v4851_v29 }
  0x2f   :  { %451 = vmatpush.msrb.mxu3 %v4720_v26  ;;  %390 = vmatpush.msrb.mxu0 %v4729_v2  ;;  %v4784_v2 = vld [vmem:[%s10062_s2 + $0x2a8] sm:$0xff] }
  0x30   :  { %430 = vmatpush.msrb.mxu2 %v4734_v54  ;;  %411 = vmatpush.msrb.mxu1 %v4739_v63  ;;  %v4779_v54 = vld [vmem:[%s10062_s2 + $0x2c0] sm:$0xff] }
  0x31   :  { %452 = vmatpush.msrb.mxu3 %v4744_v11 }
  0x32   :  { %412 = vmatpush.msrb.mxu1 %v4753_v61 }
  0x33   :  { %453 = vmatpush.msrb.mxu3 %v4758_v50 }
  0x34   :  { %413 = vmatpush.msrb.mxu1 %v4767_v58 }
  0x35   :  { %454 = vmatpush.msrb.mxu3 %v4772_v9 }
  0x36   :  { %414 = vmatpush.msrb.mxu1 %v4779_v54 }
  0x37   :  { %455 = vmatpush.msrb.mxu3 %v4784_v2 }
  0x38   :  { %415 = vmatpush.msrb.mxu1 %v4791_v57 }
  0x39   :  { %456 = vmatpush.msrb.mxu3 %v4796_v46 }
  0x3a   :  { %416 = vmatpush.msrb.mxu1 %v4803_v53 }
  0x3b   :  { %457 = vmatpush.msrb.mxu3 %v4808_v42  ;;  %v10632_v42 = vmov 0.0  }
  0x3c   :  { %417 = vmatpush.msrb.mxu1 %v4815_v49 }
  0x3d   :  { %458 = vmatpush.msrb.mxu3 %v4820_v38  ;;  %v4856_v38 = vld [vmem:[%s10062_s2 + $0x200] sm:$0xff] }
  0x3e   :  { %418 = vmatpush.msrb.mxu1 %v4827_v45  ;;  %10627 = vst [vmem:[#allocation37_spill] sm:$0xff] %v4856_v38  ;;  %v4863_v45 = vld [vmem:[%s10062_s2 + $0x3f0] sm:$0xff] }
  0x3f   :  { %459 = vmatpush.msrb.mxu3 %v4832_v41  ;;  %10628 = vst [vmem:[#allocation38_spill] sm:$0xff] %v4863_v45  ;;  %v4868_v41 = vld [vmem:[%s10062_s2 + $0x3d8] sm:$0xff] }
  0x40   :  { %419 = vmatpush.msrb.mxu1 %v4839_v37  ;;  %10629 = vst [vmem:[#allocation39_spill] sm:$0xff] %v4868_v41  ;;  %v4875_v37 = vld [vmem:[%s10062_s2 + $0x3d0] sm:$0xff] }
  0x41   :  { %460 = vmatpush.msrb.mxu3 %v4844_v33  ;;  %10630 = vst [vmem:[#allocation40_spill] sm:$0xff] %v4875_v37  ;;  %v4880_v33 = vld [vmem:[%s10062_s2 + $0x3b8] sm:$0xff] }
  0x42   :  { %420 = vmatpush.msrb.mxu1 %v4856_v38  ;;  %10631 = vst [vmem:[#allocation41_spill] sm:$0xff] %v4880_v33  ;;  %461 = vmatmul.f32.vlgmr.msrb.gmra.mxu3 %v10632_v42  ;;  %v4893_v38 = vld [vmem:[%s10062_s2 + $0x398] sm:$0xff] }
  0x43   :  { %525 = vmatpush.msra.mxu3 %v4851_v29  ;;  %v4888_v29 = vld [vmem:[%s10062_s2 + $0x3b0] sm:$0xff]  ;;  %10634 = vst [vmem:[#allocation43_spill] sm:$0xff] %v4893_v38  ;;  %421 = vmatmul.f32.vlgmr.msrb.gmra.mxu1 %v10632_v42 }
  0x44   :  { %485 = vmatpush.msra.mxu1 %v4863_v45  ;;  %10633 = vst [vmem:[#allocation42_spill] sm:$0xff] %v4888_v29  ;;  %v4906_v45 = vld [vmem:[%s10062_s2 + $0x378] sm:$0xff] }
  0x45   :  { %526 = vmatpush.msra.mxu3 %v4868_v41  ;;  %v4901_v41 = vld [vmem:[%s10062_s2 + $0x390] sm:$0xff]  ;;  %10636 = vst [vmem:[#allocation45_spill] sm:$0xff] %v4906_v45 }
  0x46   :  { %486 = vmatpush.msra.mxu1 %v4875_v37  ;;  %10635 = vst [vmem:[#allocation44_spill] sm:$0xff] %v4901_v41  ;;  %v4913_v37 = vld [vmem:[%s10062_s2 + $0x370] sm:$0xff] }
  0x47   :  { %527 = vmatpush.msra.mxu3 %v4880_v33  ;;  %10637 = vst [vmem:[#allocation46_spill] sm:$0xff] %v4913_v37  ;;  %v4918_v33 = vld [vmem:[%s10062_s2 + $0x358] sm:$0xff] }
  0x48   :  { %487 = vmatpush.msra.mxu1 %v4888_v29  ;;  %10638 = vst [vmem:[#allocation47_spill] sm:$0xff] %v4918_v33  ;;  %v4925_v29 = vld [vmem:[%s10062_s2 + $0x350] sm:$0xff] }
  0x49   :  { %528 = vmatpush.msra.mxu3 %v4893_v38  ;;  %10639 = vst [vmem:[#allocation48_spill] sm:$0xff] %v4925_v29  ;;  %v4933_v38 = vld [vmem:[%s10062_s2 + $0x120] sm:$0xff] }
  0x4a   :  { %488 = vmatpush.msra.mxu1 %v4901_v41  ;;  %10640 = vst [vmem:[#allocation49_spill] sm:$0xff] %v4933_v38  ;;  %v4943_v41 = vld [vmem:[%s10062_s2 + $0x330] sm:$0xff]  ;;  %391 = vmatpush.msrb.mxu0 %v4933_v38  ;;  %v4962_v38 = vld [vmem:[%s10062_s2 + $0x108] sm:$0xff] }
  0x4b   :  { %529 = vmatpush.msra.mxu3 %v4906_v45  ;;  %v4938_v45 = vld [vmem:[%s10062_s2 + $0x128] sm:$0xff]  ;;  %10642 = vst [vmem:[#allocation51_spill] sm:$0xff] %v4943_v41 }
  0x4c   :  { %489 = vmatpush.msra.mxu1 %v4913_v37  ;;  %10641 = vst [vmem:[#allocation50_spill] sm:$0xff] %v4938_v45  ;;  %431 = vmatpush.msrb.mxu2 %v4938_v45  ;;  %v4969_v45 = vld [vmem:[%s10062_s2 + $0x310] sm:$0xff]  ;;  %v5176_v37 = vld [vmem:[%s10062_s2 + $0x1f8] sm:$0xff] }
  0x4d   :  { %530 = vmatpush.msra.mxu3 %v4918_v33  ;;  %v4950_v33 = vld [vmem:[%s10062_s2 + $0x338] sm:$0xff]  ;;  %10645 = vst [vmem:[#allocation54_spill] sm:$0xff] %v4962_v38 }
  0x4e   :  { %490 = vmatpush.msra.mxu1 %v4925_v29  ;;  %10643 = vst [vmem:[#allocation52_spill] sm:$0xff] %v4950_v33  ;;  %v4957_v29 = vld [vmem:[%s10062_s2 + $0x100] sm:$0xff]  ;;  %432 = vmatpush.msrb.mxu2 %v4962_v38  ;;  %v4986_v38 = vld [vmem:[%s10062_s2 + $0xe8] sm:$0xff] }
  0x4f   :  { %531 = vmatpush.msra.mxu3 %v4950_v33  ;;  %10644 = vst [vmem:[#allocation53_spill] sm:$0xff] %v4957_v29  ;;  %392 = vmatpush.msrb.mxu0 %v4957_v29  ;;  %v4974_v33 = vld [vmem:[%s10062_s2 + $0x318] sm:$0xff]  ;;  %v4981_v29 = vld [vmem:[%s10062_s2 + $0xe0] sm:$0xff] }
  0x50   :  { %491 = vmatpush.msra.mxu1 %v4943_v41  ;;  %10646 = vst [vmem:[#allocation55_spill] sm:$0xff] %v4969_v45  ;;  %v4991_v41 = vld [vmem:[%s10062_s2 + $0x2f0] sm:$0xff]  ;;  %433 = vmatpush.msrb.mxu2 %v4986_v38 }
  0x51   :  { %10647 = vst [vmem:[#allocation56_spill] sm:$0xff] %v4974_v33  ;;  %532 = vmatpush.msra.mxu3 %v4974_v33  ;;  %393 = vmatpush.msrb.mxu0 %v4981_v29  ;;  %v4998_v33 = vld [vmem:[%s10062_s2 + $0x2f8] sm:$0xff] }
  0x52   :  { %492 = vmatpush.msra.mxu1 %v4969_v45  ;;  %10648 = vst [vmem:[#allocation57_spill] sm:$0xff] %v4981_v29  ;;  %v5005_v45 = vld [vmem:[%s10062_s2 + $0xc0] sm:$0xff]  ;;  %v5010_v29 = vld [vmem:[%s10062_s2 + $0xc8] sm:$0xff] }
  0x53   :  { %10649 = vst [vmem:[#allocation58_spill] sm:$0xff] %v4986_v38  ;;  %533 = vmatpush.msra.mxu3 %v4998_v33  ;;  %v5015_v38 = vld [vmem:[%s10062_s2 + $0x2d0] sm:$0xff]  ;;  %394 = vmatpush.msrb.mxu0 %v5005_v45 }
  0x54   :  { %10650 = vst [vmem:[#allocation59_spill] sm:$0xff] %v4991_v41  ;;  %493 = vmatpush.msra.mxu1 %v4991_v41  ;;  %434 = vmatpush.msrb.mxu2 %v5010_v29  ;;  %v5029_v41 = vld [vmem:[%s10062_s2 + $0xa0] sm:$0xff] }
  0x55   :  { %10651 = vst [vmem:[#allocation60_spill] sm:$0xff] %v4998_v33  ;;  %v5022_v33 = vld [vmem:[%s10062_s2 + $0x2d8] sm:$0xff]  ;;  %395 = vmatpush.msrb.mxu0 %v5029_v41 }
  0x56   :  { %10652 = vst [vmem:[#allocation61_spill] sm:$0xff] %v5005_v45  ;;  %494 = vmatpush.msra.mxu1 %v5015_v38  ;;  %534 = vmatpush.msra.mxu3 %v5022_v33  ;;  %v5034_v45 = vld [vmem:[%s10062_s2 + $0xa8] sm:$0xff] }
  0x57   :  { %10653 = vst [vmem:[#allocation62_spill] sm:$0xff] %v5010_v29  ;;  %v5039_v29 = vld [vmem:[%s10062_s2 + $0x2b0] sm:$0xff]  ;;  %435 = vmatpush.msrb.mxu2 %v5034_v45 }
  0x58   :  { %10654 = vst [vmem:[#allocation63_spill] sm:$0xff] %v5015_v38  ;;  %495 = vmatpush.msra.mxu1 %v5039_v29  ;;  %v5053_v38 = vld [vmem:[%s10062_s2 + $0x80] sm:$0xff] }
  0x59   :  { %10655 = vst [vmem:[#allocation64_spill] sm:$0xff] %v5022_v33  ;;  %v5046_v33 = vld [vmem:[%s10062_s2 + $0x2b8] sm:$0xff]  ;;  %396 = vmatpush.msrb.mxu0 %v5053_v38 }
  0x5a   :  { %10656 = vst [vmem:[#allocation65_spill] sm:$0xff] %v5029_v41  ;;  %535 = vmatpush.msra.mxu3 %v5046_v33  ;;  %v5058_v41 = vld [vmem:[%s10062_s2 + $0x88] sm:$0xff] }
  0x5b   :  { %10657 = vst [vmem:[#allocation66_spill] sm:$0xff] %v5034_v45  ;;  %v5063_v45 = vld [vmem:[%s10062_s2 + $0x290] sm:$0xff]  ;;  %436 = vmatpush.msrb.mxu2 %v5058_v41 }
  0x5c   :  { %10658 = vst [vmem:[#allocation67_spill] sm:$0xff] %v5039_v29  ;;  %496 = vmatpush.msra.mxu1 %v5063_v45  ;;  %v5077_v29 = vld [vmem:[%s10062_s2 + $0x60] sm:$0xff] }
  0x5d   :  { %10659 = vst [vmem:[#allocation68_spill] sm:$0xff] %v5046_v33  ;;  %v5070_v33 = vld [vmem:[%s10062_s2 + $0x298] sm:$0xff]  ;;  %397 = vmatpush.msrb.mxu0 %v5077_v29 }
  0x5e   :  { %10660 = vst [vmem:[#allocation69_spill] sm:$0xff] %v5053_v38  ;;  %536 = vmatpush.msra.mxu3 %v5070_v33  ;;  %v5082_v38 = vld [vmem:[%s10062_s2 + $0x68] sm:$0xff] }
  0x5f   :  { %10661 = vst [vmem:[#allocation70_spill] sm:$0xff] %v5058_v41  ;;  %v5087_v41 = vld [vmem:[%s10062_s2 + $0x270] sm:$0xff]  ;;  %437 = vmatpush.msrb.mxu2 %v5082_v38 }
  0x60   :  { %10662 = vst [vmem:[#allocation71_spill] sm:$0xff] %v5063_v45  ;;  %497 = vmatpush.msra.mxu1 %v5087_v41  ;;  %v5101_v45 = vld [vmem:[%s10062_s2 + $0x40] sm:$0xff] }
  0x61   :  { %10663 = vst [vmem:[#allocation72_spill] sm:$0xff] %v5070_v33  ;;  %v5094_v33 = vld [vmem:[%s10062_s2 + $0x278] sm:$0xff]  ;;  %398 = vmatpush.msrb.mxu0 %v5101_v45 }
  0x62   :  { %10664 = vst [vmem:[#allocation73_spill] sm:$0xff] %v5077_v29  ;;  %537 = vmatpush.msra.mxu3 %v5094_v33  ;;  %v5106_v29 = vld [vmem:[%s10062_s2 + $0x48] sm:$0xff] }
  0x63   :  { %10665 = vst [vmem:[#allocation74_spill] sm:$0xff] %v5082_v38  ;;  %v5111_v38 = vld [vmem:[%s10062_s2 + $0x250] sm:$0xff]  ;;  %438 = vmatpush.msrb.mxu2 %v5106_v29 }
  0x64   :  { %10666 = vst [vmem:[#allocation75_spill] sm:$0xff] %v5087_v41  ;;  %498 = vmatpush.msra.mxu1 %v5111_v38  ;;  %v5125_v41 = vld [vmem:[%s10062_s2 + $0x20] sm:$0xff] }
  0x65   :  { %10667 = vst [vmem:[#allocation76_spill] sm:$0xff] %v5094_v33  ;;  %v5118_v33 = vld [vmem:[%s10062_s2 + $0x258] sm:$0xff]  ;;  %399 = vmatpush.msrb.mxu0 %v5125_v41 }
  0x66   :  { %10668 = vst [vmem:[#allocation77_spill] sm:$0xff] %v5101_v45  ;;  %538 = vmatpush.msra.mxu3 %v5118_v33  ;;  %v5130_v45 = vld [vmem:[%s10062_s2 + $0x28] sm:$0xff] }
  0x67   :  { %10669 = vst [vmem:[#allocation78_spill] sm:$0xff] %v5106_v29  ;;  %v5135_v29 = vld [vmem:[%s10062_s2 + $0x230] sm:$0xff]  ;;  %439 = vmatpush.msrb.mxu2 %v5130_v45 }
  0x68   :  { %10670 = vst [vmem:[#allocation79_spill] sm:$0xff] %v5111_v38  ;;  %499 = vmatpush.msra.mxu1 %v5135_v29  ;;  %v5149_v38 = vld [vmem:[%s10062_s2] sm:$0xff] }
  0x69   :  { %10671 = vst [vmem:[#allocation80_spill] sm:$0xff] %v5118_v33  ;;  %v5142_v33 = vld [vmem:[%s10062_s2 + $0x238] sm:$0xff]  ;;  %400 = vmatpush.msrb.mxu0 %v5149_v38 }
  0x6a   :  { %10672 = vst [vmem:[#allocation81_spill] sm:$0xff] %v5125_v41  ;;  %539 = vmatpush.msra.mxu3 %v5142_v33  ;;  %v5154_v41 = vld [vmem:[%s10062_s2 + $0x8] sm:$0xff] }
  0x6b   :  { %10673 = vst [vmem:[#allocation82_spill] sm:$0xff] %v5130_v45  ;;  %v5159_v45 = vld [vmem:[%s10062_s2 + $0x210] sm:$0xff]  ;;  %440 = vmatpush.msrb.mxu2 %v5154_v41 }
  0x6c   :  { %10674 = vst [vmem:[#allocation83_spill] sm:$0xff] %v5135_v29  ;;  %v5171_v29 = vld [vmem:[%s10062_s2 + $0x1f0] sm:$0xff]  ;;  %500 = vmatpush.msra.mxu1 %v5159_v45 }
  0x6d   :  { %10675 = vst [vmem:[#allocation84_spill] sm:$0xff] %v5142_v33  ;;  %v5166_v33 = vld [vmem:[%s10062_s2 + $0x218] sm:$0xff]  ;;  %465 = vmatpush.msra.mxu0 %v5171_v29  ;;  %505 = vmatpush.msra.mxu2 %v5176_v37 }
  0x6e   :  { %10676 = vst [vmem:[#allocation85_spill] sm:$0xff] %v5149_v38  ;;  %540 = vmatpush.msra.mxu3 %v5166_v33  ;;  %v5190_v38 = vld [vmem:[%s10062_s2 + $0x1d8] sm:$0xff]  ;;  %630 = vmatpush.msrb.mxu1 %v4280_v6 }
  0x6f   :  { %10677 = vst [vmem:[#allocation86_spill] sm:$0xff] %v5154_v41  ;;  %v5185_v41 = vld [vmem:[%s10062_s2 + $0x1d0] sm:$0xff]  ;;  %506 = vmatpush.msra.mxu2 %v5190_v38  ;;  %v5218_v6 = vld [vmem:[%s10062_s2 + $0x198] sm:$0xff]  ;;  %501 = vmatmul.f32.vlgmr.msra.gmra.mxu1 %v10632_v42 }
  0x70   :  { %10678 = vst [vmem:[#allocation87_spill] sm:$0xff] %v5171_v29  ;;  %670 = vmatpush.msrb.mxu3 %v4258_v1  ;;  %466 = vmatpush.msra.mxu0 %v5185_v41  ;;  %v5204_v29 = vld [vmem:[%s10062_s2 + $0x1b8] sm:$0xff]  ;;  %v5213_v1 = vld [vmem:[%s10062_s2 + $0x190] sm:$0xff] }
  0x71   :  { %10679 = vst [vmem:[#allocation88_spill] sm:$0xff] %v5176_v37  ;;  %v5199_v37 = vld [vmem:[%s10062_s2 + $0x1b0] sm:$0xff]  ;;  %631 = vmatpush.msrb.mxu1 %v4289_v8  ;;  %507 = vmatpush.msra.mxu2 %v5204_v29  ;;  %v5232_v8 = vld [vmem:[%s10062_s2 + $0x178] sm:$0xff] }
  0x72   :  { %10680 = vst [vmem:[#allocation89_spill] sm:$0xff] %v5204_v29  ;;  %671 = vmatpush.msrb.mxu3 %v4267_v3  ;;  %467 = vmatpush.msra.mxu0 %v5199_v37  ;;  %v5227_v3 = vld [vmem:[%s10062_s2 + $0x170] sm:$0xff] }
  0x73   :  { %10681 = vst [vmem:[#allocation90_spill] sm:$0xff] %v5213_v1  ;;  %632 = vmatpush.msrb.mxu1 %v4307_v12  ;;  %508 = vmatpush.msra.mxu2 %v5218_v6 }
  0x74   :  { %10682 = vst [vmem:[#allocation91_spill] sm:$0xff] %v5218_v6  ;;  %672 = vmatpush.msrb.mxu3 %v4275_v5  ;;  %468 = vmatpush.msra.mxu0 %v5213_v1  ;;  %v5241_v6 = vld [vmem:[%s10062_s2 + $0x150] sm:$0xff]  ;;  %v5246_v1 = vld [vmem:[%s10062_s2 + $0x158] sm:$0xff] }
  0x75   :  { %10683 = vst [vmem:[#allocation92_spill] sm:$0xff] %v5227_v3  ;;  %633 = vmatpush.msrb.mxu1 %v4325_v16  ;;  %509 = vmatpush.msra.mxu2 %v5232_v8 }
  0x76   :  { %10684 = vst [vmem:[#allocation93_spill] sm:$0xff] %v5232_v8  ;;  %673 = vmatpush.msrb.mxu3 %v4298_v10  ;;  %469 = vmatpush.msra.mxu0 %v5227_v3  ;;  %v5255_v8 = vld [vmem:[%s10062_s2 + $0x130] sm:$0xff] }
  0x77   :  { %10685 = vst [vmem:[#allocation94_spill] sm:$0xff] %v5246_v1  ;;  %634 = vmatpush.msrb.mxu1 %v4343_v20  ;;  %510 = vmatpush.msra.mxu2 %v5246_v1  ;;  %v27_v1 = vld [vmem:[%s10063_s0] sm:$0xff] }
  0x78   :  { %674 = vmatpush.msrb.mxu3 %v4319_v15  ;;  %470 = vmatpush.msra.mxu0 %v5241_v6 }
  0x79   :  { %635 = vmatpush.msrb.mxu1 %v4361_v24  ;;  %541 = vmatmul.f32.vlgmr.msra.gmra.mxu3 %v10632_v42  ;;  %v5378_v42 = vld [vmem:[%s10062_s2 + $0x30] sm:$0xff] }
  0x7a   :  { %675 = vmatpush.msrb.mxu3 %v4337_v19  ;;  %471 = vmatpush.msra.mxu0 %v5255_v8 }
  0x7b   :  { %636 = vmatpush.msrb.mxu1 %v4379_v28  ;;  %v5310_v28 = vld [vmem:[%s10062_s2 + $0xd8] sm:$0xff] }
  0x7c   :  { %676 = vmatpush.msrb.mxu3 %v4355_v23  ;;  %v5305_v23 = vld [vmem:[%s10062_s2 + $0xd0] sm:$0xff] }
  0x7d   :  { %637 = vmatpush.msrb.mxu1 %v4399_v32 }
  0x7e   :  { %677 = vmatpush.msrb.mxu3 %v4373_v27 }
  0x7f   :  { %638 = vmatpush.msrb.mxu1 %v4420_v36  ;;  %v5341_v36 = vld [vmem:[%s10062_s2 + $0x98] sm:$0xff] }
  0x80   :  { %678 = vmatpush.msrb.mxu3 %v4393_v31  ;;  %v5336_v31 = vld [vmem:[%s10062_s2 + $0x90] sm:$0xff] }
  0x81   :  { %639 = vmatpush.msrb.mxu1 %v4443_v40  ;;  %v5355_v40 = vld [vmem:[%s10062_s2 + $0x78] sm:$0xff] }
  0x82   :  { %679 = vmatpush.msrb.mxu3 %v4413_v35  ;;  %v5350_v35 = vld [vmem:[%s10062_s2 + $0x70] sm:$0xff] }
  0x83   :  { %640 = vmatpush.msrb.mxu1 %v4467_v44  ;;  %v5369_v44 = vld [vmem:[%s10062_s2 + $0x58] sm:$0xff] }
  0x84   :  { %680 = vmatpush.msrb.mxu3 %v4436_v39  ;;  %v5364_v39 = vld [vmem:[%s10062_s2 + $0x50] sm:$0xff] }
  0x85   :  { %641 = vmatpush.msrb.mxu1 %v4491_v48  ;;  %v5383_v48 = vld [vmem:[%s10062_s2 + $0x38] sm:$0xff] }
  0x86   :  { %681 = vmatpush.msrb.mxu3 %v4459_v43 }
  0x87   :  { %642 = vmatpush.msrb.mxu1 %v4515_v52  ;;  %v5397_v52 = vld [vmem:[%s10062_s2 + $0x18] sm:$0xff] }
  0x88   :  { %682 = vmatpush.msrb.mxu3 %v4483_v47  ;;  %v5392_v47 = vld [vmem:[%s10062_s2 + $0x10] sm:$0xff]  ;;  %10686 = vst [vmem:[#allocation95_spill] sm:$0xff] %v5397_v52 }
  0x89   :  { %643 = vmatpush.msrb.mxu1 %v4539_v56 }
  0x8a   :  { %683 = vmatpush.msrb.mxu3 %v4507_v51 }
  0x8b   :  { %644 = vmatpush.msrb.mxu1 %v4565_v60 }
  0x8c   :  { %684 = vmatpush.msrb.mxu3 %v4531_v55 }
  0x8d   :  { %645 = vmatpush.msrb.mxu1 %v4584_v0 }
  0x8e   :  { %685 = vmatpush.msrb.mxu3 %v4555_v59 }
  0x8f   :  { %792 = vmatpush.msra.mxu1 %v4596_v4 }
  0x90   :  { %832 = vmatpush.msra.mxu3 %v4577_v62 }
  0x91   :  { %793 = vmatpush.msra.mxu1 %v4621_v13 }
  0x92   :  { %833 = vmatpush.msra.mxu3 %v4602_v7 }
  0x93   :  { %794 = vmatpush.msra.mxu1 %v4643_v21 }
  0x94   :  { %834 = vmatpush.msra.mxu3 %v4626_v14 }
  0x95   :  { %795 = vmatpush.msra.mxu1 %v4667_v30 }
  0x96   :  { %835 = vmatpush.msra.mxu3 %v4648_v22 }
  0x97   :  { %796 = vmatpush.msra.mxu1 %v4691_v17 }
  0x98   :  { %836 = vmatpush.msra.mxu3 %v4672_v34 }
  0x99   :  { %797 = vmatpush.msra.mxu1 %v4715_v25 }
  0x9a   :  { %837 = vmatpush.msra.mxu3 %v4696_v18 }
  0x9b   :  { %798 = vmatpush.msra.mxu1 %v4739_v63 }
  0x9c   :  { %838 = vmatpush.msra.mxu3 %v4720_v26 }
  0x9d   :  { %799 = vmatpush.msra.mxu1 %v4753_v61 }
  0x9e   :  { %839 = vmatpush.msra.mxu3 %v4744_v11 }
  0x9f   :  { %800 = vmatpush.msra.mxu1 %v4767_v58 }
  0xa0   :  { %v129_v12 = vpop.f32.mrf.mxu1  ;;  %840 = vmatpush.msra.mxu3 %v4758_v50 }
  0xa1   :  { %v109_v5 = vpop.f32.mrf.mxu0  ;;  %v176_v16 = vrot.slane %v129_v12, 6  ;;  %v5260_v12 = vld [vmem:[%s10062_s2 + $0x138] sm:$0xff]  ;;  %801 = vmatpush.msra.mxu1 %v4779_v54 }
  0xa2   :  { %511 = vmatpush.msra.mxu2 %v5260_v12  ;;  %841 = vmatpush.msra.mxu3 %v4772_v9  ;;  %v10687_v9 = vld [vmem:[#allocation30_spill] sm:$0xff] }
  0xa3   :  { %v180_v15 = vsel %vm179_vm0, %v109_v5, %v176_v16  ;;  %v5289_v5 = vld [vmem:[%s10062_s2 + $0xf0] sm:$0xff]  ;;  %v5294_v16 = vld [vmem:[%s10062_s2 + $0xf8] sm:$0xff]  ;;  %802 = vmatpush.msra.mxu1 %v4791_v57 }
  0xa4   :  { %v149_v10 = vpop.f32.mrf.mxu2  ;;  %v169_v29 = vpop.f32.mrf.mxu3  ;;  %842 = vmatpush.msra.mxu3 %v4784_v2  ;;  %v10688_v57 = vld [vmem:[#allocation32_spill] sm:$0xff]  ;;  %v10689_v2 = vld [vmem:[#allocation31_spill] sm:$0xff] }
  0xa5   :  { %v177_v20 = vrot.slane %v149_v10, 4  ;;  %v178_v3 = vrot.slane %v169_v29, 2  ;;  %v5273_v10 = vld [vmem:[%s10062_s2 + $0x110] sm:$0xff]  ;;  %v5278_v29 = vld [vmem:[%s10062_s2 + $0x118] sm:$0xff]  ;;  %803 = vmatpush.msra.mxu1 %v4803_v53  ;;  %v5474_v53 = vld [vmem:[%s10061_s1 + $0x1c0] sm:$0xff] }
  0xa6   :  { %472 = vmatpush.msra.mxu0 %v5273_v10  ;;  %512 = vmatpush.msra.mxu2 %v5278_v29 }
  0xa7   :  { %v182_v19 = vsel %vm181_vm1, %v177_v20, %v178_v3  ;;  %v5322_v20 = vld [vmem:[%s10062_s2 + $0xb0] sm:$0xff]  ;;  %843 = vmatpush.msra.mxu3 %v4796_v46  ;;  %804 = vmatpush.msra.mxu1 %v4815_v49  ;;  %v5460_v46 = vld [vmem:[%s10061_s1 + $0x1e0] sm:$0xff] }
  0xa8   :  { %v184_v24 = vsel %vm183_vm2, %v180_v15, %v182_v19  ;;  %473 = vmatpush.msra.mxu0 %v5289_v5  ;;  %513 = vmatpush.msra.mxu2 %v5294_v16  ;;  %v5327_v15 = vld [vmem:[%s10062_s2 + $0xb8] sm:$0xff]  ;;  %v5467_v49 = vld [vmem:[%s10061_s1 + $0x1f0] sm:$0xff] }
  0xa9   :  { %v5296_v3 = vadd.f32 %v184_v24, %v27_v1  ;;  %844 = vmatpush.msra.mxu3 %v10687_v9  ;;  %805 = vmatpush.msra.mxu1 %v10688_v57  ;;  %v10707_v9 = vld [vmem:[#allocation6_spill] sm:$0xff]  ;;  %v10709_v57 = vld [vmem:[#allocation47_spill] sm:$0xff] }
  0xaa   :  { %474 = vmatpush.msra.mxu0 %v5305_v23  ;;  %514 = vmatpush.msra.mxu2 %v5310_v28 }
  0xab   :  { %v3322_v1 = vmul.f32 -1.442695, %v5296_v3  ;;  %v207_v32 = vrot.slane %v5296_v3, 2  ;;  %v231_v27 = vrot.slane %v5296_v3, 6  ;;  %845 = vmatpush.msra.mxu3 %v10689_v2  ;;  %v10710_v2 = vld [vmem:[#allocation8_spill] sm:$0xff] }
  0xac   :  { %475 = vmatpush.msra.mxu0 %v5322_v20  ;;  %515 = vmatpush.msra.mxu2 %v5327_v15 }
  0xad   :  { %3378 = vpow2.f32 %v3322_v1  ;;  %v3323_v19 = vmul.f32 -1.442695, %v207_v32  ;;  %v3324_v24 = vmul.f32 -1.442695, %v231_v27 }
  0xae   :  { %476 = vmatpush.msra.mxu0 %v5336_v31  ;;  %516 = vmatpush.msra.mxu2 %v5341_v36 }
  0xaf   :  { %3380 = vpow2.f32 %v3323_v19 }
  0xb0   :  { %3382 = vpow2.f32 %v3324_v24  ;;  %477 = vmatpush.msra.mxu0 %v5350_v35  ;;  %517 = vmatpush.msra.mxu2 %v5355_v40 }
  0xb2   :  { %478 = vmatpush.msra.mxu0 %v5364_v39  ;;  %518 = vmatpush.msra.mxu2 %v5369_v44 }
  0xb3   :  { %v3379_v1 = vpop.eup %3378 }
  0xb4   :  { %v190_v43 = vadd.f32 1.0, %v3379_v1  ;;  %479 = vmatpush.msra.mxu0 %v5378_v42  ;;  %519 = vmatpush.msra.mxu2 %v5383_v48  ;;  %v228_v1 = vrot.slane %v5296_v3, 4 }
  0xb5   :  { %v3381_v32 = vpop.eup %3380 }
  0xb6   :  { %v3383_v27 = vpop.eup %3382  ;;  %3384 = vrcp.f32 %v190_v43  ;;  %v212_v19 = vadd.f32 1.0, %v3381_v32  ;;  %480 = vmatpush.msra.mxu0 %v5392_v47  ;;  %520 = vmatpush.msra.mxu2 %v5397_v52  ;;  %v202_v62 = vand.u32 2147483648, %v190_v43  ;;  %v200_v7 = vand.u32 2147483647, %v190_v43 }
  0xb7   :  { %v5399_v24 = vadd.f32 1.0, %v3383_v27  ;;  %vm196_vm4 = vweird.f32 %v190_v43 }
  0xb8   :  { %3386 = vrcp.f32 %v212_v19  ;;  %v224_v21 = vand.u32 2147483648, %v212_v19  ;;  %v222_v27 = vand.u32 2147483647, %v212_v19  ;;  %vm201_vm7 = vcmp.eq.f32.partialorder %v200_v7, 8.507059e+37  ;;  %v5502_v7 = vld [vmem:[%s10061_s1 + $0x180] sm:$0xff] }
  0xb9   :  { %3388 = vrcp.f32 %v5399_v24  ;;  %vm218_vm8 = vweird.f32 %v212_v19  ;;  %v248_v61 = vand.u32 2147483648, %v5399_v24  ;;  %vm242_vm12 = vweird.f32 %v5399_v24 }
  0xba   :  { %3390 = vtanh.f32 %v228_v1  ;;  %vm223_vm10 = vcmp.eq.f32.partialorder %v222_v27, 8.507059e+37  ;;  %v246_v58 = vand.u32 2147483647, %v5399_v24  ;;  %v10695_v27 = vld [vmem:[#allocation36_spill] sm:$0xff] }
  0xbb   :  { %v249_v54 = vor.u32 1.1754944e-38, %v248_v61  ;;  %v10704_v61 = vld [vmem:[#allocation4_spill] sm:$0xff] }
  0xbc   :  { %v3385_v51 = vpop.eup %3384  ;;  %vm247_vm14 = vcmp.eq.f32.partialorder %v246_v58, 8.507059e+37  ;;  %v10705_v58 = vld [vmem:[#allocation46_spill] sm:$0xff] }
  0xbd   :  { %v192_v56 = vmul.f32 %v3385_v51, %v190_v43  ;;  %vm197_vm3 = vweird.f32 %v3385_v51  ;;  %v225_v43 = vor.u32 1.1754944e-38, %v224_v21  ;;  %v5517_v21 = vld [vmem:[%s10061_s1 + $0x160] sm:$0xff] }
  0xbe   :  { %v3387_v55 = vpop.eup %3386  ;;  %vm198_vm5 = vmor %vm196_vm4, %vm197_vm3 }
  0xbf   :  { %v193_v60 = vsub.f32 1.0, %v192_v56  ;;  %v5417_v0 = vpop.eup %3388  ;;  %v214_v59 = vmul.f32 %v3387_v55, %v212_v19  ;;  %vm219_vm6 = vweird.f32 %v3387_v55 }
  0xc0   :  { %v238_v32 = vmul.f32 %v5417_v0, %v5399_v24  ;;  %vm220_vm9 = vmor %vm218_vm8, %vm219_vm6  ;;  %v3391_v34 = vpop.eup %3390  ;;  %vm243_vm11 = vweird.f32 %v5417_v0  ;;  %v10690_v24 = vld [vmem:[#allocation34_spill] sm:$0xff] }
  0xc1   :  { %v194_v4 = vmul.f32 %v3385_v51, %v193_v60  ;;  %v215_v13 = vsub.f32 1.0, %v214_v59  ;;  %v203_v60 = vor.u32 1.1754944e-38, %v202_v62  ;;  %vm244_vm13 = vmor %vm242_vm12, %vm243_vm11  ;;  %806 = vmatpush.msra.mxu1 %v10690_v24  ;;  %v5488_v59 = vld [vmem:[%s10061_s1 + $0x1a0] sm:$0xff]  ;;  %v5495_v62 = vld [vmem:[%s10061_s1 + $0x1b0] sm:$0xff] }
  0xc2   :  { %v239_v52 = vsub.f32 1.0, %v238_v32  ;;  %v10693_v32 = vld [vmem:[#allocation35_spill] sm:$0xff] }
  0xc3   :  { %v195_v3 = vadd.f32 %v3385_v51, %v194_v4  ;;  %v216_v14 = vmul.f32 %v3387_v55, %v215_v13  ;;  %v10692_v4 = vld [vmem:[#allocation37_spill] sm:$0xff]  ;;  %v10694_v13 = vld [vmem:[#allocation38_spill] sm:$0xff]  ;;  %v10711_v24 = vld [vmem:[#allocation51_spill] sm:$0xff] }
  0xc4   :  { %v240_v1 = vmul.f32 %v5417_v0, %v239_v52  ;;  %807 = vmatpush.msra.mxu1 %v10692_v4  ;;  %v10713_v4 = vld [vmem:[#allocation52_spill] sm:$0xff] }
  0xc5   :  { %v199_v56 = vsel %vm198_vm5, %v3385_v51, %v195_v3  ;;  %v217_v22 = vadd.f32 %v3387_v55, %v216_v14  ;;  %v5509_v3 = vld [vmem:[%s10061_s1 + $0x190] sm:$0xff] }
  0xc6   :  { %v204_v30 = vsel %vm201_vm7, %v203_v60, %v199_v56  ;;  %v241_v63 = vadd.f32 %v5417_v0, %v240_v1  ;;  %v5523_v14 = vld [vmem:[%s10061_s1 + $0x170] sm:$0xff]  ;;  %v5530_v56 = vld [vmem:[%s10061_s1 + $0x140] sm:$0xff]  ;;  %v10701_v1 = vld [vmem:[#allocation3_spill] sm:$0xff] }
  0xc7   :  { %v221_v17 = vsel %vm220_vm9, %v3387_v55, %v217_v22  ;;  %v253_v25 = vmul.f32 %v3391_v34, %v204_v30  ;;  %v5481_v55 = vld [vmem:[%s10061_s1 + $0x1d0] sm:$0xff]  ;;  %v10697_v30 = vld [vmem:[#allocation39_spill] sm:$0xff] }
  0xc8   :  { %v226_v51 = vsel %vm223_vm10, %v225_v43, %v221_v17  ;;  %v245_v50 = vsel %vm244_vm13, %v5417_v0, %v241_v63  ;;  %v10691_v0 = vld [vmem:[#allocation33_spill] sm:$0xff]  ;;  %v10696_v60 = vld [vmem:[#allocation40_spill] sm:$0xff]  ;;  %v10698_v43 = vld [vmem:[#allocation2_spill] sm:$0xff] }
  0xc9   :  { %v252_v18 = vmul.f32 0.0, %v226_v51  ;;  %v250_v26 = vsel %vm247_vm14, %v249_v54, %v245_v50  ;;  %846 = vmatpush.msra.mxu3 %v10691_v0  ;;  %v5537_v22 = vld [vmem:[%s10061_s1 + $0x150] sm:$0xff]  ;;  %v10699_v17 = vld [vmem:[#allocation42_spill] sm:$0xff]  ;;  %v10700_v51 = vld [vmem:[#allocation41_spill] sm:$0xff] }
  0xca   :  { %v5546_v34 = vld [vmem:[%s10061_s1 + $0x130] sm:$0xff]  ;;  %v10703_v63 = vld [vmem:[#allocation43_spill] sm:$0xff]  ;;  %v10706_v54 = vld [vmem:[#allocation45_spill] sm:$0xff] }
  0xcb   :  { %v5434_v19 = vadd.f32 %v253_v25, %v252_v18  ;;  %847 = vmatpush.msra.mxu3 %v10693_v32  ;;  %v10702_v18 = vld [vmem:[#allocation44_spill] sm:$0xff]  ;;  %v10712_v0 = vld [vmem:[#allocation5_spill] sm:$0xff]  ;;  %v10714_v32 = vld [vmem:[#allocation10_spill] sm:$0xff] }
  0xcc   :  { %v5555_v25 = vld [vmem:[%s10061_s1 + $0x110] sm:$0xff] }
  0xcd   :  { %3392 = vtanh.f32 %v5434_v19  ;;  %v5564_v50 = vld [vmem:[%s10061_s1 + $0xf0] sm:$0xff] }
  0xd3   :  { %v3393_v11 = vpop.eup %3392 }
  0xd4   :  { %v5451_v52 = vmul.f32 %v3393_v11, %v250_v26  ;;  %v10708_v11 = vld [vmem:[#allocation48_spill] sm:$0xff] }
  0xd5   :  { %v5573_v26 = vld [vmem:[%s10061_s1 + $0xd0] sm:$0xff] }
  0xd6   :  { %401 = vmatmul.f32.vlgmr.msrb.gmra.mxu0 %v5451_v52  ;;  %441 = vmatmul.f32.vlgmr.msrb.gmra.mxu2 %v5451_v52 }
  0xd7   :  { %610 = vmatpush.msrb.mxu0 %v5460_v46  ;;  %646 = vmatmul.f32.vlgmr.msrb.gmra.mxu1 %v5451_v52 }
  0xd8   :  { %650 = vmatpush.msrb.mxu2 %v5467_v49  ;;  %686 = vmatmul.f32.vlgmr.msrb.gmra.mxu3 %v5451_v52 }
  0xd9   :  { %611 = vmatpush.msrb.mxu0 %v5474_v53  ;;  %872 = vmatpush.msrb.mxu1 %v10694_v13  ;;  %v10715_v13 = vld [vmem:[#allocation55_spill] sm:$0xff] }
  0xda   :  { %651 = vmatpush.msrb.mxu2 %v5481_v55  ;;  %912 = vmatpush.msrb.mxu3 %v10695_v27  ;;  %v10716_v27 = vld [vmem:[#allocation7_spill] sm:$0xff] }
  0xdb   :  { %612 = vmatpush.msrb.mxu0 %v5488_v59  ;;  %873 = vmatpush.msrb.mxu1 %v10696_v60  ;;  %v10717_v60 = vld [vmem:[#allocation56_spill] sm:$0xff] }
  0xdc   :  { %652 = vmatpush.msrb.mxu2 %v5495_v62  ;;  %913 = vmatpush.msrb.mxu3 %v10697_v30  ;;  %v10718_v30 = vld [vmem:[#allocation12_spill] sm:$0xff] }
  0xdd   :  { %613 = vmatpush.msrb.mxu0 %v5502_v7  ;;  %874 = vmatpush.msrb.mxu1 %v10699_v17  ;;  %v10720_v17 = vld [vmem:[#allocation9_spill] sm:$0xff] }
  0xde   :  { %653 = vmatpush.msrb.mxu2 %v5509_v3  ;;  %481 = vmatmul.f32.vlgmr.msra.gmra.mxu0 %v5451_v52 }
  0xdf   :  { %521 = vmatmul.f32.vlgmr.msra.gmra.mxu2 %v5451_v52  ;;  %614 = vmatpush.msrb.mxu0 %v5517_v21 }
  0xe0   :  { %654 = vmatpush.msrb.mxu2 %v5523_v14  ;;  %914 = vmatpush.msrb.mxu3 %v10700_v51  ;;  %v10721_v51 = vld [vmem:[#allocation60_spill] sm:$0xff] }
  0xe1   :  { %615 = vmatpush.msrb.mxu0 %v5530_v56  ;;  %875 = vmatpush.msrb.mxu1 %v10702_v18  ;;  %v10723_v18 = vld [vmem:[#allocation63_spill] sm:$0xff] }
  0xe2   :  { %655 = vmatpush.msrb.mxu2 %v5537_v22  ;;  %915 = vmatpush.msrb.mxu3 %v10703_v63  ;;  %v10724_v63 = vld [vmem:[#allocation11_spill] sm:$0xff] }
  0xe3   :  { %616 = vmatpush.msrb.mxu0 %v10698_v43  ;;  %876 = vmatpush.msrb.mxu1 %v10705_v58  ;;  %v10719_v43 = vld [vmem:[#allocation59_spill] sm:$0xff]  ;;  %v10726_v58 = vld [vmem:[#allocation16_spill] sm:$0xff] }
  0xe4   :  { %656 = vmatpush.msrb.mxu2 %v5546_v34  ;;  %916 = vmatpush.msrb.mxu3 %v10706_v54  ;;  %v10727_v54 = vld [vmem:[#allocation67_spill] sm:$0xff] }
  0xe5   :  { %617 = vmatpush.msrb.mxu0 %v10701_v1  ;;  %877 = vmatpush.msrb.mxu1 %v10708_v11  ;;  %v10722_v1 = vld [vmem:[#allocation14_spill] sm:$0xff]  ;;  %v10729_v11 = vld [vmem:[#allocation68_spill] sm:$0xff] }
  0xe6   :  { %657 = vmatpush.msrb.mxu2 %v5555_v25  ;;  %917 = vmatpush.msrb.mxu3 %v10709_v57  ;;  %v10730_v57 = vld [vmem:[#allocation17_spill] sm:$0xff] }
  0xe7   :  { %618 = vmatpush.msrb.mxu0 %v10704_v61  ;;  %878 = vmatpush.msrb.mxu1 %v10711_v24  ;;  %v10725_v61 = vld [vmem:[#allocation64_spill] sm:$0xff]  ;;  %v10732_v24 = vld [vmem:[#allocation15_spill] sm:$0xff] }
  0xe8   :  { %658 = vmatpush.msrb.mxu2 %v5564_v50  ;;  %918 = vmatpush.msrb.mxu3 %v10713_v4  ;;  %v10734_v4 = vld [vmem:[#allocation19_spill] sm:$0xff] }
  0xe9   :  { %619 = vmatpush.msrb.mxu0 %v10707_v9  ;;  %879 = vmatpush.msrb.mxu1 %v10715_v13  ;;  %v10728_v9 = vld [vmem:[#allocation13_spill] sm:$0xff]  ;;  %v10736_v13 = vld [vmem:[#allocation20_spill] sm:$0xff] }
  0xea   :  { %659 = vmatpush.msrb.mxu2 %v5573_v26  ;;  %919 = vmatpush.msrb.mxu3 %v10717_v60  ;;  %v10738_v60 = vld [vmem:[#allocation21_spill] sm:$0xff] }
  0xeb   :  { %620 = vmatpush.msrb.mxu0 %v10710_v2  ;;  %880 = vmatpush.msrb.mxu1 %v10719_v43  ;;  %v10731_v2 = vld [vmem:[#allocation71_spill] sm:$0xff]  ;;  %v10740_v43 = vld [vmem:[#allocation22_spill] sm:$0xff] }
  0xec   :  { %660 = vmatpush.msrb.mxu2 %v10712_v0  ;;  %920 = vmatpush.msrb.mxu3 %v10721_v51  ;;  %v10733_v0 = vld [vmem:[#allocation18_spill] sm:$0xff]  ;;  %v10742_v51 = vld [vmem:[#allocation23_spill] sm:$0xff] }
  0xed   :  { %621 = vmatpush.msrb.mxu0 %v10714_v32  ;;  %881 = vmatpush.msrb.mxu1 %v10723_v18  ;;  %v10735_v32 = vld [vmem:[#allocation72_spill] sm:$0xff]  ;;  %v10745_v18 = vld [vmem:[#allocation83_spill] sm:$0xff] }
  0xee   :  { %661 = vmatpush.msrb.mxu2 %v10716_v27  ;;  %921 = vmatpush.msrb.mxu3 %v10725_v61  ;;  %v10737_v27 = vld [vmem:[#allocation75_spill] sm:$0xff]  ;;  %v10747_v61 = vld [vmem:[#allocation84_spill] sm:$0xff] }
  0xef   :  { %622 = vmatpush.msrb.mxu0 %v10718_v30  ;;  %882 = vmatpush.msrb.mxu1 %v10727_v54  ;;  %v10739_v30 = vld [vmem:[#allocation76_spill] sm:$0xff]  ;;  %v10749_v54 = vld [vmem:[#allocation27_spill] sm:$0xff] }
  0xf0   :  { %662 = vmatpush.msrb.mxu2 %v10720_v17  ;;  %922 = vmatpush.msrb.mxu3 %v10729_v11  ;;  %v10741_v17 = vld [vmem:[#allocation79_spill] sm:$0xff]  ;;  %v10751_v11 = vld [vmem:[#allocation29_spill] sm:$0xff] }
  0xf1   :  { %623 = vmatpush.msrb.mxu0 %v10722_v1  ;;  %883 = vmatpush.msrb.mxu1 %v10731_v2  ;;  %v10744_v1 = vld [vmem:[#allocation24_spill] sm:$0xff]  ;;  %v10753_v2 = vld [vmem:[#allocation50_spill] sm:$0xff] }
  0xf2   :  { %663 = vmatpush.msrb.mxu2 %v10724_v63  ;;  %923 = vmatpush.msrb.mxu3 %v10735_v32  ;;  %v10746_v63 = vld [vmem:[#allocation25_spill] sm:$0xff]  ;;  %v10757_v32 = vld [vmem:[#allocation58_spill] sm:$0xff] }
  0xf3   :  { %624 = vmatpush.msrb.mxu0 %v10726_v58  ;;  %884 = vmatpush.msrb.mxu1 %v10737_v27  ;;  %v10748_v58 = vld [vmem:[#allocation26_spill] sm:$0xff] }
  0xf4   :  { %664 = vmatpush.msrb.mxu2 %v10728_v9  ;;  %924 = vmatpush.msrb.mxu3 %v10739_v30  ;;  %v10750_v9 = vld [vmem:[#allocation28_spill] sm:$0xff]  ;;  %v10761_v27 = vld [vmem:[#allocation66_spill] sm:$0xff] }
  0xf5   :  { %625 = vmatpush.msrb.mxu0 %v10730_v57  ;;  %885 = vmatpush.msrb.mxu1 %v10741_v17  ;;  %v10752_v57 = vld [vmem:[#allocation49_spill] sm:$0xff]  ;;  %v10763_v30 = vld [vmem:[#allocation70_spill] sm:$0xff] }
  0xf6   :  { %665 = vmatpush.msrb.mxu2 %v10732_v24  ;;  %626 = vmatmul.f32.vlgmr.msrb.gmra.mxu0 %v5451_v52  ;;  %v10754_v24 = vld [vmem:[#allocation53_spill] sm:$0xff]  ;;  %v10765_v17 = vld [vmem:[#allocation74_spill] sm:$0xff] }
  0xf7   :  { %666 = vmatmul.f32.vlgmr.msrb.gmra.mxu2 %v5451_v52  ;;  %772 = vmatpush.msra.mxu0 %v10733_v0  ;;  %v10743_v52 = vld [vmem:[#allocation80_spill] sm:$0xff]  ;;  %v10755_v0 = vld [vmem:[#allocation54_spill] sm:$0xff] }
  0xf8   :  { %812 = vmatpush.msra.mxu2 %v10734_v4  ;;  %925 = vmatpush.msrb.mxu3 %v10743_v52  ;;  %v10756_v4 = vld [vmem:[#allocation57_spill] sm:$0xff]  ;;  %v10767_v52 = vld [vmem:[#allocation78_spill] sm:$0xff] }
  0xf9   :  { %773 = vmatpush.msra.mxu0 %v10736_v13  ;;  %886 = vmatpush.msrb.mxu1 %v10745_v18  ;;  %v10759_v13 = vld [vmem:[#allocation62_spill] sm:$0xff] }
  0xfa   :  { %813 = vmatpush.msra.mxu2 %v10738_v60  ;;  %926 = vmatpush.msrb.mxu3 %v10747_v61  ;;  %v10762_v60 = vld [vmem:[#allocation69_spill] sm:$0xff]  ;;  %v10769_v18 = vld [vmem:[#allocation82_spill] sm:$0xff] }
  0xfb   :  { %774 = vmatpush.msra.mxu0 %v10740_v43  ;;  %887 = vmatpush.msrb.mxu1 %v5159_v45  ;;  %v10758_v45 = vld [vmem:[#allocation61_spill] sm:$0xff]  ;;  %v10771_v61 = vld [vmem:[#allocation86_spill] sm:$0xff] }
  0xfc   :  { %814 = vmatpush.msra.mxu2 %v10742_v51  ;;  %927 = vmatpush.msrb.mxu3 %v5166_v33  ;;  %v10760_v33 = vld [vmem:[#allocation65_spill] sm:$0xff] }
  0xfd   :  { %775 = vmatpush.msra.mxu0 %v10744_v1  ;;  %v10764_v43 = vld [vmem:[#allocation73_spill] sm:$0xff] }
  0xfe   :  { %815 = vmatpush.msra.mxu2 %v10746_v63  ;;  %v10766_v51 = vld [vmem:[#allocation77_spill] sm:$0xff] }
  0xff   :  { %776 = vmatpush.msra.mxu0 %v10748_v58  ;;  %v10768_v1 = vld [vmem:[#allocation81_spill] sm:$0xff]  ;;  %v10772_v58 = vld [vmem:[#allocation87_spill] sm:$0xff] }
 0x100   :  { %816 = vmatpush.msra.mxu2 %v10749_v54  ;;  %v10770_v63 = vld [vmem:[#allocation85_spill] sm:$0xff]  ;;  %v10773_v54 = vld [vmem:[#allocation88_spill] sm:$0xff] }
 0x101   :  { %777 = vmatpush.msra.mxu0 %v10750_v9  ;;  %v10774_v9 = vld [vmem:[#allocation89_spill] sm:$0xff] }
 0x102   :  { %817 = vmatpush.msra.mxu2 %v10751_v11  ;;  %v10775_v11 = vld [vmem:[#allocation90_spill] sm:$0xff] }
 0x103   :  { %778 = vmatpush.msra.mxu0 %v10752_v57  ;;  %v10776_v57 = vld [vmem:[#allocation91_spill] sm:$0xff] }
 0x104   :  { %818 = vmatpush.msra.mxu2 %v10753_v2  ;;  %v10777_v2 = vld [vmem:[#allocation92_spill] sm:$0xff] }
 0x105   :  { %779 = vmatpush.msra.mxu0 %v10754_v24  ;;  %v10778_v24 = vld [vmem:[#allocation93_spill] sm:$0xff] }
 0x106   :  { %819 = vmatpush.msra.mxu2 %v10755_v0  ;;  %v10779_v0 = vld [vmem:[#allocation94_spill] sm:$0xff] }
 0x107   :  { %780 = vmatpush.msra.mxu0 %v10756_v4 }
 0x108   :  { %820 = vmatpush.msra.mxu2 %v10757_v32 }
 0x109   :  { %781 = vmatpush.msra.mxu0 %v10758_v45 }
 0x10a   :  { %821 = vmatpush.msra.mxu2 %v10759_v13 }
 0x10b   :  { %782 = vmatpush.msra.mxu0 %v10760_v33 }
 0x10c   :  { %822 = vmatpush.msra.mxu2 %v10761_v27 }
 0x10d   :  { %783 = vmatpush.msra.mxu0 %v10762_v60 }
 0x10e   :  { %823 = vmatpush.msra.mxu2 %v10763_v30 }
 0x10f   :  { %784 = vmatpush.msra.mxu0 %v10764_v43 }
 0x110   :  { %824 = vmatpush.msra.mxu2 %v10765_v17 }
 0x111   :  { %785 = vmatpush.msra.mxu0 %v10766_v51 }
 0x112   :  { %825 = vmatpush.msra.mxu2 %v10767_v52 }
 0x113   :  { %786 = vmatpush.msra.mxu0 %v10768_v1 }
 0x114   :  { %826 = vmatpush.msra.mxu2 %v10769_v18 }
 0x115   :  { %787 = vmatpush.msra.mxu0 %v10770_v63 }
 0x116   :  { %827 = vmatpush.msra.mxu2 %v10771_v61 }
 0x117   :  { %852 = vmatpush.msrb.mxu0 %v10772_v58 }
 0x118   :  { %892 = vmatpush.msrb.mxu2 %v10773_v54 }
 0x119   :  { %853 = vmatpush.msrb.mxu0 %v5185_v41 }
 0x11a   :  { %893 = vmatpush.msrb.mxu2 %v5190_v38  ;;  %v17_v38 = vld [vmem:[%s10064_s3] sm:$0xf] }
 0x11b   :  { %854 = vmatpush.msrb.mxu0 %v5199_v37  ;;  %v10780_v37 = vld [vmem:[#allocation95_spill] sm:$0xff]  ;;  %v5678_v41 = vperm.slane %v17_v38, 0 }
 0x11c   :  { %894 = vmatpush.msrb.mxu2 %v10774_v9 }
 0x11d   :  { %855 = vmatpush.msrb.mxu0 %v10775_v11  ;;  %10781 = vst [vmem:[#allocation30_spill] sm:$0xff] %v5678_v41 }
 0x11e   :  { %895 = vmatpush.msrb.mxu2 %v10776_v57 }
 0x11f   :  { %856 = vmatpush.msrb.mxu0 %v10777_v2 }
 0x120   :  { %896 = vmatpush.msrb.mxu2 %v10778_v24 }
 0x121   :  { %857 = vmatpush.msrb.mxu0 %v5241_v6 }
 0x122   :  { %897 = vmatpush.msrb.mxu2 %v10779_v0 }
 0x123   :  { %858 = vmatpush.msrb.mxu0 %v5255_v8 }
 0x124   :  { %898 = vmatpush.msrb.mxu2 %v5260_v12  ;;  %v422_v12 = vpop.f32.mrf.mxu1 }
 0x125   :  { %859 = vmatpush.msrb.mxu0 %v5273_v10 }
 0x126   :  { %899 = vmatpush.msrb.mxu2 %v5278_v29  ;;  %v5681_v29 = vperm.slane %v17_v38, 1 }
 0x127   :  { %860 = vmatpush.msrb.mxu0 %v5289_v5 }
 0x128   :  { %900 = vmatpush.msrb.mxu2 %v5294_v16  ;;  %10782 = vst [vmem:[#allocation32_spill] sm:$0xff] %v5681_v29 }
 0x129   :  { %861 = vmatpush.msrb.mxu0 %v5305_v23 }
 0x12a   :  { %901 = vmatpush.msrb.mxu2 %v5310_v28  ;;  %v462_v28 = vpop.f32.mrf.mxu3 }
 0x12b   :  { %862 = vmatpush.msrb.mxu0 %v5322_v20 }
 0x12c   :  { %902 = vmatpush.msrb.mxu2 %v5327_v15  ;;  %v502_v30 = vpop.f32.mrf.mxu1 }
 0x12d   :  { %863 = vmatpush.msrb.mxu0 %v5336_v31 }
 0x12e   :  { %903 = vmatpush.msrb.mxu2 %v5341_v36  ;;  %v5684_v36 = vperm.slane %v17_v38, 3 }
 0x12f   :  { %864 = vmatpush.msrb.mxu0 %v5350_v35 }
 0x130   :  { %904 = vmatpush.msrb.mxu2 %v5355_v40  ;;  %10783 = vst [vmem:[#allocation31_spill] sm:$0xff] %v5684_v36 }
 0x131   :  { %865 = vmatpush.msrb.mxu0 %v5364_v39 }
 0x132   :  { %905 = vmatpush.msrb.mxu2 %v5369_v44  ;;  %v542_v44 = vpop.f32.mrf.mxu3 }
 0x133   :  { %866 = vmatpush.msrb.mxu0 %v5378_v42 }
 0x134   :  { %906 = vmatpush.msrb.mxu2 %v5383_v48  ;;  %v5687_v48 = vperm.slane %v17_v38, 2 }
 0x135   :  { %867 = vmatpush.msrb.mxu0 %v5392_v47 }
 0x136   :  { %907 = vmatpush.msrb.mxu2 %v10780_v37  ;;  %10784 = vst [vmem:[#allocation34_spill] sm:$0xff] %v5687_v48 }
 0x153   :  { %v402_v6 = vpop.f32.mrf.mxu0 }
 0x154   :  { %v403_v8 = vadd.f32 %v402_v6, %v5678_v41 }
 0x156   :  { %v423_v10 = vadd.f32 %v422_v12, %v403_v8  ;;  %v647_v8 = vpop.f32.mrf.mxu1 }
 0x158   :  { %v3325_v5 = vmul.f32 -1.442695, %v423_v10 }
 0x159   :  { %v442_v16 = vpop.f32.mrf.mxu2 }
 0x15a   :  { %3394 = vpow2.f32 %v3325_v5  ;;  %v443_v23 = vadd.f32 %v442_v16, %v5681_v29 }
 0x15b   :  { %v482_v32 = vpop.f32.mrf.mxu0  ;;  %v687_v12 = vpop.f32.mrf.mxu3 }
 0x15c   :  { %v463_v20 = vadd.f32 %v462_v28, %v443_v23  ;;  %v483_v27 = vadd.f32 %v482_v32, %v5687_v48 }
 0x15e   :  { %v3326_v15 = vmul.f32 -1.442695, %v463_v20  ;;  %v503_v43 = vadd.f32 %v502_v30, %v483_v27 }
 0x160   :  { %v3395_v31 = vpop.eup %3394  ;;  %3396 = vpow2.f32 %v3326_v15 }
 0x161   :  { %v548_v35 = vadd.f32 1.0, %v3395_v31 }
 0x162   :  { %v522_v40 = vpop.f32.mrf.mxu2 }
 0x163   :  { %3398 = vrcp.f32 %v548_v35  ;;  %v523_v39 = vadd.f32 %v522_v40, %v5684_v36  ;;  %v560_v63 = vand.u32 2147483648, %v548_v35  ;;  %vm554_vm3 = vweird.f32 %v548_v35 }
 0x164   :  { %v558_v54 = vand.u32 2147483647, %v548_v35  ;;  %v696_v40 = vrot.slane %v687_v12, 2 }
 0x165   :  { %v543_v47 = vadd.f32 %v542_v44, %v523_v39  ;;  %v561_v24 = vor.u32 1.1754944e-38, %v560_v63 }
 0x166   :  { %v3397_v42 = vpop.eup %3396  ;;  %vm559_vm7 = vcmp.eq.f32.partialorder %v558_v54, 8.507059e+37 }
 0x167   :  { %v567_v4 = vadd.f32 1.0, %v3397_v42  ;;  %v3327_v45 = vmul.f32 -1.442695, %v543_v47  ;;  %v3328_v47 = vld [vmem:[%s10063_s0 + $0x8] sm:$0xff] }
 0x169   :  { %v3399_v13 = vpop.eup %3398  ;;  %3400 = vrcp.f32 %v567_v4  ;;  %v579_v9 = vand.u32 2147483648, %v567_v4  ;;  %v577_v2 = vand.u32 2147483647, %v567_v4  ;;  %vm573_vm6 = vweird.f32 %v567_v4 }
 0x16a   :  { %v550_v33 = vmul.f32 %v3399_v13, %v548_v35  ;;  %3402 = vpow2.f32 %v3327_v45  ;;  %vm555_vm15 = vweird.f32 %v3399_v13  ;;  %v694_v35 = vrot.slane %v647_v8, 6  ;;  %v5740_v8 = vld [vmem:[%s10061_s1 + $0x1b8] sm:$0xff] }
 0x16b   :  { %3404 = vtanh.f32 %v503_v43  ;;  %vm556_vm4 = vmor %vm554_vm3, %vm555_vm15  ;;  %v580_v37 = vor.u32 1.1754944e-38, %v579_v9  ;;  %vm578_vm9 = vcmp.eq.f32.partialorder %v577_v2, 8.507059e+37 }
 0x16c   :  { %v551_v60 = vsub.f32 1.0, %v550_v33 }
 0x16e   :  { %v552_v17 = vmul.f32 %v3399_v13, %v551_v60 }
 0x16f   :  { %v3401_v51 = vpop.eup %3400 }
 0x170   :  { %v3403_v52 = vpop.eup %3402  ;;  %v569_v1 = vmul.f32 %v3401_v51, %v567_v4  ;;  %v553_v18 = vadd.f32 %v3399_v13, %v552_v17  ;;  %vm574_vm5 = vweird.f32 %v3401_v51 }
 0x171   :  { %v587_v61 = vadd.f32 1.0, %v3403_v52  ;;  %vm575_vm8 = vmor %vm573_vm6, %vm574_vm5  ;;  %v3405_v6 = vpop.eup %3404 }
 0x172   :  { %v570_v58 = vsub.f32 1.0, %v569_v1  ;;  %v557_v57 = vsel %vm556_vm4, %v3399_v13, %v553_v18 }
 0x173   :  { %3406 = vrcp.f32 %v587_v61  ;;  %v562_v38 = vsel %vm559_vm7, %v561_v24, %v557_v57  ;;  %v627_v15 = vpop.f32.mrf.mxu0  ;;  %v599_v45 = vand.u32 2147483648, %v587_v61  ;;  %v597_v60 = vand.u32 2147483647, %v587_v61  ;;  %v5721_v24 = vld [vmem:[%s10061_s1 + $0x1c8] sm:$0xff] }
 0x174   :  { %v571_v11 = vmul.f32 %v3401_v51, %v570_v58  ;;  %v604_v28 = vmul.f32 %v3405_v6, %v562_v38  ;;  %v697_v4 = vsel %vm179_vm0, %v627_v15, %v694_v35  ;;  %vm593_vm11 = vweird.f32 %v587_v61  ;;  %v5734_v6 = vld [vmem:[%s10061_s1 + $0x1a8] sm:$0xff] }
 0x175   :  { %v600_v1 = vor.u32 1.1754944e-38, %v599_v45  ;;  %vm598_vm13 = vcmp.eq.f32.partialorder %v597_v60, 8.507059e+37  ;;  %v5776_v15 = vld [vmem:[%s10061_s1 + $0x148] sm:$0xff] }
 0x176   :  { %v572_v0 = vadd.f32 %v3401_v51, %v571_v11  ;;  %v5713_v11 = vld [vmem:[%s10061_s1 + $0x1f8] sm:$0xff] }
 0x178   :  { %v576_v10 = vsel %vm575_vm8, %v3401_v51, %v572_v0  ;;  %v5727_v0 = vld [vmem:[%s10061_s1 + $0x1d8] sm:$0xff] }
 0x179   :  { %v3407_v5 = vpop.eup %3406  ;;  %v581_v16 = vsel %vm578_vm9, %v580_v37, %v576_v10 }
 0x17a   :  { %v603_v23 = vmul.f32 0.0, %v581_v16  ;;  %v589_v20 = vmul.f32 %v3407_v5, %v587_v61  ;;  %v667_v31 = vpop.f32.mrf.mxu2  ;;  %vm594_vm10 = vweird.f32 %v3407_v5  ;;  %v5707_v61 = vld [vmem:[%s10061_s1 + $0x1e8] sm:$0xff]  ;;  %v5756_v16 = vld [vmem:[%s10061_s1 + $0x198] sm:$0xff] }
 0x17b   :  { %v695_v39 = vrot.slane %v667_v31, 4  ;;  %vm595_vm12 = vmor %vm593_vm11, %vm594_vm10  ;;  %v5782_v31 = vld [vmem:[%s10061_s1 + $0x158] sm:$0xff] }
 0x17c   :  { %v5690_v44 = vadd.f32 %v604_v28, %v603_v23  ;;  %v590_v42 = vsub.f32 1.0, %v589_v20  ;;  %v5764_v23 = vld [vmem:[%s10061_s1 + $0x168] sm:$0xff]  ;;  %v5770_v28 = vld [vmem:[%s10061_s1 + $0x178] sm:$0xff] }
 0x17d   :  { %v698_v32 = vsel %vm181_vm1, %v695_v39, %v696_v40  ;;  %v5789_v40 = vld [vmem:[%s10061_s1 + $0x128] sm:$0xff]  ;;  %v5795_v39 = vld [vmem:[%s10061_s1 + $0x138] sm:$0xff] }
 0x17e   :  { %3408 = vtanh.f32 %v5690_v44  ;;  %v699_v13 = vsel %vm183_vm2, %v697_v4, %v698_v32  ;;  %v591_v33 = vmul.f32 %v3407_v5, %v590_v42 }
 0x17f   :  { %v5699_v27 = vadd.f32 %v3328_v47, %v699_v13  ;;  %v5805_v13 = vld [vmem:[%s10061_s1 + $0x108] sm:$0xff] }
 0x180   :  { %v592_v30 = vadd.f32 %v3407_v5, %v591_v33  ;;  %v5811_v33 = vld [vmem:[%s10061_s1 + $0x118] sm:$0xff] }
 0x181   :  { %v3329_v43 = vmul.f32 -1.442695, %v5699_v27  ;;  %v722_v17 = vrot.slane %v5699_v27, 2  ;;  %v746_v51 = vrot.slane %v5699_v27, 6  ;;  %v743_v4 = vrot.slane %v5699_v27, 4 }
 0x182   :  { %v596_v52 = vsel %vm595_vm12, %v3407_v5, %v592_v30  ;;  %v5750_v5 = vld [vmem:[%s10061_s1 + $0x188] sm:$0xff] }
 0x183   :  { %3410 = vpow2.f32 %v3329_v43  ;;  %v3330_v18 = vmul.f32 -1.442695, %v722_v17  ;;  %v3331_v63 = vmul.f32 -1.442695, %v746_v51  ;;  %v601_v54 = vsel %vm598_vm13, %v600_v1, %v596_v52  ;;  %v5821_v51 = vld [vmem:[%s10061_s1 + $0xe8] sm:$0xff]  ;;  %v5827_v52 = vld [vmem:[%s10061_s1 + $0xf8] sm:$0xff] }
 0x184   :  { %v3409_v58 = vpop.eup %3408 }
 0x185   :  { %3412 = vpow2.f32 %v3330_v18  ;;  %v607_v9 = vmul.f32 %v3409_v58, %v601_v54 }
 0x186   :  { %3414 = vpow2.f32 %v3331_v63  ;;  %v5888_v63 = vld [vmem:[%s10061_s1 + $0x78] sm:$0xff] }
 0x187   :  { %808 = vmatmul.f32.vlgmr.msra.gmra.mxu1 %v607_v9  ;;  %848 = vmatmul.f32.vlgmr.msra.gmra.mxu3 %v607_v9 }
 0x188   :  { %1017 = vmatpush.msra.mxu1 %v5707_v61  ;;  %1057 = vmatpush.msra.mxu3 %v5713_v11 }
 0x189   :  { %v3411_v57 = vpop.eup %3410 }
 0x18a   :  { %v5716_v2 = vadd.f32 1.0, %v3411_v57  ;;  %1018 = vmatpush.msra.mxu1 %v5721_v24  ;;  %1058 = vmatpush.msra.mxu3 %v5727_v0  ;;  %v5846_v57 = vld [vmem:[%s10061_s1 + $0xd8] sm:$0xff] }
 0x18b   :  { %v3413_v37 = vpop.eup %3412 }
 0x18c   :  { %v3415_v38 = vpop.eup %3414  ;;  %3416 = vrcp.f32 %v5716_v2  ;;  %1019 = vmatpush.msra.mxu1 %v5734_v6  ;;  %1059 = vmatpush.msra.mxu3 %v5740_v8  ;;  %v5743_v12 = vadd.f32 1.0, %v3413_v37  ;;  %v717_v27 = vand.u32 2147483648, %v5716_v2  ;;  %v715_v43 = vand.u32 2147483647, %v5716_v2 }
 0x18d   :  { %v5745_v10 = vadd.f32 1.0, %v3415_v38  ;;  %vm711_vm15 = vweird.f32 %v5716_v2 }
 0x18e   :  { %1020 = vmatpush.msra.mxu1 %v5750_v5  ;;  %1060 = vmatpush.msra.mxu3 %v5756_v16  ;;  %3418 = vrcp.f32 %v5743_v12  ;;  %v739_v18 = vand.u32 2147483648, %v5743_v12  ;;  %v737_v54 = vand.u32 2147483647, %v5743_v12  ;;  %v718_v37 = vor.u32 1.1754944e-38, %v717_v27  ;;  %v5874_v27 = vld [vmem:[%s10061_s1 + $0x98] sm:$0xff] }
 0x18f   :  { %888 = vmatmul.f32.vlgmr.msrb.gmra.mxu1 %v607_v9  ;;  %928 = vmatmul.f32.vlgmr.msrb.gmra.mxu3 %v607_v9  ;;  %3420 = vrcp.f32 %v5745_v10  ;;  %v5840_v9 = vld [vmem:[%s10061_s1 + $0xc8] sm:$0xff]  ;;  %vm716_vm5 = vcmp.eq.f32.partialorder %v715_v43, 8.507059e+37  ;;  %vm733_vm6 = vweird.f32 %v5743_v12  ;;  %vm757_vm10 = vweird.f32 %v5745_v10 }
 0x190   :  { %1021 = vmatpush.msra.mxu1 %v5764_v23  ;;  %1061 = vmatpush.msra.mxu3 %v5770_v28  ;;  %3422 = vtanh.f32 %v743_v4  ;;  %v5861_v4 = vld [vmem:[%s10061_s1 + $0xb8] sm:$0xff]  ;;  %vm738_vm8 = vcmp.eq.f32.partialorder %v737_v54, 8.507059e+37 }
 0x191   :  { %v5902_v54 = vld [vmem:[%s10061_s1 + $0x58] sm:$0xff] }
 0x192   :  { %v3417_v20 = vpop.eup %3416  ;;  %1022 = vmatpush.msra.mxu1 %v5776_v15  ;;  %1062 = vmatpush.msra.mxu3 %v5782_v31 }
 0x193   :  { %v707_v35 = vmul.f32 %v3417_v20, %v5716_v2  ;;  %vm712_vm14 = vweird.f32 %v3417_v20 }
 0x194   :  { %1023 = vmatpush.msra.mxu1 %v5789_v40  ;;  %1063 = vmatpush.msra.mxu3 %v5795_v39  ;;  %v3419_v42 = vpop.eup %3418  ;;  %vm5832_vm3 = vmor %vm711_vm15, %vm712_vm14 }
 0x195   :  { %v708_v47 = vsub.f32 1.0, %v707_v35  ;;  %v5799_v32 = vpop.eup %3420  ;;  %v729_v45 = vmul.f32 %v3419_v42, %v5743_v12  ;;  %vm734_vm4 = vweird.f32 %v3419_v42  ;;  %v5868_v12 = vld [vmem:[%s10061_s1 + $0x88] sm:$0xff] }
 0x196   :  { %1024 = vmatpush.msra.mxu1 %v5805_v13  ;;  %1064 = vmatpush.msra.mxu3 %v5811_v33  ;;  %v753_v30 = vmul.f32 %v5799_v32, %v5745_v10  ;;  %vm735_vm7 = vmor %vm733_vm6, %vm734_vm4  ;;  %vm758_vm9 = vweird.f32 %v5799_v32 }
 0x197   :  { %v709_v60 = vmul.f32 %v3417_v20, %v708_v47  ;;  %v730_v17 = vsub.f32 1.0, %v729_v45  ;;  %v5855_v47 = vld [vmem:[%s10061_s1 + $0xa8] sm:$0xff]  ;;  %v740_v45 = vor.u32 1.1754944e-38, %v739_v18  ;;  %vm5923_vm11 = vmor %vm757_vm10, %vm758_vm9 }
 0x198   :  { %1025 = vmatpush.msra.mxu1 %v5821_v51  ;;  %1065 = vmatpush.msra.mxu3 %v5827_v52  ;;  %v754_v38 = vsub.f32 1.0, %v753_v30  ;;  %v3423_v30 = vpop.eup %3422  ;;  %v5882_v18 = vld [vmem:[%s10061_s1 + $0x68] sm:$0xff] }
 0x199   :  { %v710_v1 = vadd.f32 %v3417_v20, %v709_v60  ;;  %v731_v58 = vmul.f32 %v3419_v42, %v730_v17 }
 0x19a   :  { %1026 = vmatpush.msra.mxu1 %v5840_v9  ;;  %1066 = vmatpush.msra.mxu3 %v5846_v57  ;;  %v755_v17 = vmul.f32 %v5799_v32, %v754_v38  ;;  %v5912_v38 = vld [vmem:[%s10061_s1 + $0x28] sm:$0xff] }
 0x19b   :  { %v714_v2 = vsel %vm5832_vm3, %v3417_v20, %v710_v1  ;;  %v732_v35 = vadd.f32 %v3419_v42, %v731_v58 }
 0x19c   :  { %1027 = vmatpush.msra.mxu1 %v5855_v47  ;;  %1067 = vmatpush.msra.mxu3 %v5861_v4  ;;  %v719_v20 = vsel %vm716_vm5, %v718_v37, %v714_v2  ;;  %v756_v2 = vadd.f32 %v5799_v32, %v755_v17  ;;  %v763_v37 = vand.u32 2147483648, %v5745_v10  ;;  %v5951_v17 = vld [vmem:[%s10062_s2 + $0x3e8] sm:$0xff] }
 0x19d   :  { %v736_v60 = vsel %vm735_vm7, %v3419_v42, %v732_v35  ;;  %v768_v1 = vmul.f32 %v3423_v30, %v719_v20  ;;  %v5918_v35 = vld [vmem:[%s10061_s1 + $0x38] sm:$0xff]  ;;  %v761_v20 = vand.u32 2147483647, %v5745_v10 }
 0x19e   :  { %1028 = vmatpush.msra.mxu1 %v5868_v12  ;;  %1068 = vmatpush.msra.mxu3 %v5874_v27  ;;  %v741_v43 = vsel %vm738_vm8, %v740_v45, %v736_v60  ;;  %v5930_v60 = vld [vmem:[%s10061_s1 + $0x8] sm:$0xff]  ;;  %v5936_v30 = vld [vmem:[%s10061_s1 + $0x18] sm:$0xff]  ;;  %v760_v10 = vsel %vm5923_vm11, %v5799_v32, %v756_v2  ;;  %v5957_v32 = vld [vmem:[%s10062_s2 + $0x3c0] sm:$0xff] }
 0x19f   :  { %v767_v42 = vmul.f32 %v741_v43, %v5434_v19  ;;  %v5896_v19 = vld [vmem:[%s10061_s1 + $0x48] sm:$0xff]  ;;  %v5945_v43 = vld [vmem:[%s10062_s2 + $0x3e0] sm:$0xff]  ;;  %vm762_vm12 = vcmp.eq.f32.partialorder %v761_v20, 8.507059e+37 }
 0x1a0   :  { %1029 = vmatpush.msra.mxu1 %v5882_v18  ;;  %1069 = vmatpush.msra.mxu3 %v5888_v63  ;;  %10789 = vst [vmem:[#allocation33_spill] sm:$0xff] %v5945_v43  ;;  %v5977_v20 = vld [vmem:[%s10062_s2 + $0x3a8] sm:$0xff] }
 0x1a1   :  { %v5891_v58 = vadd.f32 %v768_v1, %v767_v42  ;;  %v764_v42 = vor.u32 1.1754944e-38, %v763_v37  ;;  %v5963_v1 = vld [vmem:[%s10062_s2 + $0x3c8] sm:$0xff]  ;;  %v5971_v37 = vld [vmem:[%s10062_s2 + $0x3a0] sm:$0xff] }
 0x1a2   :  { %1030 = vmatpush.msra.mxu1 %v5896_v19  ;;  %1070 = vmatpush.msra.mxu3 %v5902_v54 }
 0x1a3   :  { %3424 = vtanh.f32 %v5891_v58  ;;  %v765_v45 = vsel %vm762_vm12, %v764_v42, %v760_v10  ;;  %v5990_v10 = vld [vmem:[%s10062_s2 + $0x380] sm:$0xff] }
 0x1a4   :  { %1031 = vmatpush.msra.mxu1 %v5912_v38  ;;  %1071 = vmatpush.msra.mxu3 %v5918_v35  ;;  %v6087_v42 = vld [vmem:[%s10061_s1 + $0xe0] sm:$0xff] }
 0x1a5   :  { %10803 = vst [vmem:[#allocation46_spill] sm:$0xff] %v6087_v42 }
 0x1a6   :  { %1032 = vmatpush.msra.mxu1 %v5930_v60  ;;  %1072 = vmatpush.msra.mxu3 %v5936_v30 }
 0x1a8   :  { %1179 = vmatpush.msrb.mxu1 %v5945_v43  ;;  %1219 = vmatpush.msrb.mxu3 %v5951_v17 }
 0x1a9   :  { %v3425_v2 = vpop.eup %3424 }
 0x1aa   :  { %1180 = vmatpush.msrb.mxu1 %v5957_v32  ;;  %1220 = vmatpush.msrb.mxu3 %v5963_v1  ;;  %v5966_v43 = vmul.f32 %v3425_v2, %v765_v45  ;;  %v6093_v2 = vld [vmem:[%s10062_s2 + $0x2c0] sm:$0xff] }
 0x1ab   :  { %10804 = vst [vmem:[#allocation45_spill] sm:$0xff] %v6093_v2  ;;  %v6106_v45 = vld [vmem:[%s10061_s1 + $0xc0] sm:$0xff] }
 0x1ac   :  { %1181 = vmatpush.msrb.mxu1 %v5971_v37  ;;  %1221 = vmatpush.msrb.mxu3 %v5977_v20  ;;  %10806 = vst [vmem:[#allocation48_spill] sm:$0xff] %v6106_v45 }
 0x1ad   :  { %788 = vmatmul.f32.vlgmr.msra.gmra.mxu0 %v5966_v43  ;;  %828 = vmatmul.f32.vlgmr.msra.gmra.mxu2 %v5966_v43 }
 0x1ae   :  { %997 = vmatpush.msra.mxu0 %v5460_v46  ;;  %1033 = vmatmul.f32.vlgmr.msra.gmra.mxu1 %v5966_v43  ;;  %v5997_v46 = vld [vmem:[%s10062_s2 + $0x388] sm:$0xff] }
 0x1af   :  { %1037 = vmatpush.msra.mxu2 %v5467_v49  ;;  %1073 = vmatmul.f32.vlgmr.msra.gmra.mxu3 %v5966_v43  ;;  %10790 = vst [vmem:[#allocation37_spill] sm:$0xff] %v5997_v46  ;;  %v6004_v49 = vld [vmem:[%s10062_s2 + $0x360] sm:$0xff] }
 0x1b0   :  { %998 = vmatpush.msra.mxu0 %v5474_v53  ;;  %1182 = vmatpush.msrb.mxu1 %v5990_v10  ;;  %10791 = vst [vmem:[#allocation35_spill] sm:$0xff] %v6004_v49  ;;  %v6011_v53 = vld [vmem:[%s10062_s2 + $0x368] sm:$0xff] }
 0x1b1   :  { %1038 = vmatpush.msra.mxu2 %v5481_v55  ;;  %1222 = vmatpush.msrb.mxu3 %v5997_v46  ;;  %10792 = vst [vmem:[#allocation38_spill] sm:$0xff] %v6011_v53  ;;  %v6018_v55 = vld [vmem:[%s10062_s2 + $0x340] sm:$0xff] }
 0x1b2   :  { %999 = vmatpush.msra.mxu0 %v5488_v59  ;;  %1183 = vmatpush.msrb.mxu1 %v6004_v49  ;;  %10793 = vst [vmem:[#allocation36_spill] sm:$0xff] %v6018_v55  ;;  %v6029_v59 = vld [vmem:[%s10062_s2 + $0x348] sm:$0xff] }
 0x1b3   :  { %1039 = vmatpush.msra.mxu2 %v5495_v62  ;;  %1223 = vmatpush.msrb.mxu3 %v6011_v53  ;;  %10794 = vst [vmem:[#allocation40_spill] sm:$0xff] %v6029_v59  ;;  %v6036_v62 = vld [vmem:[%s10062_s2 + $0x320] sm:$0xff] }
 0x1b4   :  { %1000 = vmatpush.msra.mxu0 %v5502_v7  ;;  %1184 = vmatpush.msrb.mxu1 %v6018_v55  ;;  %10795 = vst [vmem:[#allocation39_spill] sm:$0xff] %v6036_v62  ;;  %v6043_v7 = vld [vmem:[%s10062_s2 + $0x328] sm:$0xff] }
 0x1b5   :  { %1040 = vmatpush.msra.mxu2 %v5509_v3  ;;  %868 = vmatmul.f32.vlgmr.msrb.gmra.mxu0 %v5966_v43  ;;  %10796 = vst [vmem:[#allocation2_spill] sm:$0xff] %v6043_v7  ;;  %v6049_v3 = vld [vmem:[%s10061_s1 + $0x120] sm:$0xff] }
 0x1b6   :  { %908 = vmatmul.f32.vlgmr.msrb.gmra.mxu2 %v5966_v43  ;;  %1001 = vmatpush.msra.mxu0 %v5517_v21  ;;  %10797 = vst [vmem:[#allocation42_spill] sm:$0xff] %v6049_v3  ;;  %v6055_v21 = vld [vmem:[%s10062_s2 + $0x300] sm:$0xff] }
 0x1b7   :  { %1041 = vmatpush.msra.mxu2 %v5523_v14  ;;  %1224 = vmatpush.msrb.mxu3 %v6029_v59  ;;  %10798 = vst [vmem:[#allocation41_spill] sm:$0xff] %v6055_v21  ;;  %v6062_v14 = vld [vmem:[%s10062_s2 + $0x308] sm:$0xff] }
 0x1b8   :  { %1002 = vmatpush.msra.mxu0 %v5530_v56  ;;  %1185 = vmatpush.msrb.mxu1 %v6036_v62  ;;  %10799 = vst [vmem:[#allocation3_spill] sm:$0xff] %v6062_v14  ;;  %v6068_v56 = vld [vmem:[%s10061_s1 + $0x100] sm:$0xff] }
 0x1b9   :  { %1042 = vmatpush.msra.mxu2 %v5537_v22  ;;  %1225 = vmatpush.msrb.mxu3 %v6043_v7  ;;  %10800 = vst [vmem:[#allocation44_spill] sm:$0xff] %v6068_v56  ;;  %v6074_v22 = vld [vmem:[%s10062_s2 + $0x2e0] sm:$0xff] }
 0x1ba   :  { %1003 = vmatpush.msra.mxu0 %v6049_v3  ;;  %1186 = vmatpush.msrb.mxu1 %v6055_v21  ;;  %10801 = vst [vmem:[#allocation43_spill] sm:$0xff] %v6074_v22 }
 0x1bb   :  { %1043 = vmatpush.msra.mxu2 %v5546_v34  ;;  %1226 = vmatpush.msrb.mxu3 %v6062_v14  ;;  %v6081_v34 = vld [vmem:[%s10062_s2 + $0x2e8] sm:$0xff] }
 0x1bc   :  { %1004 = vmatpush.msra.mxu0 %v6068_v56  ;;  %1187 = vmatpush.msrb.mxu1 %v6074_v22  ;;  %10802 = vst [vmem:[#allocation4_spill] sm:$0xff] %v6081_v34 }
 0x1bd   :  { %1044 = vmatpush.msra.mxu2 %v5555_v25  ;;  %1227 = vmatpush.msrb.mxu3 %v6081_v34  ;;  %v6100_v25 = vld [vmem:[%s10062_s2 + $0x2c8] sm:$0xff] }
 0x1be   :  { %1005 = vmatpush.msra.mxu0 %v6087_v42  ;;  %1188 = vmatpush.msrb.mxu1 %v6093_v2  ;;  %10805 = vst [vmem:[#allocation6_spill] sm:$0xff] %v6100_v25  ;;  %v6112_v2 = vld [vmem:[%s10062_s2 + $0x2a0] sm:$0xff] }
 0x1bf   :  { %1045 = vmatpush.msra.mxu2 %v5564_v50  ;;  %1228 = vmatpush.msrb.mxu3 %v6100_v25  ;;  %10807 = vst [vmem:[#allocation47_spill] sm:$0xff] %v6112_v2  ;;  %v6119_v50 = vld [vmem:[%s10062_s2 + $0x2a8] sm:$0xff] }
 0x1c0   :  { %1006 = vmatpush.msra.mxu0 %v6106_v45  ;;  %1189 = vmatpush.msrb.mxu1 %v6112_v2  ;;  %10808 = vst [vmem:[#allocation8_spill] sm:$0xff] %v6119_v50  ;;  %v6125_v45 = vld [vmem:[%s10061_s1 + $0xa0] sm:$0xff] }
 0x1c1   :  { %1046 = vmatpush.msra.mxu2 %v5573_v26  ;;  %1229 = vmatpush.msrb.mxu3 %v6119_v50  ;;  %10809 = vst [vmem:[#allocation51_spill] sm:$0xff] %v6125_v45  ;;  %v6131_v2 = vld [vmem:[%s10062_s2 + $0x280] sm:$0xff]  ;;  %v6137_v26 = vld [vmem:[%s10061_s1 + $0xb0] sm:$0xff]  ;;  %v6143_v50 = vld [vmem:[%s10062_s2 + $0x288] sm:$0xff] }
 0x1c2   :  { %1007 = vmatpush.msra.mxu0 %v6125_v45  ;;  %10810 = vst [vmem:[#allocation5_spill] sm:$0xff] %v6131_v2  ;;  %1190 = vmatpush.msrb.mxu1 %v6131_v2  ;;  %v6149_v45 = vld [vmem:[%s10061_s1 + $0x80] sm:$0xff] }
 0x1c3   :  { %10811 = vst [vmem:[#allocation52_spill] sm:$0xff] %v6137_v26  ;;  %1047 = vmatpush.msra.mxu2 %v6137_v26  ;;  %1230 = vmatpush.msrb.mxu3 %v6143_v50  ;;  %v6155_v2 = vld [vmem:[%s10062_s2 + $0x260] sm:$0xff]  ;;  %v6161_v26 = vld [vmem:[%s10061_s1 + $0x90] sm:$0xff] }
 0x1c4   :  { %10812 = vst [vmem:[#allocation10_spill] sm:$0xff] %v6143_v50  ;;  %1008 = vmatpush.msra.mxu0 %v6149_v45  ;;  %1191 = vmatpush.msrb.mxu1 %v6155_v2  ;;  %v6167_v50 = vld [vmem:[%s10062_s2 + $0x268] sm:$0xff] }
 0x1c5   :  { %10813 = vst [vmem:[#allocation55_spill] sm:$0xff] %v6149_v45  ;;  %1048 = vmatpush.msra.mxu2 %v6161_v26  ;;  %1231 = vmatpush.msrb.mxu3 %v6167_v50  ;;  %v6173_v45 = vld [vmem:[%s10061_s1 + $0x60] sm:$0xff] }
 0x1c6   :  { %10814 = vst [vmem:[#allocation7_spill] sm:$0xff] %v6155_v2  ;;  %1009 = vmatpush.msra.mxu0 %v6173_v45  ;;  %v6179_v2 = vld [vmem:[%s10062_s2 + $0x240] sm:$0xff] }
 0x1c7   :  { %10815 = vst [vmem:[#allocation56_spill] sm:$0xff] %v6161_v26  ;;  %1192 = vmatpush.msrb.mxu1 %v6179_v2  ;;  %v6185_v26 = vld [vmem:[%s10061_s1 + $0x70] sm:$0xff] }
 0x1c8   :  { %10816 = vst [vmem:[#allocation12_spill] sm:$0xff] %v6167_v50  ;;  %1049 = vmatpush.msra.mxu2 %v6185_v26  ;;  %v6191_v50 = vld [vmem:[%s10062_s2 + $0x248] sm:$0xff] }
 0x1c9   :  { %10817 = vst [vmem:[#allocation59_spill] sm:$0xff] %v6173_v45  ;;  %1232 = vmatpush.msrb.mxu3 %v6191_v50  ;;  %v6197_v45 = vld [vmem:[%s10061_s1 + $0x40] sm:$0xff] }
 0x1ca   :  { %10818 = vst [vmem:[#allocation9_spill] sm:$0xff] %v6179_v2  ;;  %1010 = vmatpush.msra.mxu0 %v6197_v45  ;;  %v6203_v2 = vld [vmem:[%s10062_s2 + $0x220] sm:$0xff] }
 0x1cb   :  { %10819 = vst [vmem:[#allocation60_spill] sm:$0xff] %v6185_v26  ;;  %1193 = vmatpush.msrb.mxu1 %v6203_v2  ;;  %v6209_v26 = vld [vmem:[%s10061_s1 + $0x50] sm:$0xff] }
 0x1cc   :  { %10820 = vst [vmem:[#allocation14_spill] sm:$0xff] %v6191_v50  ;;  %1050 = vmatpush.msra.mxu2 %v6209_v26  ;;  %v6215_v50 = vld [vmem:[%s10062_s2 + $0x228] sm:$0xff] }
 0x1cd   :  { %10821 = vst [vmem:[#allocation63_spill] sm:$0xff] %v6197_v45  ;;  %1233 = vmatpush.msrb.mxu3 %v6215_v50  ;;  %v6221_v45 = vld [vmem:[%s10061_s1 + $0x20] sm:$0xff] }
 0x1ce   :  { %10822 = vst [vmem:[#allocation11_spill] sm:$0xff] %v6203_v2  ;;  %1011 = vmatpush.msra.mxu0 %v6221_v45  ;;  %v6227_v2 = vld [vmem:[%s10062_s2 + $0x200] sm:$0xff] }
 0x1cf   :  { %10823 = vst [vmem:[#allocation64_spill] sm:$0xff] %v6209_v26  ;;  %1194 = vmatpush.msrb.mxu1 %v6227_v2  ;;  %v6233_v26 = vld [vmem:[%s10061_s1 + $0x30] sm:$0xff] }
 0x1d0   :  { %10824 = vst [vmem:[#allocation16_spill] sm:$0xff] %v6215_v50  ;;  %1051 = vmatpush.msra.mxu2 %v6233_v26  ;;  %v6239_v50 = vld [vmem:[%s10062_s2 + $0x208] sm:$0xff] }
 0x1d1   :  { %10825 = vst [vmem:[#allocation67_spill] sm:$0xff] %v6221_v45  ;;  %1234 = vmatpush.msrb.mxu3 %v6239_v50  ;;  %v6245_v45 = vld [vmem:[%s10061_s1] sm:$0xff] }
 0x1d2   :  { %10826 = vst [vmem:[#allocation13_spill] sm:$0xff] %v6227_v2  ;;  %1012 = vmatpush.msra.mxu0 %v6245_v45  ;;  %v6251_v2 = vld [vmem:[%s10062_s2 + $0x3f0] sm:$0xff] }
 0x1d3   :  { %10827 = vst [vmem:[#allocation68_spill] sm:$0xff] %v6233_v26  ;;  %1259 = vmatpush.msra.mxu1 %v6251_v2  ;;  %v6257_v26 = vld [vmem:[%s10061_s1 + $0x10] sm:$0xff]  ;;  %1013 = vmatmul.f32.vlgmr.msra.gmra.mxu0 %v5966_v43 }
 0x1d4   :  { %10828 = vst [vmem:[#allocation17_spill] sm:$0xff] %v6239_v50  ;;  %1052 = vmatpush.msra.mxu2 %v6257_v26 }
 0x1d5   :  { %10829 = vst [vmem:[#allocation71_spill] sm:$0xff] %v6245_v45  ;;  %1053 = vmatmul.f32.vlgmr.msra.gmra.mxu2 %v5966_v43  ;;  %v6265_v45 = vld [vmem:[%s10062_s2 + $0x1e0] sm:$0xff] }
 0x1d6   :  { %10830 = vst [vmem:[#allocation15_spill] sm:$0xff] %v6251_v2  ;;  %1159 = vmatpush.msrb.mxu0 %v6265_v45  ;;  %v6271_v2 = vld [vmem:[%s10062_s2 + $0x1e8] sm:$0xff]  ;;  %v6283_v43 = vld [vmem:[%s10062_s2 + $0x1c0] sm:$0xff] }
 0x1d7   :  { %10831 = vst [vmem:[#allocation18_spill] sm:$0xff] %v6257_v26  ;;  %1199 = vmatpush.msrb.mxu2 %v6271_v2  ;;  %v6277_v26 = vld [vmem:[%s10062_s2 + $0x3f8] sm:$0xff] }
 0x1d8   :  { %10832 = vst [vmem:[#allocation19_spill] sm:$0xff] %v6265_v45  ;;  %1299 = vmatpush.msra.mxu3 %v6277_v26  ;;  %1160 = vmatpush.msrb.mxu0 %v6283_v43  ;;  %v6289_v45 = vld [vmem:[%s10062_s2 + $0x3d0] sm:$0xff] }
 0x1d9   :  { %10833 = vst [vmem:[#allocation72_spill] sm:$0xff] %v6271_v2  ;;  %1260 = vmatpush.msra.mxu1 %v6289_v45  ;;  %v6295_v2 = vld [vmem:[%s10062_s2 + $0x1c8] sm:$0xff] }
 0x1da   :  { %10834 = vst [vmem:[#allocation20_spill] sm:$0xff] %v6277_v26  ;;  %1200 = vmatpush.msrb.mxu2 %v6295_v2  ;;  %v6301_v26 = vld [vmem:[%s10062_s2 + $0x3d8] sm:$0xff] }
 0x1db   :  { %10835 = vst [vmem:[#allocation75_spill] sm:$0xff] %v6283_v43  ;;  %1300 = vmatpush.msra.mxu3 %v6301_v26  ;;  %v6307_v43 = vld [vmem:[%s10062_s2 + $0x1a0] sm:$0xff] }
 0x1dc   :  { %10836 = vst [vmem:[#allocation21_spill] sm:$0xff] %v6289_v45  ;;  %1161 = vmatpush.msrb.mxu0 %v6307_v43  ;;  %v6313_v45 = vld [vmem:[%s10062_s2 + $0x3b0] sm:$0xff] }
 0x1dd   :  { %10837 = vst [vmem:[#allocation76_spill] sm:$0xff] %v6295_v2  ;;  %1261 = vmatpush.msra.mxu1 %v6313_v45  ;;  %v6319_v2 = vld [vmem:[%s10062_s2 + $0x1a8] sm:$0xff] }
 0x1de   :  { %10838 = vst [vmem:[#allocation22_spill] sm:$0xff] %v6301_v26  ;;  %1201 = vmatpush.msrb.mxu2 %v6319_v2  ;;  %v6325_v26 = vld [vmem:[%s10062_s2 + $0x3b8] sm:$0xff] }
 0x1df   :  { %10839 = vst [vmem:[#allocation79_spill] sm:$0xff] %v6307_v43  ;;  %1301 = vmatpush.msra.mxu3 %v6325_v26  ;;  %v6331_v43 = vld [vmem:[%s10062_s2 + $0x180] sm:$0xff] }
 0x1e0   :  { %10840 = vst [vmem:[#allocation23_spill] sm:$0xff] %v6313_v45  ;;  %1162 = vmatpush.msrb.mxu0 %v6331_v43  ;;  %v6337_v45 = vld [vmem:[%s10062_s2 + $0x390] sm:$0xff] }
 0x1e1   :  { %10841 = vst [vmem:[#allocation80_spill] sm:$0xff] %v6319_v2  ;;  %1262 = vmatpush.msra.mxu1 %v6337_v45  ;;  %v6343_v2 = vld [vmem:[%s10062_s2 + $0x188] sm:$0xff] }
 0x1e2   :  { %10842 = vst [vmem:[#allocation24_spill] sm:$0xff] %v6325_v26  ;;  %1202 = vmatpush.msrb.mxu2 %v6343_v2  ;;  %v6349_v26 = vld [vmem:[%s10062_s2 + $0x398] sm:$0xff] }
 0x1e3   :  { %10843 = vst [vmem:[#allocation83_spill] sm:$0xff] %v6331_v43  ;;  %1302 = vmatpush.msra.mxu3 %v6349_v26  ;;  %v6355_v43 = vld [vmem:[%s10062_s2 + $0x160] sm:$0xff] }
 0x1e4   :  { %10844 = vst [vmem:[#allocation25_spill] sm:$0xff] %v6337_v45  ;;  %1163 = vmatpush.msrb.mxu0 %v6355_v43  ;;  %v6361_v45 = vld [vmem:[%s10062_s2 + $0x370] sm:$0xff] }
 0x1e5   :  { %10845 = vst [vmem:[#allocation84_spill] sm:$0xff] %v6343_v2  ;;  %1263 = vmatpush.msra.mxu1 %v6361_v45  ;;  %v6367_v2 = vld [vmem:[%s10062_s2 + $0x168] sm:$0xff] }
 0x1e6   :  { %10846 = vst [vmem:[#allocation26_spill] sm:$0xff] %v6349_v26  ;;  %1203 = vmatpush.msrb.mxu2 %v6367_v2  ;;  %v6373_v26 = vld [vmem:[%s10062_s2 + $0x378] sm:$0xff] }
 0x1e7   :  { %10847 = vst [vmem:[#allocation27_spill] sm:$0xff] %v6355_v43  ;;  %1303 = vmatpush.msra.mxu3 %v6373_v26  ;;  %v6379_v43 = vld [vmem:[%s10062_s2 + $0x140] sm:$0xff] }
 0x1e8   :  { %10848 = vst [vmem:[#allocation28_spill] sm:$0xff] %v6361_v45  ;;  %1164 = vmatpush.msrb.mxu0 %v6379_v43  ;;  %v6385_v45 = vld [vmem:[%s10062_s2 + $0x350] sm:$0xff] }
 0x1e9   :  { %10849 = vst [vmem:[#allocation29_spill] sm:$0xff] %v6367_v2  ;;  %1264 = vmatpush.msra.mxu1 %v6385_v45  ;;  %v6391_v2 = vld [vmem:[%s10062_s2 + $0x148] sm:$0xff] }
 0x1ea   :  { %10850 = vst [vmem:[#allocation49_spill] sm:$0xff] %v6373_v26  ;;  %1204 = vmatpush.msrb.mxu2 %v6391_v2  ;;  %v6397_v26 = vld [vmem:[%s10062_s2 + $0x358] sm:$0xff] }
 0x1eb   :  { %10851 = vst [vmem:[#allocation50_spill] sm:$0xff] %v6379_v43  ;;  %1304 = vmatpush.msra.mxu3 %v6397_v26  ;;  %v6403_v43 = vld [vmem:[%s10062_s2 + $0x120] sm:$0xff] }
 0x1ec   :  { %10852 = vst [vmem:[#allocation53_spill] sm:$0xff] %v6385_v45  ;;  %1165 = vmatpush.msrb.mxu0 %v6403_v43  ;;  %v6409_v45 = vld [vmem:[%s10062_s2 + $0x330] sm:$0xff] }
 0x1ed   :  { %10853 = vst [vmem:[#allocation54_spill] sm:$0xff] %v6391_v2  ;;  %1265 = vmatpush.msra.mxu1 %v6409_v45  ;;  %v6415_v2 = vld [vmem:[%s10062_s2 + $0x128] sm:$0xff] }
 0x1ee   :  { %10854 = vst [vmem:[#allocation57_spill] sm:$0xff] %v6397_v26  ;;  %1205 = vmatpush.msrb.mxu2 %v6415_v2  ;;  %v6421_v26 = vld [vmem:[%s10062_s2 + $0x338] sm:$0xff] }
 0x1ef   :  { %10855 = vst [vmem:[#allocation58_spill] sm:$0xff] %v6403_v43  ;;  %1305 = vmatpush.msra.mxu3 %v6421_v26  ;;  %v6427_v43 = vld [vmem:[%s10062_s2 + $0x100] sm:$0xff] }
 0x1f0   :  { %10856 = vst [vmem:[#allocation61_spill] sm:$0xff] %v6409_v45  ;;  %1166 = vmatpush.msrb.mxu0 %v6427_v43  ;;  %v6433_v45 = vld [vmem:[%s10062_s2 + $0x310] sm:$0xff] }
 0x1f1   :  { %10857 = vst [vmem:[#allocation62_spill] sm:$0xff] %v6415_v2  ;;  %1266 = vmatpush.msra.mxu1 %v6433_v45  ;;  %v6439_v2 = vld [vmem:[%s10062_s2 + $0x108] sm:$0xff] }
 0x1f2   :  { %10858 = vst [vmem:[#allocation65_spill] sm:$0xff] %v6421_v26  ;;  %1206 = vmatpush.msrb.mxu2 %v6439_v2  ;;  %v6445_v26 = vld [vmem:[%s10062_s2 + $0x318] sm:$0xff] }
 0x1f3   :  { %10859 = vst [vmem:[#allocation66_spill] sm:$0xff] %v6427_v43  ;;  %1306 = vmatpush.msra.mxu3 %v6445_v26  ;;  %v6451_v43 = vld [vmem:[%s10062_s2 + $0xe0] sm:$0xff] }
 0x1f4   :  { %10860 = vst [vmem:[#allocation69_spill] sm:$0xff] %v6433_v45  ;;  %1167 = vmatpush.msrb.mxu0 %v6451_v43  ;;  %v6457_v45 = vld [vmem:[%s10062_s2 + $0x2f0] sm:$0xff] }
 0x1f5   :  { %10861 = vst [vmem:[#allocation70_spill] sm:$0xff] %v6439_v2  ;;  %1267 = vmatpush.msra.mxu1 %v6457_v45  ;;  %v6463_v2 = vld [vmem:[%s10062_s2 + $0xe8] sm:$0xff] }
 0x1f6   :  { %10862 = vst [vmem:[#allocation73_spill] sm:$0xff] %v6445_v26  ;;  %1207 = vmatpush.msrb.mxu2 %v6463_v2  ;;  %v6469_v26 = vld [vmem:[%s10062_s2 + $0x2f8] sm:$0xff] }
 0x1f7   :  { %10863 = vst [vmem:[#allocation74_spill] sm:$0xff] %v6451_v43  ;;  %1307 = vmatpush.msra.mxu3 %v6469_v26  ;;  %v6475_v43 = vld [vmem:[%s10062_s2 + $0xc0] sm:$0xff] }
 0x1f8   :  { %10864 = vst [vmem:[#allocation77_spill] sm:$0xff] %v6457_v45  ;;  %1168 = vmatpush.msrb.mxu0 %v6475_v43  ;;  %v6481_v45 = vld [vmem:[%s10062_s2 + $0x2d0] sm:$0xff] }
 0x1f9   :  { %10865 = vst [vmem:[#allocation78_spill] sm:$0xff] %v6463_v2  ;;  %1268 = vmatpush.msra.mxu1 %v6481_v45  ;;  %v6487_v2 = vld [vmem:[%s10062_s2 + $0xc8] sm:$0xff] }
 0x1fa   :  { %10866 = vst [vmem:[#allocation81_spill] sm:$0xff] %v6469_v26  ;;  %1208 = vmatpush.msrb.mxu2 %v6487_v2  ;;  %v6493_v26 = vld [vmem:[%s10062_s2 + $0x2d8] sm:$0xff] }
 0x1fb   :  { %10867 = vst [vmem:[#allocation82_spill] sm:$0xff] %v6475_v43  ;;  %1308 = vmatpush.msra.mxu3 %v6493_v26  ;;  %v6499_v43 = vld [vmem:[%s10062_s2 + $0xa0] sm:$0xff] }
 0x1fc   :  { %10868 = vst [vmem:[#allocation85_spill] sm:$0xff] %v6481_v45  ;;  %1169 = vmatpush.msrb.mxu0 %v6499_v43  ;;  %v6505_v45 = vld [vmem:[%s10062_s2 + $0x2b0] sm:$0xff] }
 0x1fd   :  { %10869 = vst [vmem:[#allocation86_spill] sm:$0xff] %v6487_v2  ;;  %1269 = vmatpush.msra.mxu1 %v6505_v45  ;;  %v6511_v2 = vld [vmem:[%s10062_s2 + $0xa8] sm:$0xff] }
 0x1fe   :  { %10870 = vst [vmem:[#allocation87_spill] sm:$0xff] %v6493_v26  ;;  %1209 = vmatpush.msrb.mxu2 %v6511_v2  ;;  %v6517_v26 = vld [vmem:[%s10062_s2 + $0x2b8] sm:$0xff] }
 0x1ff   :  { %10871 = vst [vmem:[#allocation88_spill] sm:$0xff] %v6499_v43  ;;  %1309 = vmatpush.msra.mxu3 %v6517_v26  ;;  %v6523_v43 = vld [vmem:[%s10062_s2 + $0x80] sm:$0xff] }
 0x200   :  { %10872 = vst [vmem:[#allocation89_spill] sm:$0xff] %v6505_v45  ;;  %1170 = vmatpush.msrb.mxu0 %v6523_v43  ;;  %v6529_v45 = vld [vmem:[%s10062_s2 + $0x290] sm:$0xff] }
 0x201   :  { %10873 = vst [vmem:[#allocation90_spill] sm:$0xff] %v6511_v2  ;;  %1270 = vmatpush.msra.mxu1 %v6529_v45  ;;  %v6535_v2 = vld [vmem:[%s10062_s2 + $0x88] sm:$0xff] }
 0x202   :  { %10874 = vst [vmem:[#allocation91_spill] sm:$0xff] %v6517_v26  ;;  %1210 = vmatpush.msrb.mxu2 %v6535_v2  ;;  %v6541_v26 = vld [vmem:[%s10062_s2 + $0x298] sm:$0xff] }
 0x203   :  { %10875 = vst [vmem:[#allocation92_spill] sm:$0xff] %v6523_v43  ;;  %1310 = vmatpush.msra.mxu3 %v6541_v26  ;;  %v6547_v43 = vld [vmem:[%s10062_s2 + $0x60] sm:$0xff] }
 0x204   :  { %10876 = vst [vmem:[#allocation93_spill] sm:$0xff] %v6529_v45  ;;  %1171 = vmatpush.msrb.mxu0 %v6547_v43  ;;  %v6553_v45 = vld [vmem:[%s10062_s2 + $0x270] sm:$0xff]  ;;  %v809_v25 = vpop.f32.mrf.mxu1 }
 0x205   :  { %10877 = vst [vmem:[#allocation94_spill] sm:$0xff] %v6535_v2  ;;  %1271 = vmatpush.msra.mxu1 %v6553_v45  ;;  %v6559_v2 = vld [vmem:[%s10062_s2 + $0x68] sm:$0xff] }
 0x206   :  { %10878 = vst [vmem:[#allocation95_spill] sm:$0xff] %v6541_v26  ;;  %1211 = vmatpush.msrb.mxu2 %v6559_v2  ;;  %v6565_v26 = vld [vmem:[%s10062_s2 + $0x278] sm:$0xff] }
 0x207   :  { %10879 = vst [vmem:[#allocation96_spill] sm:$0xff] %v6547_v43  ;;  %1311 = vmatpush.msra.mxu3 %v6565_v26  ;;  %v6571_v43 = vld [vmem:[%s10062_s2 + $0x40] sm:$0xff] }
 0x208   :  { %10880 = vst [vmem:[#allocation97_spill] sm:$0xff] %v6553_v45  ;;  %1172 = vmatpush.msrb.mxu0 %v6571_v43  ;;  %v6577_v45 = vld [vmem:[%s10062_s2 + $0x250] sm:$0xff] }
 0x209   :  { %10881 = vst [vmem:[#allocation98_spill] sm:$0xff] %v6559_v2  ;;  %1272 = vmatpush.msra.mxu1 %v6577_v45  ;;  %v6583_v2 = vld [vmem:[%s10062_s2 + $0x48] sm:$0xff] }
 0x20a   :  { %10882 = vst [vmem:[#allocation99_spill] sm:$0xff] %v6565_v26  ;;  %1212 = vmatpush.msrb.mxu2 %v6583_v2  ;;  %v6589_v26 = vld [vmem:[%s10062_s2 + $0x258] sm:$0xff]  ;;  %v849_v56 = vpop.f32.mrf.mxu3 }
 0x20b   :  { %10883 = vst [vmem:[#allocation100_spill] sm:$0xff] %v6571_v43  ;;  %1312 = vmatpush.msra.mxu3 %v6589_v26  ;;  %v6595_v43 = vld [vmem:[%s10062_s2 + $0x20] sm:$0xff] }
 0x20c   :  { %10884 = vst [vmem:[#allocation101_spill] sm:$0xff] %v6577_v45  ;;  %1173 = vmatpush.msrb.mxu0 %v6595_v43  ;;  %v6601_v45 = vld [vmem:[%s10062_s2 + $0x230] sm:$0xff] }
 0x20d   :  { %10885 = vst [vmem:[#allocation102_spill] sm:$0xff] %v6583_v2  ;;  %1273 = vmatpush.msra.mxu1 %v6601_v45  ;;  %v6607_v2 = vld [vmem:[%s10062_s2 + $0x28] sm:$0xff] }
 0x20e   :  { %10886 = vst [vmem:[#allocation103_spill] sm:$0xff] %v6589_v26  ;;  %1213 = vmatpush.msrb.mxu2 %v6607_v2  ;;  %v6613_v26 = vld [vmem:[%s10062_s2 + $0x238] sm:$0xff] }
 0x20f   :  { %10887 = vst [vmem:[#allocation104_spill] sm:$0xff] %v6595_v43  ;;  %1313 = vmatpush.msra.mxu3 %v6613_v26  ;;  %v6619_v43 = vld [vmem:[%s10062_s2] sm:$0xff] }
 0x210   :  { %10888 = vst [vmem:[#allocation105_spill] sm:$0xff] %v6601_v45  ;;  %1174 = vmatpush.msrb.mxu0 %v6619_v43  ;;  %v6625_v45 = vld [vmem:[%s10062_s2 + $0x210] sm:$0xff] }
 0x211   :  { %10889 = vst [vmem:[#allocation106_spill] sm:$0xff] %v6607_v2  ;;  %1274 = vmatpush.msra.mxu1 %v6625_v45  ;;  %v6631_v2 = vld [vmem:[%s10062_s2 + $0x8] sm:$0xff] }
 0x212   :  { %10890 = vst [vmem:[#allocation107_spill] sm:$0xff] %v6613_v26  ;;  %1214 = vmatpush.msrb.mxu2 %v6631_v2  ;;  %v6637_v26 = vld [vmem:[%s10062_s2 + $0x218] sm:$0xff]  ;;  %v929_v62 = vpop.f32.mrf.mxu3 }
 0x213   :  { %10891 = vst [vmem:[#allocation108_spill] sm:$0xff] %v6619_v43  ;;  %1314 = vmatpush.msra.mxu3 %v6637_v26  ;;  %v6643_v43 = vld [vmem:[%s10062_s2 + $0x1f0] sm:$0xff] }
 0x214   :  { %10892 = vst [vmem:[#allocation109_spill] sm:$0xff] %v6625_v45  ;;  %1239 = vmatpush.msra.mxu0 %v6643_v43  ;;  %v6649_v45 = vld [vmem:[%s10062_s2 + $0x1f8] sm:$0xff] }
 0x215   :  { %10893 = vst [vmem:[#allocation110_spill] sm:$0xff] %v6631_v2  ;;  %1279 = vmatpush.msra.mxu2 %v6649_v45  ;;  %v6655_v2 = vld [vmem:[%s10062_s2 + $0x1d0] sm:$0xff] }
 0x216   :  { %10894 = vst [vmem:[#allocation111_spill] sm:$0xff] %v6637_v26  ;;  %1240 = vmatpush.msra.mxu0 %v6655_v2  ;;  %v6661_v26 = vld [vmem:[%s10062_s2 + $0x1d8] sm:$0xff] }
 0x217   :  { %10895 = vst [vmem:[#allocation112_spill] sm:$0xff] %v6643_v43  ;;  %1280 = vmatpush.msra.mxu2 %v6661_v26  ;;  %v6667_v43 = vld [vmem:[%s10062_s2 + $0x1b0] sm:$0xff] }
 0x218   :  { %10896 = vst [vmem:[#allocation113_spill] sm:$0xff] %v6649_v45  ;;  %1241 = vmatpush.msra.mxu0 %v6667_v43  ;;  %v6673_v45 = vld [vmem:[%s10062_s2 + $0x1b8] sm:$0xff] }
 0x219   :  { %10897 = vst [vmem:[#allocation114_spill] sm:$0xff] %v6655_v2  ;;  %1281 = vmatpush.msra.mxu2 %v6673_v45  ;;  %v6679_v2 = vld [vmem:[%s10062_s2 + $0x190] sm:$0xff] }
 0x21a   :  { %10898 = vst [vmem:[#allocation115_spill] sm:$0xff] %v6661_v26  ;;  %1242 = vmatpush.msra.mxu0 %v6679_v2  ;;  %v6685_v26 = vld [vmem:[%s10062_s2 + $0x198] sm:$0xff] }
 0x21b   :  { %10899 = vst [vmem:[#allocation116_spill] sm:$0xff] %v6667_v43  ;;  %1282 = vmatpush.msra.mxu2 %v6685_v26  ;;  %v6691_v43 = vld [vmem:[%s10062_s2 + $0x170] sm:$0xff] }
 0x21c   :  { %10900 = vst [vmem:[#allocation117_spill] sm:$0xff] %v6673_v45  ;;  %1243 = vmatpush.msra.mxu0 %v6691_v43  ;;  %v6697_v45 = vld [vmem:[%s10062_s2 + $0x178] sm:$0xff] }
 0x21d   :  { %10901 = vst [vmem:[#allocation118_spill] sm:$0xff] %v6679_v2  ;;  %1283 = vmatpush.msra.mxu2 %v6697_v45  ;;  %v6703_v2 = vld [vmem:[%s10062_s2 + $0x150] sm:$0xff] }
 0x21e   :  { %10902 = vst [vmem:[#allocation119_spill] sm:$0xff] %v6685_v26  ;;  %1244 = vmatpush.msra.mxu0 %v6703_v2  ;;  %v6709_v26 = vld [vmem:[%s10062_s2 + $0x158] sm:$0xff] }
 0x21f   :  { %10903 = vst [vmem:[#allocation120_spill] sm:$0xff] %v6691_v43  ;;  %1284 = vmatpush.msra.mxu2 %v6709_v26  ;;  %v6715_v43 = vld [vmem:[%s10062_s2 + $0x130] sm:$0xff] }
 0x220   :  { %10904 = vst [vmem:[#allocation121_spill] sm:$0xff] %v6697_v45  ;;  %1245 = vmatpush.msra.mxu0 %v6715_v43  ;;  %v6721_v45 = vld [vmem:[%s10062_s2 + $0x138] sm:$0xff] }
 0x221   :  { %10905 = vst [vmem:[#allocation122_spill] sm:$0xff] %v6703_v2  ;;  %1285 = vmatpush.msra.mxu2 %v6721_v45  ;;  %v6727_v2 = vld [vmem:[%s10062_s2 + $0x110] sm:$0xff] }
 0x222   :  { %10906 = vst [vmem:[#allocation123_spill] sm:$0xff] %v6709_v26  ;;  %1246 = vmatpush.msra.mxu0 %v6727_v2  ;;  %v6733_v26 = vld [vmem:[%s10062_s2 + $0x118] sm:$0xff] }
 0x223   :  { %10907 = vst [vmem:[#allocation124_spill] sm:$0xff] %v6715_v43  ;;  %1286 = vmatpush.msra.mxu2 %v6733_v26  ;;  %v6739_v43 = vld [vmem:[%s10062_s2 + $0xf0] sm:$0xff] }
 0x224   :  { %10908 = vst [vmem:[#allocation125_spill] sm:$0xff] %v6721_v45  ;;  %1247 = vmatpush.msra.mxu0 %v6739_v43  ;;  %v6745_v45 = vld [vmem:[%s10062_s2 + $0xf8] sm:$0xff] }
 0x225   :  { %10909 = vst [vmem:[#allocation126_spill] sm:$0xff] %v6727_v2  ;;  %1287 = vmatpush.msra.mxu2 %v6745_v45  ;;  %v6751_v2 = vld [vmem:[%s10062_s2 + $0xd0] sm:$0xff] }
 0x226   :  { %10910 = vst [vmem:[#allocation127_spill] sm:$0xff] %v6733_v26  ;;  %1248 = vmatpush.msra.mxu0 %v6751_v2  ;;  %v6757_v26 = vld [vmem:[%s10062_s2 + $0xd8] sm:$0xff] }
 0x227   :  { %10911 = vst [vmem:[#allocation128_spill] sm:$0xff] %v6739_v43  ;;  %1288 = vmatpush.msra.mxu2 %v6757_v26  ;;  %v6763_v43 = vld [vmem:[%s10062_s2 + $0xb0] sm:$0xff] }
 0x228   :  { %10912 = vst [vmem:[#allocation129_spill] sm:$0xff] %v6745_v45  ;;  %1249 = vmatpush.msra.mxu0 %v6763_v43  ;;  %v6769_v45 = vld [vmem:[%s10062_s2 + $0xb8] sm:$0xff] }
 0x229   :  { %10913 = vst [vmem:[#allocation130_spill] sm:$0xff] %v6751_v2  ;;  %1289 = vmatpush.msra.mxu2 %v6769_v45  ;;  %v6775_v2 = vld [vmem:[%s10062_s2 + $0x90] sm:$0xff] }
 0x22a   :  { %10914 = vst [vmem:[#allocation131_spill] sm:$0xff] %v6757_v26  ;;  %1250 = vmatpush.msra.mxu0 %v6775_v2  ;;  %v6781_v26 = vld [vmem:[%s10062_s2 + $0x98] sm:$0xff] }
 0x22b   :  { %10915 = vst [vmem:[#allocation132_spill] sm:$0xff] %v6763_v43  ;;  %1290 = vmatpush.msra.mxu2 %v6781_v26  ;;  %v6787_v43 = vld [vmem:[%s10062_s2 + $0x70] sm:$0xff] }
 0x22c   :  { %10916 = vst [vmem:[#allocation133_spill] sm:$0xff] %v6769_v45  ;;  %1251 = vmatpush.msra.mxu0 %v6787_v43  ;;  %v6793_v45 = vld [vmem:[%s10062_s2 + $0x78] sm:$0xff] }
 0x22d   :  { %10917 = vst [vmem:[#allocation134_spill] sm:$0xff] %v6775_v2  ;;  %1291 = vmatpush.msra.mxu2 %v6793_v45  ;;  %v6799_v2 = vld [vmem:[%s10062_s2 + $0x50] sm:$0xff] }
 0x22e   :  { %10918 = vst [vmem:[#allocation135_spill] sm:$0xff] %v6781_v26  ;;  %1252 = vmatpush.msra.mxu0 %v6799_v2  ;;  %v6805_v26 = vld [vmem:[%s10062_s2 + $0x58] sm:$0xff] }
 0x22f   :  { %10919 = vst [vmem:[#allocation136_spill] sm:$0xff] %v6787_v43  ;;  %1292 = vmatpush.msra.mxu2 %v6805_v26  ;;  %v6811_v43 = vld [vmem:[%s10062_s2 + $0x30] sm:$0xff] }
 0x230   :  { %10920 = vst [vmem:[#allocation137_spill] sm:$0xff] %v6793_v45  ;;  %1253 = vmatpush.msra.mxu0 %v6811_v43  ;;  %v6817_v45 = vld [vmem:[%s10062_s2 + $0x38] sm:$0xff]  ;;  %v829_v34 = vpop.f32.mrf.mxu2 }
 0x231   :  { %10921 = vst [vmem:[#allocation138_spill] sm:$0xff] %v6799_v2  ;;  %1293 = vmatpush.msra.mxu2 %v6817_v45  ;;  %v6823_v2 = vld [vmem:[%s10062_s2 + $0x10] sm:$0xff]  ;;  %v830_v22 = vadd.f32 %v829_v34, %v5681_v29 }
 0x232   :  { %10922 = vst [vmem:[#allocation139_spill] sm:$0xff] %v6805_v26  ;;  %1254 = vmatpush.msra.mxu0 %v6823_v2  ;;  %v6829_v26 = vld [vmem:[%s10062_s2 + $0x18] sm:$0xff] }
 0x233   :  { %10923 = vst [vmem:[#allocation140_spill] sm:$0xff] %v6811_v43  ;;  %1294 = vmatpush.msra.mxu2 %v6829_v26  ;;  %v789_v43 = vpop.f32.mrf.mxu0  ;;  %v850_v14 = vadd.f32 %v849_v56, %v830_v22  ;;  %v889_v56 = vpop.f32.mrf.mxu1 }
 0x234   :  { %10924 = vst [vmem:[#allocation141_spill] sm:$0xff] %v6817_v45  ;;  %v790_v50 = vadd.f32 %v789_v43, %v5678_v41 }
 0x235   :  { %10925 = vst [vmem:[#allocation142_spill] sm:$0xff] %v6823_v2  ;;  %v3333_v2 = vmul.f32 -1.442695, %v850_v14 }
 0x236   :  { %10926 = vst [vmem:[#allocation143_spill] sm:$0xff] %v6829_v26  ;;  %v810_v42 = vadd.f32 %v809_v25, %v790_v50 }
 0x238   :  { %v3332_v45 = vmul.f32 -1.442695, %v810_v42 }
 0x239   :  { %v909_v7 = vpop.f32.mrf.mxu2 }
 0x23a   :  { %3426 = vpow2.f32 %v3332_v45  ;;  %v910_v26 = vadd.f32 %v909_v7, %v5684_v36 }
 0x23b   :  { %3428 = vpow2.f32 %v3333_v2  ;;  %v869_v25 = vpop.f32.mrf.mxu0 }
 0x23c   :  { %v930_v43 = vadd.f32 %v929_v62, %v910_v26  ;;  %v870_v34 = vadd.f32 %v869_v25, %v5687_v48 }
 0x23e   :  { %v3334_v42 = vmul.f32 -1.442695, %v930_v43  ;;  %v890_v22 = vadd.f32 %v889_v56, %v870_v34 }
 0x240   :  { %v3427_v21 = vpop.eup %3426 }
 0x241   :  { %v935_v3 = vadd.f32 1.0, %v3427_v21  ;;  %v3429_v59 = vpop.eup %3428 }
 0x242   :  { %v954_v41 = vadd.f32 1.0, %v3429_v59 }
 0x243   :  { %3430 = vrcp.f32 %v935_v3  ;;  %v947_v36 = vand.u32 2147483648, %v935_v3  ;;  %vm941_vm14 = vweird.f32 %v935_v3  ;;  %v945_v26 = vand.u32 2147483647, %v935_v3 }
 0x244   :  { %3432 = vrcp.f32 %v954_v41  ;;  %v966_v43 = vand.u32 2147483648, %v954_v41  ;;  %vm960_vm4 = vweird.f32 %v954_v41 }
 0x245   :  { %3434 = vpow2.f32 %v3334_v42  ;;  %v948_v34 = vor.u32 1.1754944e-38, %v947_v36  ;;  %vm946_vm5 = vcmp.eq.f32.partialorder %v945_v26, 8.507059e+37 }
 0x246   :  { %3436 = vtanh.f32 %v890_v22  ;;  %v967_v56 = vor.u32 1.1754944e-38, %v966_v43 }
 0x249   :  { %v3431_v50 = vpop.eup %3430 }
 0x24a   :  { %v937_v45 = vmul.f32 %v3431_v50, %v935_v3  ;;  %v3433_v2 = vpop.eup %3432  ;;  %vm942_vm13 = vweird.f32 %v3431_v50 }
 0x24b   :  { %v3435_v29 = vpop.eup %3434  ;;  %v956_v55 = vmul.f32 %v3433_v2, %v954_v41  ;;  %vm943_vm15 = vmor %vm941_vm14, %vm942_vm13  ;;  %vm961_vm3 = vweird.f32 %v3433_v2 }
 0x24c   :  { %v938_v14 = vsub.f32 1.0, %v937_v45  ;;  %v974_v62 = vadd.f32 1.0, %v3435_v29  ;;  %v964_v45 = vand.u32 2147483647, %v954_v41  ;;  %vm962_vm6 = vmor %vm960_vm4, %vm961_vm3  ;;  %v3437_v48 = vpop.eup %3436  ;;  %v1034_v29 = vpop.f32.mrf.mxu1 }
 0x24d   :  { %v957_v59 = vsub.f32 1.0, %v956_v55  ;;  %v1074_v55 = vpop.f32.mrf.mxu3  ;;  %v1081_v36 = vrot.slane %v1034_v29, 6 }
 0x24e   :  { %v939_v21 = vmul.f32 %v3431_v50, %v938_v14  ;;  %3438 = vrcp.f32 %v974_v62  ;;  %vm965_vm7 = vcmp.eq.f32.partialorder %v964_v45, 8.507059e+37  ;;  %v1083_v41 = vrot.slane %v1074_v55, 2 }
 0x24f   :  { %v958_v25 = vmul.f32 %v3433_v2, %v957_v59  ;;  %v986_v45 = vand.u32 2147483648, %v974_v62  ;;  %vm980_vm9 = vweird.f32 %v974_v62 }
 0x250   :  { %v940_v7 = vadd.f32 %v3431_v50, %v939_v21 }
 0x251   :  { %v959_v14 = vadd.f32 %v3433_v2, %v958_v25  ;;  %v987_v55 = vor.u32 1.1754944e-38, %v986_v45 }
 0x252   :  { %v944_v42 = vsel %vm943_vm15, %v3431_v50, %v940_v7  ;;  %v1014_v50 = vpop.f32.mrf.mxu0 }
 0x253   :  { %v949_v21 = vsel %vm946_vm5, %v948_v34, %v944_v42  ;;  %v963_v53 = vsel %vm962_vm6, %v3433_v2, %v959_v14  ;;  %v3335_v42 = vld [vmem:[%s10063_s0 + $0x10] sm:$0xff]  ;;  %v1084_v2 = vsel %vm179_vm0, %v1014_v50, %v1081_v36 }
 0x254   :  { %v3439_v3 = vpop.eup %3438  ;;  %v968_v22 = vsel %vm965_vm7, %v967_v56, %v963_v53  ;;  %v991_v59 = vmul.f32 %v3437_v48, %v949_v21 }
 0x255   :  { %v990_v49 = vmul.f32 %v968_v22, %v5690_v44  ;;  %v976_v46 = vmul.f32 %v3439_v3, %v974_v62  ;;  %vm981_vm8 = vweird.f32 %v3439_v3 }
 0x256   :  { %vm982_vm10 = vmor %vm980_vm9, %vm981_vm8 }
 0x257   :  { %v6837_v25 = vadd.f32 %v991_v59, %v990_v49  ;;  %v977_v43 = vsub.f32 1.0, %v976_v46  ;;  %v984_v49 = vand.u32 2147483647, %v974_v62 }
 0x258   :  { %v1054_v7 = vpop.f32.mrf.mxu2 }
 0x259   :  { %v1082_v26 = vrot.slane %v1054_v7, 4  ;;  %3440 = vtanh.f32 %v6837_v25  ;;  %v978_v44 = vmul.f32 %v3439_v3, %v977_v43  ;;  %vm985_vm11 = vcmp.eq.f32.partialorder %v984_v49, 8.507059e+37 }
 0x25b   :  { %v1085_v53 = vsel %vm181_vm1, %v1082_v26, %v1083_v41  ;;  %v979_v14 = vadd.f32 %v3439_v3, %v978_v44 }
 0x25c   :  { %v1086_v48 = vsel %vm183_vm2, %v1084_v2, %v1085_v53 }
 0x25d   :  { %v6846_v34 = vadd.f32 %v3335_v42, %v1086_v48  ;;  %v983_v29 = vsel %vm982_vm10, %v3439_v3, %v979_v14 }
 0x25e   :  { %v988_v7 = vsel %vm985_vm11, %v987_v55, %v983_v29  ;;  %v6972_v29 = vld [vmem:[%s10061_s1 + $0x160] sm:$0xff]  ;;  %v6978_v55 = vld [vmem:[%s10061_s1 + $0x170] sm:$0xff] }
 0x25f   :  { %v3336_v46 = vmul.f32 -1.442695, %v6846_v34  ;;  %v1109_v56 = vrot.slane %v6846_v34, 2  ;;  %v1133_v21 = vrot.slane %v6846_v34, 6  ;;  %v3441_v50 = vpop.eup %3440 }
 0x260   :  { %v994_v36 = vmul.f32 %v3441_v50, %v988_v7  ;;  %v10933_v50 = vld [vmem:[#allocation39_spill] sm:$0xff]  ;;  %v6992_v7 = vld [vmem:[%s10061_s1 + $0x150] sm:$0xff] }
 0x261   :  { %3442 = vpow2.f32 %v3336_v46  ;;  %v3337_v22 = vmul.f32 -1.442695, %v1109_v56  ;;  %v3338_v59 = vmul.f32 -1.442695, %v1133_v21  ;;  %v6957_v46 = vld [vmem:[%s10061_s1 + $0x180] sm:$0xff]  ;;  %v10931_v56 = vld [vmem:[#allocation36_spill] sm:$0xff] }
 0x262   :  { %1195 = vmatmul.f32.vlgmr.msrb.gmra.mxu1 %v994_v36  ;;  %1235 = vmatmul.f32.vlgmr.msrb.gmra.mxu3 %v994_v36  ;;  %v6964_v21 = vld [vmem:[%s10061_s1 + $0x190] sm:$0xff] }
 0x263   :  { %3444 = vpow2.f32 %v3337_v22  ;;  %1404 = vmatpush.msrb.mxu1 %v5707_v61  ;;  %1444 = vmatpush.msrb.mxu3 %v5713_v11  ;;  %v10932_v22 = vld [vmem:[#allocation40_spill] sm:$0xff] }
 0x264   :  { %3446 = vpow2.f32 %v3338_v59  ;;  %v6985_v59 = vld [vmem:[%s10061_s1 + $0x140] sm:$0xff] }
 0x265   :  { %1405 = vmatpush.msrb.mxu1 %v5721_v24  ;;  %1445 = vmatpush.msrb.mxu3 %v5727_v0 }
 0x267   :  { %v3443_v62 = vpop.eup %3442  ;;  %1406 = vmatpush.msrb.mxu1 %v5734_v6  ;;  %1446 = vmatpush.msrb.mxu3 %v5740_v8  ;;  %v1130_v6 = vrot.slane %v6846_v34, 4 }
 0x268   :  { %v1092_v41 = vadd.f32 1.0, %v3443_v62  ;;  %v10935_v62 = vld [vmem:[#allocation42_spill] sm:$0xff] }
 0x269   :  { %v3445_v3 = vpop.eup %3444  ;;  %1407 = vmatpush.msrb.mxu1 %v5750_v5  ;;  %1447 = vmatpush.msrb.mxu3 %v5756_v16 }
 0x26a   :  { %v3447_v26 = vpop.eup %3446  ;;  %3448 = vrcp.f32 %v1092_v41  ;;  %v1114_v43 = vadd.f32 1.0, %v3445_v3  ;;  %1275 = vmatmul.f32.vlgmr.msra.gmra.mxu1 %v994_v36  ;;  %1315 = vmatmul.f32.vlgmr.msra.gmra.mxu3 %v994_v36  ;;  %vm1098_vm13 = vweird.f32 %v1092_v41  ;;  %v10934_v36 = vld [vmem:[#allocation2_spill] sm:$0xff]  ;;  %v7001_v3 = vld [vmem:[%s10061_s1 + $0x130] sm:$0xff] }
 0x26b   :  { %v6857_v42 = vadd.f32 1.0, %v3447_v26  ;;  %1408 = vmatpush.msrb.mxu1 %v5764_v23  ;;  %1448 = vmatpush.msrb.mxu3 %v5770_v28  ;;  %v1104_v23 = vand.u32 2147483648, %v1092_v41  ;;  %v10937_v26 = vld [vmem:[#allocation3_spill] sm:$0xff] }
 0x26c   :  { %3450 = vrcp.f32 %v1114_v43  ;;  %vm1120_vm4 = vweird.f32 %v1114_v43 }
 0x26d   :  { %3452 = vrcp.f32 %v6857_v42  ;;  %1409 = vmatpush.msrb.mxu1 %v5776_v15  ;;  %1449 = vmatpush.msrb.mxu3 %v5782_v31  ;;  %v1102_v15 = vand.u32 2147483647, %v1092_v41  ;;  %v1105_v53 = vor.u32 1.1754944e-38, %v1104_v23  ;;  %vm1144_vm8 = vweird.f32 %v6857_v42  ;;  %v7028_v23 = vld [vmem:[%s10061_s1 + $0xd0] sm:$0xff] }
 0x26e   :  { %3454 = vtanh.f32 %v1130_v6  ;;  %v7019_v6 = vld [vmem:[%s10061_s1 + $0xf0] sm:$0xff] }
 0x26f   :  { %1410 = vmatpush.msrb.mxu1 %v5789_v40  ;;  %1450 = vmatpush.msrb.mxu3 %v5795_v39  ;;  %v1126_v39 = vand.u32 2147483648, %v1114_v43  ;;  %vm1103_vm3 = vcmp.eq.f32.partialorder %v1102_v15, 8.507059e+37  ;;  %v10947_v15 = vld [vmem:[#allocation51_spill] sm:$0xff] }
 0x270   :  { %v3449_v61 = vpop.eup %3448 }
 0x271   :  { %v1094_v11 = vmul.f32 %v3449_v61, %v1092_v41  ;;  %1411 = vmatpush.msrb.mxu1 %v5805_v13  ;;  %1451 = vmatpush.msrb.mxu3 %v5811_v33  ;;  %vm1099_vm12 = vweird.f32 %v3449_v61  ;;  %v1124_v33 = vand.u32 2147483647, %v1114_v43  ;;  %v10936_v41 = vld [vmem:[#allocation41_spill] sm:$0xff] }
 0x272   :  { %v3451_v24 = vpop.eup %3450  ;;  %vm1100_vm14 = vmor %vm1098_vm13, %vm1099_vm12 }
 0x273   :  { %v1095_v0 = vsub.f32 1.0, %v1094_v11  ;;  %v6869_v8 = vpop.eup %3452  ;;  %v1116_v5 = vmul.f32 %v3451_v24, %v1114_v43  ;;  %1412 = vmatpush.msrb.mxu1 %v5821_v51  ;;  %1452 = vmatpush.msrb.mxu3 %v5827_v52  ;;  %vm1121_vm15 = vweird.f32 %v3451_v24  ;;  %v1127_v52 = vor.u32 1.1754944e-38, %v1126_v39  ;;  %v10938_v43 = vld [vmem:[#allocation44_spill] sm:$0xff]  ;;  %v10950_v39 = vld [vmem:[#allocation10_spill] sm:$0xff] }
 0x274   :  { %v1140_v28 = vmul.f32 %v6869_v8, %v6857_v42  ;;  %vm1122_vm5 = vmor %vm1120_vm4, %vm1121_vm15  ;;  %vm1125_vm6 = vcmp.eq.f32.partialorder %v1124_v33, 8.507059e+37  ;;  %vm1145_vm7 = vweird.f32 %v6869_v8  ;;  %v10940_v11 = vld [vmem:[#allocation4_spill] sm:$0xff]  ;;  %v10952_v33 = vld [vmem:[#allocation7_spill] sm:$0xff] }
 0x275   :  { %v1096_v16 = vmul.f32 %v3449_v61, %v1095_v0  ;;  %v1117_v31 = vsub.f32 1.0, %v1116_v5  ;;  %1413 = vmatpush.msrb.mxu1 %v5840_v9  ;;  %1453 = vmatpush.msrb.mxu3 %v5846_v57  ;;  %v3455_v9 = vpop.eup %3454  ;;  %vm1146_vm9 = vmor %vm1144_vm8, %vm1145_vm7  ;;  %v10942_v0 = vld [vmem:[#allocation45_spill] sm:$0xff]  ;;  %v10944_v5 = vld [vmem:[#allocation48_spill] sm:$0xff] }
 0x276   :  { %v1141_v45 = vsub.f32 1.0, %v1140_v28  ;;  %v10946_v28 = vld [vmem:[#allocation8_spill] sm:$0xff] }
 0x277   :  { %v1097_v40 = vadd.f32 %v3449_v61, %v1096_v16  ;;  %v1118_v13 = vmul.f32 %v3451_v24, %v1117_v31  ;;  %1414 = vmatpush.msrb.mxu1 %v5855_v47  ;;  %1454 = vmatpush.msrb.mxu3 %v5861_v4  ;;  %v10945_v16 = vld [vmem:[#allocation47_spill] sm:$0xff]  ;;  %v10948_v31 = vld [vmem:[#allocation5_spill] sm:$0xff] }
 0x278   :  { %v1142_v34 = vmul.f32 %v6869_v8, %v1141_v45  ;;  %v10955_v45 = vld [vmem:[#allocation59_spill] sm:$0xff] }
 0x279   :  { %v1101_v2 = vsel %vm1100_vm14, %v3449_v61, %v1097_v40  ;;  %v1119_v48 = vadd.f32 %v3451_v24, %v1118_v13  ;;  %1415 = vmatpush.msrb.mxu1 %v5868_v12  ;;  %1455 = vmatpush.msrb.mxu3 %v5874_v27  ;;  %v1150_v12 = vand.u32 2147483648, %v6857_v42  ;;  %v1148_v27 = vand.u32 2147483647, %v6857_v42  ;;  %v10939_v42 = vld [vmem:[#allocation43_spill] sm:$0xff]  ;;  %v7010_v61 = vld [vmem:[%s10061_s1 + $0x110] sm:$0xff] }
 0x27a   :  { %v1106_v51 = vsel %vm1103_vm3, %v1105_v53, %v1101_v2  ;;  %v1143_v4 = vadd.f32 %v6869_v8, %v1142_v34  ;;  %v10949_v40 = vld [vmem:[#allocation52_spill] sm:$0xff]  ;;  %v10951_v13 = vld [vmem:[#allocation55_spill] sm:$0xff] }
 0x27b   :  { %v1123_v44 = vsel %vm1122_vm5, %v3451_v24, %v1119_v48  ;;  %v1155_v14 = vmul.f32 %v3455_v9, %v1106_v51  ;;  %1416 = vmatpush.msrb.mxu1 %v5882_v18  ;;  %1456 = vmatpush.msrb.mxu3 %v5888_v63  ;;  %v10927_v63 = vld [vmem:[#allocation33_spill] sm:$0xff]  ;;  %vm1149_vm10 = vcmp.eq.f32.partialorder %v1148_v27, 8.507059e+37  ;;  %v10941_v24 = vld [vmem:[#allocation46_spill] sm:$0xff]  ;;  %v10953_v2 = vld [vmem:[#allocation56_spill] sm:$0xff] }
 0x27c   :  { %v1128_v57 = vsel %vm1125_vm6, %v1127_v52, %v1123_v44  ;;  %v1147_v18 = vsel %vm1146_vm9, %v6869_v8, %v1143_v4  ;;  %v10943_v8 = vld [vmem:[#allocation6_spill] sm:$0xff]  ;;  %v10954_v53 = vld [vmem:[#allocation12_spill] sm:$0xff]  ;;  %v10956_v48 = vld [vmem:[#allocation9_spill] sm:$0xff] }
 0x27d   :  { %v1154_v49 = vmul.f32 %v1128_v57, %v5891_v58  ;;  %1417 = vmatpush.msrb.mxu1 %v5896_v19  ;;  %1457 = vmatpush.msrb.mxu3 %v5902_v54  ;;  %v1151_v58 = vor.u32 1.1754944e-38, %v1150_v12  ;;  %v10957_v51 = vld [vmem:[#allocation60_spill] sm:$0xff]  ;;  %v10958_v52 = vld [vmem:[#allocation14_spill] sm:$0xff]  ;;  %v10959_v44 = vld [vmem:[#allocation63_spill] sm:$0xff] }
 0x27e   :  { %v10960_v9 = vld [vmem:[#allocation11_spill] sm:$0xff]  ;;  %v10961_v57 = vld [vmem:[#allocation64_spill] sm:$0xff]  ;;  %v10966_v12 = vld [vmem:[#allocation17_spill] sm:$0xff] }
 0x27f   :  { %v6887_v47 = vadd.f32 %v1155_v14, %v1154_v49  ;;  %1418 = vmatpush.msrb.mxu1 %v5912_v38  ;;  %1458 = vmatpush.msrb.mxu3 %v5918_v35  ;;  %v1152_v54 = vsel %vm1149_vm10, %v1151_v58, %v1147_v18  ;;  %v6915_v35 = vld [vmem:[%s10061_s1 + $0x1e0] sm:$0xff]  ;;  %v10962_v34 = vld [vmem:[#allocation16_spill] sm:$0xff]  ;;  %v10963_v49 = vld [vmem:[#allocation67_spill] sm:$0xff] }
 0x280   :  { %v10964_v14 = vld [vmem:[#allocation13_spill] sm:$0xff]  ;;  %v10965_v4 = vld [vmem:[#allocation68_spill] sm:$0xff]  ;;  %v10967_v27 = vld [vmem:[#allocation71_spill] sm:$0xff] }
 0x281   :  { %3456 = vtanh.f32 %v6887_v47  ;;  %1419 = vmatpush.msrb.mxu1 %v5930_v60  ;;  %1459 = vmatpush.msrb.mxu3 %v5936_v30  ;;  %v6922_v60 = vld [vmem:[%s10061_s1 + $0x1f0] sm:$0xff]  ;;  %v6929_v30 = vld [vmem:[%s10061_s1 + $0x1c0] sm:$0xff]  ;;  %v10968_v18 = vld [vmem:[#allocation15_spill] sm:$0xff] }
 0x282   :  { %v10970_v58 = vld [vmem:[#allocation19_spill] sm:$0xff] }
 0x283   :  { %1566 = vmatpush.msra.mxu1 %v10927_v63  ;;  %1606 = vmatpush.msra.mxu3 %v5951_v17  ;;  %v6936_v17 = vld [vmem:[%s10061_s1 + $0x1d0] sm:$0xff]  ;;  %v10969_v63 = vld [vmem:[#allocation18_spill] sm:$0xff] }
 0x285   :  { %1567 = vmatpush.msra.mxu1 %v5957_v32  ;;  %1607 = vmatpush.msra.mxu3 %v5963_v1  ;;  %v10928_v32 = vld [vmem:[#allocation37_spill] sm:$0xff]  ;;  %v6943_v1 = vld [vmem:[%s10061_s1 + $0x1a0] sm:$0xff] }
 0x287   :  { %v3457_v19 = vpop.eup %3456  ;;  %1568 = vmatpush.msra.mxu1 %v5971_v37  ;;  %1608 = vmatpush.msra.mxu3 %v5977_v20  ;;  %v10929_v37 = vld [vmem:[#allocation35_spill] sm:$0xff]  ;;  %v6950_v20 = vld [vmem:[%s10061_s1 + $0x1b0] sm:$0xff] }
 0x288   :  { %v6906_v38 = vmul.f32 %v3457_v19, %v1152_v54  ;;  %v10971_v19 = vld [vmem:[#allocation72_spill] sm:$0xff] }
 0x289   :  { %1569 = vmatpush.msra.mxu1 %v5990_v10  ;;  %1609 = vmatpush.msra.mxu3 %v10928_v32  ;;  %v10930_v10 = vld [vmem:[#allocation38_spill] sm:$0xff]  ;;  %v10972_v54 = vld [vmem:[#allocation20_spill] sm:$0xff]  ;;  %v10973_v32 = vld [vmem:[#allocation75_spill] sm:$0xff] }
 0x28a   :  { %1175 = vmatmul.f32.vlgmr.msrb.gmra.mxu0 %v6906_v38  ;;  %1215 = vmatmul.f32.vlgmr.msrb.gmra.mxu2 %v6906_v38 }
 0x28b   :  { %1384 = vmatpush.msrb.mxu0 %v6915_v35  ;;  %1420 = vmatmul.f32.vlgmr.msrb.gmra.mxu1 %v6906_v38 }
 0x28c   :  { %1424 = vmatpush.msrb.mxu2 %v6922_v60  ;;  %1460 = vmatmul.f32.vlgmr.msrb.gmra.mxu3 %v6906_v38 }
 0x28d   :  { %1385 = vmatpush.msrb.mxu0 %v6929_v30  ;;  %1570 = vmatpush.msra.mxu1 %v10929_v37  ;;  %v10974_v37 = vld [vmem:[#allocation21_spill] sm:$0xff] }
 0x28e   :  { %1425 = vmatpush.msrb.mxu2 %v6936_v17  ;;  %1610 = vmatpush.msra.mxu3 %v10930_v10  ;;  %v10975_v10 = vld [vmem:[#allocation76_spill] sm:$0xff] }
 0x28f   :  { %1386 = vmatpush.msrb.mxu0 %v6943_v1  ;;  %1571 = vmatpush.msra.mxu1 %v10931_v56  ;;  %v10976_v56 = vld [vmem:[#allocation22_spill] sm:$0xff] }
 0x290   :  { %1426 = vmatpush.msrb.mxu2 %v6950_v20  ;;  %1611 = vmatpush.msra.mxu3 %v10932_v22  ;;  %v10977_v22 = vld [vmem:[#allocation79_spill] sm:$0xff] }
 0x291   :  { %1387 = vmatpush.msrb.mxu0 %v6957_v46  ;;  %1572 = vmatpush.msra.mxu1 %v10933_v50  ;;  %v10978_v50 = vld [vmem:[#allocation23_spill] sm:$0xff] }
 0x292   :  { %1427 = vmatpush.msrb.mxu2 %v6964_v21  ;;  %1255 = vmatmul.f32.vlgmr.msra.gmra.mxu0 %v6906_v38 }
 0x293   :  { %1295 = vmatmul.f32.vlgmr.msra.gmra.mxu2 %v6906_v38  ;;  %1388 = vmatpush.msrb.mxu0 %v6972_v29 }
 0x294   :  { %1428 = vmatpush.msrb.mxu2 %v6978_v55  ;;  %1612 = vmatpush.msra.mxu3 %v10934_v36  ;;  %v10979_v36 = vld [vmem:[#allocation80_spill] sm:$0xff] }
 0x295   :  { %1389 = vmatpush.msrb.mxu0 %v6985_v59  ;;  %1573 = vmatpush.msra.mxu1 %v10936_v41  ;;  %v10982_v41 = vld [vmem:[#allocation25_spill] sm:$0xff] }
 0x296   :  { %1429 = vmatpush.msrb.mxu2 %v6992_v7  ;;  %1613 = vmatpush.msra.mxu3 %v10937_v26  ;;  %v10983_v26 = vld [vmem:[#allocation84_spill] sm:$0xff] }
 0x297   :  { %1390 = vmatpush.msrb.mxu0 %v10935_v62  ;;  %1574 = vmatpush.msra.mxu1 %v10939_v42  ;;  %v10981_v62 = vld [vmem:[#allocation83_spill] sm:$0xff] }
 0x298   :  { %1430 = vmatpush.msrb.mxu2 %v7001_v3  ;;  %1614 = vmatpush.msra.mxu3 %v10940_v11  ;;  %v10985_v42 = vld [vmem:[#allocation27_spill] sm:$0xff]  ;;  %v10986_v11 = vld [vmem:[#allocation28_spill] sm:$0xff] }
 0x299   :  { %1391 = vmatpush.msrb.mxu0 %v10938_v43  ;;  %1575 = vmatpush.msra.mxu1 %v10942_v0  ;;  %v10984_v43 = vld [vmem:[#allocation26_spill] sm:$0xff]  ;;  %v10988_v0 = vld [vmem:[#allocation49_spill] sm:$0xff] }
 0x29a   :  { %1431 = vmatpush.msrb.mxu2 %v7010_v61  ;;  %1615 = vmatpush.msra.mxu3 %v10943_v8  ;;  %v10989_v8 = vld [vmem:[#allocation50_spill] sm:$0xff] }
 0x29b   :  { %1392 = vmatpush.msrb.mxu0 %v10941_v24  ;;  %1576 = vmatpush.msra.mxu1 %v10945_v16  ;;  %v10987_v24 = vld [vmem:[#allocation29_spill] sm:$0xff]  ;;  %v10991_v16 = vld [vmem:[#allocation54_spill] sm:$0xff] }
 0x29c   :  { %1432 = vmatpush.msrb.mxu2 %v7019_v6  ;;  %1616 = vmatpush.msra.mxu3 %v10946_v28  ;;  %v10992_v28 = vld [vmem:[#allocation57_spill] sm:$0xff] }
 0x29d   :  { %1393 = vmatpush.msrb.mxu0 %v10944_v5  ;;  %1577 = vmatpush.msra.mxu1 %v10948_v31  ;;  %v10990_v5 = vld [vmem:[#allocation53_spill] sm:$0xff] }
 0x29e   :  { %1433 = vmatpush.msrb.mxu2 %v7028_v23  ;;  %1617 = vmatpush.msra.mxu3 %v10950_v39  ;;  %v10994_v31 = vld [vmem:[#allocation61_spill] sm:$0xff] }
 0x29f   :  { %1394 = vmatpush.msrb.mxu0 %v10947_v15  ;;  %1578 = vmatpush.msra.mxu1 %v10952_v33  ;;  %v10993_v15 = vld [vmem:[#allocation58_spill] sm:$0xff]  ;;  %v10996_v39 = vld [vmem:[#allocation65_spill] sm:$0xff] }
 0x2a0   :  { %1434 = vmatpush.msrb.mxu2 %v10949_v40  ;;  %1618 = vmatpush.msra.mxu3 %v10954_v53  ;;  %v10995_v40 = vld [vmem:[#allocation62_spill] sm:$0xff]  ;;  %v10998_v33 = vld [vmem:[#allocation69_spill] sm:$0xff] }
 0x2a1   :  { %1395 = vmatpush.msrb.mxu0 %v10951_v13  ;;  %1579 = vmatpush.msra.mxu1 %v10956_v48  ;;  %v10997_v13 = vld [vmem:[#allocation66_spill] sm:$0xff]  ;;  %v11000_v53 = vld [vmem:[#allocation73_spill] sm:$0xff] }
 0x2a2   :  { %1435 = vmatpush.msrb.mxu2 %v10953_v2  ;;  %1619 = vmatpush.msra.mxu3 %v10958_v52  ;;  %v10999_v2 = vld [vmem:[#allocation70_spill] sm:$0xff]  ;;  %v11002_v48 = vld [vmem:[#allocation77_spill] sm:$0xff] }
 0x2a3   :  { %1396 = vmatpush.msrb.mxu0 %v10955_v45  ;;  %1580 = vmatpush.msra.mxu1 %v10960_v9  ;;  %v11001_v45 = vld [vmem:[#allocation74_spill] sm:$0xff]  ;;  %v11004_v52 = vld [vmem:[#allocation81_spill] sm:$0xff] }
 0x2a4   :  { %1436 = vmatpush.msrb.mxu2 %v10957_v51  ;;  %1620 = vmatpush.msra.mxu3 %v10962_v34  ;;  %v11003_v51 = vld [vmem:[#allocation78_spill] sm:$0xff]  ;;  %v11006_v9 = vld [vmem:[#allocation85_spill] sm:$0xff]  ;;  %v11008_v34 = vld [vmem:[#allocation87_spill] sm:$0xff] }
 0x2a5   :  { %1397 = vmatpush.msrb.mxu0 %v10959_v44  ;;  %1581 = vmatpush.msra.mxu1 %v10964_v14  ;;  %v11005_v44 = vld [vmem:[#allocation82_spill] sm:$0xff]  ;;  %v11010_v14 = vld [vmem:[#allocation89_spill] sm:$0xff] }
 0x2a6   :  { %1437 = vmatpush.msrb.mxu2 %v10961_v57  ;;  %1621 = vmatpush.msra.mxu3 %v10966_v12  ;;  %v11007_v57 = vld [vmem:[#allocation86_spill] sm:$0xff]  ;;  %v11012_v12 = vld [vmem:[#allocation91_spill] sm:$0xff] }
 0x2a7   :  { %1398 = vmatpush.msrb.mxu0 %v10963_v49  ;;  %1646 = vmatpush.msrb.mxu1 %v10968_v18  ;;  %v11009_v49 = vld [vmem:[#allocation88_spill] sm:$0xff]  ;;  %v11014_v18 = vld [vmem:[#allocation93_spill] sm:$0xff] }
 0x2a8   :  { %1438 = vmatpush.msrb.mxu2 %v10965_v4  ;;  %1686 = vmatpush.msrb.mxu3 %v10972_v54  ;;  %v11011_v4 = vld [vmem:[#allocation90_spill] sm:$0xff]  ;;  %v11018_v54 = vld [vmem:[#allocation97_spill] sm:$0xff] }
 0x2a9   :  { %1399 = vmatpush.msrb.mxu0 %v10967_v27  ;;  %1647 = vmatpush.msrb.mxu1 %v10974_v37  ;;  %v11013_v27 = vld [vmem:[#allocation92_spill] sm:$0xff]  ;;  %v11020_v37 = vld [vmem:[#allocation99_spill] sm:$0xff] }
 0x2aa   :  { %1439 = vmatpush.msrb.mxu2 %v10969_v63  ;;  %1400 = vmatmul.f32.vlgmr.msrb.gmra.mxu0 %v6906_v38  ;;  %v11015_v63 = vld [vmem:[#allocation94_spill] sm:$0xff] }
 0x2ab   :  { %1440 = vmatmul.f32.vlgmr.msrb.gmra.mxu2 %v6906_v38  ;;  %1546 = vmatpush.msra.mxu0 %v10970_v58  ;;  %v10980_v38 = vld [vmem:[#allocation24_spill] sm:$0xff]  ;;  %v11016_v58 = vld [vmem:[#allocation95_spill] sm:$0xff] }
 0x2ac   :  { %1586 = vmatpush.msra.mxu2 %v10971_v19  ;;  %1687 = vmatpush.msrb.mxu3 %v10976_v56  ;;  %v11017_v19 = vld [vmem:[#allocation96_spill] sm:$0xff]  ;;  %v11022_v56 = vld [vmem:[#allocation101_spill] sm:$0xff] }
 0x2ad   :  { %1547 = vmatpush.msra.mxu0 %v10973_v32  ;;  %1648 = vmatpush.msrb.mxu1 %v10978_v50  ;;  %v11019_v32 = vld [vmem:[#allocation98_spill] sm:$0xff]  ;;  %v11024_v50 = vld [vmem:[#allocation103_spill] sm:$0xff] }
 0x2ae   :  { %1587 = vmatpush.msra.mxu2 %v10975_v10  ;;  %1688 = vmatpush.msrb.mxu3 %v10980_v38  ;;  %v11021_v10 = vld [vmem:[#allocation100_spill] sm:$0xff]  ;;  %v11026_v38 = vld [vmem:[#allocation105_spill] sm:$0xff] }
 0x2af   :  { %1548 = vmatpush.msra.mxu0 %v10977_v22  ;;  %1649 = vmatpush.msrb.mxu1 %v10982_v41  ;;  %v11023_v22 = vld [vmem:[#allocation102_spill] sm:$0xff]  ;;  %v11028_v41 = vld [vmem:[#allocation107_spill] sm:$0xff] }
 0x2b0   :  { %1588 = vmatpush.msra.mxu2 %v10979_v36  ;;  %1689 = vmatpush.msrb.mxu3 %v10984_v43  ;;  %v11025_v36 = vld [vmem:[#allocation104_spill] sm:$0xff]  ;;  %v11030_v43 = vld [vmem:[#allocation109_spill] sm:$0xff] }
 0x2b1   :  { %1549 = vmatpush.msra.mxu0 %v10981_v62  ;;  %1650 = vmatpush.msrb.mxu1 %v10986_v11  ;;  %v11027_v62 = vld [vmem:[#allocation106_spill] sm:$0xff]  ;;  %v11032_v11 = vld [vmem:[#allocation111_spill] sm:$0xff] }
 0x2b2   :  { %1589 = vmatpush.msra.mxu2 %v10983_v26  ;;  %1690 = vmatpush.msrb.mxu3 %v10988_v0  ;;  %v11029_v26 = vld [vmem:[#allocation108_spill] sm:$0xff]  ;;  %v11034_v0 = vld [vmem:[#allocation113_spill] sm:$0xff] }
 0x2b3   :  { %1550 = vmatpush.msra.mxu0 %v10985_v42  ;;  %1651 = vmatpush.msrb.mxu1 %v10990_v5  ;;  %v11031_v42 = vld [vmem:[#allocation110_spill] sm:$0xff]  ;;  %v11036_v5 = vld [vmem:[#allocation115_spill] sm:$0xff] }
 0x2b4   :  { %1590 = vmatpush.msra.mxu2 %v10987_v24  ;;  %1691 = vmatpush.msrb.mxu3 %v10992_v28  ;;  %v11033_v24 = vld [vmem:[#allocation112_spill] sm:$0xff]  ;;  %v11038_v28 = vld [vmem:[#allocation117_spill] sm:$0xff] }
 0x2b5   :  { %1551 = vmatpush.msra.mxu0 %v10989_v8  ;;  %1652 = vmatpush.msrb.mxu1 %v10994_v31  ;;  %v11035_v8 = vld [vmem:[#allocation114_spill] sm:$0xff]  ;;  %v11040_v31 = vld [vmem:[#allocation119_spill] sm:$0xff] }
 0x2b6   :  { %1591 = vmatpush.msra.mxu2 %v10991_v16  ;;  %1692 = vmatpush.msrb.mxu3 %v10996_v39  ;;  %v11037_v16 = vld [vmem:[#allocation116_spill] sm:$0xff]  ;;  %v11042_v39 = vld [vmem:[#allocation121_spill] sm:$0xff] }
 0x2b7   :  { %1552 = vmatpush.msra.mxu0 %v10993_v15  ;;  %1653 = vmatpush.msrb.mxu1 %v10998_v33  ;;  %v11039_v15 = vld [vmem:[#allocation118_spill] sm:$0xff]  ;;  %v11044_v33 = vld [vmem:[#allocation123_spill] sm:$0xff] }
 0x2b8   :  { %1592 = vmatpush.msra.mxu2 %v10995_v40  ;;  %1693 = vmatpush.msrb.mxu3 %v11000_v53  ;;  %v11041_v40 = vld [vmem:[#allocation120_spill] sm:$0xff]  ;;  %v11046_v53 = vld [vmem:[#allocation125_spill] sm:$0xff] }
 0x2b9   :  { %1553 = vmatpush.msra.mxu0 %v10997_v13  ;;  %1654 = vmatpush.msrb.mxu1 %v11002_v48  ;;  %v11043_v13 = vld [vmem:[#allocation122_spill] sm:$0xff]  ;;  %v11048_v48 = vld [vmem:[#allocation127_spill] sm:$0xff] }
 0x2ba   :  { %1593 = vmatpush.msra.mxu2 %v10999_v2  ;;  %1694 = vmatpush.msrb.mxu3 %v11004_v52  ;;  %v11045_v2 = vld [vmem:[#allocation124_spill] sm:$0xff]  ;;  %v11050_v52 = vld [vmem:[#allocation129_spill] sm:$0xff] }
 0x2bb   :  { %1554 = vmatpush.msra.mxu0 %v11001_v45  ;;  %1655 = vmatpush.msrb.mxu1 %v11006_v9  ;;  %v11047_v45 = vld [vmem:[#allocation126_spill] sm:$0xff]  ;;  %v11052_v9 = vld [vmem:[#allocation131_spill] sm:$0xff] }
 0x2bc   :  { %1594 = vmatpush.msra.mxu2 %v11003_v51  ;;  %1695 = vmatpush.msrb.mxu3 %v11008_v34  ;;  %v11049_v51 = vld [vmem:[#allocation128_spill] sm:$0xff]  ;;  %v11054_v34 = vld [vmem:[#allocation133_spill] sm:$0xff] }
 0x2bd   :  { %1555 = vmatpush.msra.mxu0 %v11005_v44  ;;  %1656 = vmatpush.msrb.mxu1 %v11010_v14  ;;  %v11051_v44 = vld [vmem:[#allocation130_spill] sm:$0xff]  ;;  %v11056_v14 = vld [vmem:[#allocation135_spill] sm:$0xff] }
 0x2be   :  { %1595 = vmatpush.msra.mxu2 %v11007_v57  ;;  %1696 = vmatpush.msrb.mxu3 %v11012_v12  ;;  %v11053_v57 = vld [vmem:[#allocation132_spill] sm:$0xff]  ;;  %v11058_v12 = vld [vmem:[#allocation137_spill] sm:$0xff] }
 0x2bf   :  { %1556 = vmatpush.msra.mxu0 %v11009_v49  ;;  %1657 = vmatpush.msrb.mxu1 %v11014_v18  ;;  %v11055_v49 = vld [vmem:[#allocation134_spill] sm:$0xff]  ;;  %v11060_v18 = vld [vmem:[#allocation139_spill] sm:$0xff] }
 0x2c0   :  { %1596 = vmatpush.msra.mxu2 %v11011_v4  ;;  %1697 = vmatpush.msrb.mxu3 %v11016_v58  ;;  %v11057_v4 = vld [vmem:[#allocation136_spill] sm:$0xff]  ;;  %v11062_v58 = vld [vmem:[#allocation141_spill] sm:$0xff] }
 0x2c1   :  { %1557 = vmatpush.msra.mxu0 %v11013_v27  ;;  %1658 = vmatpush.msrb.mxu1 %v11018_v54  ;;  %v11059_v27 = vld [vmem:[#allocation138_spill] sm:$0xff]  ;;  %v11064_v54 = vld [vmem:[#allocation143_spill] sm:$0xff] }
 0x2c2   :  { %1597 = vmatpush.msra.mxu2 %v11015_v63  ;;  %1698 = vmatpush.msrb.mxu3 %v11020_v37  ;;  %v11061_v63 = vld [vmem:[#allocation140_spill] sm:$0xff]  ;;  %v11065_v37 = vld [vmem:[#allocation30_spill] sm:$0xff] }
 0x2c3   :  { %1558 = vmatpush.msra.mxu0 %v11017_v19  ;;  %1659 = vmatpush.msrb.mxu1 %v11022_v56  ;;  %v11063_v19 = vld [vmem:[#allocation142_spill] sm:$0xff] }
 0x2c4   :  { %1598 = vmatpush.msra.mxu2 %v11019_v32  ;;  %1699 = vmatpush.msrb.mxu3 %v11024_v50 }
 0x2c5   :  { %1559 = vmatpush.msra.mxu0 %v11021_v10  ;;  %1660 = vmatpush.msrb.mxu1 %v11026_v38  ;;  %v11066_v38 = vld [vmem:[#allocation32_spill] sm:$0xff] }
 0x2c6   :  { %1599 = vmatpush.msra.mxu2 %v11023_v22  ;;  %1700 = vmatpush.msrb.mxu3 %v11028_v41 }
 0x2c7   :  { %1560 = vmatpush.msra.mxu0 %v11025_v36  ;;  %1661 = vmatpush.msrb.mxu1 %v11030_v43 }
 0x2c8   :  { %1600 = vmatpush.msra.mxu2 %v11027_v62  ;;  %1701 = vmatpush.msrb.mxu3 %v11032_v11 }
 0x2c9   :  { %1561 = vmatpush.msra.mxu0 %v11029_v26 }
 0x2ca   :  { %1601 = vmatpush.msra.mxu2 %v11031_v42 }
 0x2cb   :  { %1626 = vmatpush.msrb.mxu0 %v11033_v24 }
 0x2cc   :  { %1666 = vmatpush.msrb.mxu2 %v11034_v0  ;;  %v11067_v0 = vld [vmem:[#allocation31_spill] sm:$0xff] }
 0x2cd   :  { %1627 = vmatpush.msrb.mxu0 %v11035_v8 }
 0x2ce   :  { %1667 = vmatpush.msrb.mxu2 %v11036_v5 }
 0x2cf   :  { %1628 = vmatpush.msrb.mxu0 %v11037_v16 }
 0x2d0   :  { %1668 = vmatpush.msrb.mxu2 %v11038_v28 }
 0x2d1   :  { %1629 = vmatpush.msrb.mxu0 %v11039_v15 }
 0x2d2   :  { %1669 = vmatpush.msrb.mxu2 %v11040_v31 }
 0x2d3   :  { %1630 = vmatpush.msrb.mxu0 %v11041_v40 }
 0x2d4   :  { %1670 = vmatpush.msrb.mxu2 %v11042_v39 }
 0x2d5   :  { %1631 = vmatpush.msrb.mxu0 %v11043_v13 }
 0x2d6   :  { %1671 = vmatpush.msrb.mxu2 %v11044_v33  ;;  %v11068_v33 = vld [vmem:[#allocation34_spill] sm:$0xff] }
 0x2d7   :  { %1632 = vmatpush.msrb.mxu0 %v11045_v2 }
 0x2d8   :  { %1672 = vmatpush.msrb.mxu2 %v11046_v53 }
 0x2d9   :  { %1633 = vmatpush.msrb.mxu0 %v11047_v45 }
 0x2da   :  { %1673 = vmatpush.msrb.mxu2 %v11048_v48 }
 0x2db   :  { %1634 = vmatpush.msrb.mxu0 %v11049_v51 }
 0x2dc   :  { %1674 = vmatpush.msrb.mxu2 %v11050_v52 }
 0x2dd   :  { %1635 = vmatpush.msrb.mxu0 %v11051_v44 }
 0x2de   :  { %1675 = vmatpush.msrb.mxu2 %v11052_v9 }
 0x2df   :  { %1636 = vmatpush.msrb.mxu0 %v11053_v57  ;;  %v1196_v56 = vpop.f32.mrf.mxu1 }
 0x2e0   :  { %1676 = vmatpush.msrb.mxu2 %v11054_v34 }
 0x2e1   :  { %1637 = vmatpush.msrb.mxu0 %v11055_v49 }
 0x2e2   :  { %1677 = vmatpush.msrb.mxu2 %v11056_v14 }
 0x2e3   :  { %1638 = vmatpush.msrb.mxu0 %v11057_v4 }
 0x2e4   :  { %1678 = vmatpush.msrb.mxu2 %v11058_v12 }
 0x2e5   :  { %1639 = vmatpush.msrb.mxu0 %v11059_v27  ;;  %v1236_v41 = vpop.f32.mrf.mxu3 }
 0x2e6   :  { %1679 = vmatpush.msrb.mxu2 %v11060_v18 }
 0x2e7   :  { %1640 = vmatpush.msrb.mxu0 %v11061_v63  ;;  %v1276_v45 = vpop.f32.mrf.mxu1 }
 0x2e8   :  { %1680 = vmatpush.msrb.mxu2 %v11062_v58 }
 0x2e9   :  { %1641 = vmatpush.msrb.mxu0 %v11063_v19 }
 0x2ea   :  { %1681 = vmatpush.msrb.mxu2 %v11064_v54 }
 0x2ed   :  { %v1316_v5 = vpop.f32.mrf.mxu3 }
 0x307   :  { %v1176_v32 = vpop.f32.mrf.mxu0 }
 0x308   :  { %v1177_v10 = vadd.f32 %v1176_v32, %v11065_v37 }
 0x30a   :  { %v1197_v22 = vadd.f32 %v1196_v56, %v1177_v10  ;;  %v1421_v56 = vpop.f32.mrf.mxu1 }
 0x30c   :  { %v3339_v50 = vmul.f32 -1.442695, %v1197_v22 }
 0x30d   :  { %v1216_v36 = vpop.f32.mrf.mxu2 }
 0x30e   :  { %3458 = vpow2.f32 %v3339_v50  ;;  %v1217_v62 = vadd.f32 %v1216_v36, %v11066_v38 }
 0x30f   :  { %v1256_v31 = vpop.f32.mrf.mxu0  ;;  %v1461_v22 = vpop.f32.mrf.mxu3 }
 0x310   :  { %v1237_v26 = vadd.f32 %v1236_v41, %v1217_v62  ;;  %v1257_v2 = vadd.f32 %v1256_v31, %v11068_v33 }
 0x312   :  { %v3340_v43 = vmul.f32 -1.442695, %v1237_v26  ;;  %v1277_v48 = vadd.f32 %v1276_v45, %v1257_v2 }
 0x314   :  { %v3459_v42 = vpop.eup %3458  ;;  %3460 = vpow2.f32 %v3340_v43 }
 0x315   :  { %v1322_v11 = vadd.f32 1.0, %v3459_v42 }
 0x316   :  { %v1296_v24 = vpop.f32.mrf.mxu2 }
 0x317   :  { %3462 = vrcp.f32 %v1322_v11  ;;  %v1297_v8 = vadd.f32 %v1296_v24, %v11067_v0  ;;  %v1334_v34 = vand.u32 2147483648, %v1322_v11  ;;  %vm1328_vm12 = vweird.f32 %v1322_v11 }
 0x318   :  { %v1332_v4 = vand.u32 2147483647, %v1322_v11  ;;  %v1468_v24 = vrot.slane %v1421_v56, 6  ;;  %v7207_v56 = vld [vmem:[%s10061_s1 + $0x1b8] sm:$0xff] }
 0x319   :  { %v1317_v28 = vadd.f32 %v1316_v5, %v1297_v8  ;;  %v1335_v58 = vor.u32 1.1754944e-38, %v1334_v34  ;;  %v1470_v8 = vrot.slane %v1461_v22, 2 }
 0x31a   :  { %v3461_v16 = vpop.eup %3460  ;;  %vm1333_vm3 = vcmp.eq.f32.partialorder %v1332_v4, 8.507059e+37 }
 0x31b   :  { %v1341_v15 = vadd.f32 1.0, %v3461_v16  ;;  %v3341_v40 = vmul.f32 -1.442695, %v1317_v28 }
 0x31d   :  { %v3463_v39 = vpop.eup %3462  ;;  %3464 = vrcp.f32 %v1341_v15  ;;  %v1353_v12 = vand.u32 2147483648, %v1341_v15  ;;  %v1351_v63 = vand.u32 2147483647, %v1341_v15  ;;  %vm1347_vm15 = vweird.f32 %v1341_v15 }
 0x31e   :  { %v1324_v13 = vmul.f32 %v3463_v39, %v1322_v11  ;;  %3466 = vpow2.f32 %v3341_v40  ;;  %vm1329_vm11 = vweird.f32 %v3463_v39 }
 0x31f   :  { %3468 = vtanh.f32 %v1277_v48  ;;  %vm1330_vm13 = vmor %vm1328_vm12, %vm1329_vm11  ;;  %v1354_v54 = vor.u32 1.1754944e-38, %v1353_v12  ;;  %vm1352_vm5 = vcmp.eq.f32.partialorder %v1351_v63, 8.507059e+37 }
 0x320   :  { %v1325_v53 = vsub.f32 1.0, %v1324_v13 }
 0x322   :  { %v1326_v51 = vmul.f32 %v3463_v39, %v1325_v53 }
 0x323   :  { %v3465_v52 = vpop.eup %3464 }
 0x324   :  { %v3467_v44 = vpop.eup %3466  ;;  %v1343_v9 = vmul.f32 %v3465_v52, %v1341_v15  ;;  %v1327_v57 = vadd.f32 %v3463_v39, %v1326_v51  ;;  %vm1348_vm14 = vweird.f32 %v3465_v52  ;;  %v3342_v15 = vld [vmem:[%s10063_s0 + $0x18] sm:$0xff] }
 0x325   :  { %v1361_v49 = vadd.f32 1.0, %v3467_v44  ;;  %vm1349_vm4 = vmor %vm1347_vm15, %vm1348_vm14  ;;  %v3469_v10 = vpop.eup %3468 }
 0x326   :  { %v1344_v14 = vsub.f32 1.0, %v1343_v9  ;;  %v1331_v18 = vsel %vm1330_vm13, %v3463_v39, %v1327_v57 }
 0x327   :  { %3470 = vrcp.f32 %v1361_v49  ;;  %v1336_v32 = vsel %vm1333_vm3, %v1335_v58, %v1331_v18  ;;  %v1401_v42 = vpop.f32.mrf.mxu0  ;;  %v1373_v39 = vand.u32 2147483648, %v1361_v49  ;;  %v1371_v53 = vand.u32 2147483647, %v1361_v49  ;;  %v7188_v58 = vld [vmem:[%s10061_s1 + $0x1c8] sm:$0xff] }
 0x328   :  { %v1345_v27 = vmul.f32 %v3465_v52, %v1344_v14  ;;  %v1378_v26 = vmul.f32 %v3469_v10, %v1336_v32  ;;  %v1471_v31 = vsel %vm179_vm0, %v1401_v42, %v1468_v24  ;;  %vm1367_vm7 = vweird.f32 %v1361_v49  ;;  %v7201_v10 = vld [vmem:[%s10061_s1 + $0x1a8] sm:$0xff] }
 0x329   :  { %v1374_v9 = vor.u32 1.1754944e-38, %v1373_v39  ;;  %vm1372_vm9 = vcmp.eq.f32.partialorder %v1371_v53, 8.507059e+37  ;;  %v7243_v42 = vld [vmem:[%s10061_s1 + $0x148] sm:$0xff] }
 0x32a   :  { %v1346_v19 = vadd.f32 %v3465_v52, %v1345_v27  ;;  %v7180_v27 = vld [vmem:[%s10061_s1 + $0x1f8] sm:$0xff] }
 0x32c   :  { %v1350_v50 = vsel %vm1349_vm4, %v3465_v52, %v1346_v19  ;;  %v7194_v19 = vld [vmem:[%s10061_s1 + $0x1d8] sm:$0xff] }
 0x32d   :  { %v3471_v36 = vpop.eup %3470  ;;  %v1355_v62 = vsel %vm1352_vm5, %v1354_v54, %v1350_v50 }
 0x32e   :  { %v1377_v41 = vmul.f32 %v1355_v62, %v6837_v25  ;;  %v1363_v43 = vmul.f32 %v3471_v36, %v1361_v49  ;;  %v1441_v11 = vpop.f32.mrf.mxu2  ;;  %vm1368_vm6 = vweird.f32 %v3471_v36  ;;  %v7174_v49 = vld [vmem:[%s10061_s1 + $0x1e8] sm:$0xff]  ;;  %v7223_v62 = vld [vmem:[%s10061_s1 + $0x198] sm:$0xff] }
 0x32f   :  { %v1469_v5 = vrot.slane %v1441_v11, 4  ;;  %vm1369_vm8 = vmor %vm1367_vm7, %vm1368_vm6  ;;  %v7249_v11 = vld [vmem:[%s10061_s1 + $0x158] sm:$0xff] }
 0x330   :  { %v7157_v16 = vadd.f32 %v1378_v26, %v1377_v41  ;;  %v1364_v28 = vsub.f32 1.0, %v1363_v43  ;;  %v7231_v41 = vld [vmem:[%s10061_s1 + $0x168] sm:$0xff]  ;;  %v7237_v26 = vld [vmem:[%s10061_s1 + $0x178] sm:$0xff] }
 0x331   :  { %v1472_v40 = vsel %vm181_vm1, %v1469_v5, %v1470_v8  ;;  %v7256_v8 = vld [vmem:[%s10061_s1 + $0x128] sm:$0xff]  ;;  %v7262_v5 = vld [vmem:[%s10061_s1 + $0x138] sm:$0xff] }
 0x332   :  { %3472 = vtanh.f32 %v7157_v16  ;;  %v1473_v25 = vsel %vm183_vm2, %v1471_v31, %v1472_v40  ;;  %v1365_v13 = vmul.f32 %v3471_v36, %v1364_v28 }
 0x333   :  { %v7166_v2 = vadd.f32 %v3342_v15, %v1473_v25  ;;  %v7272_v25 = vld [vmem:[%s10061_s1 + $0x108] sm:$0xff] }
 0x334   :  { %v1366_v45 = vadd.f32 %v3471_v36, %v1365_v13  ;;  %v7278_v13 = vld [vmem:[%s10061_s1 + $0x118] sm:$0xff] }
 0x335   :  { %v3343_v48 = vmul.f32 -1.442695, %v7166_v2  ;;  %v1496_v51 = vrot.slane %v7166_v2, 2  ;;  %v1520_v52 = vrot.slane %v7166_v2, 6  ;;  %v1517_v31 = vrot.slane %v7166_v2, 4 }
 0x336   :  { %v1370_v44 = vsel %vm1369_vm8, %v3471_v36, %v1366_v45  ;;  %v7217_v36 = vld [vmem:[%s10061_s1 + $0x188] sm:$0xff] }
 0x337   :  { %3474 = vpow2.f32 %v3343_v48  ;;  %v3344_v57 = vmul.f32 -1.442695, %v1496_v51  ;;  %v3345_v34 = vmul.f32 -1.442695, %v1520_v52  ;;  %v1375_v4 = vsel %vm1372_vm9, %v1374_v9, %v1370_v44  ;;  %v7288_v52 = vld [vmem:[%s10061_s1 + $0xe8] sm:$0xff]  ;;  %v7294_v44 = vld [vmem:[%s10061_s1 + $0xf8] sm:$0xff] }
 0x338   :  { %v3473_v14 = vpop.eup %3472 }
 0x339   :  { %3476 = vpow2.f32 %v3344_v57  ;;  %v1381_v12 = vmul.f32 %v3473_v14, %v1375_v4 }
 0x33a   :  { %3478 = vpow2.f32 %v3345_v34  ;;  %v7355_v34 = vld [vmem:[%s10061_s1 + $0x78] sm:$0xff] }
 0x33b   :  { %1582 = vmatmul.f32.vlgmr.msra.gmra.mxu1 %v1381_v12  ;;  %1622 = vmatmul.f32.vlgmr.msra.gmra.mxu3 %v1381_v12 }
 0x33c   :  { %1791 = vmatpush.msra.mxu1 %v7174_v49  ;;  %1831 = vmatpush.msra.mxu3 %v7180_v27 }
 0x33d   :  { %v3475_v18 = vpop.eup %3474 }
 0x33e   :  { %v7183_v63 = vadd.f32 1.0, %v3475_v18  ;;  %1792 = vmatpush.msra.mxu1 %v7188_v58  ;;  %1832 = vmatpush.msra.mxu3 %v7194_v19  ;;  %v7313_v18 = vld [vmem:[%s10061_s1 + $0xd8] sm:$0xff] }
 0x33f   :  { %v3477_v54 = vpop.eup %3476 }
 0x340   :  { %v3479_v32 = vpop.eup %3478  ;;  %3480 = vrcp.f32 %v7183_v63  ;;  %1793 = vmatpush.msra.mxu1 %v7201_v10  ;;  %1833 = vmatpush.msra.mxu3 %v7207_v56  ;;  %v7210_v22 = vadd.f32 1.0, %v3477_v54  ;;  %v1491_v2 = vand.u32 2147483648, %v7183_v63  ;;  %v1489_v48 = vand.u32 2147483647, %v7183_v63 }
 0x341   :  { %v7212_v50 = vadd.f32 1.0, %v3479_v32  ;;  %vm1485_vm11 = vweird.f32 %v7183_v63 }
 0x342   :  { %1794 = vmatpush.msra.mxu1 %v7217_v36  ;;  %1834 = vmatpush.msra.mxu3 %v7223_v62  ;;  %3482 = vrcp.f32 %v7210_v22  ;;  %v1513_v57 = vand.u32 2147483648, %v7210_v22  ;;  %v1511_v4 = vand.u32 2147483647, %v7210_v22  ;;  %v1492_v54 = vor.u32 1.1754944e-38, %v1491_v2  ;;  %v7341_v2 = vld [vmem:[%s10061_s1 + $0x98] sm:$0xff] }
 0x343   :  { %1662 = vmatmul.f32.vlgmr.msrb.gmra.mxu1 %v1381_v12  ;;  %1702 = vmatmul.f32.vlgmr.msrb.gmra.mxu3 %v1381_v12  ;;  %3484 = vrcp.f32 %v7212_v50  ;;  %v7307_v12 = vld [vmem:[%s10061_s1 + $0xc8] sm:$0xff]  ;;  %vm1490_vm14 = vcmp.eq.f32.partialorder %v1489_v48, 8.507059e+37  ;;  %vm1507_vm15 = vweird.f32 %v7210_v22  ;;  %vm1531_vm6 = vweird.f32 %v7212_v50 }
 0x344   :  { %1795 = vmatpush.msra.mxu1 %v7231_v41  ;;  %1835 = vmatpush.msra.mxu3 %v7237_v26  ;;  %3486 = vtanh.f32 %v1517_v31  ;;  %v7328_v31 = vld [vmem:[%s10061_s1 + $0xb8] sm:$0xff]  ;;  %vm1512_vm4 = vcmp.eq.f32.partialorder %v1511_v4, 8.507059e+37 }
 0x345   :  { %v7369_v4 = vld [vmem:[%s10061_s1 + $0x58] sm:$0xff] }
 0x346   :  { %v3481_v43 = vpop.eup %3480  ;;  %1796 = vmatpush.msra.mxu1 %v7243_v42  ;;  %1836 = vmatpush.msra.mxu3 %v7249_v11 }
 0x347   :  { %v1481_v24 = vmul.f32 %v3481_v43, %v7183_v63  ;;  %vm1486_vm10 = vweird.f32 %v3481_v43 }
 0x348   :  { %1797 = vmatpush.msra.mxu1 %v7256_v8  ;;  %1837 = vmatpush.msra.mxu3 %v7262_v5  ;;  %v3483_v28 = vpop.eup %3482  ;;  %vm7299_vm12 = vmor %vm1485_vm11, %vm1486_vm10 }
 0x349   :  { %v1482_v15 = vsub.f32 1.0, %v1481_v24  ;;  %v7266_v40 = vpop.eup %3484  ;;  %v1503_v39 = vmul.f32 %v3483_v28, %v7210_v22  ;;  %vm1508_vm13 = vweird.f32 %v3483_v28  ;;  %v7335_v22 = vld [vmem:[%s10061_s1 + $0x88] sm:$0xff] }
 0x34a   :  { %1798 = vmatpush.msra.mxu1 %v7272_v25  ;;  %1838 = vmatpush.msra.mxu3 %v7278_v13  ;;  %v1527_v45 = vmul.f32 %v7266_v40, %v7212_v50  ;;  %vm1509_vm3 = vmor %vm1507_vm15, %vm1508_vm13  ;;  %vm1532_vm5 = vweird.f32 %v7266_v40 }
 0x34b   :  { %v1483_v53 = vmul.f32 %v3481_v43, %v1482_v15  ;;  %v1504_v51 = vsub.f32 1.0, %v1503_v39  ;;  %v7322_v15 = vld [vmem:[%s10061_s1 + $0xa8] sm:$0xff]  ;;  %v1514_v39 = vor.u32 1.1754944e-38, %v1513_v57  ;;  %vm7390_vm7 = vmor %vm1531_vm6, %vm1532_vm5 }
 0x34c   :  { %1799 = vmatpush.msra.mxu1 %v7288_v52  ;;  %1839 = vmatpush.msra.mxu3 %v7294_v44  ;;  %v1528_v32 = vsub.f32 1.0, %v1527_v45  ;;  %v3487_v45 = vpop.eup %3486  ;;  %v7349_v57 = vld [vmem:[%s10061_s1 + $0x68] sm:$0xff] }
 0x34d   :  { %v1484_v9 = vadd.f32 %v3481_v43, %v1483_v53  ;;  %v1505_v14 = vmul.f32 %v3483_v28, %v1504_v51 }
 0x34e   :  { %1800 = vmatpush.msra.mxu1 %v7307_v12  ;;  %1840 = vmatpush.msra.mxu3 %v7313_v18  ;;  %v1529_v51 = vmul.f32 %v7266_v40, %v1528_v32  ;;  %v7379_v32 = vld [vmem:[%s10061_s1 + $0x28] sm:$0xff] }
 0x34f   :  { %v1488_v63 = vsel %vm7299_vm12, %v3481_v43, %v1484_v9  ;;  %v1506_v24 = vadd.f32 %v3483_v28, %v1505_v14 }
 0x350   :  { %1801 = vmatpush.msra.mxu1 %v7322_v15  ;;  %1841 = vmatpush.msra.mxu3 %v7328_v31  ;;  %v1493_v43 = vsel %vm1490_vm14, %v1492_v54, %v1488_v63  ;;  %v1530_v63 = vadd.f32 %v7266_v40, %v1529_v51  ;;  %v1537_v54 = vand.u32 2147483648, %v7212_v50  ;;  %v7418_v51 = vld [vmem:[%s10062_s2 + $0x3e8] sm:$0xff] }
 0x351   :  { %v1510_v53 = vsel %vm1509_vm3, %v3483_v28, %v1506_v24  ;;  %v1542_v9 = vmul.f32 %v3487_v45, %v1493_v43  ;;  %v7385_v24 = vld [vmem:[%s10061_s1 + $0x38] sm:$0xff]  ;;  %v1535_v43 = vand.u32 2147483647, %v7212_v50 }
 0x352   :  { %1802 = vmatpush.msra.mxu1 %v7335_v22  ;;  %1842 = vmatpush.msra.mxu3 %v7341_v2  ;;  %v1515_v48 = vsel %vm1512_vm4, %v1514_v39, %v1510_v53  ;;  %v7397_v53 = vld [vmem:[%s10061_s1 + $0x8] sm:$0xff]  ;;  %v7403_v45 = vld [vmem:[%s10061_s1 + $0x18] sm:$0xff]  ;;  %v1534_v50 = vsel %vm7390_vm7, %v7266_v40, %v1530_v63  ;;  %v7424_v40 = vld [vmem:[%s10062_s2 + $0x3c0] sm:$0xff] }
 0x353   :  { %v1541_v28 = vmul.f32 %v1515_v48, %v6887_v47  ;;  %v7363_v47 = vld [vmem:[%s10061_s1 + $0x48] sm:$0xff]  ;;  %v7412_v48 = vld [vmem:[%s10062_s2 + $0x3e0] sm:$0xff]  ;;  %vm1536_vm8 = vcmp.eq.f32.partialorder %v1535_v43, 8.507059e+37 }
 0x354   :  { %1803 = vmatpush.msra.mxu1 %v7349_v57  ;;  %1843 = vmatpush.msra.mxu3 %v7355_v34  ;;  %11073 = vst [vmem:[#allocation33_spill] sm:$0xff] %v7412_v48  ;;  %v7444_v43 = vld [vmem:[%s10062_s2 + $0x3a8] sm:$0xff] }
 0x355   :  { %v7358_v14 = vadd.f32 %v1542_v9, %v1541_v28  ;;  %v1538_v28 = vor.u32 1.1754944e-38, %v1537_v54  ;;  %v7430_v9 = vld [vmem:[%s10062_s2 + $0x3c8] sm:$0xff]  ;;  %v7438_v54 = vld [vmem:[%s10062_s2 + $0x3a0] sm:$0xff] }
 0x356   :  { %1804 = vmatpush.msra.mxu1 %v7363_v47  ;;  %1844 = vmatpush.msra.mxu3 %v7369_v4 }
 0x357   :  { %3488 = vtanh.f32 %v7358_v14  ;;  %v1539_v39 = vsel %vm1536_vm8, %v1538_v28, %v1534_v50  ;;  %v7457_v50 = vld [vmem:[%s10062_s2 + $0x380] sm:$0xff] }
 0x358   :  { %1805 = vmatpush.msra.mxu1 %v7379_v32  ;;  %1845 = vmatpush.msra.mxu3 %v7385_v24  ;;  %v7554_v28 = vld [vmem:[%s10061_s1 + $0xe0] sm:$0xff] }
 0x359   :  { %11087 = vst [vmem:[#allocation46_spill] sm:$0xff] %v7554_v28 }
 0x35a   :  { %1806 = vmatpush.msra.mxu1 %v7397_v53  ;;  %1846 = vmatpush.msra.mxu3 %v7403_v45 }
 0x35c   :  { %1953 = vmatpush.msrb.mxu1 %v7412_v48  ;;  %1993 = vmatpush.msrb.mxu3 %v7418_v51 }
 0x35d   :  { %v3489_v63 = vpop.eup %3488 }
 0x35e   :  { %1954 = vmatpush.msrb.mxu1 %v7424_v40  ;;  %1994 = vmatpush.msrb.mxu3 %v7430_v9  ;;  %v7433_v48 = vmul.f32 %v3489_v63, %v1539_v39  ;;  %v7560_v63 = vld [vmem:[%s10062_s2 + $0x2c0] sm:$0xff] }
 0x35f   :  { %11088 = vst [vmem:[#allocation45_spill] sm:$0xff] %v7560_v63  ;;  %v7573_v39 = vld [vmem:[%s10061_s1 + $0xc0] sm:$0xff] }
 0x360   :  { %1955 = vmatpush.msrb.mxu1 %v7438_v54  ;;  %1995 = vmatpush.msrb.mxu3 %v7444_v43  ;;  %11090 = vst [vmem:[#allocation48_spill] sm:$0xff] %v7573_v39 }
 0x361   :  { %1562 = vmatmul.f32.vlgmr.msra.gmra.mxu0 %v7433_v48  ;;  %1602 = vmatmul.f32.vlgmr.msra.gmra.mxu2 %v7433_v48 }
 0x362   :  { %1771 = vmatpush.msra.mxu0 %v6915_v35  ;;  %1807 = vmatmul.f32.vlgmr.msra.gmra.mxu1 %v7433_v48  ;;  %v7464_v35 = vld [vmem:[%s10062_s2 + $0x388] sm:$0xff] }
 0x363   :  { %1811 = vmatpush.msra.mxu2 %v6922_v60  ;;  %1847 = vmatmul.f32.vlgmr.msra.gmra.mxu3 %v7433_v48  ;;  %11074 = vst [vmem:[#allocation37_spill] sm:$0xff] %v7464_v35  ;;  %v7471_v60 = vld [vmem:[%s10062_s2 + $0x360] sm:$0xff] }
 0x364   :  { %1772 = vmatpush.msra.mxu0 %v6929_v30  ;;  %1956 = vmatpush.msrb.mxu1 %v7457_v50  ;;  %11075 = vst [vmem:[#allocation35_spill] sm:$0xff] %v7471_v60  ;;  %v7478_v30 = vld [vmem:[%s10062_s2 + $0x368] sm:$0xff] }
 0x365   :  { %1812 = vmatpush.msra.mxu2 %v6936_v17  ;;  %1996 = vmatpush.msrb.mxu3 %v7464_v35  ;;  %11076 = vst [vmem:[#allocation38_spill] sm:$0xff] %v7478_v30  ;;  %v7485_v17 = vld [vmem:[%s10062_s2 + $0x340] sm:$0xff] }
 0x366   :  { %1773 = vmatpush.msra.mxu0 %v6943_v1  ;;  %1957 = vmatpush.msrb.mxu1 %v7471_v60  ;;  %11077 = vst [vmem:[#allocation36_spill] sm:$0xff] %v7485_v17  ;;  %v7496_v1 = vld [vmem:[%s10062_s2 + $0x348] sm:$0xff] }
 0x367   :  { %1813 = vmatpush.msra.mxu2 %v6950_v20  ;;  %1997 = vmatpush.msrb.mxu3 %v7478_v30  ;;  %11078 = vst [vmem:[#allocation40_spill] sm:$0xff] %v7496_v1  ;;  %v7503_v20 = vld [vmem:[%s10062_s2 + $0x320] sm:$0xff] }
 0x368   :  { %1774 = vmatpush.msra.mxu0 %v6957_v46  ;;  %1958 = vmatpush.msrb.mxu1 %v7485_v17  ;;  %11079 = vst [vmem:[#allocation39_spill] sm:$0xff] %v7503_v20  ;;  %v7510_v46 = vld [vmem:[%s10062_s2 + $0x328] sm:$0xff] }
 0x369   :  { %1814 = vmatpush.msra.mxu2 %v6964_v21  ;;  %1642 = vmatmul.f32.vlgmr.msrb.gmra.mxu0 %v7433_v48  ;;  %11080 = vst [vmem:[#allocation2_spill] sm:$0xff] %v7510_v46  ;;  %v7516_v21 = vld [vmem:[%s10061_s1 + $0x120] sm:$0xff] }
 0x36a   :  { %1682 = vmatmul.f32.vlgmr.msrb.gmra.mxu2 %v7433_v48  ;;  %1775 = vmatpush.msra.mxu0 %v6972_v29  ;;  %11081 = vst [vmem:[#allocation42_spill] sm:$0xff] %v7516_v21  ;;  %v7522_v29 = vld [vmem:[%s10062_s2 + $0x300] sm:$0xff] }
 0x36b   :  { %1815 = vmatpush.msra.mxu2 %v6978_v55  ;;  %1998 = vmatpush.msrb.mxu3 %v7496_v1  ;;  %11082 = vst [vmem:[#allocation41_spill] sm:$0xff] %v7522_v29  ;;  %v7529_v55 = vld [vmem:[%s10062_s2 + $0x308] sm:$0xff] }
 0x36c   :  { %1776 = vmatpush.msra.mxu0 %v6985_v59  ;;  %1959 = vmatpush.msrb.mxu1 %v7503_v20  ;;  %11083 = vst [vmem:[#allocation3_spill] sm:$0xff] %v7529_v55  ;;  %v7535_v59 = vld [vmem:[%s10061_s1 + $0x100] sm:$0xff] }
 0x36d   :  { %1816 = vmatpush.msra.mxu2 %v6992_v7  ;;  %1999 = vmatpush.msrb.mxu3 %v7510_v46  ;;  %11084 = vst [vmem:[#allocation44_spill] sm:$0xff] %v7535_v59  ;;  %v7541_v7 = vld [vmem:[%s10062_s2 + $0x2e0] sm:$0xff] }
 0x36e   :  { %1777 = vmatpush.msra.mxu0 %v7516_v21  ;;  %1960 = vmatpush.msrb.mxu1 %v7522_v29  ;;  %11085 = vst [vmem:[#allocation43_spill] sm:$0xff] %v7541_v7 }
 0x36f   :  { %1817 = vmatpush.msra.mxu2 %v7001_v3  ;;  %2000 = vmatpush.msrb.mxu3 %v7529_v55  ;;  %v7548_v3 = vld [vmem:[%s10062_s2 + $0x2e8] sm:$0xff] }
 0x370   :  { %1778 = vmatpush.msra.mxu0 %v7535_v59  ;;  %1961 = vmatpush.msrb.mxu1 %v7541_v7  ;;  %11086 = vst [vmem:[#allocation4_spill] sm:$0xff] %v7548_v3 }
 0x371   :  { %1818 = vmatpush.msra.mxu2 %v7010_v61  ;;  %2001 = vmatpush.msrb.mxu3 %v7548_v3  ;;  %v7567_v61 = vld [vmem:[%s10062_s2 + $0x2c8] sm:$0xff] }
 0x372   :  { %1779 = vmatpush.msra.mxu0 %v7554_v28  ;;  %1962 = vmatpush.msrb.mxu1 %v7560_v63  ;;  %11089 = vst [vmem:[#allocation6_spill] sm:$0xff] %v7567_v61  ;;  %v7579_v63 = vld [vmem:[%s10062_s2 + $0x2a0] sm:$0xff] }
 0x373   :  { %1819 = vmatpush.msra.mxu2 %v7019_v6  ;;  %2002 = vmatpush.msrb.mxu3 %v7567_v61  ;;  %11091 = vst [vmem:[#allocation47_spill] sm:$0xff] %v7579_v63  ;;  %v7586_v6 = vld [vmem:[%s10062_s2 + $0x2a8] sm:$0xff] }
 0x374   :  { %1780 = vmatpush.msra.mxu0 %v7573_v39  ;;  %1963 = vmatpush.msrb.mxu1 %v7579_v63  ;;  %11092 = vst [vmem:[#allocation8_spill] sm:$0xff] %v7586_v6  ;;  %v7592_v39 = vld [vmem:[%s10061_s1 + $0xa0] sm:$0xff] }
 0x375   :  { %1820 = vmatpush.msra.mxu2 %v7028_v23  ;;  %2003 = vmatpush.msrb.mxu3 %v7586_v6  ;;  %11093 = vst [vmem:[#allocation51_spill] sm:$0xff] %v7592_v39  ;;  %v7598_v63 = vld [vmem:[%s10062_s2 + $0x280] sm:$0xff]  ;;  %v7604_v23 = vld [vmem:[%s10061_s1 + $0xb0] sm:$0xff]  ;;  %v7610_v6 = vld [vmem:[%s10062_s2 + $0x288] sm:$0xff] }
 0x376   :  { %1781 = vmatpush.msra.mxu0 %v7592_v39  ;;  %11094 = vst [vmem:[#allocation5_spill] sm:$0xff] %v7598_v63  ;;  %1964 = vmatpush.msrb.mxu1 %v7598_v63  ;;  %v7616_v39 = vld [vmem:[%s10061_s1 + $0x80] sm:$0xff] }
 0x377   :  { %11095 = vst [vmem:[#allocation52_spill] sm:$0xff] %v7604_v23  ;;  %1821 = vmatpush.msra.mxu2 %v7604_v23  ;;  %2004 = vmatpush.msrb.mxu3 %v7610_v6  ;;  %v7622_v63 = vld [vmem:[%s10062_s2 + $0x260] sm:$0xff]  ;;  %v7628_v23 = vld [vmem:[%s10061_s1 + $0x90] sm:$0xff] }
 0x378   :  { %11096 = vst [vmem:[#allocation10_spill] sm:$0xff] %v7610_v6  ;;  %1782 = vmatpush.msra.mxu0 %v7616_v39  ;;  %1965 = vmatpush.msrb.mxu1 %v7622_v63  ;;  %v7634_v6 = vld [vmem:[%s10062_s2 + $0x268] sm:$0xff] }
 0x379   :  { %11097 = vst [vmem:[#allocation55_spill] sm:$0xff] %v7616_v39  ;;  %1822 = vmatpush.msra.mxu2 %v7628_v23  ;;  %2005 = vmatpush.msrb.mxu3 %v7634_v6  ;;  %v7640_v39 = vld [vmem:[%s10061_s1 + $0x60] sm:$0xff] }
 0x37a   :  { %11098 = vst [vmem:[#allocation7_spill] sm:$0xff] %v7622_v63  ;;  %1783 = vmatpush.msra.mxu0 %v7640_v39  ;;  %v7646_v63 = vld [vmem:[%s10062_s2 + $0x240] sm:$0xff] }
 0x37b   :  { %11099 = vst [vmem:[#allocation56_spill] sm:$0xff] %v7628_v23  ;;  %1966 = vmatpush.msrb.mxu1 %v7646_v63  ;;  %v7652_v23 = vld [vmem:[%s10061_s1 + $0x70] sm:$0xff] }
 0x37c   :  { %11100 = vst [vmem:[#allocation12_spill] sm:$0xff] %v7634_v6  ;;  %1823 = vmatpush.msra.mxu2 %v7652_v23  ;;  %v7658_v6 = vld [vmem:[%s10062_s2 + $0x248] sm:$0xff] }
 0x37d   :  { %11101 = vst [vmem:[#allocation59_spill] sm:$0xff] %v7640_v39  ;;  %2006 = vmatpush.msrb.mxu3 %v7658_v6  ;;  %v7664_v39 = vld [vmem:[%s10061_s1 + $0x40] sm:$0xff] }
 0x37e   :  { %11102 = vst [vmem:[#allocation9_spill] sm:$0xff] %v7646_v63  ;;  %1784 = vmatpush.msra.mxu0 %v7664_v39  ;;  %v7670_v63 = vld [vmem:[%s10062_s2 + $0x220] sm:$0xff] }
 0x37f   :  { %11103 = vst [vmem:[#allocation60_spill] sm:$0xff] %v7652_v23  ;;  %1967 = vmatpush.msrb.mxu1 %v7670_v63  ;;  %v7676_v23 = vld [vmem:[%s10061_s1 + $0x50] sm:$0xff] }
 0x380   :  { %11104 = vst [vmem:[#allocation14_spill] sm:$0xff] %v7658_v6  ;;  %1824 = vmatpush.msra.mxu2 %v7676_v23  ;;  %v7682_v6 = vld [vmem:[%s10062_s2 + $0x228] sm:$0xff] }
 0x381   :  { %11105 = vst [vmem:[#allocation63_spill] sm:$0xff] %v7664_v39  ;;  %2007 = vmatpush.msrb.mxu3 %v7682_v6  ;;  %v7688_v39 = vld [vmem:[%s10061_s1 + $0x20] sm:$0xff] }
 0x382   :  { %11106 = vst [vmem:[#allocation11_spill] sm:$0xff] %v7670_v63  ;;  %1785 = vmatpush.msra.mxu0 %v7688_v39  ;;  %v7694_v63 = vld [vmem:[%s10062_s2 + $0x200] sm:$0xff] }
 0x383   :  { %11107 = vst [vmem:[#allocation64_spill] sm:$0xff] %v7676_v23  ;;  %1968 = vmatpush.msrb.mxu1 %v7694_v63  ;;  %v7700_v23 = vld [vmem:[%s10061_s1 + $0x30] sm:$0xff] }
 0x384   :  { %11108 = vst [vmem:[#allocation16_spill] sm:$0xff] %v7682_v6  ;;  %1825 = vmatpush.msra.mxu2 %v7700_v23  ;;  %v7706_v6 = vld [vmem:[%s10062_s2 + $0x208] sm:$0xff] }
 0x385   :  { %11109 = vst [vmem:[#allocation67_spill] sm:$0xff] %v7688_v39  ;;  %2008 = vmatpush.msrb.mxu3 %v7706_v6  ;;  %v7712_v39 = vld [vmem:[%s10061_s1] sm:$0xff] }
 0x386   :  { %11110 = vst [vmem:[#allocation13_spill] sm:$0xff] %v7694_v63  ;;  %1786 = vmatpush.msra.mxu0 %v7712_v39  ;;  %v7718_v63 = vld [vmem:[%s10062_s2 + $0x3f0] sm:$0xff] }
 0x387   :  { %11111 = vst [vmem:[#allocation68_spill] sm:$0xff] %v7700_v23  ;;  %2033 = vmatpush.msra.mxu1 %v7718_v63  ;;  %v7724_v23 = vld [vmem:[%s10061_s1 + $0x10] sm:$0xff]  ;;  %1787 = vmatmul.f32.vlgmr.msra.gmra.mxu0 %v7433_v48 }
 0x388   :  { %11112 = vst [vmem:[#allocation17_spill] sm:$0xff] %v7706_v6  ;;  %1826 = vmatpush.msra.mxu2 %v7724_v23 }
 0x389   :  { %11113 = vst [vmem:[#allocation71_spill] sm:$0xff] %v7712_v39  ;;  %1827 = vmatmul.f32.vlgmr.msra.gmra.mxu2 %v7433_v48  ;;  %v7732_v39 = vld [vmem:[%s10062_s2 + $0x1e0] sm:$0xff] }
 0x38a   :  { %11114 = vst [vmem:[#allocation15_spill] sm:$0xff] %v7718_v63  ;;  %1933 = vmatpush.msrb.mxu0 %v7732_v39  ;;  %v7738_v63 = vld [vmem:[%s10062_s2 + $0x1e8] sm:$0xff]  ;;  %v7750_v48 = vld [vmem:[%s10062_s2 + $0x1c0] sm:$0xff] }
 0x38b   :  { %11115 = vst [vmem:[#allocation18_spill] sm:$0xff] %v7724_v23  ;;  %1973 = vmatpush.msrb.mxu2 %v7738_v63  ;;  %v7744_v23 = vld [vmem:[%s10062_s2 + $0x3f8] sm:$0xff] }
 0x38c   :  { %11116 = vst [vmem:[#allocation19_spill] sm:$0xff] %v7732_v39  ;;  %2073 = vmatpush.msra.mxu3 %v7744_v23  ;;  %1934 = vmatpush.msrb.mxu0 %v7750_v48  ;;  %v7756_v39 = vld [vmem:[%s10062_s2 + $0x3d0] sm:$0xff] }
 0x38d   :  { %11117 = vst [vmem:[#allocation72_spill] sm:$0xff] %v7738_v63  ;;  %2034 = vmatpush.msra.mxu1 %v7756_v39  ;;  %v7762_v63 = vld [vmem:[%s10062_s2 + $0x1c8] sm:$0xff] }
 0x38e   :  { %11118 = vst [vmem:[#allocation20_spill] sm:$0xff] %v7744_v23  ;;  %1974 = vmatpush.msrb.mxu2 %v7762_v63  ;;  %v7768_v23 = vld [vmem:[%s10062_s2 + $0x3d8] sm:$0xff] }
 0x38f   :  { %11119 = vst [vmem:[#allocation75_spill] sm:$0xff] %v7750_v48  ;;  %2074 = vmatpush.msra.mxu3 %v7768_v23  ;;  %v7774_v48 = vld [vmem:[%s10062_s2 + $0x1a0] sm:$0xff] }
 0x390   :  { %11120 = vst [vmem:[#allocation21_spill] sm:$0xff] %v7756_v39  ;;  %1935 = vmatpush.msrb.mxu0 %v7774_v48  ;;  %v7780_v39 = vld [vmem:[%s10062_s2 + $0x3b0] sm:$0xff] }
 0x391   :  { %11121 = vst [vmem:[#allocation76_spill] sm:$0xff] %v7762_v63  ;;  %2035 = vmatpush.msra.mxu1 %v7780_v39  ;;  %v7786_v63 = vld [vmem:[%s10062_s2 + $0x1a8] sm:$0xff] }
 0x392   :  { %11122 = vst [vmem:[#allocation22_spill] sm:$0xff] %v7768_v23  ;;  %1975 = vmatpush.msrb.mxu2 %v7786_v63  ;;  %v7792_v23 = vld [vmem:[%s10062_s2 + $0x3b8] sm:$0xff] }
 0x393   :  { %11123 = vst [vmem:[#allocation79_spill] sm:$0xff] %v7774_v48  ;;  %2075 = vmatpush.msra.mxu3 %v7792_v23  ;;  %v7798_v48 = vld [vmem:[%s10062_s2 + $0x180] sm:$0xff] }
 0x394   :  { %11124 = vst [vmem:[#allocation23_spill] sm:$0xff] %v7780_v39  ;;  %1936 = vmatpush.msrb.mxu0 %v7798_v48  ;;  %v7804_v39 = vld [vmem:[%s10062_s2 + $0x390] sm:$0xff] }
 0x395   :  { %11125 = vst [vmem:[#allocation80_spill] sm:$0xff] %v7786_v63  ;;  %2036 = vmatpush.msra.mxu1 %v7804_v39  ;;  %v7810_v63 = vld [vmem:[%s10062_s2 + $0x188] sm:$0xff] }
 0x396   :  { %11126 = vst [vmem:[#allocation24_spill] sm:$0xff] %v7792_v23  ;;  %1976 = vmatpush.msrb.mxu2 %v7810_v63  ;;  %v7816_v23 = vld [vmem:[%s10062_s2 + $0x398] sm:$0xff] }
 0x397   :  { %11127 = vst [vmem:[#allocation83_spill] sm:$0xff] %v7798_v48  ;;  %2076 = vmatpush.msra.mxu3 %v7816_v23  ;;  %v7822_v48 = vld [vmem:[%s10062_s2 + $0x160] sm:$0xff] }
 0x398   :  { %11128 = vst [vmem:[#allocation25_spill] sm:$0xff] %v7804_v39  ;;  %1937 = vmatpush.msrb.mxu0 %v7822_v48  ;;  %v7828_v39 = vld [vmem:[%s10062_s2 + $0x370] sm:$0xff] }
 0x399   :  { %11129 = vst [vmem:[#allocation84_spill] sm:$0xff] %v7810_v63  ;;  %2037 = vmatpush.msra.mxu1 %v7828_v39  ;;  %v7834_v63 = vld [vmem:[%s10062_s2 + $0x168] sm:$0xff] }
 0x39a   :  { %11130 = vst [vmem:[#allocation26_spill] sm:$0xff] %v7816_v23  ;;  %1977 = vmatpush.msrb.mxu2 %v7834_v63  ;;  %v7840_v23 = vld [vmem:[%s10062_s2 + $0x378] sm:$0xff] }
 0x39b   :  { %11131 = vst [vmem:[#allocation27_spill] sm:$0xff] %v7822_v48  ;;  %2077 = vmatpush.msra.mxu3 %v7840_v23  ;;  %v7846_v48 = vld [vmem:[%s10062_s2 + $0x140] sm:$0xff] }
 0x39c   :  { %11132 = vst [vmem:[#allocation28_spill] sm:$0xff] %v7828_v39  ;;  %1938 = vmatpush.msrb.mxu0 %v7846_v48  ;;  %v7852_v39 = vld [vmem:[%s10062_s2 + $0x350] sm:$0xff] }
 0x39d   :  { %11133 = vst [vmem:[#allocation29_spill] sm:$0xff] %v7834_v63  ;;  %2038 = vmatpush.msra.mxu1 %v7852_v39  ;;  %v7858_v63 = vld [vmem:[%s10062_s2 + $0x148] sm:$0xff] }
 0x39e   :  { %11134 = vst [vmem:[#allocation49_spill] sm:$0xff] %v7840_v23  ;;  %1978 = vmatpush.msrb.mxu2 %v7858_v63  ;;  %v7864_v23 = vld [vmem:[%s10062_s2 + $0x358] sm:$0xff] }
 0x39f   :  { %11135 = vst [vmem:[#allocation50_spill] sm:$0xff] %v7846_v48  ;;  %2078 = vmatpush.msra.mxu3 %v7864_v23  ;;  %v7870_v48 = vld [vmem:[%s10062_s2 + $0x120] sm:$0xff] }
 0x3a0   :  { %11136 = vst [vmem:[#allocation53_spill] sm:$0xff] %v7852_v39  ;;  %1939 = vmatpush.msrb.mxu0 %v7870_v48  ;;  %v7876_v39 = vld [vmem:[%s10062_s2 + $0x330] sm:$0xff] }
 0x3a1   :  { %11137 = vst [vmem:[#allocation54_spill] sm:$0xff] %v7858_v63  ;;  %2039 = vmatpush.msra.mxu1 %v7876_v39  ;;  %v7882_v63 = vld [vmem:[%s10062_s2 + $0x128] sm:$0xff] }
 0x3a2   :  { %11138 = vst [vmem:[#allocation57_spill] sm:$0xff] %v7864_v23  ;;  %1979 = vmatpush.msrb.mxu2 %v7882_v63  ;;  %v7888_v23 = vld [vmem:[%s10062_s2 + $0x338] sm:$0xff] }
 0x3a3   :  { %11139 = vst [vmem:[#allocation58_spill] sm:$0xff] %v7870_v48  ;;  %2079 = vmatpush.msra.mxu3 %v7888_v23  ;;  %v7894_v48 = vld [vmem:[%s10062_s2 + $0x100] sm:$0xff] }
 0x3a4   :  { %11140 = vst [vmem:[#allocation61_spill] sm:$0xff] %v7876_v39  ;;  %1940 = vmatpush.msrb.mxu0 %v7894_v48  ;;  %v7900_v39 = vld [vmem:[%s10062_s2 + $0x310] sm:$0xff] }
 0x3a5   :  { %11141 = vst [vmem:[#allocation62_spill] sm:$0xff] %v7882_v63  ;;  %2040 = vmatpush.msra.mxu1 %v7900_v39  ;;  %v7906_v63 = vld [vmem:[%s10062_s2 + $0x108] sm:$0xff] }
 0x3a6   :  { %11142 = vst [vmem:[#allocation65_spill] sm:$0xff] %v7888_v23  ;;  %1980 = vmatpush.msrb.mxu2 %v7906_v63  ;;  %v7912_v23 = vld [vmem:[%s10062_s2 + $0x318] sm:$0xff] }
 0x3a7   :  { %11143 = vst [vmem:[#allocation66_spill] sm:$0xff] %v7894_v48  ;;  %2080 = vmatpush.msra.mxu3 %v7912_v23  ;;  %v7918_v48 = vld [vmem:[%s10062_s2 + $0xe0] sm:$0xff] }
 0x3a8   :  { %11144 = vst [vmem:[#allocation69_spill] sm:$0xff] %v7900_v39  ;;  %1941 = vmatpush.msrb.mxu0 %v7918_v48  ;;  %v7924_v39 = vld [vmem:[%s10062_s2 + $0x2f0] sm:$0xff] }
 0x3a9   :  { %11145 = vst [vmem:[#allocation70_spill] sm:$0xff] %v7906_v63  ;;  %2041 = vmatpush.msra.mxu1 %v7924_v39  ;;  %v7930_v63 = vld [vmem:[%s10062_s2 + $0xe8] sm:$0xff] }
 0x3aa   :  { %11146 = vst [vmem:[#allocation73_spill] sm:$0xff] %v7912_v23  ;;  %1981 = vmatpush.msrb.mxu2 %v7930_v63  ;;  %v7936_v23 = vld [vmem:[%s10062_s2 + $0x2f8] sm:$0xff] }
 0x3ab   :  { %11147 = vst [vmem:[#allocation74_spill] sm:$0xff] %v7918_v48  ;;  %2081 = vmatpush.msra.mxu3 %v7936_v23  ;;  %v7942_v48 = vld [vmem:[%s10062_s2 + $0xc0] sm:$0xff] }
 0x3ac   :  { %11148 = vst [vmem:[#allocation77_spill] sm:$0xff] %v7924_v39  ;;  %1942 = vmatpush.msrb.mxu0 %v7942_v48  ;;  %v7948_v39 = vld [vmem:[%s10062_s2 + $0x2d0] sm:$0xff] }
 0x3ad   :  { %11149 = vst [vmem:[#allocation78_spill] sm:$0xff] %v7930_v63  ;;  %2042 = vmatpush.msra.mxu1 %v7948_v39  ;;  %v7954_v63 = vld [vmem:[%s10062_s2 + $0xc8] sm:$0xff] }
 0x3ae   :  { %11150 = vst [vmem:[#allocation81_spill] sm:$0xff] %v7936_v23  ;;  %1982 = vmatpush.msrb.mxu2 %v7954_v63  ;;  %v7960_v23 = vld [vmem:[%s10062_s2 + $0x2d8] sm:$0xff] }
 0x3af   :  { %11151 = vst [vmem:[#allocation82_spill] sm:$0xff] %v7942_v48  ;;  %2082 = vmatpush.msra.mxu3 %v7960_v23  ;;  %v7966_v48 = vld [vmem:[%s10062_s2 + $0xa0] sm:$0xff] }
 0x3b0   :  { %11152 = vst [vmem:[#allocation85_spill] sm:$0xff] %v7948_v39  ;;  %1943 = vmatpush.msrb.mxu0 %v7966_v48  ;;  %v7972_v39 = vld [vmem:[%s10062_s2 + $0x2b0] sm:$0xff] }
 0x3b1   :  { %11153 = vst [vmem:[#allocation86_spill] sm:$0xff] %v7954_v63  ;;  %2043 = vmatpush.msra.mxu1 %v7972_v39  ;;  %v7978_v63 = vld [vmem:[%s10062_s2 + $0xa8] sm:$0xff] }
 0x3b2   :  { %11154 = vst [vmem:[#allocation87_spill] sm:$0xff] %v7960_v23  ;;  %1983 = vmatpush.msrb.mxu2 %v7978_v63  ;;  %v7984_v23 = vld [vmem:[%s10062_s2 + $0x2b8] sm:$0xff] }
 0x3b3   :  { %11155 = vst [vmem:[#allocation88_spill] sm:$0xff] %v7966_v48  ;;  %2083 = vmatpush.msra.mxu3 %v7984_v23  ;;  %v7990_v48 = vld [vmem:[%s10062_s2 + $0x80] sm:$0xff] }
 0x3b4   :  { %11156 = vst [vmem:[#allocation89_spill] sm:$0xff] %v7972_v39  ;;  %1944 = vmatpush.msrb.mxu0 %v7990_v48  ;;  %v7996_v39 = vld [vmem:[%s10062_s2 + $0x290] sm:$0xff] }
 0x3b5   :  { %11157 = vst [vmem:[#allocation90_spill] sm:$0xff] %v7978_v63  ;;  %2044 = vmatpush.msra.mxu1 %v7996_v39  ;;  %v8002_v63 = vld [vmem:[%s10062_s2 + $0x88] sm:$0xff] }
 0x3b6   :  { %11158 = vst [vmem:[#allocation91_spill] sm:$0xff] %v7984_v23  ;;  %1984 = vmatpush.msrb.mxu2 %v8002_v63  ;;  %v8008_v23 = vld [vmem:[%s10062_s2 + $0x298] sm:$0xff] }
 0x3b7   :  { %11159 = vst [vmem:[#allocation92_spill] sm:$0xff] %v7990_v48  ;;  %2084 = vmatpush.msra.mxu3 %v8008_v23  ;;  %v8014_v48 = vld [vmem:[%s10062_s2 + $0x60] sm:$0xff] }
 0x3b8   :  { %11160 = vst [vmem:[#allocation93_spill] sm:$0xff] %v7996_v39  ;;  %1945 = vmatpush.msrb.mxu0 %v8014_v48  ;;  %v8020_v39 = vld [vmem:[%s10062_s2 + $0x270] sm:$0xff]  ;;  %v1583_v61 = vpop.f32.mrf.mxu1 }
 0x3b9   :  { %11161 = vst [vmem:[#allocation94_spill] sm:$0xff] %v8002_v63  ;;  %2045 = vmatpush.msra.mxu1 %v8020_v39  ;;  %v8026_v63 = vld [vmem:[%s10062_s2 + $0x68] sm:$0xff] }
 0x3ba   :  { %11162 = vst [vmem:[#allocation95_spill] sm:$0xff] %v8008_v23  ;;  %1985 = vmatpush.msrb.mxu2 %v8026_v63  ;;  %v8032_v23 = vld [vmem:[%s10062_s2 + $0x278] sm:$0xff] }
 0x3bb   :  { %11163 = vst [vmem:[#allocation96_spill] sm:$0xff] %v8014_v48  ;;  %2085 = vmatpush.msra.mxu3 %v8032_v23  ;;  %v8038_v48 = vld [vmem:[%s10062_s2 + $0x40] sm:$0xff] }
 0x3bc   :  { %11164 = vst [vmem:[#allocation97_spill] sm:$0xff] %v8020_v39  ;;  %1946 = vmatpush.msrb.mxu0 %v8038_v48  ;;  %v8044_v39 = vld [vmem:[%s10062_s2 + $0x250] sm:$0xff] }
 0x3bd   :  { %11165 = vst [vmem:[#allocation98_spill] sm:$0xff] %v8026_v63  ;;  %2046 = vmatpush.msra.mxu1 %v8044_v39  ;;  %v8050_v63 = vld [vmem:[%s10062_s2 + $0x48] sm:$0xff] }
 0x3be   :  { %11166 = vst [vmem:[#allocation99_spill] sm:$0xff] %v8032_v23  ;;  %1986 = vmatpush.msrb.mxu2 %v8050_v63  ;;  %v8056_v23 = vld [vmem:[%s10062_s2 + $0x258] sm:$0xff]  ;;  %v1623_v59 = vpop.f32.mrf.mxu3 }
 0x3bf   :  { %11167 = vst [vmem:[#allocation100_spill] sm:$0xff] %v8038_v48  ;;  %2086 = vmatpush.msra.mxu3 %v8056_v23  ;;  %v8062_v48 = vld [vmem:[%s10062_s2 + $0x20] sm:$0xff] }
 0x3c0   :  { %11168 = vst [vmem:[#allocation101_spill] sm:$0xff] %v8044_v39  ;;  %1947 = vmatpush.msrb.mxu0 %v8062_v48  ;;  %v8068_v39 = vld [vmem:[%s10062_s2 + $0x230] sm:$0xff] }
 0x3c1   :  { %11169 = vst [vmem:[#allocation102_spill] sm:$0xff] %v8050_v63  ;;  %2047 = vmatpush.msra.mxu1 %v8068_v39  ;;  %v8074_v63 = vld [vmem:[%s10062_s2 + $0x28] sm:$0xff] }
 0x3c2   :  { %11170 = vst [vmem:[#allocation103_spill] sm:$0xff] %v8056_v23  ;;  %1987 = vmatpush.msrb.mxu2 %v8074_v63  ;;  %v8080_v23 = vld [vmem:[%s10062_s2 + $0x238] sm:$0xff] }
 0x3c3   :  { %11171 = vst [vmem:[#allocation104_spill] sm:$0xff] %v8062_v48  ;;  %2087 = vmatpush.msra.mxu3 %v8080_v23  ;;  %v8086_v48 = vld [vmem:[%s10062_s2] sm:$0xff] }
 0x3c4   :  { %11172 = vst [vmem:[#allocation105_spill] sm:$0xff] %v8068_v39  ;;  %1948 = vmatpush.msrb.mxu0 %v8086_v48  ;;  %v8092_v39 = vld [vmem:[%s10062_s2 + $0x210] sm:$0xff] }
 0x3c5   :  { %11173 = vst [vmem:[#allocation106_spill] sm:$0xff] %v8074_v63  ;;  %2048 = vmatpush.msra.mxu1 %v8092_v39  ;;  %v8098_v63 = vld [vmem:[%s10062_s2 + $0x8] sm:$0xff] }
 0x3c6   :  { %11174 = vst [vmem:[#allocation107_spill] sm:$0xff] %v8080_v23  ;;  %1988 = vmatpush.msrb.mxu2 %v8098_v63  ;;  %v8104_v23 = vld [vmem:[%s10062_s2 + $0x218] sm:$0xff]  ;;  %v1703_v20 = vpop.f32.mrf.mxu3 }
 0x3c7   :  { %11175 = vst [vmem:[#allocation108_spill] sm:$0xff] %v8086_v48  ;;  %2088 = vmatpush.msra.mxu3 %v8104_v23  ;;  %v8110_v48 = vld [vmem:[%s10062_s2 + $0x1f0] sm:$0xff] }
 0x3c8   :  { %11176 = vst [vmem:[#allocation109_spill] sm:$0xff] %v8092_v39  ;;  %2013 = vmatpush.msra.mxu0 %v8110_v48  ;;  %v8116_v39 = vld [vmem:[%s10062_s2 + $0x1f8] sm:$0xff] }
 0x3c9   :  { %11177 = vst [vmem:[#allocation110_spill] sm:$0xff] %v8098_v63  ;;  %2053 = vmatpush.msra.mxu2 %v8116_v39  ;;  %v8122_v63 = vld [vmem:[%s10062_s2 + $0x1d0] sm:$0xff] }
 0x3ca   :  { %11178 = vst [vmem:[#allocation111_spill] sm:$0xff] %v8104_v23  ;;  %2014 = vmatpush.msra.mxu0 %v8122_v63  ;;  %v8128_v23 = vld [vmem:[%s10062_s2 + $0x1d8] sm:$0xff] }
 0x3cb   :  { %11179 = vst [vmem:[#allocation112_spill] sm:$0xff] %v8110_v48  ;;  %2054 = vmatpush.msra.mxu2 %v8128_v23  ;;  %v8134_v48 = vld [vmem:[%s10062_s2 + $0x1b0] sm:$0xff] }
 0x3cc   :  { %11180 = vst [vmem:[#allocation113_spill] sm:$0xff] %v8116_v39  ;;  %2015 = vmatpush.msra.mxu0 %v8134_v48  ;;  %v8140_v39 = vld [vmem:[%s10062_s2 + $0x1b8] sm:$0xff] }
 0x3cd   :  { %11181 = vst [vmem:[#allocation114_spill] sm:$0xff] %v8122_v63  ;;  %2055 = vmatpush.msra.mxu2 %v8140_v39  ;;  %v8146_v63 = vld [vmem:[%s10062_s2 + $0x190] sm:$0xff] }
 0x3ce   :  { %11182 = vst [vmem:[#allocation115_spill] sm:$0xff] %v8128_v23  ;;  %2016 = vmatpush.msra.mxu0 %v8146_v63  ;;  %v8152_v23 = vld [vmem:[%s10062_s2 + $0x198] sm:$0xff] }
 0x3cf   :  { %11183 = vst [vmem:[#allocation116_spill] sm:$0xff] %v8134_v48  ;;  %2056 = vmatpush.msra.mxu2 %v8152_v23  ;;  %v8158_v48 = vld [vmem:[%s10062_s2 + $0x170] sm:$0xff] }
 0x3d0   :  { %11184 = vst [vmem:[#allocation117_spill] sm:$0xff] %v8140_v39  ;;  %2017 = vmatpush.msra.mxu0 %v8158_v48  ;;  %v8164_v39 = vld [vmem:[%s10062_s2 + $0x178] sm:$0xff] }
 0x3d1   :  { %11185 = vst [vmem:[#allocation118_spill] sm:$0xff] %v8146_v63  ;;  %2057 = vmatpush.msra.mxu2 %v8164_v39  ;;  %v8170_v63 = vld [vmem:[%s10062_s2 + $0x150] sm:$0xff] }
 0x3d2   :  { %11186 = vst [vmem:[#allocation119_spill] sm:$0xff] %v8152_v23  ;;  %2018 = vmatpush.msra.mxu0 %v8170_v63  ;;  %v8176_v23 = vld [vmem:[%s10062_s2 + $0x158] sm:$0xff] }
 0x3d3   :  { %11187 = vst [vmem:[#allocation120_spill] sm:$0xff] %v8158_v48  ;;  %2058 = vmatpush.msra.mxu2 %v8176_v23  ;;  %v8182_v48 = vld [vmem:[%s10062_s2 + $0x130] sm:$0xff] }
 0x3d4   :  { %11188 = vst [vmem:[#allocation121_spill] sm:$0xff] %v8164_v39  ;;  %2019 = vmatpush.msra.mxu0 %v8182_v48  ;;  %v8188_v39 = vld [vmem:[%s10062_s2 + $0x138] sm:$0xff] }
 0x3d5   :  { %11189 = vst [vmem:[#allocation122_spill] sm:$0xff] %v8170_v63  ;;  %2059 = vmatpush.msra.mxu2 %v8188_v39  ;;  %v8194_v63 = vld [vmem:[%s10062_s2 + $0x110] sm:$0xff] }
 0x3d6   :  { %11190 = vst [vmem:[#allocation123_spill] sm:$0xff] %v8176_v23  ;;  %2020 = vmatpush.msra.mxu0 %v8194_v63  ;;  %v8200_v23 = vld [vmem:[%s10062_s2 + $0x118] sm:$0xff] }
 0x3d7   :  { %11191 = vst [vmem:[#allocation124_spill] sm:$0xff] %v8182_v48  ;;  %2060 = vmatpush.msra.mxu2 %v8200_v23  ;;  %v8206_v48 = vld [vmem:[%s10062_s2 + $0xf0] sm:$0xff] }
 0x3d8   :  { %11192 = vst [vmem:[#allocation125_spill] sm:$0xff] %v8188_v39  ;;  %2021 = vmatpush.msra.mxu0 %v8206_v48  ;;  %v8212_v39 = vld [vmem:[%s10062_s2 + $0xf8] sm:$0xff] }
 0x3d9   :  { %11193 = vst [vmem:[#allocation126_spill] sm:$0xff] %v8194_v63  ;;  %2061 = vmatpush.msra.mxu2 %v8212_v39  ;;  %v8218_v63 = vld [vmem:[%s10062_s2 + $0xd0] sm:$0xff] }
 0x3da   :  { %11194 = vst [vmem:[#allocation127_spill] sm:$0xff] %v8200_v23  ;;  %2022 = vmatpush.msra.mxu0 %v8218_v63  ;;  %v8224_v23 = vld [vmem:[%s10062_s2 + $0xd8] sm:$0xff] }
 0x3db   :  { %11195 = vst [vmem:[#allocation128_spill] sm:$0xff] %v8206_v48  ;;  %2062 = vmatpush.msra.mxu2 %v8224_v23  ;;  %v8230_v48 = vld [vmem:[%s10062_s2 + $0xb0] sm:$0xff] }
 0x3dc   :  { %11196 = vst [vmem:[#allocation129_spill] sm:$0xff] %v8212_v39  ;;  %2023 = vmatpush.msra.mxu0 %v8230_v48  ;;  %v8236_v39 = vld [vmem:[%s10062_s2 + $0xb8] sm:$0xff] }
 0x3dd   :  { %11197 = vst [vmem:[#allocation130_spill] sm:$0xff] %v8218_v63  ;;  %2063 = vmatpush.msra.mxu2 %v8236_v39  ;;  %v8242_v63 = vld [vmem:[%s10062_s2 + $0x90] sm:$0xff] }
 0x3de   :  { %11198 = vst [vmem:[#allocation131_spill] sm:$0xff] %v8224_v23  ;;  %2024 = vmatpush.msra.mxu0 %v8242_v63  ;;  %v8248_v23 = vld [vmem:[%s10062_s2 + $0x98] sm:$0xff] }
 0x3df   :  { %11199 = vst [vmem:[#allocation132_spill] sm:$0xff] %v8230_v48  ;;  %2064 = vmatpush.msra.mxu2 %v8248_v23  ;;  %v8254_v48 = vld [vmem:[%s10062_s2 + $0x70] sm:$0xff] }
 0x3e0   :  { %11200 = vst [vmem:[#allocation133_spill] sm:$0xff] %v8236_v39  ;;  %2025 = vmatpush.msra.mxu0 %v8254_v48  ;;  %v8260_v39 = vld [vmem:[%s10062_s2 + $0x78] sm:$0xff] }
 0x3e1   :  { %11201 = vst [vmem:[#allocation134_spill] sm:$0xff] %v8242_v63  ;;  %2065 = vmatpush.msra.mxu2 %v8260_v39  ;;  %v8266_v63 = vld [vmem:[%s10062_s2 + $0x50] sm:$0xff] }
 0x3e2   :  { %11202 = vst [vmem:[#allocation135_spill] sm:$0xff] %v8248_v23  ;;  %2026 = vmatpush.msra.mxu0 %v8266_v63  ;;  %v8272_v23 = vld [vmem:[%s10062_s2 + $0x58] sm:$0xff] }
 0x3e3   :  { %11203 = vst [vmem:[#allocation136_spill] sm:$0xff] %v8254_v48  ;;  %2066 = vmatpush.msra.mxu2 %v8272_v23  ;;  %v8278_v48 = vld [vmem:[%s10062_s2 + $0x30] sm:$0xff] }
 0x3e4   :  { %11204 = vst [vmem:[#allocation137_spill] sm:$0xff] %v8260_v39  ;;  %2027 = vmatpush.msra.mxu0 %v8278_v48  ;;  %v8284_v39 = vld [vmem:[%s10062_s2 + $0x38] sm:$0xff]  ;;  %v1603_v3 = vpop.f32.mrf.mxu2 }
 0x3e5   :  { %11205 = vst [vmem:[#allocation138_spill] sm:$0xff] %v8266_v63  ;;  %2067 = vmatpush.msra.mxu2 %v8284_v39  ;;  %v8290_v63 = vld [vmem:[%s10062_s2 + $0x10] sm:$0xff]  ;;  %v1604_v7 = vadd.f32 %v1603_v3, %v11066_v38 }
 0x3e6   :  { %11206 = vst [vmem:[#allocation139_spill] sm:$0xff] %v8272_v23  ;;  %2028 = vmatpush.msra.mxu0 %v8290_v63  ;;  %v8296_v23 = vld [vmem:[%s10062_s2 + $0x18] sm:$0xff] }
 0x3e7   :  { %11207 = vst [vmem:[#allocation140_spill] sm:$0xff] %v8278_v48  ;;  %2068 = vmatpush.msra.mxu2 %v8296_v23  ;;  %v1563_v48 = vpop.f32.mrf.mxu0  ;;  %v1624_v55 = vadd.f32 %v1623_v59, %v1604_v7  ;;  %v1663_v59 = vpop.f32.mrf.mxu1 }
 0x3e8   :  { %11208 = vst [vmem:[#allocation141_spill] sm:$0xff] %v8284_v39  ;;  %v1564_v6 = vadd.f32 %v1563_v48, %v11065_v37 }
 0x3e9   :  { %11209 = vst [vmem:[#allocation142_spill] sm:$0xff] %v8290_v63  ;;  %v3347_v63 = vmul.f32 -1.442695, %v1624_v55 }
 0x3ea   :  { %11210 = vst [vmem:[#allocation143_spill] sm:$0xff] %v8296_v23  ;;  %v1584_v28 = vadd.f32 %v1583_v61, %v1564_v6 }
 0x3ec   :  { %v3346_v39 = vmul.f32 -1.442695, %v1584_v28 }
 0x3ed   :  { %v1683_v46 = vpop.f32.mrf.mxu2 }
 0x3ee   :  { %3490 = vpow2.f32 %v3346_v39  ;;  %v1684_v23 = vadd.f32 %v1683_v46, %v11067_v0 }
 0x3ef   :  { %3492 = vpow2.f32 %v3347_v63  ;;  %v1643_v61 = vpop.f32.mrf.mxu0 }
 0x3f0   :  { %v1704_v48 = vadd.f32 %v1703_v20, %v1684_v23  ;;  %v1644_v3 = vadd.f32 %v1643_v61, %v11068_v33 }
 0x3f2   :  { %v3348_v28 = vmul.f32 -1.442695, %v1704_v48  ;;  %v1664_v7 = vadd.f32 %v1663_v59, %v1644_v3 }
 0x3f4   :  { %v3491_v29 = vpop.eup %3490 }
 0x3f5   :  { %v1709_v21 = vadd.f32 1.0, %v3491_v29  ;;  %v3493_v1 = vpop.eup %3492 }
 0x3f6   :  { %v1728_v37 = vadd.f32 1.0, %v3493_v1 }
 0x3f7   :  { %3494 = vrcp.f32 %v1709_v21  ;;  %v1721_v0 = vand.u32 2147483648, %v1709_v21  ;;  %vm1715_vm10 = vweird.f32 %v1709_v21  ;;  %v1719_v23 = vand.u32 2147483647, %v1709_v21 }
 0x3f8   :  { %3496 = vrcp.f32 %v1728_v37  ;;  %v1740_v48 = vand.u32 2147483648, %v1728_v37  ;;  %vm1734_vm13 = vweird.f32 %v1728_v37 }
 0x3f9   :  { %3498 = vpow2.f32 %v3348_v28  ;;  %v1722_v3 = vor.u32 1.1754944e-38, %v1721_v0  ;;  %vm1720_vm14 = vcmp.eq.f32.partialorder %v1719_v23, 8.507059e+37 }
 0x3fa   :  { %3500 = vtanh.f32 %v1664_v7  ;;  %v1741_v59 = vor.u32 1.1754944e-38, %v1740_v48 }
 0x3fd   :  { %v3495_v6 = vpop.eup %3494 }
 0x3fe   :  { %v1711_v39 = vmul.f32 %v3495_v6, %v1709_v21  ;;  %v3497_v63 = vpop.eup %3496  ;;  %vm1716_vm9 = vweird.f32 %v3495_v6 }
 0x3ff   :  { %v3499_v38 = vpop.eup %3498  ;;  %v1730_v17 = vmul.f32 %v3497_v63, %v1728_v37  ;;  %vm1717_vm11 = vmor %vm1715_vm10, %vm1716_vm9  ;;  %vm1735_vm12 = vweird.f32 %v3497_v63 }
 0x400   :  { %v1712_v55 = vsub.f32 1.0, %v1711_v39  ;;  %v1748_v20 = vadd.f32 1.0, %v3499_v38  ;;  %v1738_v39 = vand.u32 2147483647, %v1728_v37  ;;  %vm1736_vm15 = vmor %vm1734_vm13, %vm1735_vm12  ;;  %v3501_v33 = vpop.eup %3500  ;;  %v1808_v38 = vpop.f32.mrf.mxu1 }
 0x401   :  { %v1731_v1 = vsub.f32 1.0, %v1730_v17  ;;  %v1848_v17 = vpop.f32.mrf.mxu3  ;;  %v1855_v0 = vrot.slane %v1808_v38, 6 }
 0x402   :  { %v1713_v29 = vmul.f32 %v3495_v6, %v1712_v55  ;;  %3502 = vrcp.f32 %v1748_v20  ;;  %vm1739_vm3 = vcmp.eq.f32.partialorder %v1738_v39, 8.507059e+37  ;;  %v1857_v37 = vrot.slane %v1848_v17, 2 }
 0x403   :  { %v1732_v61 = vmul.f32 %v3497_v63, %v1731_v1  ;;  %v1760_v39 = vand.u32 2147483648, %v1748_v20  ;;  %vm1754_vm5 = vweird.f32 %v1748_v20 }
 0x404   :  { %v1714_v46 = vadd.f32 %v3495_v6, %v1713_v29 }
 0x405   :  { %v1733_v55 = vadd.f32 %v3497_v63, %v1732_v61  ;;  %v1761_v17 = vor.u32 1.1754944e-38, %v1760_v39 }
 0x406   :  { %v1718_v28 = vsel %vm1717_vm11, %v3495_v6, %v1714_v46  ;;  %v1788_v6 = vpop.f32.mrf.mxu0 }
 0x407   :  { %v1723_v29 = vsel %vm1720_vm14, %v1722_v3, %v1718_v28  ;;  %v1737_v30 = vsel %vm1736_vm15, %v3497_v63, %v1733_v55  ;;  %v3349_v28 = vld [vmem:[%s10063_s0 + $0x20] sm:$0xff]  ;;  %v1858_v63 = vsel %vm179_vm0, %v1788_v6, %v1855_v0 }
 0x408   :  { %v3503_v21 = vpop.eup %3502  ;;  %v1742_v7 = vsel %vm1739_vm3, %v1741_v59, %v1737_v30  ;;  %v1765_v1 = vmul.f32 %v3501_v33, %v1723_v29 }
 0x409   :  { %v1764_v60 = vmul.f32 %v1742_v7, %v7157_v16  ;;  %v1750_v35 = vmul.f32 %v3503_v21, %v1748_v20  ;;  %vm1755_vm4 = vweird.f32 %v3503_v21 }
 0x40a   :  { %vm1756_vm6 = vmor %vm1754_vm5, %vm1755_vm4 }
 0x40b   :  { %v8304_v61 = vadd.f32 %v1765_v1, %v1764_v60  ;;  %v1751_v48 = vsub.f32 1.0, %v1750_v35  ;;  %v1758_v60 = vand.u32 2147483647, %v1748_v20 }
 0x40c   :  { %v1828_v46 = vpop.f32.mrf.mxu2 }
 0x40d   :  { %v1856_v23 = vrot.slane %v1828_v46, 4  ;;  %3504 = vtanh.f32 %v8304_v61  ;;  %v1752_v16 = vmul.f32 %v3503_v21, %v1751_v48  ;;  %vm1759_vm7 = vcmp.eq.f32.partialorder %v1758_v60, 8.507059e+37 }
 0x40f   :  { %v1859_v30 = vsel %vm181_vm1, %v1856_v23, %v1857_v37  ;;  %v1753_v55 = vadd.f32 %v3503_v21, %v1752_v16 }
 0x410   :  { %v1860_v33 = vsel %vm183_vm2, %v1858_v63, %v1859_v30 }
 0x411   :  { %v8313_v3 = vadd.f32 %v3349_v28, %v1860_v33  ;;  %v1757_v38 = vsel %vm1756_vm6, %v3503_v21, %v1753_v55 }
 0x412   :  { %v1762_v46 = vsel %vm1759_vm7, %v1761_v17, %v1757_v38  ;;  %v8439_v38 = vld [vmem:[%s10061_s1 + $0x160] sm:$0xff]  ;;  %v8445_v17 = vld [vmem:[%s10061_s1 + $0x170] sm:$0xff] }
 0x413   :  { %v3350_v35 = vmul.f32 -1.442695, %v8313_v3  ;;  %v1883_v59 = vrot.slane %v8313_v3, 2  ;;  %v1907_v29 = vrot.slane %v8313_v3, 6  ;;  %v3505_v6 = vpop.eup %3504 }
 0x414   :  { %v1768_v0 = vmul.f32 %v3505_v6, %v1762_v46  ;;  %v11217_v6 = vld [vmem:[#allocation39_spill] sm:$0xff]  ;;  %v8459_v46 = vld [vmem:[%s10061_s1 + $0x150] sm:$0xff] }
 0x415   :  { %3506 = vpow2.f32 %v3350_v35  ;;  %v3351_v7 = vmul.f32 -1.442695, %v1883_v59  ;;  %v3352_v1 = vmul.f32 -1.442695, %v1907_v29  ;;  %v8424_v35 = vld [vmem:[%s10061_s1 + $0x180] sm:$0xff]  ;;  %v11215_v59 = vld [vmem:[#allocation36_spill] sm:$0xff] }
 0x416   :  { %1969 = vmatmul.f32.vlgmr.msrb.gmra.mxu1 %v1768_v0  ;;  %2009 = vmatmul.f32.vlgmr.msrb.gmra.mxu3 %v1768_v0  ;;  %v8431_v29 = vld [vmem:[%s10061_s1 + $0x190] sm:$0xff] }
 0x417   :  { %3508 = vpow2.f32 %v3351_v7  ;;  %2178 = vmatpush.msrb.mxu1 %v7174_v49  ;;  %2218 = vmatpush.msrb.mxu3 %v7180_v27  ;;  %v11216_v7 = vld [vmem:[#allocation40_spill] sm:$0xff] }
 0x418   :  { %3510 = vpow2.f32 %v3352_v1  ;;  %v8452_v1 = vld [vmem:[%s10061_s1 + $0x140] sm:$0xff] }
 0x419   :  { %2179 = vmatpush.msrb.mxu1 %v7188_v58  ;;  %2219 = vmatpush.msrb.mxu3 %v7194_v19 }
 0x41b   :  { %v3507_v20 = vpop.eup %3506  ;;  %2180 = vmatpush.msrb.mxu1 %v7201_v10  ;;  %2220 = vmatpush.msrb.mxu3 %v7207_v56  ;;  %v1904_v10 = vrot.slane %v8313_v3, 4 }
 0x41c   :  { %v1866_v37 = vadd.f32 1.0, %v3507_v20  ;;  %v11219_v20 = vld [vmem:[#allocation42_spill] sm:$0xff] }
 0x41d   :  { %v3509_v21 = vpop.eup %3508  ;;  %2181 = vmatpush.msrb.mxu1 %v7217_v36  ;;  %2221 = vmatpush.msrb.mxu3 %v7223_v62 }
 0x41e   :  { %v3511_v23 = vpop.eup %3510  ;;  %3512 = vrcp.f32 %v1866_v37  ;;  %v1888_v48 = vadd.f32 1.0, %v3509_v21  ;;  %2049 = vmatmul.f32.vlgmr.msra.gmra.mxu1 %v1768_v0  ;;  %2089 = vmatmul.f32.vlgmr.msra.gmra.mxu3 %v1768_v0  ;;  %vm1872_vm9 = vweird.f32 %v1866_v37  ;;  %v11218_v0 = vld [vmem:[#allocation2_spill] sm:$0xff]  ;;  %v8468_v21 = vld [vmem:[%s10061_s1 + $0x130] sm:$0xff] }
 0x41f   :  { %v8324_v28 = vadd.f32 1.0, %v3511_v23  ;;  %2182 = vmatpush.msrb.mxu1 %v7231_v41  ;;  %2222 = vmatpush.msrb.mxu3 %v7237_v26  ;;  %v1878_v41 = vand.u32 2147483648, %v1866_v37  ;;  %v11221_v23 = vld [vmem:[#allocation3_spill] sm:$0xff] }
 0x420   :  { %3514 = vrcp.f32 %v1888_v48  ;;  %vm1894_vm13 = vweird.f32 %v1888_v48 }
 0x421   :  { %3516 = vrcp.f32 %v8324_v28  ;;  %2183 = vmatpush.msrb.mxu1 %v7243_v42  ;;  %2223 = vmatpush.msrb.mxu3 %v7249_v11  ;;  %v1876_v42 = vand.u32 2147483647, %v1866_v37  ;;  %v1879_v30 = vor.u32 1.1754944e-38, %v1878_v41  ;;  %vm1918_vm4 = vweird.f32 %v8324_v28  ;;  %v8495_v41 = vld [vmem:[%s10061_s1 + $0xd0] sm:$0xff] }
 0x422   :  { %3518 = vtanh.f32 %v1904_v10  ;;  %v8486_v10 = vld [vmem:[%s10061_s1 + $0xf0] sm:$0xff] }
 0x423   :  { %2184 = vmatpush.msrb.mxu1 %v7256_v8  ;;  %2224 = vmatpush.msrb.mxu3 %v7262_v5  ;;  %v1900_v5 = vand.u32 2147483648, %v1888_v48  ;;  %vm1877_vm12 = vcmp.eq.f32.partialorder %v1876_v42, 8.507059e+37  ;;  %v11231_v42 = vld [vmem:[#allocation51_spill] sm:$0xff] }
 0x424   :  { %v3513_v49 = vpop.eup %3512 }
 0x425   :  { %v1868_v27 = vmul.f32 %v3513_v49, %v1866_v37  ;;  %2185 = vmatpush.msrb.mxu1 %v7272_v25  ;;  %2225 = vmatpush.msrb.mxu3 %v7278_v13  ;;  %vm1873_vm8 = vweird.f32 %v3513_v49  ;;  %v1898_v13 = vand.u32 2147483647, %v1888_v48  ;;  %v11220_v37 = vld [vmem:[#allocation41_spill] sm:$0xff] }
 0x426   :  { %v3515_v58 = vpop.eup %3514  ;;  %vm1874_vm10 = vmor %vm1872_vm9, %vm1873_vm8 }
 0x427   :  { %v1869_v19 = vsub.f32 1.0, %v1868_v27  ;;  %v8336_v56 = vpop.eup %3516  ;;  %v1890_v36 = vmul.f32 %v3515_v58, %v1888_v48  ;;  %2186 = vmatpush.msrb.mxu1 %v7288_v52  ;;  %2226 = vmatpush.msrb.mxu3 %v7294_v44  ;;  %vm1895_vm11 = vweird.f32 %v3515_v58  ;;  %v1901_v44 = vor.u32 1.1754944e-38, %v1900_v5  ;;  %v11222_v48 = vld [vmem:[#allocation44_spill] sm:$0xff]  ;;  %v11234_v5 = vld [vmem:[#allocation10_spill] sm:$0xff] }
 0x428   :  { %v1914_v26 = vmul.f32 %v8336_v56, %v8324_v28  ;;  %vm1896_vm14 = vmor %vm1894_vm13, %vm1895_vm11  ;;  %vm1899_vm15 = vcmp.eq.f32.partialorder %v1898_v13, 8.507059e+37  ;;  %vm1919_vm3 = vweird.f32 %v8336_v56  ;;  %v11224_v27 = vld [vmem:[#allocation4_spill] sm:$0xff]  ;;  %v11236_v13 = vld [vmem:[#allocation7_spill] sm:$0xff] }
 0x429   :  { %v1870_v62 = vmul.f32 %v3513_v49, %v1869_v19  ;;  %v1891_v11 = vsub.f32 1.0, %v1890_v36  ;;  %2187 = vmatpush.msrb.mxu1 %v7307_v12  ;;  %2227 = vmatpush.msrb.mxu3 %v7313_v18  ;;  %v3519_v12 = vpop.eup %3518  ;;  %vm1920_vm5 = vmor %vm1918_vm4, %vm1919_vm3  ;;  %v11226_v19 = vld [vmem:[#allocation45_spill] sm:$0xff]  ;;  %v11228_v36 = vld [vmem:[#allocation48_spill] sm:$0xff] }
 0x42a   :  { %v1915_v39 = vsub.f32 1.0, %v1914_v26  ;;  %v11230_v26 = vld [vmem:[#allocation8_spill] sm:$0xff] }
 0x42b   :  { %v1871_v8 = vadd.f32 %v3513_v49, %v1870_v62  ;;  %v1892_v25 = vmul.f32 %v3515_v58, %v1891_v11  ;;  %2188 = vmatpush.msrb.mxu1 %v7322_v15  ;;  %2228 = vmatpush.msrb.mxu3 %v7328_v31  ;;  %v11229_v62 = vld [vmem:[#allocation47_spill] sm:$0xff]  ;;  %v11232_v11 = vld [vmem:[#allocation5_spill] sm:$0xff] }
 0x42c   :  { %v1916_v3 = vmul.f32 %v8336_v56, %v1915_v39  ;;  %v11239_v39 = vld [vmem:[#allocation59_spill] sm:$0xff] }
 0x42d   :  { %v1875_v63 = vsel %vm1874_vm10, %v3513_v49, %v1871_v8  ;;  %v1893_v33 = vadd.f32 %v3515_v58, %v1892_v25  ;;  %2189 = vmatpush.msrb.mxu1 %v7335_v22  ;;  %2229 = vmatpush.msrb.mxu3 %v7341_v2  ;;  %v1924_v22 = vand.u32 2147483648, %v8324_v28  ;;  %v1922_v2 = vand.u32 2147483647, %v8324_v28  ;;  %v11223_v28 = vld [vmem:[#allocation43_spill] sm:$0xff]  ;;  %v8477_v49 = vld [vmem:[%s10061_s1 + $0x110] sm:$0xff] }
 0x42e   :  { %v1880_v52 = vsel %vm1877_vm12, %v1879_v30, %v1875_v63  ;;  %v1917_v31 = vadd.f32 %v8336_v56, %v1916_v3  ;;  %v11233_v8 = vld [vmem:[#allocation52_spill] sm:$0xff]  ;;  %v11235_v25 = vld [vmem:[#allocation55_spill] sm:$0xff] }
 0x42f   :  { %v1897_v16 = vsel %vm1896_vm14, %v3515_v58, %v1893_v33  ;;  %v1929_v55 = vmul.f32 %v3519_v12, %v1880_v52  ;;  %2190 = vmatpush.msrb.mxu1 %v7349_v57  ;;  %2230 = vmatpush.msrb.mxu3 %v7355_v34  ;;  %v11211_v34 = vld [vmem:[#allocation33_spill] sm:$0xff]  ;;  %vm1923_vm6 = vcmp.eq.f32.partialorder %v1922_v2, 8.507059e+37  ;;  %v11225_v58 = vld [vmem:[#allocation46_spill] sm:$0xff]  ;;  %v11237_v63 = vld [vmem:[#allocation56_spill] sm:$0xff] }
 0x430   :  { %v1902_v18 = vsel %vm1899_vm15, %v1901_v44, %v1897_v16  ;;  %v1921_v57 = vsel %vm1920_vm5, %v8336_v56, %v1917_v31  ;;  %v11227_v56 = vld [vmem:[#allocation6_spill] sm:$0xff]  ;;  %v11238_v30 = vld [vmem:[#allocation12_spill] sm:$0xff]  ;;  %v11240_v33 = vld [vmem:[#allocation9_spill] sm:$0xff] }
 0x431   :  { %v1928_v60 = vmul.f32 %v1902_v18, %v7358_v14  ;;  %2191 = vmatpush.msrb.mxu1 %v7363_v47  ;;  %2231 = vmatpush.msrb.mxu3 %v7369_v4  ;;  %v1925_v14 = vor.u32 1.1754944e-38, %v1924_v22  ;;  %v11241_v52 = vld [vmem:[#allocation60_spill] sm:$0xff]  ;;  %v11242_v44 = vld [vmem:[#allocation14_spill] sm:$0xff]  ;;  %v11243_v16 = vld [vmem:[#allocation63_spill] sm:$0xff] }
 0x432   :  { %v11244_v12 = vld [vmem:[#allocation11_spill] sm:$0xff]  ;;  %v11245_v18 = vld [vmem:[#allocation64_spill] sm:$0xff]  ;;  %v11250_v22 = vld [vmem:[#allocation17_spill] sm:$0xff] }
 0x433   :  { %v8354_v15 = vadd.f32 %v1929_v55, %v1928_v60  ;;  %2192 = vmatpush.msrb.mxu1 %v7379_v32  ;;  %2232 = vmatpush.msrb.mxu3 %v7385_v24  ;;  %v1926_v4 = vsel %vm1923_vm6, %v1925_v14, %v1921_v57  ;;  %v8382_v24 = vld [vmem:[%s10061_s1 + $0x1e0] sm:$0xff]  ;;  %v11246_v3 = vld [vmem:[#allocation16_spill] sm:$0xff]  ;;  %v11247_v60 = vld [vmem:[#allocation67_spill] sm:$0xff] }
 0x434   :  { %v11248_v55 = vld [vmem:[#allocation13_spill] sm:$0xff]  ;;  %v11249_v31 = vld [vmem:[#allocation68_spill] sm:$0xff]  ;;  %v11251_v2 = vld [vmem:[#allocation71_spill] sm:$0xff] }
 0x435   :  { %3520 = vtanh.f32 %v8354_v15  ;;  %2193 = vmatpush.msrb.mxu1 %v7397_v53  ;;  %2233 = vmatpush.msrb.mxu3 %v7403_v45  ;;  %v8389_v53 = vld [vmem:[%s10061_s1 + $0x1f0] sm:$0xff]  ;;  %v8396_v45 = vld [vmem:[%s10061_s1 + $0x1c0] sm:$0xff]  ;;  %v11252_v57 = vld [vmem:[#allocation15_spill] sm:$0xff] }
 0x436   :  { %v11254_v14 = vld [vmem:[#allocation19_spill] sm:$0xff] }
 0x437   :  { %2340 = vmatpush.msra.mxu1 %v11211_v34  ;;  %2380 = vmatpush.msra.mxu3 %v7418_v51  ;;  %v8403_v51 = vld [vmem:[%s10061_s1 + $0x1d0] sm:$0xff]  ;;  %v11253_v34 = vld [vmem:[#allocation18_spill] sm:$0xff] }
 0x439   :  { %2341 = vmatpush.msra.mxu1 %v7424_v40  ;;  %2381 = vmatpush.msra.mxu3 %v7430_v9  ;;  %v11212_v40 = vld [vmem:[#allocation37_spill] sm:$0xff]  ;;  %v8410_v9 = vld [vmem:[%s10061_s1 + $0x1a0] sm:$0xff] }
 0x43b   :  { %v3521_v47 = vpop.eup %3520  ;;  %2342 = vmatpush.msra.mxu1 %v7438_v54  ;;  %2382 = vmatpush.msra.mxu3 %v7444_v43  ;;  %v11213_v54 = vld [vmem:[#allocation35_spill] sm:$0xff]  ;;  %v8417_v43 = vld [vmem:[%s10061_s1 + $0x1b0] sm:$0xff] }
 0x43c   :  { %v8373_v32 = vmul.f32 %v3521_v47, %v1926_v4  ;;  %v11255_v47 = vld [vmem:[#allocation72_spill] sm:$0xff] }
 0x43d   :  { %2343 = vmatpush.msra.mxu1 %v7457_v50  ;;  %2383 = vmatpush.msra.mxu3 %v11212_v40  ;;  %v11214_v50 = vld [vmem:[#allocation38_spill] sm:$0xff]  ;;  %v11256_v4 = vld [vmem:[#allocation20_spill] sm:$0xff]  ;;  %v11257_v40 = vld [vmem:[#allocation75_spill] sm:$0xff] }
 0x43e   :  { %1949 = vmatmul.f32.vlgmr.msrb.gmra.mxu0 %v8373_v32  ;;  %1989 = vmatmul.f32.vlgmr.msrb.gmra.mxu2 %v8373_v32 }
 0x43f   :  { %2158 = vmatpush.msrb.mxu0 %v8382_v24  ;;  %2194 = vmatmul.f32.vlgmr.msrb.gmra.mxu1 %v8373_v32 }
 0x440   :  { %2198 = vmatpush.msrb.mxu2 %v8389_v53  ;;  %2234 = vmatmul.f32.vlgmr.msrb.gmra.mxu3 %v8373_v32 }
 0x441   :  { %2159 = vmatpush.msrb.mxu0 %v8396_v45  ;;  %2344 = vmatpush.msra.mxu1 %v11213_v54  ;;  %v11258_v54 = vld [vmem:[#allocation21_spill] sm:$0xff] }
 0x442   :  { %2199 = vmatpush.msrb.mxu2 %v8403_v51  ;;  %2384 = vmatpush.msra.mxu3 %v11214_v50  ;;  %v11259_v50 = vld [vmem:[#allocation76_spill] sm:$0xff] }
 0x443   :  { %2160 = vmatpush.msrb.mxu0 %v8410_v9  ;;  %2345 = vmatpush.msra.mxu1 %v11215_v59  ;;  %v11260_v59 = vld [vmem:[#allocation22_spill] sm:$0xff] }
 0x444   :  { %2200 = vmatpush.msrb.mxu2 %v8417_v43  ;;  %2385 = vmatpush.msra.mxu3 %v11216_v7  ;;  %v11261_v7 = vld [vmem:[#allocation79_spill] sm:$0xff] }
 0x445   :  { %2161 = vmatpush.msrb.mxu0 %v8424_v35  ;;  %2346 = vmatpush.msra.mxu1 %v11217_v6  ;;  %v11262_v6 = vld [vmem:[#allocation23_spill] sm:$0xff] }
 0x446   :  { %2201 = vmatpush.msrb.mxu2 %v8431_v29  ;;  %2029 = vmatmul.f32.vlgmr.msra.gmra.mxu0 %v8373_v32 }
 0x447   :  { %2069 = vmatmul.f32.vlgmr.msra.gmra.mxu2 %v8373_v32  ;;  %2162 = vmatpush.msrb.mxu0 %v8439_v38 }
 0x448   :  { %2202 = vmatpush.msrb.mxu2 %v8445_v17  ;;  %2386 = vmatpush.msra.mxu3 %v11218_v0  ;;  %v11263_v0 = vld [vmem:[#allocation80_spill] sm:$0xff] }
 0x449   :  { %2163 = vmatpush.msrb.mxu0 %v8452_v1  ;;  %2347 = vmatpush.msra.mxu1 %v11220_v37  ;;  %v11266_v37 = vld [vmem:[#allocation25_spill] sm:$0xff] }
 0x44a   :  { %2203 = vmatpush.msrb.mxu2 %v8459_v46  ;;  %2387 = vmatpush.msra.mxu3 %v11221_v23  ;;  %v11267_v23 = vld [vmem:[#allocation84_spill] sm:$0xff] }
 0x44b   :  { %2164 = vmatpush.msrb.mxu0 %v11219_v20  ;;  %2348 = vmatpush.msra.mxu1 %v11223_v28  ;;  %v11265_v20 = vld [vmem:[#allocation83_spill] sm:$0xff] }
 0x44c   :  { %2204 = vmatpush.msrb.mxu2 %v8468_v21  ;;  %2388 = vmatpush.msra.mxu3 %v11224_v27  ;;  %v11269_v28 = vld [vmem:[#allocation27_spill] sm:$0xff]  ;;  %v11270_v27 = vld [vmem:[#allocation28_spill] sm:$0xff] }
 0x44d   :  { %2165 = vmatpush.msrb.mxu0 %v11222_v48  ;;  %2349 = vmatpush.msra.mxu1 %v11226_v19  ;;  %v11268_v48 = vld [vmem:[#allocation26_spill] sm:$0xff]  ;;  %v11272_v19 = vld [vmem:[#allocation49_spill] sm:$0xff] }
 0x44e   :  { %2205 = vmatpush.msrb.mxu2 %v8477_v49  ;;  %2389 = vmatpush.msra.mxu3 %v11227_v56  ;;  %v11273_v56 = vld [vmem:[#allocation50_spill] sm:$0xff] }
 0x44f   :  { %2166 = vmatpush.msrb.mxu0 %v11225_v58  ;;  %2350 = vmatpush.msra.mxu1 %v11229_v62  ;;  %v11271_v58 = vld [vmem:[#allocation29_spill] sm:$0xff]  ;;  %v11275_v62 = vld [vmem:[#allocation54_spill] sm:$0xff] }
 0x450   :  { %2206 = vmatpush.msrb.mxu2 %v8486_v10  ;;  %2390 = vmatpush.msra.mxu3 %v11230_v26  ;;  %v11276_v26 = vld [vmem:[#allocation57_spill] sm:$0xff] }
 0x451   :  { %2167 = vmatpush.msrb.mxu0 %v11228_v36  ;;  %2351 = vmatpush.msra.mxu1 %v11232_v11  ;;  %v11274_v36 = vld [vmem:[#allocation53_spill] sm:$0xff] }
 0x452   :  { %2207 = vmatpush.msrb.mxu2 %v8495_v41  ;;  %2391 = vmatpush.msra.mxu3 %v11234_v5  ;;  %v11278_v11 = vld [vmem:[#allocation61_spill] sm:$0xff] }
 0x453   :  { %2168 = vmatpush.msrb.mxu0 %v11231_v42  ;;  %2352 = vmatpush.msra.mxu1 %v11236_v13  ;;  %v11277_v42 = vld [vmem:[#allocation58_spill] sm:$0xff]  ;;  %v11280_v5 = vld [vmem:[#allocation65_spill] sm:$0xff] }
 0x454   :  { %2208 = vmatpush.msrb.mxu2 %v11233_v8  ;;  %2392 = vmatpush.msra.mxu3 %v11238_v30  ;;  %v11279_v8 = vld [vmem:[#allocation62_spill] sm:$0xff]  ;;  %v11282_v13 = vld [vmem:[#allocation69_spill] sm:$0xff] }
 0x455   :  { %2169 = vmatpush.msrb.mxu0 %v11235_v25  ;;  %2353 = vmatpush.msra.mxu1 %v11240_v33  ;;  %v11281_v25 = vld [vmem:[#allocation66_spill] sm:$0xff]  ;;  %v11284_v30 = vld [vmem:[#allocation73_spill] sm:$0xff] }
 0x456   :  { %2209 = vmatpush.msrb.mxu2 %v11237_v63  ;;  %2393 = vmatpush.msra.mxu3 %v11242_v44  ;;  %v11283_v63 = vld [vmem:[#allocation70_spill] sm:$0xff]  ;;  %v11286_v33 = vld [vmem:[#allocation77_spill] sm:$0xff] }
 0x457   :  { %2170 = vmatpush.msrb.mxu0 %v11239_v39  ;;  %2354 = vmatpush.msra.mxu1 %v11244_v12  ;;  %v11285_v39 = vld [vmem:[#allocation74_spill] sm:$0xff]  ;;  %v11288_v44 = vld [vmem:[#allocation81_spill] sm:$0xff] }
 0x458   :  { %2210 = vmatpush.msrb.mxu2 %v11241_v52  ;;  %2394 = vmatpush.msra.mxu3 %v11246_v3  ;;  %v11287_v52 = vld [vmem:[#allocation78_spill] sm:$0xff]  ;;  %v11290_v12 = vld [vmem:[#allocation85_spill] sm:$0xff]  ;;  %v11292_v3 = vld [vmem:[#allocation87_spill] sm:$0xff] }
 0x459   :  { %2171 = vmatpush.msrb.mxu0 %v11243_v16  ;;  %2355 = vmatpush.msra.mxu1 %v11248_v55  ;;  %v11289_v16 = vld [vmem:[#allocation82_spill] sm:$0xff]  ;;  %v11294_v55 = vld [vmem:[#allocation89_spill] sm:$0xff] }
 0x45a   :  { %2211 = vmatpush.msrb.mxu2 %v11245_v18  ;;  %2395 = vmatpush.msra.mxu3 %v11250_v22  ;;  %v11291_v18 = vld [vmem:[#allocation86_spill] sm:$0xff]  ;;  %v11296_v22 = vld [vmem:[#allocation91_spill] sm:$0xff] }
 0x45b   :  { %2172 = vmatpush.msrb.mxu0 %v11247_v60  ;;  %2420 = vmatpush.msrb.mxu1 %v11252_v57  ;;  %v11293_v60 = vld [vmem:[#allocation88_spill] sm:$0xff]  ;;  %v11298_v57 = vld [vmem:[#allocation93_spill] sm:$0xff] }
 0x45c   :  { %2212 = vmatpush.msrb.mxu2 %v11249_v31  ;;  %2460 = vmatpush.msrb.mxu3 %v11256_v4  ;;  %v11295_v31 = vld [vmem:[#allocation90_spill] sm:$0xff]  ;;  %v11302_v4 = vld [vmem:[#allocation97_spill] sm:$0xff] }
 0x45d   :  { %2173 = vmatpush.msrb.mxu0 %v11251_v2  ;;  %2421 = vmatpush.msrb.mxu1 %v11258_v54  ;;  %v11297_v2 = vld [vmem:[#allocation92_spill] sm:$0xff]  ;;  %v11304_v54 = vld [vmem:[#allocation99_spill] sm:$0xff] }
 0x45e   :  { %2213 = vmatpush.msrb.mxu2 %v11253_v34  ;;  %2174 = vmatmul.f32.vlgmr.msrb.gmra.mxu0 %v8373_v32  ;;  %v11299_v34 = vld [vmem:[#allocation94_spill] sm:$0xff] }
 0x45f   :  { %2214 = vmatmul.f32.vlgmr.msrb.gmra.mxu2 %v8373_v32  ;;  %2320 = vmatpush.msra.mxu0 %v11254_v14  ;;  %v11264_v32 = vld [vmem:[#allocation24_spill] sm:$0xff]  ;;  %v11300_v14 = vld [vmem:[#allocation95_spill] sm:$0xff] }
 0x460   :  { %2360 = vmatpush.msra.mxu2 %v11255_v47  ;;  %2461 = vmatpush.msrb.mxu3 %v11260_v59  ;;  %v11301_v47 = vld [vmem:[#allocation96_spill] sm:$0xff]  ;;  %v11306_v59 = vld [vmem:[#allocation101_spill] sm:$0xff] }
 0x461   :  { %2321 = vmatpush.msra.mxu0 %v11257_v40  ;;  %2422 = vmatpush.msrb.mxu1 %v11262_v6  ;;  %v11303_v40 = vld [vmem:[#allocation98_spill] sm:$0xff]  ;;  %v11308_v6 = vld [vmem:[#allocation103_spill] sm:$0xff] }
 0x462   :  { %2361 = vmatpush.msra.mxu2 %v11259_v50  ;;  %2462 = vmatpush.msrb.mxu3 %v11264_v32  ;;  %v11305_v50 = vld [vmem:[#allocation100_spill] sm:$0xff]  ;;  %v11310_v32 = vld [vmem:[#allocation105_spill] sm:$0xff] }
 0x463   :  { %2322 = vmatpush.msra.mxu0 %v11261_v7  ;;  %2423 = vmatpush.msrb.mxu1 %v11266_v37  ;;  %v11307_v7 = vld [vmem:[#allocation102_spill] sm:$0xff]  ;;  %v11312_v37 = vld [vmem:[#allocation107_spill] sm:$0xff] }
 0x464   :  { %2362 = vmatpush.msra.mxu2 %v11263_v0  ;;  %2463 = vmatpush.msrb.mxu3 %v11268_v48  ;;  %v11309_v0 = vld [vmem:[#allocation104_spill] sm:$0xff]  ;;  %v11314_v48 = vld [vmem:[#allocation109_spill] sm:$0xff] }
 0x465   :  { %2323 = vmatpush.msra.mxu0 %v11265_v20  ;;  %2424 = vmatpush.msrb.mxu1 %v11270_v27  ;;  %v11311_v20 = vld [vmem:[#allocation106_spill] sm:$0xff]  ;;  %v11316_v27 = vld [vmem:[#allocation111_spill] sm:$0xff] }
 0x466   :  { %2363 = vmatpush.msra.mxu2 %v11267_v23  ;;  %2464 = vmatpush.msrb.mxu3 %v11272_v19  ;;  %v11313_v23 = vld [vmem:[#allocation108_spill] sm:$0xff]  ;;  %v11318_v19 = vld [vmem:[#allocation113_spill] sm:$0xff] }
 0x467   :  { %2324 = vmatpush.msra.mxu0 %v11269_v28  ;;  %2425 = vmatpush.msrb.mxu1 %v11274_v36  ;;  %v11315_v28 = vld [vmem:[#allocation110_spill] sm:$0xff]  ;;  %v11320_v36 = vld [vmem:[#allocation115_spill] sm:$0xff] }
 0x468   :  { %2364 = vmatpush.msra.mxu2 %v11271_v58  ;;  %2465 = vmatpush.msrb.mxu3 %v11276_v26  ;;  %v11317_v58 = vld [vmem:[#allocation112_spill] sm:$0xff]  ;;  %v11322_v26 = vld [vmem:[#allocation117_spill] sm:$0xff] }
 0x469   :  { %2325 = vmatpush.msra.mxu0 %v11273_v56  ;;  %2426 = vmatpush.msrb.mxu1 %v11278_v11  ;;  %v11319_v56 = vld [vmem:[#allocation114_spill] sm:$0xff]  ;;  %v11324_v11 = vld [vmem:[#allocation119_spill] sm:$0xff] }
 0x46a   :  { %2365 = vmatpush.msra.mxu2 %v11275_v62  ;;  %2466 = vmatpush.msrb.mxu3 %v11280_v5  ;;  %v11321_v62 = vld [vmem:[#allocation116_spill] sm:$0xff]  ;;  %v11326_v5 = vld [vmem:[#allocation121_spill] sm:$0xff] }
 0x46b   :  { %2326 = vmatpush.msra.mxu0 %v11277_v42  ;;  %2427 = vmatpush.msrb.mxu1 %v11282_v13  ;;  %v11323_v42 = vld [vmem:[#allocation118_spill] sm:$0xff]  ;;  %v11328_v13 = vld [vmem:[#allocation123_spill] sm:$0xff] }
 0x46c   :  { %2366 = vmatpush.msra.mxu2 %v11279_v8  ;;  %2467 = vmatpush.msrb.mxu3 %v11284_v30  ;;  %v11325_v8 = vld [vmem:[#allocation120_spill] sm:$0xff]  ;;  %v11330_v30 = vld [vmem:[#allocation125_spill] sm:$0xff] }
 0x46d   :  { %2327 = vmatpush.msra.mxu0 %v11281_v25  ;;  %2428 = vmatpush.msrb.mxu1 %v11286_v33  ;;  %v11327_v25 = vld [vmem:[#allocation122_spill] sm:$0xff]  ;;  %v11332_v33 = vld [vmem:[#allocation127_spill] sm:$0xff] }
 0x46e   :  { %2367 = vmatpush.msra.mxu2 %v11283_v63  ;;  %2468 = vmatpush.msrb.mxu3 %v11288_v44  ;;  %v11329_v63 = vld [vmem:[#allocation124_spill] sm:$0xff]  ;;  %v11334_v44 = vld [vmem:[#allocation129_spill] sm:$0xff] }
 0x46f   :  { %2328 = vmatpush.msra.mxu0 %v11285_v39  ;;  %2429 = vmatpush.msrb.mxu1 %v11290_v12  ;;  %v11331_v39 = vld [vmem:[#allocation126_spill] sm:$0xff]  ;;  %v11336_v12 = vld [vmem:[#allocation131_spill] sm:$0xff] }
 0x470   :  { %2368 = vmatpush.msra.mxu2 %v11287_v52  ;;  %2469 = vmatpush.msrb.mxu3 %v11292_v3  ;;  %v11333_v52 = vld [vmem:[#allocation128_spill] sm:$0xff]  ;;  %v11338_v3 = vld [vmem:[#allocation133_spill] sm:$0xff] }
 0x471   :  { %2329 = vmatpush.msra.mxu0 %v11289_v16  ;;  %2430 = vmatpush.msrb.mxu1 %v11294_v55  ;;  %v11335_v16 = vld [vmem:[#allocation130_spill] sm:$0xff]  ;;  %v11340_v55 = vld [vmem:[#allocation135_spill] sm:$0xff] }
 0x472   :  { %2369 = vmatpush.msra.mxu2 %v11291_v18  ;;  %2470 = vmatpush.msrb.mxu3 %v11296_v22  ;;  %v11337_v18 = vld [vmem:[#allocation132_spill] sm:$0xff]  ;;  %v11342_v22 = vld [vmem:[#allocation137_spill] sm:$0xff] }
 0x473   :  { %2330 = vmatpush.msra.mxu0 %v11293_v60  ;;  %2431 = vmatpush.msrb.mxu1 %v11298_v57  ;;  %v11339_v60 = vld [vmem:[#allocation134_spill] sm:$0xff]  ;;  %v11344_v57 = vld [vmem:[#allocation139_spill] sm:$0xff] }
 0x474   :  { %2370 = vmatpush.msra.mxu2 %v11295_v31  ;;  %2471 = vmatpush.msrb.mxu3 %v11300_v14  ;;  %v11341_v31 = vld [vmem:[#allocation136_spill] sm:$0xff]  ;;  %v11346_v14 = vld [vmem:[#allocation141_spill] sm:$0xff] }
 0x475   :  { %2331 = vmatpush.msra.mxu0 %v11297_v2  ;;  %2432 = vmatpush.msrb.mxu1 %v11302_v4  ;;  %v11343_v2 = vld [vmem:[#allocation138_spill] sm:$0xff]  ;;  %v11348_v4 = vld [vmem:[#allocation143_spill] sm:$0xff] }
 0x476   :  { %2371 = vmatpush.msra.mxu2 %v11299_v34  ;;  %2472 = vmatpush.msrb.mxu3 %v11304_v54  ;;  %v11345_v34 = vld [vmem:[#allocation140_spill] sm:$0xff]  ;;  %v11349_v54 = vld [vmem:[#allocation30_spill] sm:$0xff] }
 0x477   :  { %2332 = vmatpush.msra.mxu0 %v11301_v47  ;;  %2433 = vmatpush.msrb.mxu1 %v11306_v59  ;;  %v11347_v47 = vld [vmem:[#allocation142_spill] sm:$0xff] }
 0x478   :  { %2372 = vmatpush.msra.mxu2 %v11303_v40  ;;  %2473 = vmatpush.msrb.mxu3 %v11308_v6 }
 0x479   :  { %2333 = vmatpush.msra.mxu0 %v11305_v50  ;;  %2434 = vmatpush.msrb.mxu1 %v11310_v32  ;;  %v11350_v32 = vld [vmem:[#allocation32_spill] sm:$0xff] }
 0x47a   :  { %2373 = vmatpush.msra.mxu2 %v11307_v7  ;;  %2474 = vmatpush.msrb.mxu3 %v11312_v37 }
 0x47b   :  { %2334 = vmatpush.msra.mxu0 %v11309_v0  ;;  %2435 = vmatpush.msrb.mxu1 %v11314_v48 }
 0x47c   :  { %2374 = vmatpush.msra.mxu2 %v11311_v20  ;;  %2475 = vmatpush.msrb.mxu3 %v11316_v27 }
 0x47d   :  { %2335 = vmatpush.msra.mxu0 %v11313_v23 }
 0x47e   :  { %2375 = vmatpush.msra.mxu2 %v11315_v28 }
 0x47f   :  { %2400 = vmatpush.msrb.mxu0 %v11317_v58 }
 0x480   :  { %2440 = vmatpush.msrb.mxu2 %v11318_v19  ;;  %v11351_v19 = vld [vmem:[#allocation31_spill] sm:$0xff] }
 0x481   :  { %2401 = vmatpush.msrb.mxu0 %v11319_v56 }
 0x482   :  { %2441 = vmatpush.msrb.mxu2 %v11320_v36 }
 0x483   :  { %2402 = vmatpush.msrb.mxu0 %v11321_v62 }
 0x484   :  { %2442 = vmatpush.msrb.mxu2 %v11322_v26 }
 0x485   :  { %2403 = vmatpush.msrb.mxu0 %v11323_v42 }
 0x486   :  { %2443 = vmatpush.msrb.mxu2 %v11324_v11 }
 0x487   :  { %2404 = vmatpush.msrb.mxu0 %v11325_v8 }
 0x488   :  { %2444 = vmatpush.msrb.mxu2 %v11326_v5 }
 0x489   :  { %2405 = vmatpush.msrb.mxu0 %v11327_v25 }
 0x48a   :  { %2445 = vmatpush.msrb.mxu2 %v11328_v13  ;;  %v11352_v13 = vld [vmem:[#allocation34_spill] sm:$0xff] }
 0x48b   :  { %2406 = vmatpush.msrb.mxu0 %v11329_v63 }
 0x48c   :  { %2446 = vmatpush.msrb.mxu2 %v11330_v30 }
 0x48d   :  { %2407 = vmatpush.msrb.mxu0 %v11331_v39 }
 0x48e   :  { %2447 = vmatpush.msrb.mxu2 %v11332_v33 }
 0x48f   :  { %2408 = vmatpush.msrb.mxu0 %v11333_v52 }
 0x490   :  { %2448 = vmatpush.msrb.mxu2 %v11334_v44 }
 0x491   :  { %2409 = vmatpush.msrb.mxu0 %v11335_v16 }
 0x492   :  { %2449 = vmatpush.msrb.mxu2 %v11336_v12 }
 0x493   :  { %2410 = vmatpush.msrb.mxu0 %v11337_v18  ;;  %v1970_v59 = vpop.f32.mrf.mxu1 }
 0x494   :  { %2450 = vmatpush.msrb.mxu2 %v11338_v3 }
 0x495   :  { %2411 = vmatpush.msrb.mxu0 %v11339_v60 }
 0x496   :  { %2451 = vmatpush.msrb.mxu2 %v11340_v55 }
 0x497   :  { %2412 = vmatpush.msrb.mxu0 %v11341_v31 }
 0x498   :  { %2452 = vmatpush.msrb.mxu2 %v11342_v22 }
 0x499   :  { %2413 = vmatpush.msrb.mxu0 %v11343_v2  ;;  %v2010_v37 = vpop.f32.mrf.mxu3 }
 0x49a   :  { %2453 = vmatpush.msrb.mxu2 %v11344_v57 }
 0x49b   :  { %2414 = vmatpush.msrb.mxu0 %v11345_v34  ;;  %v2050_v39 = vpop.f32.mrf.mxu1 }
 0x49c   :  { %2454 = vmatpush.msrb.mxu2 %v11346_v14 }
 0x49d   :  { %2415 = vmatpush.msrb.mxu0 %v11347_v47 }
 0x49e   :  { %2455 = vmatpush.msrb.mxu2 %v11348_v4 }
 0x4a1   :  { %v2090_v36 = vpop.f32.mrf.mxu3 }
 0x4bb   :  { %v1950_v40 = vpop.f32.mrf.mxu0 }
 0x4bc   :  { %v1951_v50 = vadd.f32 %v1950_v40, %v11349_v54 }
 0x4be   :  { %v1971_v7 = vadd.f32 %v1970_v59, %v1951_v50  ;;  %v2195_v59 = vpop.f32.mrf.mxu1 }
 0x4c0   :  { %v3353_v6 = vmul.f32 -1.442695, %v1971_v7 }
 0x4c1   :  { %v1990_v0 = vpop.f32.mrf.mxu2 }
 0x4c2   :  { %3522 = vpow2.f32 %v3353_v6  ;;  %v1991_v20 = vadd.f32 %v1990_v0, %v11350_v32 }
 0x4c3   :  { %v2030_v11 = vpop.f32.mrf.mxu0  ;;  %v2235_v7 = vpop.f32.mrf.mxu3 }
 0x4c4   :  { %v2011_v23 = vadd.f32 %v2010_v37, %v1991_v20  ;;  %v2031_v63 = vadd.f32 %v2030_v11, %v11352_v13 }
 0x4c6   :  { %v3354_v48 = vmul.f32 -1.442695, %v2011_v23  ;;  %v2051_v33 = vadd.f32 %v2050_v39, %v2031_v63 }
 0x4c8   :  { %v3523_v28 = vpop.eup %3522  ;;  %3524 = vpow2.f32 %v3354_v48 }
 0x4c9   :  { %v2096_v27 = vadd.f32 1.0, %v3523_v28 }
 0x4ca   :  { %v2070_v58 = vpop.f32.mrf.mxu2 }
 0x4cb   :  { %3526 = vrcp.f32 %v2096_v27  ;;  %v2071_v56 = vadd.f32 %v2070_v58, %v11351_v19  ;;  %v2108_v3 = vand.u32 2147483648, %v2096_v27  ;;  %vm2102_vm8 = vweird.f32 %v2096_v27 }
 0x4cc   :  { %v2106_v31 = vand.u32 2147483647, %v2096_v27  ;;  %v2242_v58 = vrot.slane %v2195_v59, 6  ;;  %v8674_v59 = vld [vmem:[%s10061_s1 + $0x1b8] sm:$0xff] }
 0x4cd   :  { %v2091_v26 = vadd.f32 %v2090_v36, %v2071_v56  ;;  %v2109_v14 = vor.u32 1.1754944e-38, %v2108_v3  ;;  %v2244_v56 = vrot.slane %v2235_v7, 2 }
 0x4ce   :  { %v3525_v62 = vpop.eup %3524  ;;  %vm2107_vm12 = vcmp.eq.f32.partialorder %v2106_v31, 8.507059e+37 }
 0x4cf   :  { %v2115_v42 = vadd.f32 1.0, %v3525_v62  ;;  %v3355_v8 = vmul.f32 -1.442695, %v2091_v26 }
 0x4d1   :  { %v3527_v5 = vpop.eup %3526  ;;  %3528 = vrcp.f32 %v2115_v42  ;;  %v2127_v22 = vand.u32 2147483648, %v2115_v42  ;;  %v2125_v34 = vand.u32 2147483647, %v2115_v42  ;;  %vm2121_vm11 = vweird.f32 %v2115_v42 }
 0x4d2   :  { %v2098_v25 = vmul.f32 %v3527_v5, %v2096_v27  ;;  %3530 = vpow2.f32 %v3355_v8  ;;  %vm2103_vm7 = vweird.f32 %v3527_v5 }
 0x4d3   :  { %3532 = vtanh.f32 %v2051_v33  ;;  %vm2104_vm9 = vmor %vm2102_vm8, %vm2103_vm7  ;;  %v2128_v4 = vor.u32 1.1754944e-38, %v2127_v22  ;;  %vm2126_vm14 = vcmp.eq.f32.partialorder %v2125_v34, 8.507059e+37 }
 0x4d4   :  { %v2099_v30 = vsub.f32 1.0, %v2098_v25 }
 0x4d6   :  { %v2100_v52 = vmul.f32 %v3527_v5, %v2099_v30 }
 0x4d7   :  { %v3529_v44 = vpop.eup %3528 }
 0x4d8   :  { %v3531_v16 = vpop.eup %3530  ;;  %v2117_v12 = vmul.f32 %v3529_v44, %v2115_v42  ;;  %v2101_v18 = vadd.f32 %v3527_v5, %v2100_v52  ;;  %vm2122_vm10 = vweird.f32 %v3529_v44  ;;  %v3356_v42 = vld [vmem:[%s10063_s0 + $0x28] sm:$0xff] }
 0x4d9   :  { %v2135_v60 = vadd.f32 1.0, %v3531_v16  ;;  %vm2123_vm13 = vmor %vm2121_vm11, %vm2122_vm10  ;;  %v3533_v50 = vpop.eup %3532 }
 0x4da   :  { %v2118_v55 = vsub.f32 1.0, %v2117_v12  ;;  %v2105_v57 = vsel %vm2104_vm9, %v3527_v5, %v2101_v18 }
 0x4db   :  { %3534 = vrcp.f32 %v2135_v60  ;;  %v2110_v40 = vsel %vm2107_vm12, %v2109_v14, %v2105_v57  ;;  %v2175_v28 = vpop.f32.mrf.mxu0  ;;  %v2147_v5 = vand.u32 2147483648, %v2135_v60  ;;  %v2145_v30 = vand.u32 2147483647, %v2135_v60  ;;  %v8655_v14 = vld [vmem:[%s10061_s1 + $0x1c8] sm:$0xff] }
 0x4dc   :  { %v2119_v2 = vmul.f32 %v3529_v44, %v2118_v55  ;;  %v2152_v23 = vmul.f32 %v3533_v50, %v2110_v40  ;;  %v2245_v11 = vsel %vm179_vm0, %v2175_v28, %v2242_v58  ;;  %vm2141_vm3 = vweird.f32 %v2135_v60  ;;  %v8668_v50 = vld [vmem:[%s10061_s1 + $0x1a8] sm:$0xff] }
 0x4dd   :  { %v2148_v12 = vor.u32 1.1754944e-38, %v2147_v5  ;;  %vm2146_vm5 = vcmp.eq.f32.partialorder %v2145_v30, 8.507059e+37  ;;  %v8710_v28 = vld [vmem:[%s10061_s1 + $0x148] sm:$0xff] }
 0x4de   :  { %v2120_v47 = vadd.f32 %v3529_v44, %v2119_v2  ;;  %v8647_v2 = vld [vmem:[%s10061_s1 + $0x1f8] sm:$0xff] }
 0x4e0   :  { %v2124_v6 = vsel %vm2123_vm13, %v3529_v44, %v2120_v47  ;;  %v8661_v47 = vld [vmem:[%s10061_s1 + $0x1d8] sm:$0xff] }
 0x4e1   :  { %v3535_v0 = vpop.eup %3534  ;;  %v2129_v20 = vsel %vm2126_vm14, %v2128_v4, %v2124_v6 }
 0x4e2   :  { %v2151_v37 = vmul.f32 %v2129_v20, %v8304_v61  ;;  %v2137_v48 = vmul.f32 %v3535_v0, %v2135_v60  ;;  %v2215_v27 = vpop.f32.mrf.mxu2  ;;  %vm2142_vm15 = vweird.f32 %v3535_v0  ;;  %v8641_v60 = vld [vmem:[%s10061_s1 + $0x1e8] sm:$0xff]  ;;  %v8690_v20 = vld [vmem:[%s10061_s1 + $0x198] sm:$0xff] }
 0x4e3   :  { %v2243_v36 = vrot.slane %v2215_v27, 4  ;;  %vm2143_vm4 = vmor %vm2141_vm3, %vm2142_vm15  ;;  %v8716_v27 = vld [vmem:[%s10061_s1 + $0x158] sm:$0xff] }
 0x4e4   :  { %v8624_v62 = vadd.f32 %v2152_v23, %v2151_v37  ;;  %v2138_v26 = vsub.f32 1.0, %v2137_v48  ;;  %v8698_v37 = vld [vmem:[%s10061_s1 + $0x168] sm:$0xff]  ;;  %v8704_v23 = vld [vmem:[%s10061_s1 + $0x178] sm:$0xff] }
 0x4e5   :  { %v2246_v8 = vsel %vm181_vm1, %v2243_v36, %v2244_v56  ;;  %v8723_v56 = vld [vmem:[%s10061_s1 + $0x128] sm:$0xff]  ;;  %v8729_v36 = vld [vmem:[%s10061_s1 + $0x138] sm:$0xff] }
 0x4e6   :  { %3536 = vtanh.f32 %v8624_v62  ;;  %v2247_v61 = vsel %vm183_vm2, %v2245_v11, %v2246_v8  ;;  %v2139_v25 = vmul.f32 %v3535_v0, %v2138_v26 }
 0x4e7   :  { %v8633_v63 = vadd.f32 %v3356_v42, %v2247_v61  ;;  %v8739_v61 = vld [vmem:[%s10061_s1 + $0x108] sm:$0xff] }
 0x4e8   :  { %v2140_v39 = vadd.f32 %v3535_v0, %v2139_v25  ;;  %v8745_v25 = vld [vmem:[%s10061_s1 + $0x118] sm:$0xff] }
 0x4e9   :  { %v3357_v33 = vmul.f32 -1.442695, %v8633_v63  ;;  %v2270_v52 = vrot.slane %v8633_v63, 2  ;;  %v2294_v44 = vrot.slane %v8633_v63, 6  ;;  %v2291_v11 = vrot.slane %v8633_v63, 4 }
 0x4ea   :  { %v2144_v16 = vsel %vm2143_vm4, %v3535_v0, %v2140_v39  ;;  %v8684_v0 = vld [vmem:[%s10061_s1 + $0x188] sm:$0xff] }
 0x4eb   :  { %3538 = vpow2.f32 %v3357_v33  ;;  %v3358_v18 = vmul.f32 -1.442695, %v2270_v52  ;;  %v3359_v3 = vmul.f32 -1.442695, %v2294_v44  ;;  %v2149_v31 = vsel %vm2146_vm5, %v2148_v12, %v2144_v16  ;;  %v8755_v44 = vld [vmem:[%s10061_s1 + $0xe8] sm:$0xff]  ;;  %v8761_v16 = vld [vmem:[%s10061_s1 + $0xf8] sm:$0xff] }
 0x4ec   :  { %v3537_v55 = vpop.eup %3536 }
 0x4ed   :  { %3540 = vpow2.f32 %v3358_v18  ;;  %v2155_v22 = vmul.f32 %v3537_v55, %v2149_v31 }
 0x4ee   :  { %3542 = vpow2.f32 %v3359_v3  ;;  %v8822_v3 = vld [vmem:[%s10061_s1 + $0x78] sm:$0xff] }
 0x4ef   :  { %2356 = vmatmul.f32.vlgmr.msra.gmra.mxu1 %v2155_v22  ;;  %2396 = vmatmul.f32.vlgmr.msra.gmra.mxu3 %v2155_v22 }
 0x4f0   :  { %2565 = vmatpush.msra.mxu1 %v8641_v60  ;;  %2605 = vmatpush.msra.mxu3 %v8647_v2 }
 0x4f1   :  { %v3539_v57 = vpop.eup %3538 }
 0x4f2   :  { %v8650_v34 = vadd.f32 1.0, %v3539_v57  ;;  %2566 = vmatpush.msra.mxu1 %v8655_v14  ;;  %2606 = vmatpush.msra.mxu3 %v8661_v47  ;;  %v8780_v57 = vld [vmem:[%s10061_s1 + $0xd8] sm:$0xff] }
 0x4f3   :  { %v3541_v4 = vpop.eup %3540 }
 0x4f4   :  { %v3543_v40 = vpop.eup %3542  ;;  %3544 = vrcp.f32 %v8650_v34  ;;  %2567 = vmatpush.msra.mxu1 %v8668_v50  ;;  %2607 = vmatpush.msra.mxu3 %v8674_v59  ;;  %v8677_v7 = vadd.f32 1.0, %v3541_v4  ;;  %v2265_v63 = vand.u32 2147483648, %v8650_v34  ;;  %v2263_v33 = vand.u32 2147483647, %v8650_v34 }
 0x4f5   :  { %v8679_v6 = vadd.f32 1.0, %v3543_v40  ;;  %vm2259_vm7 = vweird.f32 %v8650_v34 }
 0x4f6   :  { %2568 = vmatpush.msra.mxu1 %v8684_v0  ;;  %2608 = vmatpush.msra.mxu3 %v8690_v20  ;;  %3546 = vrcp.f32 %v8677_v7  ;;  %v2287_v18 = vand.u32 2147483648, %v8677_v7  ;;  %v2285_v31 = vand.u32 2147483647, %v8677_v7  ;;  %v2266_v4 = vor.u32 1.1754944e-38, %v2265_v63  ;;  %v8808_v63 = vld [vmem:[%s10061_s1 + $0x98] sm:$0xff] }
 0x4f7   :  { %2436 = vmatmul.f32.vlgmr.msrb.gmra.mxu1 %v2155_v22  ;;  %2476 = vmatmul.f32.vlgmr.msrb.gmra.mxu3 %v2155_v22  ;;  %3548 = vrcp.f32 %v8679_v6  ;;  %v8774_v22 = vld [vmem:[%s10061_s1 + $0xc8] sm:$0xff]  ;;  %vm2264_vm10 = vcmp.eq.f32.partialorder %v2263_v33, 8.507059e+37  ;;  %vm2281_vm11 = vweird.f32 %v8677_v7  ;;  %vm2305_vm15 = vweird.f32 %v8679_v6 }
 0x4f8   :  { %2569 = vmatpush.msra.mxu1 %v8698_v37  ;;  %2609 = vmatpush.msra.mxu3 %v8704_v23  ;;  %3550 = vtanh.f32 %v2291_v11  ;;  %v8795_v11 = vld [vmem:[%s10061_s1 + $0xb8] sm:$0xff]  ;;  %vm2286_vm13 = vcmp.eq.f32.partialorder %v2285_v31, 8.507059e+37 }
 0x4f9   :  { %v8836_v31 = vld [vmem:[%s10061_s1 + $0x58] sm:$0xff] }
 0x4fa   :  { %v3545_v48 = vpop.eup %3544  ;;  %2570 = vmatpush.msra.mxu1 %v8710_v28  ;;  %2610 = vmatpush.msra.mxu3 %v8716_v27 }
 0x4fb   :  { %v2255_v58 = vmul.f32 %v3545_v48, %v8650_v34  ;;  %vm2260_vm6 = vweird.f32 %v3545_v48 }
 0x4fc   :  { %2571 = vmatpush.msra.mxu1 %v8723_v56  ;;  %2611 = vmatpush.msra.mxu3 %v8729_v36  ;;  %v3547_v26 = vpop.eup %3546  ;;  %vm8766_vm8 = vmor %vm2259_vm7, %vm2260_vm6 }
 0x4fd   :  { %v2256_v42 = vsub.f32 1.0, %v2255_v58  ;;  %v8733_v8 = vpop.eup %3548  ;;  %v2277_v5 = vmul.f32 %v3547_v26, %v8677_v7  ;;  %vm2282_vm9 = vweird.f32 %v3547_v26  ;;  %v8802_v7 = vld [vmem:[%s10061_s1 + $0x88] sm:$0xff] }
 0x4fe   :  { %2572 = vmatpush.msra.mxu1 %v8739_v61  ;;  %2612 = vmatpush.msra.mxu3 %v8745_v25  ;;  %v2301_v39 = vmul.f32 %v8733_v8, %v8679_v6  ;;  %vm2283_vm12 = vmor %vm2281_vm11, %vm2282_vm9  ;;  %vm2306_vm14 = vweird.f32 %v8733_v8 }
 0x4ff   :  { %v2257_v30 = vmul.f32 %v3545_v48, %v2256_v42  ;;  %v2278_v52 = vsub.f32 1.0, %v2277_v5  ;;  %v8789_v42 = vld [vmem:[%s10061_s1 + $0xa8] sm:$0xff]  ;;  %v2288_v5 = vor.u32 1.1754944e-38, %v2287_v18  ;;  %vm8857_vm3 = vmor %vm2305_vm15, %vm2306_vm14 }
 0x500   :  { %2573 = vmatpush.msra.mxu1 %v8755_v44  ;;  %2613 = vmatpush.msra.mxu3 %v8761_v16  ;;  %v2302_v40 = vsub.f32 1.0, %v2301_v39  ;;  %v3551_v39 = vpop.eup %3550  ;;  %v8816_v18 = vld [vmem:[%s10061_s1 + $0x68] sm:$0xff] }
 0x501   :  { %v2258_v12 = vadd.f32 %v3545_v48, %v2257_v30  ;;  %v2279_v55 = vmul.f32 %v3547_v26, %v2278_v52 }
 0x502   :  { %2574 = vmatpush.msra.mxu1 %v8774_v22  ;;  %2614 = vmatpush.msra.mxu3 %v8780_v57  ;;  %v2303_v52 = vmul.f32 %v8733_v8, %v2302_v40  ;;  %v8846_v40 = vld [vmem:[%s10061_s1 + $0x28] sm:$0xff] }
 0x503   :  { %v2262_v34 = vsel %vm8766_vm8, %v3545_v48, %v2258_v12  ;;  %v2280_v58 = vadd.f32 %v3547_v26, %v2279_v55 }
 0x504   :  { %2575 = vmatpush.msra.mxu1 %v8789_v42  ;;  %2615 = vmatpush.msra.mxu3 %v8795_v11  ;;  %v2267_v48 = vsel %vm2264_vm10, %v2266_v4, %v2262_v34  ;;  %v2304_v34 = vadd.f32 %v8733_v8, %v2303_v52  ;;  %v2311_v4 = vand.u32 2147483648, %v8679_v6  ;;  %v8885_v52 = vld [vmem:[%s10062_s2 + $0x3e8] sm:$0xff] }
 0x505   :  { %v2284_v30 = vsel %vm2283_vm12, %v3547_v26, %v2280_v58  ;;  %v2316_v12 = vmul.f32 %v3551_v39, %v2267_v48  ;;  %v8852_v58 = vld [vmem:[%s10061_s1 + $0x38] sm:$0xff]  ;;  %v2309_v48 = vand.u32 2147483647, %v8679_v6 }
 0x506   :  { %2576 = vmatpush.msra.mxu1 %v8802_v7  ;;  %2616 = vmatpush.msra.mxu3 %v8808_v63  ;;  %v2289_v33 = vsel %vm2286_vm13, %v2288_v5, %v2284_v30  ;;  %v8864_v30 = vld [vmem:[%s10061_s1 + $0x8] sm:$0xff]  ;;  %v8870_v39 = vld [vmem:[%s10061_s1 + $0x18] sm:$0xff]  ;;  %v2308_v6 = vsel %vm8857_vm3, %v8733_v8, %v2304_v34  ;;  %v8891_v8 = vld [vmem:[%s10062_s2 + $0x3c0] sm:$0xff] }
 0x507   :  { %v2315_v26 = vmul.f32 %v2289_v33, %v8354_v15  ;;  %v8830_v15 = vld [vmem:[%s10061_s1 + $0x48] sm:$0xff]  ;;  %v8879_v33 = vld [vmem:[%s10062_s2 + $0x3e0] sm:$0xff]  ;;  %vm2310_vm4 = vcmp.eq.f32.partialorder %v2309_v48, 8.507059e+37 }
 0x508   :  { %2577 = vmatpush.msra.mxu1 %v8816_v18  ;;  %2617 = vmatpush.msra.mxu3 %v8822_v3  ;;  %11357 = vst [vmem:[#allocation33_spill] sm:$0xff] %v8879_v33  ;;  %v8911_v48 = vld [vmem:[%s10062_s2 + $0x3a8] sm:$0xff] }
 0x509   :  { %v8825_v55 = vadd.f32 %v2316_v12, %v2315_v26  ;;  %v2312_v26 = vor.u32 1.1754944e-38, %v2311_v4  ;;  %v8897_v12 = vld [vmem:[%s10062_s2 + $0x3c8] sm:$0xff]  ;;  %v8905_v4 = vld [vmem:[%s10062_s2 + $0x3a0] sm:$0xff] }
 0x50a   :  { %2578 = vmatpush.msra.mxu1 %v8830_v15  ;;  %2618 = vmatpush.msra.mxu3 %v8836_v31 }
 0x50b   :  { %3552 = vtanh.f32 %v8825_v55  ;;  %v2313_v5 = vsel %vm2310_vm4, %v2312_v26, %v2308_v6  ;;  %v8924_v6 = vld [vmem:[%s10062_s2 + $0x380] sm:$0xff] }
 0x50c   :  { %2579 = vmatpush.msra.mxu1 %v8846_v40  ;;  %2619 = vmatpush.msra.mxu3 %v8852_v58  ;;  %v9021_v26 = vld [vmem:[%s10061_s1 + $0xe0] sm:$0xff] }
 0x50d   :  { %11371 = vst [vmem:[#allocation46_spill] sm:$0xff] %v9021_v26 }
 0x50e   :  { %2580 = vmatpush.msra.mxu1 %v8864_v30  ;;  %2620 = vmatpush.msra.mxu3 %v8870_v39 }
 0x510   :  { %2727 = vmatpush.msrb.mxu1 %v8879_v33  ;;  %2767 = vmatpush.msrb.mxu3 %v8885_v52 }
 0x511   :  { %v3553_v34 = vpop.eup %3552 }
 0x512   :  { %2728 = vmatpush.msrb.mxu1 %v8891_v8  ;;  %2768 = vmatpush.msrb.mxu3 %v8897_v12  ;;  %v8900_v33 = vmul.f32 %v3553_v34, %v2313_v5  ;;  %v9027_v34 = vld [vmem:[%s10062_s2 + $0x2c0] sm:$0xff] }
 0x513   :  { %11372 = vst [vmem:[#allocation45_spill] sm:$0xff] %v9027_v34  ;;  %v9040_v5 = vld [vmem:[%s10061_s1 + $0xc0] sm:$0xff] }
 0x514   :  { %2729 = vmatpush.msrb.mxu1 %v8905_v4  ;;  %2769 = vmatpush.msrb.mxu3 %v8911_v48  ;;  %11374 = vst [vmem:[#allocation48_spill] sm:$0xff] %v9040_v5 }
 0x515   :  { %2336 = vmatmul.f32.vlgmr.msra.gmra.mxu0 %v8900_v33  ;;  %2376 = vmatmul.f32.vlgmr.msra.gmra.mxu2 %v8900_v33 }
 0x516   :  { %2545 = vmatpush.msra.mxu0 %v8382_v24  ;;  %2581 = vmatmul.f32.vlgmr.msra.gmra.mxu1 %v8900_v33  ;;  %v8931_v24 = vld [vmem:[%s10062_s2 + $0x388] sm:$0xff] }
 0x517   :  { %2585 = vmatpush.msra.mxu2 %v8389_v53  ;;  %2621 = vmatmul.f32.vlgmr.msra.gmra.mxu3 %v8900_v33  ;;  %11358 = vst [vmem:[#allocation37_spill] sm:$0xff] %v8931_v24  ;;  %v8938_v53 = vld [vmem:[%s10062_s2 + $0x360] sm:$0xff] }
 0x518   :  { %2546 = vmatpush.msra.mxu0 %v8396_v45  ;;  %2730 = vmatpush.msrb.mxu1 %v8924_v6  ;;  %11359 = vst [vmem:[#allocation35_spill] sm:$0xff] %v8938_v53  ;;  %v8945_v45 = vld [vmem:[%s10062_s2 + $0x368] sm:$0xff] }
 0x519   :  { %2586 = vmatpush.msra.mxu2 %v8403_v51  ;;  %2770 = vmatpush.msrb.mxu3 %v8931_v24  ;;  %11360 = vst [vmem:[#allocation38_spill] sm:$0xff] %v8945_v45  ;;  %v8952_v51 = vld [vmem:[%s10062_s2 + $0x340] sm:$0xff] }
 0x51a   :  { %2547 = vmatpush.msra.mxu0 %v8410_v9  ;;  %2731 = vmatpush.msrb.mxu1 %v8938_v53  ;;  %11361 = vst [vmem:[#allocation36_spill] sm:$0xff] %v8952_v51  ;;  %v8963_v9 = vld [vmem:[%s10062_s2 + $0x348] sm:$0xff] }
 0x51b   :  { %2587 = vmatpush.msra.mxu2 %v8417_v43  ;;  %2771 = vmatpush.msrb.mxu3 %v8945_v45  ;;  %11362 = vst [vmem:[#allocation40_spill] sm:$0xff] %v8963_v9  ;;  %v8970_v43 = vld [vmem:[%s10062_s2 + $0x320] sm:$0xff] }
 0x51c   :  { %2548 = vmatpush.msra.mxu0 %v8424_v35  ;;  %2732 = vmatpush.msrb.mxu1 %v8952_v51  ;;  %11363 = vst [vmem:[#allocation39_spill] sm:$0xff] %v8970_v43  ;;  %v8977_v35 = vld [vmem:[%s10062_s2 + $0x328] sm:$0xff] }
 0x51d   :  { %2588 = vmatpush.msra.mxu2 %v8431_v29  ;;  %2416 = vmatmul.f32.vlgmr.msrb.gmra.mxu0 %v8900_v33  ;;  %11364 = vst [vmem:[#allocation2_spill] sm:$0xff] %v8977_v35  ;;  %v8983_v29 = vld [vmem:[%s10061_s1 + $0x120] sm:$0xff] }
 0x51e   :  { %2456 = vmatmul.f32.vlgmr.msrb.gmra.mxu2 %v8900_v33  ;;  %2549 = vmatpush.msra.mxu0 %v8439_v38  ;;  %11365 = vst [vmem:[#allocation42_spill] sm:$0xff] %v8983_v29  ;;  %v8989_v38 = vld [vmem:[%s10062_s2 + $0x300] sm:$0xff] }
 0x51f   :  { %2589 = vmatpush.msra.mxu2 %v8445_v17  ;;  %2772 = vmatpush.msrb.mxu3 %v8963_v9  ;;  %11366 = vst [vmem:[#allocation41_spill] sm:$0xff] %v8989_v38  ;;  %v8996_v17 = vld [vmem:[%s10062_s2 + $0x308] sm:$0xff] }
 0x520   :  { %2550 = vmatpush.msra.mxu0 %v8452_v1  ;;  %2733 = vmatpush.msrb.mxu1 %v8970_v43  ;;  %11367 = vst [vmem:[#allocation3_spill] sm:$0xff] %v8996_v17  ;;  %v9002_v1 = vld [vmem:[%s10061_s1 + $0x100] sm:$0xff] }
 0x521   :  { %2590 = vmatpush.msra.mxu2 %v8459_v46  ;;  %2773 = vmatpush.msrb.mxu3 %v8977_v35  ;;  %11368 = vst [vmem:[#allocation44_spill] sm:$0xff] %v9002_v1  ;;  %v9008_v46 = vld [vmem:[%s10062_s2 + $0x2e0] sm:$0xff] }
 0x522   :  { %2551 = vmatpush.msra.mxu0 %v8983_v29  ;;  %2734 = vmatpush.msrb.mxu1 %v8989_v38  ;;  %11369 = vst [vmem:[#allocation43_spill] sm:$0xff] %v9008_v46 }
 0x523   :  { %2591 = vmatpush.msra.mxu2 %v8468_v21  ;;  %2774 = vmatpush.msrb.mxu3 %v8996_v17  ;;  %v9015_v21 = vld [vmem:[%s10062_s2 + $0x2e8] sm:$0xff] }
 0x524   :  { %2552 = vmatpush.msra.mxu0 %v9002_v1  ;;  %2735 = vmatpush.msrb.mxu1 %v9008_v46  ;;  %11370 = vst [vmem:[#allocation4_spill] sm:$0xff] %v9015_v21 }
 0x525   :  { %2592 = vmatpush.msra.mxu2 %v8477_v49  ;;  %2775 = vmatpush.msrb.mxu3 %v9015_v21  ;;  %v9034_v49 = vld [vmem:[%s10062_s2 + $0x2c8] sm:$0xff] }
 0x526   :  { %2553 = vmatpush.msra.mxu0 %v9021_v26  ;;  %2736 = vmatpush.msrb.mxu1 %v9027_v34  ;;  %11373 = vst [vmem:[#allocation6_spill] sm:$0xff] %v9034_v49  ;;  %v9046_v34 = vld [vmem:[%s10062_s2 + $0x2a0] sm:$0xff] }
 0x527   :  { %2593 = vmatpush.msra.mxu2 %v8486_v10  ;;  %2776 = vmatpush.msrb.mxu3 %v9034_v49  ;;  %11375 = vst [vmem:[#allocation47_spill] sm:$0xff] %v9046_v34  ;;  %v9053_v10 = vld [vmem:[%s10062_s2 + $0x2a8] sm:$0xff] }
 0x528   :  { %2554 = vmatpush.msra.mxu0 %v9040_v5  ;;  %2737 = vmatpush.msrb.mxu1 %v9046_v34  ;;  %11376 = vst [vmem:[#allocation8_spill] sm:$0xff] %v9053_v10  ;;  %v9059_v5 = vld [vmem:[%s10061_s1 + $0xa0] sm:$0xff] }
 0x529   :  { %2594 = vmatpush.msra.mxu2 %v8495_v41  ;;  %2777 = vmatpush.msrb.mxu3 %v9053_v10  ;;  %11377 = vst [vmem:[#allocation51_spill] sm:$0xff] %v9059_v5  ;;  %v9065_v34 = vld [vmem:[%s10062_s2 + $0x280] sm:$0xff]  ;;  %v9071_v41 = vld [vmem:[%s10061_s1 + $0xb0] sm:$0xff]  ;;  %v9077_v10 = vld [vmem:[%s10062_s2 + $0x288] sm:$0xff] }
 0x52a   :  { %2555 = vmatpush.msra.mxu0 %v9059_v5  ;;  %11378 = vst [vmem:[#allocation5_spill] sm:$0xff] %v9065_v34  ;;  %2738 = vmatpush.msrb.mxu1 %v9065_v34  ;;  %v9083_v5 = vld [vmem:[%s10061_s1 + $0x80] sm:$0xff] }
 0x52b   :  { %11379 = vst [vmem:[#allocation52_spill] sm:$0xff] %v9071_v41  ;;  %2595 = vmatpush.msra.mxu2 %v9071_v41  ;;  %2778 = vmatpush.msrb.mxu3 %v9077_v10  ;;  %v9089_v34 = vld [vmem:[%s10062_s2 + $0x260] sm:$0xff]  ;;  %v9095_v41 = vld [vmem:[%s10061_s1 + $0x90] sm:$0xff] }
 0x52c   :  { %11380 = vst [vmem:[#allocation10_spill] sm:$0xff] %v9077_v10  ;;  %2556 = vmatpush.msra.mxu0 %v9083_v5  ;;  %2739 = vmatpush.msrb.mxu1 %v9089_v34  ;;  %v9101_v10 = vld [vmem:[%s10062_s2 + $0x268] sm:$0xff] }
 0x52d   :  { %11381 = vst [vmem:[#allocation55_spill] sm:$0xff] %v9083_v5  ;;  %2596 = vmatpush.msra.mxu2 %v9095_v41  ;;  %2779 = vmatpush.msrb.mxu3 %v9101_v10  ;;  %v9107_v5 = vld [vmem:[%s10061_s1 + $0x60] sm:$0xff] }
 0x52e   :  { %11382 = vst [vmem:[#allocation7_spill] sm:$0xff] %v9089_v34  ;;  %2557 = vmatpush.msra.mxu0 %v9107_v5  ;;  %v9113_v34 = vld [vmem:[%s10062_s2 + $0x240] sm:$0xff] }
 0x52f   :  { %11383 = vst [vmem:[#allocation56_spill] sm:$0xff] %v9095_v41  ;;  %2740 = vmatpush.msrb.mxu1 %v9113_v34  ;;  %v9119_v41 = vld [vmem:[%s10061_s1 + $0x70] sm:$0xff] }
 0x530   :  { %11384 = vst [vmem:[#allocation12_spill] sm:$0xff] %v9101_v10  ;;  %2597 = vmatpush.msra.mxu2 %v9119_v41  ;;  %v9125_v10 = vld [vmem:[%s10062_s2 + $0x248] sm:$0xff] }
 0x531   :  { %11385 = vst [vmem:[#allocation59_spill] sm:$0xff] %v9107_v5  ;;  %2780 = vmatpush.msrb.mxu3 %v9125_v10  ;;  %v9131_v5 = vld [vmem:[%s10061_s1 + $0x40] sm:$0xff] }
 0x532   :  { %11386 = vst [vmem:[#allocation9_spill] sm:$0xff] %v9113_v34  ;;  %2558 = vmatpush.msra.mxu0 %v9131_v5  ;;  %v9137_v34 = vld [vmem:[%s10062_s2 + $0x220] sm:$0xff] }
 0x533   :  { %11387 = vst [vmem:[#allocation60_spill] sm:$0xff] %v9119_v41  ;;  %2741 = vmatpush.msrb.mxu1 %v9137_v34  ;;  %v9143_v41 = vld [vmem:[%s10061_s1 + $0x50] sm:$0xff] }
 0x534   :  { %11388 = vst [vmem:[#allocation14_spill] sm:$0xff] %v9125_v10  ;;  %2598 = vmatpush.msra.mxu2 %v9143_v41  ;;  %v9149_v10 = vld [vmem:[%s10062_s2 + $0x228] sm:$0xff] }
 0x535   :  { %11389 = vst [vmem:[#allocation63_spill] sm:$0xff] %v9131_v5  ;;  %2781 = vmatpush.msrb.mxu3 %v9149_v10  ;;  %v9155_v5 = vld [vmem:[%s10061_s1 + $0x20] sm:$0xff] }
 0x536   :  { %11390 = vst [vmem:[#allocation11_spill] sm:$0xff] %v9137_v34  ;;  %2559 = vmatpush.msra.mxu0 %v9155_v5  ;;  %v9161_v34 = vld [vmem:[%s10062_s2 + $0x200] sm:$0xff] }
 0x537   :  { %11391 = vst [vmem:[#allocation64_spill] sm:$0xff] %v9143_v41  ;;  %2742 = vmatpush.msrb.mxu1 %v9161_v34  ;;  %v9167_v41 = vld [vmem:[%s10061_s1 + $0x30] sm:$0xff] }
 0x538   :  { %11392 = vst [vmem:[#allocation16_spill] sm:$0xff] %v9149_v10  ;;  %2599 = vmatpush.msra.mxu2 %v9167_v41  ;;  %v9173_v10 = vld [vmem:[%s10062_s2 + $0x208] sm:$0xff] }
 0x539   :  { %11393 = vst [vmem:[#allocation67_spill] sm:$0xff] %v9155_v5  ;;  %2782 = vmatpush.msrb.mxu3 %v9173_v10  ;;  %v9179_v5 = vld [vmem:[%s10061_s1] sm:$0xff] }
 0x53a   :  { %11394 = vst [vmem:[#allocation13_spill] sm:$0xff] %v9161_v34  ;;  %2560 = vmatpush.msra.mxu0 %v9179_v5  ;;  %v9185_v34 = vld [vmem:[%s10062_s2 + $0x3f0] sm:$0xff] }
 0x53b   :  { %11395 = vst [vmem:[#allocation68_spill] sm:$0xff] %v9167_v41  ;;  %2807 = vmatpush.msra.mxu1 %v9185_v34  ;;  %v9191_v41 = vld [vmem:[%s10061_s1 + $0x10] sm:$0xff]  ;;  %2561 = vmatmul.f32.vlgmr.msra.gmra.mxu0 %v8900_v33 }
 0x53c   :  { %11396 = vst [vmem:[#allocation17_spill] sm:$0xff] %v9173_v10  ;;  %2600 = vmatpush.msra.mxu2 %v9191_v41 }
 0x53d   :  { %11397 = vst [vmem:[#allocation71_spill] sm:$0xff] %v9179_v5  ;;  %2601 = vmatmul.f32.vlgmr.msra.gmra.mxu2 %v8900_v33  ;;  %v9199_v5 = vld [vmem:[%s10062_s2 + $0x1e0] sm:$0xff] }
 0x53e   :  { %11398 = vst [vmem:[#allocation15_spill] sm:$0xff] %v9185_v34  ;;  %2707 = vmatpush.msrb.mxu0 %v9199_v5  ;;  %v9205_v34 = vld [vmem:[%s10062_s2 + $0x1e8] sm:$0xff]  ;;  %v9217_v33 = vld [vmem:[%s10062_s2 + $0x1c0] sm:$0xff] }
 0x53f   :  { %11399 = vst [vmem:[#allocation18_spill] sm:$0xff] %v9191_v41  ;;  %2747 = vmatpush.msrb.mxu2 %v9205_v34  ;;  %v9211_v41 = vld [vmem:[%s10062_s2 + $0x3f8] sm:$0xff] }
 0x540   :  { %11400 = vst [vmem:[#allocation19_spill] sm:$0xff] %v9199_v5  ;;  %2847 = vmatpush.msra.mxu3 %v9211_v41  ;;  %2708 = vmatpush.msrb.mxu0 %v9217_v33  ;;  %v9223_v5 = vld [vmem:[%s10062_s2 + $0x3d0] sm:$0xff] }
 0x541   :  { %11401 = vst [vmem:[#allocation72_spill] sm:$0xff] %v9205_v34  ;;  %2808 = vmatpush.msra.mxu1 %v9223_v5  ;;  %v9229_v34 = vld [vmem:[%s10062_s2 + $0x1c8] sm:$0xff] }
 0x542   :  { %11402 = vst [vmem:[#allocation20_spill] sm:$0xff] %v9211_v41  ;;  %2748 = vmatpush.msrb.mxu2 %v9229_v34  ;;  %v9235_v41 = vld [vmem:[%s10062_s2 + $0x3d8] sm:$0xff] }
 0x543   :  { %11403 = vst [vmem:[#allocation75_spill] sm:$0xff] %v9217_v33  ;;  %2848 = vmatpush.msra.mxu3 %v9235_v41  ;;  %v9241_v33 = vld [vmem:[%s10062_s2 + $0x1a0] sm:$0xff] }
 0x544   :  { %11404 = vst [vmem:[#allocation21_spill] sm:$0xff] %v9223_v5  ;;  %2709 = vmatpush.msrb.mxu0 %v9241_v33  ;;  %v9247_v5 = vld [vmem:[%s10062_s2 + $0x3b0] sm:$0xff] }
 0x545   :  { %11405 = vst [vmem:[#allocation76_spill] sm:$0xff] %v9229_v34  ;;  %2809 = vmatpush.msra.mxu1 %v9247_v5  ;;  %v9253_v34 = vld [vmem:[%s10062_s2 + $0x1a8] sm:$0xff] }
 0x546   :  { %11406 = vst [vmem:[#allocation22_spill] sm:$0xff] %v9235_v41  ;;  %2749 = vmatpush.msrb.mxu2 %v9253_v34  ;;  %v9259_v41 = vld [vmem:[%s10062_s2 + $0x3b8] sm:$0xff] }
 0x547   :  { %11407 = vst [vmem:[#allocation79_spill] sm:$0xff] %v9241_v33  ;;  %2849 = vmatpush.msra.mxu3 %v9259_v41  ;;  %v9265_v33 = vld [vmem:[%s10062_s2 + $0x180] sm:$0xff] }
 0x548   :  { %11408 = vst [vmem:[#allocation23_spill] sm:$0xff] %v9247_v5  ;;  %2710 = vmatpush.msrb.mxu0 %v9265_v33  ;;  %v9271_v5 = vld [vmem:[%s10062_s2 + $0x390] sm:$0xff] }
 0x549   :  { %11409 = vst [vmem:[#allocation80_spill] sm:$0xff] %v9253_v34  ;;  %2810 = vmatpush.msra.mxu1 %v9271_v5  ;;  %v9277_v34 = vld [vmem:[%s10062_s2 + $0x188] sm:$0xff] }
 0x54a   :  { %11410 = vst [vmem:[#allocation24_spill] sm:$0xff] %v9259_v41  ;;  %2750 = vmatpush.msrb.mxu2 %v9277_v34  ;;  %v9283_v41 = vld [vmem:[%s10062_s2 + $0x398] sm:$0xff] }
 0x54b   :  { %11411 = vst [vmem:[#allocation83_spill] sm:$0xff] %v9265_v33  ;;  %2850 = vmatpush.msra.mxu3 %v9283_v41  ;;  %v9289_v33 = vld [vmem:[%s10062_s2 + $0x160] sm:$0xff] }
 0x54c   :  { %11412 = vst [vmem:[#allocation25_spill] sm:$0xff] %v9271_v5  ;;  %2711 = vmatpush.msrb.mxu0 %v9289_v33  ;;  %v9295_v5 = vld [vmem:[%s10062_s2 + $0x370] sm:$0xff] }
 0x54d   :  { %11413 = vst [vmem:[#allocation84_spill] sm:$0xff] %v9277_v34  ;;  %2811 = vmatpush.msra.mxu1 %v9295_v5  ;;  %v9301_v34 = vld [vmem:[%s10062_s2 + $0x168] sm:$0xff] }
 0x54e   :  { %11414 = vst [vmem:[#allocation26_spill] sm:$0xff] %v9283_v41  ;;  %2751 = vmatpush.msrb.mxu2 %v9301_v34  ;;  %v9307_v41 = vld [vmem:[%s10062_s2 + $0x378] sm:$0xff] }
 0x54f   :  { %11415 = vst [vmem:[#allocation27_spill] sm:$0xff] %v9289_v33  ;;  %2851 = vmatpush.msra.mxu3 %v9307_v41  ;;  %v9313_v33 = vld [vmem:[%s10062_s2 + $0x140] sm:$0xff] }
 0x550   :  { %11416 = vst [vmem:[#allocation28_spill] sm:$0xff] %v9295_v5  ;;  %2712 = vmatpush.msrb.mxu0 %v9313_v33  ;;  %v9319_v5 = vld [vmem:[%s10062_s2 + $0x350] sm:$0xff] }
 0x551   :  { %11417 = vst [vmem:[#allocation29_spill] sm:$0xff] %v9301_v34  ;;  %2812 = vmatpush.msra.mxu1 %v9319_v5  ;;  %v9325_v34 = vld [vmem:[%s10062_s2 + $0x148] sm:$0xff] }
 0x552   :  { %11418 = vst [vmem:[#allocation49_spill] sm:$0xff] %v9307_v41  ;;  %2752 = vmatpush.msrb.mxu2 %v9325_v34  ;;  %v9331_v41 = vld [vmem:[%s10062_s2 + $0x358] sm:$0xff] }
 0x553   :  { %11419 = vst [vmem:[#allocation50_spill] sm:$0xff] %v9313_v33  ;;  %2852 = vmatpush.msra.mxu3 %v9331_v41  ;;  %v9337_v33 = vld [vmem:[%s10062_s2 + $0x120] sm:$0xff] }
 0x554   :  { %11420 = vst [vmem:[#allocation53_spill] sm:$0xff] %v9319_v5  ;;  %2713 = vmatpush.msrb.mxu0 %v9337_v33  ;;  %v9343_v5 = vld [vmem:[%s10062_s2 + $0x330] sm:$0xff] }
 0x555   :  { %11421 = vst [vmem:[#allocation54_spill] sm:$0xff] %v9325_v34  ;;  %2813 = vmatpush.msra.mxu1 %v9343_v5  ;;  %v9349_v34 = vld [vmem:[%s10062_s2 + $0x128] sm:$0xff] }
 0x556   :  { %11422 = vst [vmem:[#allocation57_spill] sm:$0xff] %v9331_v41  ;;  %2753 = vmatpush.msrb.mxu2 %v9349_v34  ;;  %v9355_v41 = vld [vmem:[%s10062_s2 + $0x338] sm:$0xff] }
 0x557   :  { %11423 = vst [vmem:[#allocation58_spill] sm:$0xff] %v9337_v33  ;;  %2853 = vmatpush.msra.mxu3 %v9355_v41  ;;  %v9361_v33 = vld [vmem:[%s10062_s2 + $0x100] sm:$0xff] }
 0x558   :  { %11424 = vst [vmem:[#allocation61_spill] sm:$0xff] %v9343_v5  ;;  %2714 = vmatpush.msrb.mxu0 %v9361_v33  ;;  %v9367_v5 = vld [vmem:[%s10062_s2 + $0x310] sm:$0xff] }
 0x559   :  { %11425 = vst [vmem:[#allocation62_spill] sm:$0xff] %v9349_v34  ;;  %2814 = vmatpush.msra.mxu1 %v9367_v5  ;;  %v9373_v34 = vld [vmem:[%s10062_s2 + $0x108] sm:$0xff] }
 0x55a   :  { %11426 = vst [vmem:[#allocation65_spill] sm:$0xff] %v9355_v41  ;;  %2754 = vmatpush.msrb.mxu2 %v9373_v34  ;;  %v9379_v41 = vld [vmem:[%s10062_s2 + $0x318] sm:$0xff] }
 0x55b   :  { %11427 = vst [vmem:[#allocation66_spill] sm:$0xff] %v9361_v33  ;;  %2854 = vmatpush.msra.mxu3 %v9379_v41  ;;  %v9385_v33 = vld [vmem:[%s10062_s2 + $0xe0] sm:$0xff] }
 0x55c   :  { %11428 = vst [vmem:[#allocation69_spill] sm:$0xff] %v9367_v5  ;;  %2715 = vmatpush.msrb.mxu0 %v9385_v33  ;;  %v9391_v5 = vld [vmem:[%s10062_s2 + $0x2f0] sm:$0xff] }
 0x55d   :  { %11429 = vst [vmem:[#allocation70_spill] sm:$0xff] %v9373_v34  ;;  %2815 = vmatpush.msra.mxu1 %v9391_v5  ;;  %v9397_v34 = vld [vmem:[%s10062_s2 + $0xe8] sm:$0xff] }
 0x55e   :  { %11430 = vst [vmem:[#allocation73_spill] sm:$0xff] %v9379_v41  ;;  %2755 = vmatpush.msrb.mxu2 %v9397_v34  ;;  %v9403_v41 = vld [vmem:[%s10062_s2 + $0x2f8] sm:$0xff] }
 0x55f   :  { %11431 = vst [vmem:[#allocation74_spill] sm:$0xff] %v9385_v33  ;;  %2855 = vmatpush.msra.mxu3 %v9403_v41  ;;  %v9409_v33 = vld [vmem:[%s10062_s2 + $0xc0] sm:$0xff] }
 0x560   :  { %11432 = vst [vmem:[#allocation77_spill] sm:$0xff] %v9391_v5  ;;  %2716 = vmatpush.msrb.mxu0 %v9409_v33  ;;  %v9415_v5 = vld [vmem:[%s10062_s2 + $0x2d0] sm:$0xff] }
 0x561   :  { %11433 = vst [vmem:[#allocation78_spill] sm:$0xff] %v9397_v34  ;;  %2816 = vmatpush.msra.mxu1 %v9415_v5  ;;  %v9421_v34 = vld [vmem:[%s10062_s2 + $0xc8] sm:$0xff] }
 0x562   :  { %11434 = vst [vmem:[#allocation81_spill] sm:$0xff] %v9403_v41  ;;  %2756 = vmatpush.msrb.mxu2 %v9421_v34  ;;  %v9427_v41 = vld [vmem:[%s10062_s2 + $0x2d8] sm:$0xff] }
 0x563   :  { %11435 = vst [vmem:[#allocation82_spill] sm:$0xff] %v9409_v33  ;;  %2856 = vmatpush.msra.mxu3 %v9427_v41  ;;  %v9433_v33 = vld [vmem:[%s10062_s2 + $0xa0] sm:$0xff] }
 0x564   :  { %11436 = vst [vmem:[#allocation85_spill] sm:$0xff] %v9415_v5  ;;  %2717 = vmatpush.msrb.mxu0 %v9433_v33  ;;  %v9439_v5 = vld [vmem:[%s10062_s2 + $0x2b0] sm:$0xff] }
 0x565   :  { %11437 = vst [vmem:[#allocation86_spill] sm:$0xff] %v9421_v34  ;;  %2817 = vmatpush.msra.mxu1 %v9439_v5  ;;  %v9445_v34 = vld [vmem:[%s10062_s2 + $0xa8] sm:$0xff] }
 0x566   :  { %11438 = vst [vmem:[#allocation87_spill] sm:$0xff] %v9427_v41  ;;  %2757 = vmatpush.msrb.mxu2 %v9445_v34  ;;  %v9451_v41 = vld [vmem:[%s10062_s2 + $0x2b8] sm:$0xff] }
 0x567   :  { %11439 = vst [vmem:[#allocation88_spill] sm:$0xff] %v9433_v33  ;;  %2857 = vmatpush.msra.mxu3 %v9451_v41  ;;  %v9457_v33 = vld [vmem:[%s10062_s2 + $0x80] sm:$0xff] }
 0x568   :  { %11440 = vst [vmem:[#allocation89_spill] sm:$0xff] %v9439_v5  ;;  %2718 = vmatpush.msrb.mxu0 %v9457_v33  ;;  %v9463_v5 = vld [vmem:[%s10062_s2 + $0x290] sm:$0xff] }
 0x569   :  { %11441 = vst [vmem:[#allocation90_spill] sm:$0xff] %v9445_v34  ;;  %2818 = vmatpush.msra.mxu1 %v9463_v5  ;;  %v9469_v34 = vld [vmem:[%s10062_s2 + $0x88] sm:$0xff] }
 0x56a   :  { %11442 = vst [vmem:[#allocation91_spill] sm:$0xff] %v9451_v41  ;;  %2758 = vmatpush.msrb.mxu2 %v9469_v34  ;;  %v9475_v41 = vld [vmem:[%s10062_s2 + $0x298] sm:$0xff] }
 0x56b   :  { %11443 = vst [vmem:[#allocation92_spill] sm:$0xff] %v9457_v33  ;;  %2858 = vmatpush.msra.mxu3 %v9475_v41  ;;  %v9481_v33 = vld [vmem:[%s10062_s2 + $0x60] sm:$0xff] }
 0x56c   :  { %11444 = vst [vmem:[#allocation93_spill] sm:$0xff] %v9463_v5  ;;  %2719 = vmatpush.msrb.mxu0 %v9481_v33  ;;  %v9487_v5 = vld [vmem:[%s10062_s2 + $0x270] sm:$0xff]  ;;  %v2357_v49 = vpop.f32.mrf.mxu1 }
 0x56d   :  { %11445 = vst [vmem:[#allocation94_spill] sm:$0xff] %v9469_v34  ;;  %2819 = vmatpush.msra.mxu1 %v9487_v5  ;;  %v9493_v34 = vld [vmem:[%s10062_s2 + $0x68] sm:$0xff] }
 0x56e   :  { %11446 = vst [vmem:[#allocation95_spill] sm:$0xff] %v9475_v41  ;;  %2759 = vmatpush.msrb.mxu2 %v9493_v34  ;;  %v9499_v41 = vld [vmem:[%s10062_s2 + $0x278] sm:$0xff] }
 0x56f   :  { %11447 = vst [vmem:[#allocation96_spill] sm:$0xff] %v9481_v33  ;;  %2859 = vmatpush.msra.mxu3 %v9499_v41  ;;  %v9505_v33 = vld [vmem:[%s10062_s2 + $0x40] sm:$0xff] }
 0x570   :  { %11448 = vst [vmem:[#allocation97_spill] sm:$0xff] %v9487_v5  ;;  %2720 = vmatpush.msrb.mxu0 %v9505_v33  ;;  %v9511_v5 = vld [vmem:[%s10062_s2 + $0x250] sm:$0xff] }
 0x571   :  { %11449 = vst [vmem:[#allocation98_spill] sm:$0xff] %v9493_v34  ;;  %2820 = vmatpush.msra.mxu1 %v9511_v5  ;;  %v9517_v34 = vld [vmem:[%s10062_s2 + $0x48] sm:$0xff] }
 0x572   :  { %11450 = vst [vmem:[#allocation99_spill] sm:$0xff] %v9499_v41  ;;  %2760 = vmatpush.msrb.mxu2 %v9517_v34  ;;  %v9523_v41 = vld [vmem:[%s10062_s2 + $0x258] sm:$0xff]  ;;  %v2397_v1 = vpop.f32.mrf.mxu3 }
 0x573   :  { %11451 = vst [vmem:[#allocation100_spill] sm:$0xff] %v9505_v33  ;;  %2860 = vmatpush.msra.mxu3 %v9523_v41  ;;  %v9529_v33 = vld [vmem:[%s10062_s2 + $0x20] sm:$0xff] }
 0x574   :  { %11452 = vst [vmem:[#allocation101_spill] sm:$0xff] %v9511_v5  ;;  %2721 = vmatpush.msrb.mxu0 %v9529_v33  ;;  %v9535_v5 = vld [vmem:[%s10062_s2 + $0x230] sm:$0xff] }
 0x575   :  { %11453 = vst [vmem:[#allocation102_spill] sm:$0xff] %v9517_v34  ;;  %2821 = vmatpush.msra.mxu1 %v9535_v5  ;;  %v9541_v34 = vld [vmem:[%s10062_s2 + $0x28] sm:$0xff] }
 0x576   :  { %11454 = vst [vmem:[#allocation103_spill] sm:$0xff] %v9523_v41  ;;  %2761 = vmatpush.msrb.mxu2 %v9541_v34  ;;  %v9547_v41 = vld [vmem:[%s10062_s2 + $0x238] sm:$0xff] }
 0x577   :  { %11455 = vst [vmem:[#allocation104_spill] sm:$0xff] %v9529_v33  ;;  %2861 = vmatpush.msra.mxu3 %v9547_v41  ;;  %v9553_v33 = vld [vmem:[%s10062_s2] sm:$0xff] }
 0x578   :  { %11456 = vst [vmem:[#allocation105_spill] sm:$0xff] %v9535_v5  ;;  %2722 = vmatpush.msrb.mxu0 %v9553_v33  ;;  %v9559_v5 = vld [vmem:[%s10062_s2 + $0x210] sm:$0xff] }
 0x579   :  { %11457 = vst [vmem:[#allocation106_spill] sm:$0xff] %v9541_v34  ;;  %2822 = vmatpush.msra.mxu1 %v9559_v5  ;;  %v9565_v34 = vld [vmem:[%s10062_s2 + $0x8] sm:$0xff] }
 0x57a   :  { %11458 = vst [vmem:[#allocation107_spill] sm:$0xff] %v9547_v41  ;;  %2762 = vmatpush.msrb.mxu2 %v9565_v34  ;;  %v9571_v41 = vld [vmem:[%s10062_s2 + $0x218] sm:$0xff]  ;;  %v2477_v43 = vpop.f32.mrf.mxu3 }
 0x57b   :  { %11459 = vst [vmem:[#allocation108_spill] sm:$0xff] %v9553_v33  ;;  %2862 = vmatpush.msra.mxu3 %v9571_v41  ;;  %v9577_v33 = vld [vmem:[%s10062_s2 + $0x1f0] sm:$0xff] }
 0x57c   :  { %11460 = vst [vmem:[#allocation109_spill] sm:$0xff] %v9559_v5  ;;  %2787 = vmatpush.msra.mxu0 %v9577_v33  ;;  %v9583_v5 = vld [vmem:[%s10062_s2 + $0x1f8] sm:$0xff] }
 0x57d   :  { %11461 = vst [vmem:[#allocation110_spill] sm:$0xff] %v9565_v34  ;;  %2827 = vmatpush.msra.mxu2 %v9583_v5  ;;  %v9589_v34 = vld [vmem:[%s10062_s2 + $0x1d0] sm:$0xff] }
 0x57e   :  { %11462 = vst [vmem:[#allocation111_spill] sm:$0xff] %v9571_v41  ;;  %2788 = vmatpush.msra.mxu0 %v9589_v34  ;;  %v9595_v41 = vld [vmem:[%s10062_s2 + $0x1d8] sm:$0xff] }
 0x57f   :  { %11463 = vst [vmem:[#allocation112_spill] sm:$0xff] %v9577_v33  ;;  %2828 = vmatpush.msra.mxu2 %v9595_v41  ;;  %v9601_v33 = vld [vmem:[%s10062_s2 + $0x1b0] sm:$0xff] }
 0x580   :  { %11464 = vst [vmem:[#allocation113_spill] sm:$0xff] %v9583_v5  ;;  %2789 = vmatpush.msra.mxu0 %v9601_v33  ;;  %v9607_v5 = vld [vmem:[%s10062_s2 + $0x1b8] sm:$0xff] }
 0x581   :  { %11465 = vst [vmem:[#allocation114_spill] sm:$0xff] %v9589_v34  ;;  %2829 = vmatpush.msra.mxu2 %v9607_v5  ;;  %v9613_v34 = vld [vmem:[%s10062_s2 + $0x190] sm:$0xff] }
 0x582   :  { %11466 = vst [vmem:[#allocation115_spill] sm:$0xff] %v9595_v41  ;;  %2790 = vmatpush.msra.mxu0 %v9613_v34  ;;  %v9619_v41 = vld [vmem:[%s10062_s2 + $0x198] sm:$0xff] }
 0x583   :  { %11467 = vst [vmem:[#allocation116_spill] sm:$0xff] %v9601_v33  ;;  %2830 = vmatpush.msra.mxu2 %v9619_v41  ;;  %v9625_v33 = vld [vmem:[%s10062_s2 + $0x170] sm:$0xff] }
 0x584   :  { %11468 = vst [vmem:[#allocation117_spill] sm:$0xff] %v9607_v5  ;;  %2791 = vmatpush.msra.mxu0 %v9625_v33  ;;  %v9631_v5 = vld [vmem:[%s10062_s2 + $0x178] sm:$0xff] }
 0x585   :  { %11469 = vst [vmem:[#allocation118_spill] sm:$0xff] %v9613_v34  ;;  %2831 = vmatpush.msra.mxu2 %v9631_v5  ;;  %v9637_v34 = vld [vmem:[%s10062_s2 + $0x150] sm:$0xff] }
 0x586   :  { %11470 = vst [vmem:[#allocation119_spill] sm:$0xff] %v9619_v41  ;;  %2792 = vmatpush.msra.mxu0 %v9637_v34  ;;  %v9643_v41 = vld [vmem:[%s10062_s2 + $0x158] sm:$0xff] }
 0x587   :  { %11471 = vst [vmem:[#allocation120_spill] sm:$0xff] %v9625_v33  ;;  %2832 = vmatpush.msra.mxu2 %v9643_v41  ;;  %v9649_v33 = vld [vmem:[%s10062_s2 + $0x130] sm:$0xff] }
 0x588   :  { %11472 = vst [vmem:[#allocation121_spill] sm:$0xff] %v9631_v5  ;;  %2793 = vmatpush.msra.mxu0 %v9649_v33  ;;  %v9655_v5 = vld [vmem:[%s10062_s2 + $0x138] sm:$0xff] }
 0x589   :  { %11473 = vst [vmem:[#allocation122_spill] sm:$0xff] %v9637_v34  ;;  %2833 = vmatpush.msra.mxu2 %v9655_v5  ;;  %v9661_v34 = vld [vmem:[%s10062_s2 + $0x110] sm:$0xff] }
 0x58a   :  { %11474 = vst [vmem:[#allocation123_spill] sm:$0xff] %v9643_v41  ;;  %2794 = vmatpush.msra.mxu0 %v9661_v34  ;;  %v9667_v41 = vld [vmem:[%s10062_s2 + $0x118] sm:$0xff] }
 0x58b   :  { %11475 = vst [vmem:[#allocation124_spill] sm:$0xff] %v9649_v33  ;;  %2834 = vmatpush.msra.mxu2 %v9667_v41  ;;  %v9673_v33 = vld [vmem:[%s10062_s2 + $0xf0] sm:$0xff] }
 0x58c   :  { %11476 = vst [vmem:[#allocation125_spill] sm:$0xff] %v9655_v5  ;;  %2795 = vmatpush.msra.mxu0 %v9673_v33  ;;  %v9679_v5 = vld [vmem:[%s10062_s2 + $0xf8] sm:$0xff] }
 0x58d   :  { %11477 = vst [vmem:[#allocation126_spill] sm:$0xff] %v9661_v34  ;;  %2835 = vmatpush.msra.mxu2 %v9679_v5  ;;  %v9685_v34 = vld [vmem:[%s10062_s2 + $0xd0] sm:$0xff] }
 0x58e   :  { %11478 = vst [vmem:[#allocation127_spill] sm:$0xff] %v9667_v41  ;;  %2796 = vmatpush.msra.mxu0 %v9685_v34  ;;  %v9691_v41 = vld [vmem:[%s10062_s2 + $0xd8] sm:$0xff] }
 0x58f   :  { %11479 = vst [vmem:[#allocation128_spill] sm:$0xff] %v9673_v33  ;;  %2836 = vmatpush.msra.mxu2 %v9691_v41  ;;  %v9697_v33 = vld [vmem:[%s10062_s2 + $0xb0] sm:$0xff] }
 0x590   :  { %11480 = vst [vmem:[#allocation129_spill] sm:$0xff] %v9679_v5  ;;  %2797 = vmatpush.msra.mxu0 %v9697_v33  ;;  %v9703_v5 = vld [vmem:[%s10062_s2 + $0xb8] sm:$0xff] }
 0x591   :  { %11481 = vst [vmem:[#allocation130_spill] sm:$0xff] %v9685_v34  ;;  %2837 = vmatpush.msra.mxu2 %v9703_v5  ;;  %v9709_v34 = vld [vmem:[%s10062_s2 + $0x90] sm:$0xff] }
 0x592   :  { %11482 = vst [vmem:[#allocation131_spill] sm:$0xff] %v9691_v41  ;;  %2798 = vmatpush.msra.mxu0 %v9709_v34  ;;  %v9715_v41 = vld [vmem:[%s10062_s2 + $0x98] sm:$0xff] }
 0x593   :  { %11483 = vst [vmem:[#allocation132_spill] sm:$0xff] %v9697_v33  ;;  %2838 = vmatpush.msra.mxu2 %v9715_v41  ;;  %v9721_v33 = vld [vmem:[%s10062_s2 + $0x70] sm:$0xff] }
 0x594   :  { %11484 = vst [vmem:[#allocation133_spill] sm:$0xff] %v9703_v5  ;;  %2799 = vmatpush.msra.mxu0 %v9721_v33  ;;  %v9727_v5 = vld [vmem:[%s10062_s2 + $0x78] sm:$0xff] }
 0x595   :  { %11485 = vst [vmem:[#allocation134_spill] sm:$0xff] %v9709_v34  ;;  %2839 = vmatpush.msra.mxu2 %v9727_v5  ;;  %v9733_v34 = vld [vmem:[%s10062_s2 + $0x50] sm:$0xff] }
 0x596   :  { %11486 = vst [vmem:[#allocation135_spill] sm:$0xff] %v9715_v41  ;;  %2800 = vmatpush.msra.mxu0 %v9733_v34  ;;  %v9739_v41 = vld [vmem:[%s10062_s2 + $0x58] sm:$0xff] }
 0x597   :  { %11487 = vst [vmem:[#allocation136_spill] sm:$0xff] %v9721_v33  ;;  %2840 = vmatpush.msra.mxu2 %v9739_v41  ;;  %v9745_v33 = vld [vmem:[%s10062_s2 + $0x30] sm:$0xff] }
 0x598   :  { %11488 = vst [vmem:[#allocation137_spill] sm:$0xff] %v9727_v5  ;;  %2801 = vmatpush.msra.mxu0 %v9745_v33  ;;  %v9751_v5 = vld [vmem:[%s10062_s2 + $0x38] sm:$0xff]  ;;  %v2377_v21 = vpop.f32.mrf.mxu2 }
 0x599   :  { %11489 = vst [vmem:[#allocation138_spill] sm:$0xff] %v9733_v34  ;;  %2841 = vmatpush.msra.mxu2 %v9751_v5  ;;  %v9757_v34 = vld [vmem:[%s10062_s2 + $0x10] sm:$0xff]  ;;  %v2378_v46 = vadd.f32 %v2377_v21, %v11350_v32 }
 0x59a   :  { %11490 = vst [vmem:[#allocation139_spill] sm:$0xff] %v9739_v41  ;;  %2802 = vmatpush.msra.mxu0 %v9757_v34  ;;  %v9763_v41 = vld [vmem:[%s10062_s2 + $0x18] sm:$0xff] }
 0x59b   :  { %11491 = vst [vmem:[#allocation140_spill] sm:$0xff] %v9745_v33  ;;  %2842 = vmatpush.msra.mxu2 %v9763_v41  ;;  %v2337_v33 = vpop.f32.mrf.mxu0  ;;  %v2398_v17 = vadd.f32 %v2397_v1, %v2378_v46  ;;  %v2437_v1 = vpop.f32.mrf.mxu1 }
 0x59c   :  { %11492 = vst [vmem:[#allocation141_spill] sm:$0xff] %v9751_v5  ;;  %v2338_v10 = vadd.f32 %v2337_v33, %v11349_v54 }
 0x59d   :  { %11493 = vst [vmem:[#allocation142_spill] sm:$0xff] %v9757_v34  ;;  %v3361_v34 = vmul.f32 -1.442695, %v2398_v17 }
 0x59e   :  { %11494 = vst [vmem:[#allocation143_spill] sm:$0xff] %v9763_v41  ;;  %v2358_v26 = vadd.f32 %v2357_v49, %v2338_v10 }
 0x5a0   :  { %v3360_v5 = vmul.f32 -1.442695, %v2358_v26 }
 0x5a1   :  { %v2457_v35 = vpop.f32.mrf.mxu2 }
 0x5a2   :  { %3554 = vpow2.f32 %v3360_v5  ;;  %v2458_v41 = vadd.f32 %v2457_v35, %v11351_v19 }
 0x5a3   :  { %3556 = vpow2.f32 %v3361_v34  ;;  %v2417_v49 = vpop.f32.mrf.mxu0 }
 0x5a4   :  { %v2478_v33 = vadd.f32 %v2477_v43, %v2458_v41  ;;  %v2418_v21 = vadd.f32 %v2417_v49, %v11352_v13 }
 0x5a6   :  { %v3362_v26 = vmul.f32 -1.442695, %v2478_v33  ;;  %v2438_v46 = vadd.f32 %v2437_v1, %v2418_v21 }
 0x5a8   :  { %v3555_v38 = vpop.eup %3554 }
 0x5a9   :  { %v2483_v29 = vadd.f32 1.0, %v3555_v38  ;;  %v3557_v9 = vpop.eup %3556 }
 0x5aa   :  { %v2502_v54 = vadd.f32 1.0, %v3557_v9 }
 0x5ab   :  { %3558 = vrcp.f32 %v2483_v29  ;;  %v2495_v19 = vand.u32 2147483648, %v2483_v29  ;;  %vm2489_vm6 = vweird.f32 %v2483_v29  ;;  %v2493_v41 = vand.u32 2147483647, %v2483_v29 }
 0x5ac   :  { %3560 = vrcp.f32 %v2502_v54  ;;  %v2514_v33 = vand.u32 2147483648, %v2502_v54  ;;  %vm2508_vm9 = vweird.f32 %v2502_v54 }
 0x5ad   :  { %3562 = vpow2.f32 %v3362_v26  ;;  %v2496_v21 = vor.u32 1.1754944e-38, %v2495_v19  ;;  %vm2494_vm10 = vcmp.eq.f32.partialorder %v2493_v41, 8.507059e+37 }
 0x5ae   :  { %3564 = vtanh.f32 %v2438_v46  ;;  %v2515_v1 = vor.u32 1.1754944e-38, %v2514_v33 }
 0x5b1   :  { %v3559_v10 = vpop.eup %3558 }
 0x5b2   :  { %v2485_v5 = vmul.f32 %v3559_v10, %v2483_v29  ;;  %v3561_v34 = vpop.eup %3560  ;;  %vm2490_vm5 = vweird.f32 %v3559_v10 }
 0x5b3   :  { %v3563_v32 = vpop.eup %3562  ;;  %v2504_v51 = vmul.f32 %v3561_v34, %v2502_v54  ;;  %vm2491_vm7 = vmor %vm2489_vm6, %vm2490_vm5  ;;  %vm2509_vm8 = vweird.f32 %v3561_v34 }
 0x5b4   :  { %v2486_v17 = vsub.f32 1.0, %v2485_v5  ;;  %v2522_v43 = vadd.f32 1.0, %v3563_v32  ;;  %v2512_v5 = vand.u32 2147483647, %v2502_v54  ;;  %vm2510_vm11 = vmor %vm2508_vm9, %vm2509_vm8  ;;  %v3565_v13 = vpop.eup %3564  ;;  %v2582_v32 = vpop.f32.mrf.mxu1 }
 0x5b5   :  { %v2505_v9 = vsub.f32 1.0, %v2504_v51  ;;  %v2622_v51 = vpop.f32.mrf.mxu3  ;;  %v2629_v19 = vrot.slane %v2582_v32, 6 }
 0x5b6   :  { %v2487_v38 = vmul.f32 %v3559_v10, %v2486_v17  ;;  %3566 = vrcp.f32 %v2522_v43  ;;  %vm2513_vm12 = vcmp.eq.f32.partialorder %v2512_v5, 8.507059e+37  ;;  %v2631_v54 = vrot.slane %v2622_v51, 2 }
 0x5b7   :  { %v2506_v49 = vmul.f32 %v3561_v34, %v2505_v9  ;;  %v2534_v5 = vand.u32 2147483648, %v2522_v43  ;;  %vm2528_vm14 = vweird.f32 %v2522_v43 }
 0x5b8   :  { %v2488_v35 = vadd.f32 %v3559_v10, %v2487_v38 }
 0x5b9   :  { %v2507_v17 = vadd.f32 %v3561_v34, %v2506_v49  ;;  %v2535_v51 = vor.u32 1.1754944e-38, %v2534_v5 }
 0x5ba   :  { %v2492_v26 = vsel %vm2491_vm7, %v3559_v10, %v2488_v35  ;;  %v2562_v10 = vpop.f32.mrf.mxu0 }
 0x5bb   :  { %v2497_v38 = vsel %vm2494_vm10, %v2496_v21, %v2492_v26  ;;  %v2511_v45 = vsel %vm2510_vm11, %v3561_v34, %v2507_v17  ;;  %v3363_v26 = vld [vmem:[%s10063_s0 + $0x30] sm:$0xff]  ;;  %v2632_v34 = vsel %vm179_vm0, %v2562_v10, %v2629_v19 }
 0x5bc   :  { %v3567_v29 = vpop.eup %3566  ;;  %v2516_v46 = vsel %vm2513_vm12, %v2515_v1, %v2511_v45  ;;  %v2539_v9 = vmul.f32 %v3565_v13, %v2497_v38 }
 0x5bd   :  { %v2538_v53 = vmul.f32 %v2516_v46, %v8624_v62  ;;  %v2524_v24 = vmul.f32 %v3567_v29, %v2522_v43  ;;  %vm2529_vm13 = vweird.f32 %v3567_v29 }
 0x5be   :  { %vm2530_vm15 = vmor %vm2528_vm14, %vm2529_vm13 }
 0x5bf   :  { %v9771_v49 = vadd.f32 %v2539_v9, %v2538_v53  ;;  %v2525_v33 = vsub.f32 1.0, %v2524_v24  ;;  %v2532_v53 = vand.u32 2147483647, %v2522_v43 }
 0x5c0   :  { %v2602_v35 = vpop.f32.mrf.mxu2 }
 0x5c1   :  { %v2630_v41 = vrot.slane %v2602_v35, 4  ;;  %3568 = vtanh.f32 %v9771_v49  ;;  %v2526_v62 = vmul.f32 %v3567_v29, %v2525_v33  ;;  %vm2533_vm3 = vcmp.eq.f32.partialorder %v2532_v53, 8.507059e+37 }
 0x5c3   :  { %v2633_v45 = vsel %vm181_vm1, %v2630_v41, %v2631_v54  ;;  %v2527_v17 = vadd.f32 %v3567_v29, %v2526_v62 }
 0x5c4   :  { %v2634_v13 = vsel %vm183_vm2, %v2632_v34, %v2633_v45 }
 0x5c5   :  { %v9780_v21 = vadd.f32 %v3363_v26, %v2634_v13  ;;  %v2531_v32 = vsel %vm2530_vm15, %v3567_v29, %v2527_v17 }
 0x5c6   :  { %v2536_v35 = vsel %vm2533_vm3, %v2535_v51, %v2531_v32  ;;  %v4218_v32 = vld [vmem:[%s10061_s1 + $0x160] sm:$0xff]  ;;  %v4219_v51 = vld [vmem:[%s10061_s1 + $0x170] sm:$0xff] }
 0x5c7   :  { %v3364_v24 = vmul.f32 -1.442695, %v9780_v21  ;;  %v2657_v1 = vrot.slane %v9780_v21, 2  ;;  %v2681_v38 = vrot.slane %v9780_v21, 6  ;;  %v3569_v10 = vpop.eup %3568 }
 0x5c8   :  { %v2542_v19 = vmul.f32 %v3569_v10, %v2536_v35  ;;  %v11501_v10 = vld [vmem:[#allocation39_spill] sm:$0xff]  ;;  %v4221_v35 = vld [vmem:[%s10061_s1 + $0x150] sm:$0xff] }
 0x5c9   :  { %3570 = vpow2.f32 %v3364_v24  ;;  %v3365_v46 = vmul.f32 -1.442695, %v2657_v1  ;;  %v3366_v9 = vmul.f32 -1.442695, %v2681_v38  ;;  %v4216_v24 = vld [vmem:[%s10061_s1 + $0x180] sm:$0xff]  ;;  %v11499_v1 = vld [vmem:[#allocation36_spill] sm:$0xff] }
 0x5ca   :  { %2743 = vmatmul.f32.vlgmr.msrb.gmra.mxu1 %v2542_v19  ;;  %2783 = vmatmul.f32.vlgmr.msrb.gmra.mxu3 %v2542_v19  ;;  %v4217_v38 = vld [vmem:[%s10061_s1 + $0x190] sm:$0xff] }
 0x5cb   :  { %3572 = vpow2.f32 %v3365_v46  ;;  %2952 = vmatpush.msrb.mxu1 %v8641_v60  ;;  %2992 = vmatpush.msrb.mxu3 %v8647_v2  ;;  %v11500_v46 = vld [vmem:[#allocation40_spill] sm:$0xff] }
 0x5cc   :  { %3574 = vpow2.f32 %v3366_v9  ;;  %v4220_v9 = vld [vmem:[%s10061_s1 + $0x140] sm:$0xff] }
 0x5cd   :  { %2953 = vmatpush.msrb.mxu1 %v8655_v14  ;;  %2993 = vmatpush.msrb.mxu3 %v8661_v47 }
 0x5cf   :  { %v3571_v43 = vpop.eup %3570  ;;  %2954 = vmatpush.msrb.mxu1 %v8668_v50  ;;  %2994 = vmatpush.msrb.mxu3 %v8674_v59  ;;  %v2678_v50 = vrot.slane %v9780_v21, 4 }
 0x5d0   :  { %v2640_v54 = vadd.f32 1.0, %v3571_v43  ;;  %v11503_v43 = vld [vmem:[#allocation42_spill] sm:$0xff] }
 0x5d1   :  { %v3573_v29 = vpop.eup %3572  ;;  %2955 = vmatpush.msrb.mxu1 %v8684_v0  ;;  %2995 = vmatpush.msrb.mxu3 %v8690_v20 }
 0x5d2   :  { %v3575_v41 = vpop.eup %3574  ;;  %3576 = vrcp.f32 %v2640_v54  ;;  %v2662_v33 = vadd.f32 1.0, %v3573_v29  ;;  %2823 = vmatmul.f32.vlgmr.msra.gmra.mxu1 %v2542_v19  ;;  %2863 = vmatmul.f32.vlgmr.msra.gmra.mxu3 %v2542_v19  ;;  %vm2646_vm5 = vweird.f32 %v2640_v54  ;;  %v11502_v19 = vld [vmem:[#allocation2_spill] sm:$0xff]  ;;  %v4222_v29 = vld [vmem:[%s10061_s1 + $0x130] sm:$0xff] }
 0x5d3   :  { %v9791_v26 = vadd.f32 1.0, %v3575_v41  ;;  %2956 = vmatpush.msrb.mxu1 %v8698_v37  ;;  %2996 = vmatpush.msrb.mxu3 %v8704_v23  ;;  %v2652_v37 = vand.u32 2147483648, %v2640_v54  ;;  %v11505_v41 = vld [vmem:[#allocation3_spill] sm:$0xff] }
 0x5d4   :  { %3578 = vrcp.f32 %v2662_v33  ;;  %vm2668_vm9 = vweird.f32 %v2662_v33 }
 0x5d5   :  { %3580 = vrcp.f32 %v9791_v26  ;;  %2957 = vmatpush.msrb.mxu1 %v8710_v28  ;;  %2997 = vmatpush.msrb.mxu3 %v8716_v27  ;;  %v2650_v28 = vand.u32 2147483647, %v2640_v54  ;;  %v2653_v45 = vor.u32 1.1754944e-38, %v2652_v37  ;;  %vm2692_vm13 = vweird.f32 %v9791_v26  ;;  %v4225_v37 = vld [vmem:[%s10061_s1 + $0xd0] sm:$0xff] }
 0x5d6   :  { %3582 = vtanh.f32 %v2678_v50  ;;  %v4224_v50 = vld [vmem:[%s10061_s1 + $0xf0] sm:$0xff] }
 0x5d7   :  { %2958 = vmatpush.msrb.mxu1 %v8723_v56  ;;  %2998 = vmatpush.msrb.mxu3 %v8729_v36  ;;  %v2674_v36 = vand.u32 2147483648, %v2662_v33  ;;  %vm2651_vm8 = vcmp.eq.f32.partialorder %v2650_v28, 8.507059e+37  ;;  %v11515_v28 = vld [vmem:[#allocation51_spill] sm:$0xff] }
 0x5d8   :  { %v3577_v60 = vpop.eup %3576 }
 0x5d9   :  { %v2642_v2 = vmul.f32 %v3577_v60, %v2640_v54  ;;  %2959 = vmatpush.msrb.mxu1 %v8739_v61  ;;  %2999 = vmatpush.msrb.mxu3 %v8745_v25  ;;  %vm2647_vm4 = vweird.f32 %v3577_v60  ;;  %v2672_v25 = vand.u32 2147483647, %v2662_v33  ;;  %v11504_v54 = vld [vmem:[#allocation41_spill] sm:$0xff] }
 0x5da   :  { %v3579_v14 = vpop.eup %3578  ;;  %vm2648_vm6 = vmor %vm2646_vm5, %vm2647_vm4 }
 0x5db   :  { %v2643_v47 = vsub.f32 1.0, %v2642_v2  ;;  %v9803_v59 = vpop.eup %3580  ;;  %v2664_v0 = vmul.f32 %v3579_v14, %v2662_v33  ;;  %2960 = vmatpush.msrb.mxu1 %v8755_v44  ;;  %3000 = vmatpush.msrb.mxu3 %v8761_v16  ;;  %vm2669_vm7 = vweird.f32 %v3579_v14  ;;  %v2675_v16 = vor.u32 1.1754944e-38, %v2674_v36  ;;  %v11506_v33 = vld [vmem:[#allocation44_spill] sm:$0xff]  ;;  %v11518_v36 = vld [vmem:[#allocation10_spill] sm:$0xff] }
 0x5dc   :  { %v2688_v23 = vmul.f32 %v9803_v59, %v9791_v26  ;;  %vm2670_vm10 = vmor %vm2668_vm9, %vm2669_vm7  ;;  %vm2673_vm11 = vcmp.eq.f32.partialorder %v2672_v25, 8.507059e+37  ;;  %vm2693_vm12 = vweird.f32 %v9803_v59  ;;  %v11508_v2 = vld [vmem:[#allocation4_spill] sm:$0xff]  ;;  %v11520_v25 = vld [vmem:[#allocation7_spill] sm:$0xff] }
 0x5dd   :  { %v2644_v20 = vmul.f32 %v3577_v60, %v2643_v47  ;;  %v2665_v27 = vsub.f32 1.0, %v2664_v0  ;;  %2961 = vmatpush.msrb.mxu1 %v8774_v22  ;;  %3001 = vmatpush.msrb.mxu3 %v8780_v57  ;;  %v3583_v22 = vpop.eup %3582  ;;  %vm2694_vm14 = vmor %vm2692_vm13, %vm2693_vm12  ;;  %v11510_v47 = vld [vmem:[#allocation45_spill] sm:$0xff]  ;;  %v11512_v0 = vld [vmem:[#allocation48_spill] sm:$0xff] }
 0x5de   :  { %v2689_v5 = vsub.f32 1.0, %v2688_v23  ;;  %v11514_v23 = vld [vmem:[#allocation8_spill] sm:$0xff] }
 0x5df   :  { %v2645_v56 = vadd.f32 %v3577_v60, %v2644_v20  ;;  %v2666_v61 = vmul.f32 %v3579_v14, %v2665_v27  ;;  %2962 = vmatpush.msrb.mxu1 %v8789_v42  ;;  %3002 = vmatpush.msrb.mxu3 %v8795_v11  ;;  %v11513_v20 = vld [vmem:[#allocation47_spill] sm:$0xff]  ;;  %v11516_v27 = vld [vmem:[#allocation5_spill] sm:$0xff] }
 0x5e0   :  { %v2690_v21 = vmul.f32 %v9803_v59, %v2689_v5  ;;  %v11523_v5 = vld [vmem:[#allocation59_spill] sm:$0xff] }
 0x5e1   :  { %v2649_v34 = vsel %vm2648_vm6, %v3577_v60, %v2645_v56  ;;  %v2667_v13 = vadd.f32 %v3579_v14, %v2666_v61  ;;  %2963 = vmatpush.msrb.mxu1 %v8802_v7  ;;  %3003 = vmatpush.msrb.mxu3 %v8808_v63  ;;  %v2698_v7 = vand.u32 2147483648, %v9791_v26  ;;  %v2696_v63 = vand.u32 2147483647, %v9791_v26  ;;  %v11507_v26 = vld [vmem:[#allocation43_spill] sm:$0xff]  ;;  %v4223_v60 = vld [vmem:[%s10061_s1 + $0x110] sm:$0xff] }
 0x5e2   :  { %v2654_v44 = vsel %vm2651_vm8, %v2653_v45, %v2649_v34  ;;  %v2691_v11 = vadd.f32 %v9803_v59, %v2690_v21  ;;  %v11517_v56 = vld [vmem:[#allocation52_spill] sm:$0xff]  ;;  %v11519_v61 = vld [vmem:[#allocation55_spill] sm:$0xff] }
 0x5e3   :  { %v2671_v62 = vsel %vm2670_vm10, %v3579_v14, %v2667_v13  ;;  %v2703_v17 = vmul.f32 %v3583_v22, %v2654_v44  ;;  %2964 = vmatpush.msrb.mxu1 %v8816_v18  ;;  %3004 = vmatpush.msrb.mxu3 %v8822_v3  ;;  %v11495_v3 = vld [vmem:[#allocation33_spill] sm:$0xff]  ;;  %vm2697_vm15 = vcmp.eq.f32.partialorder %v2696_v63, 8.507059e+37  ;;  %v11509_v14 = vld [vmem:[#allocation46_spill] sm:$0xff]  ;;  %v11521_v34 = vld [vmem:[#allocation56_spill] sm:$0xff] }
 0x5e4   :  { %v2676_v57 = vsel %vm2673_vm11, %v2675_v16, %v2671_v62  ;;  %v2695_v18 = vsel %vm2694_vm14, %v9803_v59, %v2691_v11  ;;  %v11511_v59 = vld [vmem:[#allocation6_spill] sm:$0xff]  ;;  %v11522_v45 = vld [vmem:[#allocation12_spill] sm:$0xff]  ;;  %v11524_v13 = vld [vmem:[#allocation9_spill] sm:$0xff] }
 0x5e5   :  { %v2702_v53 = vmul.f32 %v2676_v57, %v8825_v55  ;;  %2965 = vmatpush.msrb.mxu1 %v8830_v15  ;;  %3005 = vmatpush.msrb.mxu3 %v8836_v31  ;;  %v2699_v55 = vor.u32 1.1754944e-38, %v2698_v7  ;;  %v11525_v44 = vld [vmem:[#allocation60_spill] sm:$0xff]  ;;  %v11526_v16 = vld [vmem:[#allocation14_spill] sm:$0xff]  ;;  %v11527_v62 = vld [vmem:[#allocation63_spill] sm:$0xff] }
 0x5e6   :  { %v11528_v22 = vld [vmem:[#allocation11_spill] sm:$0xff]  ;;  %v11529_v57 = vld [vmem:[#allocation64_spill] sm:$0xff]  ;;  %v11534_v7 = vld [vmem:[#allocation17_spill] sm:$0xff] }
 0x5e7   :  { %v9821_v42 = vadd.f32 %v2703_v17, %v2702_v53  ;;  %2966 = vmatpush.msrb.mxu1 %v8846_v40  ;;  %3006 = vmatpush.msrb.mxu3 %v8852_v58  ;;  %v2700_v31 = vsel %vm2697_vm15, %v2699_v55, %v2695_v18  ;;  %v4210_v58 = vld [vmem:[%s10061_s1 + $0x1e0] sm:$0xff]  ;;  %v11530_v21 = vld [vmem:[#allocation16_spill] sm:$0xff]  ;;  %v11531_v53 = vld [vmem:[#allocation67_spill] sm:$0xff] }
 0x5e8   :  { %v11532_v17 = vld [vmem:[#allocation13_spill] sm:$0xff]  ;;  %v11533_v11 = vld [vmem:[#allocation68_spill] sm:$0xff]  ;;  %v11535_v63 = vld [vmem:[#allocation71_spill] sm:$0xff] }
 0x5e9   :  { %3584 = vtanh.f32 %v9821_v42  ;;  %2967 = vmatpush.msrb.mxu1 %v8864_v30  ;;  %3007 = vmatpush.msrb.mxu3 %v8870_v39  ;;  %v4211_v30 = vld [vmem:[%s10061_s1 + $0x1f0] sm:$0xff]  ;;  %v4212_v39 = vld [vmem:[%s10061_s1 + $0x1c0] sm:$0xff]  ;;  %v11536_v18 = vld [vmem:[#allocation15_spill] sm:$0xff] }
 0x5ea   :  { %v11538_v55 = vld [vmem:[#allocation20_spill] sm:$0xff] }
 0x5eb   :  { %3114 = vmatpush.msra.mxu1 %v11495_v3  ;;  %3154 = vmatpush.msra.mxu3 %v8885_v52  ;;  %v4213_v52 = vld [vmem:[%s10061_s1 + $0x1d0] sm:$0xff]  ;;  %v11537_v3 = vld [vmem:[#allocation18_spill] sm:$0xff] }
 0x5ed   :  { %3115 = vmatpush.msra.mxu1 %v8891_v8  ;;  %3155 = vmatpush.msra.mxu3 %v8897_v12  ;;  %v11496_v8 = vld [vmem:[#allocation37_spill] sm:$0xff]  ;;  %v4214_v12 = vld [vmem:[%s10061_s1 + $0x1a0] sm:$0xff] }
 0x5ef   :  { %v3585_v15 = vpop.eup %3584  ;;  %3116 = vmatpush.msra.mxu1 %v8905_v4  ;;  %3156 = vmatpush.msra.mxu3 %v8911_v48  ;;  %v11497_v4 = vld [vmem:[#allocation35_spill] sm:$0xff]  ;;  %v4215_v48 = vld [vmem:[%s10061_s1 + $0x1b0] sm:$0xff] }
 0x5f0   :  { %v9840_v40 = vmul.f32 %v3585_v15, %v2700_v31  ;;  %v11539_v15 = vld [vmem:[#allocation21_spill] sm:$0xff]  ;;  %v11540_v31 = vld [vmem:[#allocation19_spill] sm:$0xff] }
 0x5f1   :  { %3117 = vmatpush.msra.mxu1 %v8924_v6  ;;  %3157 = vmatpush.msra.mxu3 %v11496_v8  ;;  %v11498_v6 = vld [vmem:[#allocation38_spill] sm:$0xff]  ;;  %v11545_v8 = vld [vmem:[#allocation24_spill] sm:$0xff] }
 0x5f2   :  { %2723 = vmatmul.f32.vlgmr.msrb.gmra.mxu0 %v9840_v40  ;;  %2763 = vmatmul.f32.vlgmr.msrb.gmra.mxu2 %v9840_v40 }
 0x5f3   :  { %2932 = vmatpush.msrb.mxu0 %v4210_v58  ;;  %2968 = vmatmul.f32.vlgmr.msrb.gmra.mxu1 %v9840_v40  ;;  %v11541_v58 = vld [vmem:[#allocation22_spill] sm:$0xff] }
 0x5f4   :  { %2972 = vmatpush.msrb.mxu2 %v4211_v30  ;;  %3008 = vmatmul.f32.vlgmr.msrb.gmra.mxu3 %v9840_v40  ;;  %v11542_v30 = vld [vmem:[#allocation72_spill] sm:$0xff] }
 0x5f5   :  { %2933 = vmatpush.msrb.mxu0 %v4212_v39  ;;  %3118 = vmatpush.msra.mxu1 %v11497_v4  ;;  %v11543_v39 = vld [vmem:[#allocation23_spill] sm:$0xff]  ;;  %v11547_v4 = vld [vmem:[#allocation25_spill] sm:$0xff] }
 0x5f6   :  { %2973 = vmatpush.msrb.mxu2 %v4213_v52  ;;  %3158 = vmatpush.msra.mxu3 %v11498_v6  ;;  %v11544_v52 = vld [vmem:[#allocation75_spill] sm:$0xff]  ;;  %v11550_v6 = vld [vmem:[#allocation80_spill] sm:$0xff] }
 0x5f7   :  { %2934 = vmatpush.msrb.mxu0 %v4214_v12  ;;  %3119 = vmatpush.msra.mxu1 %v11499_v1  ;;  %v11546_v12 = vld [vmem:[#allocation76_spill] sm:$0xff]  ;;  %v11552_v1 = vld [vmem:[#allocation83_spill] sm:$0xff] }
 0x5f8   :  { %2974 = vmatpush.msrb.mxu2 %v4215_v48  ;;  %3159 = vmatpush.msra.mxu3 %v11500_v46  ;;  %v11549_v48 = vld [vmem:[#allocation26_spill] sm:$0xff]  ;;  %v11556_v46 = vld [vmem:[#allocation27_spill] sm:$0xff] }
 0x5f9   :  { %2935 = vmatpush.msrb.mxu0 %v4216_v24  ;;  %3120 = vmatpush.msra.mxu1 %v11501_v10  ;;  %v11551_v24 = vld [vmem:[#allocation28_spill] sm:$0xff]  ;;  %v11558_v10 = vld [vmem:[#allocation29_spill] sm:$0xff] }
 0x5fa   :  { %2975 = vmatpush.msrb.mxu2 %v4217_v38  ;;  %2803 = vmatmul.f32.vlgmr.msra.gmra.mxu0 %v9840_v40  ;;  %v11553_v38 = vld [vmem:[#allocation49_spill] sm:$0xff] }
 0x5fb   :  { %2843 = vmatmul.f32.vlgmr.msra.gmra.mxu2 %v9840_v40  ;;  %2936 = vmatpush.msrb.mxu0 %v4218_v32  ;;  %v11554_v32 = vld [vmem:[#allocation84_spill] sm:$0xff] }
 0x5fc   :  { %2976 = vmatpush.msrb.mxu2 %v4219_v51  ;;  %3160 = vmatpush.msra.mxu3 %v11502_v19  ;;  %v11555_v51 = vld [vmem:[#allocation53_spill] sm:$0xff]  ;;  %v11560_v19 = vld [vmem:[#allocation50_spill] sm:$0xff] }
 0x5fd   :  { %2937 = vmatpush.msrb.mxu0 %v4220_v9  ;;  %3121 = vmatpush.msra.mxu1 %v11504_v54  ;;  %v11557_v9 = vld [vmem:[#allocation57_spill] sm:$0xff]  ;;  %v11562_v54 = vld [vmem:[#allocation54_spill] sm:$0xff] }
 0x5fe   :  { %2977 = vmatpush.msrb.mxu2 %v4221_v35  ;;  %3161 = vmatpush.msra.mxu3 %v11505_v41  ;;  %v11559_v35 = vld [vmem:[#allocation61_spill] sm:$0xff]  ;;  %v11564_v41 = vld [vmem:[#allocation58_spill] sm:$0xff] }
 0x5ff   :  { %2938 = vmatpush.msrb.mxu0 %v11503_v43  ;;  %3122 = vmatpush.msra.mxu1 %v11507_v26  ;;  %v11561_v43 = vld [vmem:[#allocation65_spill] sm:$0xff]  ;;  %v11566_v26 = vld [vmem:[#allocation62_spill] sm:$0xff] }
 0x600   :  { %2978 = vmatpush.msrb.mxu2 %v4222_v29  ;;  %3162 = vmatpush.msra.mxu3 %v11508_v2  ;;  %v11563_v29 = vld [vmem:[#allocation69_spill] sm:$0xff]  ;;  %v11568_v2 = vld [vmem:[#allocation66_spill] sm:$0xff] }
 0x601   :  { %2939 = vmatpush.msrb.mxu0 %v11506_v33  ;;  %3123 = vmatpush.msra.mxu1 %v11510_v47  ;;  %v11565_v33 = vld [vmem:[#allocation73_spill] sm:$0xff]  ;;  %v11570_v47 = vld [vmem:[#allocation70_spill] sm:$0xff] }
 0x602   :  { %2979 = vmatpush.msrb.mxu2 %v4223_v60  ;;  %3163 = vmatpush.msra.mxu3 %v11511_v59  ;;  %v11567_v60 = vld [vmem:[#allocation77_spill] sm:$0xff]  ;;  %v11572_v59 = vld [vmem:[#allocation74_spill] sm:$0xff] }
 0x603   :  { %2940 = vmatpush.msrb.mxu0 %v11509_v14  ;;  %3124 = vmatpush.msra.mxu1 %v11513_v20  ;;  %v11569_v14 = vld [vmem:[#allocation81_spill] sm:$0xff]  ;;  %v11574_v20 = vld [vmem:[#allocation78_spill] sm:$0xff] }
 0x604   :  { %2980 = vmatpush.msrb.mxu2 %v4224_v50  ;;  %3164 = vmatpush.msra.mxu3 %v11514_v23  ;;  %v11571_v50 = vld [vmem:[#allocation85_spill] sm:$0xff]  ;;  %v11576_v23 = vld [vmem:[#allocation82_spill] sm:$0xff] }
 0x605   :  { %2941 = vmatpush.msrb.mxu0 %v11512_v0  ;;  %3125 = vmatpush.msra.mxu1 %v11516_v27  ;;  %v11573_v0 = vld [vmem:[#allocation87_spill] sm:$0xff]  ;;  %v11578_v27 = vld [vmem:[#allocation86_spill] sm:$0xff] }
 0x606   :  { %2981 = vmatpush.msrb.mxu2 %v4225_v37  ;;  %3165 = vmatpush.msra.mxu3 %v11518_v36  ;;  %v11575_v37 = vld [vmem:[#allocation89_spill] sm:$0xff]  ;;  %v11580_v36 = vld [vmem:[#allocation88_spill] sm:$0xff] }
 0x607   :  { %2942 = vmatpush.msrb.mxu0 %v11515_v28  ;;  %3126 = vmatpush.msra.mxu1 %v11520_v25  ;;  %v11577_v28 = vld [vmem:[#allocation91_spill] sm:$0xff]  ;;  %v11582_v25 = vld [vmem:[#allocation90_spill] sm:$0xff] }
 0x608   :  { %2982 = vmatpush.msrb.mxu2 %v11517_v56  ;;  %3166 = vmatpush.msra.mxu3 %v11522_v45  ;;  %v11579_v56 = vld [vmem:[#allocation93_spill] sm:$0xff]  ;;  %v11584_v45 = vld [vmem:[#allocation92_spill] sm:$0xff] }
 0x609   :  { %2943 = vmatpush.msrb.mxu0 %v11519_v61  ;;  %3127 = vmatpush.msra.mxu1 %v11524_v13  ;;  %v11581_v61 = vld [vmem:[#allocation95_spill] sm:$0xff]  ;;  %v11586_v13 = vld [vmem:[#allocation94_spill] sm:$0xff] }
 0x60a   :  { %2983 = vmatpush.msrb.mxu2 %v11521_v34  ;;  %3167 = vmatpush.msra.mxu3 %v11526_v16  ;;  %v11583_v34 = vld [vmem:[#allocation97_spill] sm:$0xff]  ;;  %v11588_v16 = vld [vmem:[#allocation96_spill] sm:$0xff] }
 0x60b   :  { %2944 = vmatpush.msrb.mxu0 %v11523_v5  ;;  %3128 = vmatpush.msra.mxu1 %v11528_v22  ;;  %v11585_v5 = vld [vmem:[#allocation99_spill] sm:$0xff]  ;;  %v11590_v22 = vld [vmem:[#allocation98_spill] sm:$0xff] }
 0x60c   :  { %2984 = vmatpush.msrb.mxu2 %v11525_v44  ;;  %3168 = vmatpush.msra.mxu3 %v11530_v21  ;;  %v11587_v44 = vld [vmem:[#allocation101_spill] sm:$0xff]  ;;  %v11592_v21 = vld [vmem:[#allocation100_spill] sm:$0xff] }
 0x60d   :  { %2945 = vmatpush.msrb.mxu0 %v11527_v62  ;;  %3129 = vmatpush.msra.mxu1 %v11532_v17  ;;  %v11589_v62 = vld [vmem:[#allocation103_spill] sm:$0xff]  ;;  %v11594_v17 = vld [vmem:[#allocation102_spill] sm:$0xff] }
 0x60e   :  { %2985 = vmatpush.msrb.mxu2 %v11529_v57  ;;  %3169 = vmatpush.msra.mxu3 %v11534_v7  ;;  %v11591_v57 = vld [vmem:[#allocation105_spill] sm:$0xff]  ;;  %v11596_v7 = vld [vmem:[#allocation104_spill] sm:$0xff] }
 0x60f   :  { %2946 = vmatpush.msrb.mxu0 %v11531_v53  ;;  %3194 = vmatpush.msrb.mxu1 %v11536_v18  ;;  %v11593_v53 = vld [vmem:[#allocation107_spill] sm:$0xff]  ;;  %v11598_v18 = vld [vmem:[#allocation106_spill] sm:$0xff] }
 0x610   :  { %2986 = vmatpush.msrb.mxu2 %v11533_v11  ;;  %3234 = vmatpush.msrb.mxu3 %v11538_v55  ;;  %v11595_v11 = vld [vmem:[#allocation109_spill] sm:$0xff]  ;;  %v11600_v55 = vld [vmem:[#allocation110_spill] sm:$0xff] }
 0x611   :  { %2947 = vmatpush.msrb.mxu0 %v11535_v63  ;;  %3195 = vmatpush.msrb.mxu1 %v11539_v15  ;;  %v11597_v63 = vld [vmem:[#allocation111_spill] sm:$0xff]  ;;  %v11601_v15 = vld [vmem:[#allocation112_spill] sm:$0xff] }
 0x612   :  { %2987 = vmatpush.msrb.mxu2 %v11537_v3  ;;  %2948 = vmatmul.f32.vlgmr.msrb.gmra.mxu0 %v9840_v40  ;;  %v11599_v3 = vld [vmem:[#allocation108_spill] sm:$0xff] }
 0x613   :  { %2988 = vmatmul.f32.vlgmr.msrb.gmra.mxu2 %v9840_v40  ;;  %3094 = vmatpush.msra.mxu0 %v11540_v31  ;;  %v11548_v40 = vld [vmem:[#allocation79_spill] sm:$0xff]  ;;  %v11602_v31 = vld [vmem:[#allocation113_spill] sm:$0xff] }
 0x614   :  { %3235 = vmatpush.msrb.mxu3 %v11541_v58  ;;  %3134 = vmatpush.msra.mxu2 %v11542_v30  ;;  %v11603_v58 = vld [vmem:[#allocation114_spill] sm:$0xff]  ;;  %v11604_v30 = vld [vmem:[#allocation115_spill] sm:$0xff] }
 0x615   :  { %3196 = vmatpush.msrb.mxu1 %v11543_v39  ;;  %3095 = vmatpush.msra.mxu0 %v11544_v52  ;;  %v11605_v39 = vld [vmem:[#allocation116_spill] sm:$0xff]  ;;  %v11606_v52 = vld [vmem:[#allocation117_spill] sm:$0xff] }
 0x616   :  { %3236 = vmatpush.msrb.mxu3 %v11545_v8  ;;  %3135 = vmatpush.msra.mxu2 %v11546_v12  ;;  %v11607_v8 = vld [vmem:[#allocation118_spill] sm:$0xff]  ;;  %v11608_v12 = vld [vmem:[#allocation119_spill] sm:$0xff] }
 0x617   :  { %3197 = vmatpush.msrb.mxu1 %v11547_v4  ;;  %3096 = vmatpush.msra.mxu0 %v11548_v40  ;;  %v11609_v4 = vld [vmem:[#allocation120_spill] sm:$0xff]  ;;  %v11610_v40 = vld [vmem:[#allocation121_spill] sm:$0xff] }
 0x618   :  { %3237 = vmatpush.msrb.mxu3 %v11549_v48  ;;  %3136 = vmatpush.msra.mxu2 %v11550_v6  ;;  %v11611_v48 = vld [vmem:[#allocation122_spill] sm:$0xff]  ;;  %v11612_v6 = vld [vmem:[#allocation123_spill] sm:$0xff] }
 0x619   :  { %3198 = vmatpush.msrb.mxu1 %v11551_v24  ;;  %3097 = vmatpush.msra.mxu0 %v11552_v1  ;;  %v11613_v24 = vld [vmem:[#allocation124_spill] sm:$0xff]  ;;  %v11614_v1 = vld [vmem:[#allocation125_spill] sm:$0xff] }
 0x61a   :  { %3238 = vmatpush.msrb.mxu3 %v11553_v38  ;;  %3137 = vmatpush.msra.mxu2 %v11554_v32  ;;  %v11615_v38 = vld [vmem:[#allocation126_spill] sm:$0xff]  ;;  %v11616_v32 = vld [vmem:[#allocation127_spill] sm:$0xff] }
 0x61b   :  { %3199 = vmatpush.msrb.mxu1 %v11555_v51  ;;  %3098 = vmatpush.msra.mxu0 %v11556_v46  ;;  %v11617_v51 = vld [vmem:[#allocation128_spill] sm:$0xff]  ;;  %v11618_v46 = vld [vmem:[#allocation129_spill] sm:$0xff] }
 0x61c   :  { %3239 = vmatpush.msrb.mxu3 %v11557_v9  ;;  %3138 = vmatpush.msra.mxu2 %v11558_v10  ;;  %v11619_v9 = vld [vmem:[#allocation130_spill] sm:$0xff]  ;;  %v11620_v10 = vld [vmem:[#allocation131_spill] sm:$0xff] }
 0x61d   :  { %3200 = vmatpush.msrb.mxu1 %v11559_v35  ;;  %3099 = vmatpush.msra.mxu0 %v11560_v19  ;;  %v11621_v35 = vld [vmem:[#allocation132_spill] sm:$0xff]  ;;  %v11622_v19 = vld [vmem:[#allocation133_spill] sm:$0xff] }
 0x61e   :  { %3240 = vmatpush.msrb.mxu3 %v11561_v43  ;;  %3139 = vmatpush.msra.mxu2 %v11562_v54  ;;  %v11623_v43 = vld [vmem:[#allocation134_spill] sm:$0xff]  ;;  %v11624_v54 = vld [vmem:[#allocation135_spill] sm:$0xff] }
 0x61f   :  { %3201 = vmatpush.msrb.mxu1 %v11563_v29  ;;  %3100 = vmatpush.msra.mxu0 %v11564_v41  ;;  %v11625_v29 = vld [vmem:[#allocation136_spill] sm:$0xff]  ;;  %v11626_v41 = vld [vmem:[#allocation137_spill] sm:$0xff] }
 0x620   :  { %3241 = vmatpush.msrb.mxu3 %v11565_v33  ;;  %3140 = vmatpush.msra.mxu2 %v11566_v26  ;;  %v11627_v33 = vld [vmem:[#allocation138_spill] sm:$0xff]  ;;  %v11628_v26 = vld [vmem:[#allocation139_spill] sm:$0xff] }
 0x621   :  { %3202 = vmatpush.msrb.mxu1 %v11567_v60  ;;  %3101 = vmatpush.msra.mxu0 %v11568_v2  ;;  %v11629_v60 = vld [vmem:[#allocation140_spill] sm:$0xff]  ;;  %v11630_v2 = vld [vmem:[#allocation141_spill] sm:$0xff] }
 0x622   :  { %3242 = vmatpush.msrb.mxu3 %v11569_v14  ;;  %3141 = vmatpush.msra.mxu2 %v11570_v47  ;;  %v11631_v14 = vld [vmem:[#allocation142_spill] sm:$0xff]  ;;  %v11632_v47 = vld [vmem:[#allocation143_spill] sm:$0xff] }
 0x623   :  { %3203 = vmatpush.msrb.mxu1 %v11571_v50  ;;  %3102 = vmatpush.msra.mxu0 %v11572_v59  ;;  %v11633_v59 = vld [vmem:[#allocation30_spill] sm:$0xff] }
 0x624   :  { %3243 = vmatpush.msrb.mxu3 %v11573_v0  ;;  %3142 = vmatpush.msra.mxu2 %v11574_v20 }
 0x625   :  { %3204 = vmatpush.msrb.mxu1 %v11575_v37  ;;  %3103 = vmatpush.msra.mxu0 %v11576_v23 }
 0x626   :  { %3244 = vmatpush.msrb.mxu3 %v11577_v28  ;;  %3143 = vmatpush.msra.mxu2 %v11578_v27  ;;  %v11634_v27 = vld [vmem:[#allocation32_spill] sm:$0xff] }
 0x627   :  { %3205 = vmatpush.msrb.mxu1 %v11579_v56  ;;  %3104 = vmatpush.msra.mxu0 %v11580_v36 }
 0x628   :  { %3245 = vmatpush.msrb.mxu3 %v11581_v61  ;;  %3144 = vmatpush.msra.mxu2 %v11582_v25 }
 0x629   :  { %3206 = vmatpush.msrb.mxu1 %v11583_v34  ;;  %3105 = vmatpush.msra.mxu0 %v11584_v45 }
 0x62a   :  { %3246 = vmatpush.msrb.mxu3 %v11585_v5  ;;  %3145 = vmatpush.msra.mxu2 %v11586_v13  ;;  %v11635_v13 = vld [vmem:[#allocation31_spill] sm:$0xff] }
 0x62b   :  { %3207 = vmatpush.msrb.mxu1 %v11587_v44  ;;  %3106 = vmatpush.msra.mxu0 %v11588_v16 }
 0x62c   :  { %3247 = vmatpush.msrb.mxu3 %v11589_v62  ;;  %3146 = vmatpush.msra.mxu2 %v11590_v22 }
 0x62d   :  { %3208 = vmatpush.msrb.mxu1 %v11591_v57  ;;  %3107 = vmatpush.msra.mxu0 %v11592_v21 }
 0x62e   :  { %3248 = vmatpush.msrb.mxu3 %v11593_v53  ;;  %3147 = vmatpush.msra.mxu2 %v11594_v17 }
 0x62f   :  { %3209 = vmatpush.msrb.mxu1 %v11595_v11  ;;  %3108 = vmatpush.msra.mxu0 %v11596_v7  ;;  %v11636_v7 = vld [vmem:[#allocation34_spill] sm:$0xff] }
 0x630   :  { %3249 = vmatpush.msrb.mxu3 %v11597_v63  ;;  %3148 = vmatpush.msra.mxu2 %v11598_v18 }
 0x631   :  { %3109 = vmatpush.msra.mxu0 %v11599_v3 }
 0x632   :  { %3149 = vmatpush.msra.mxu2 %v11600_v55 }
 0x633   :  { %3174 = vmatpush.msrb.mxu0 %v11601_v15 }
 0x634   :  { %3214 = vmatpush.msrb.mxu2 %v11602_v31 }
 0x635   :  { %3175 = vmatpush.msrb.mxu0 %v11603_v58 }
 0x636   :  { %3215 = vmatpush.msrb.mxu2 %v11604_v30 }
 0x637   :  { %3176 = vmatpush.msrb.mxu0 %v11605_v39 }
 0x638   :  { %3216 = vmatpush.msrb.mxu2 %v11606_v52 }
 0x639   :  { %3177 = vmatpush.msrb.mxu0 %v11607_v8 }
 0x63a   :  { %3217 = vmatpush.msrb.mxu2 %v11608_v12 }
 0x63b   :  { %3178 = vmatpush.msrb.mxu0 %v11609_v4 }
 0x63c   :  { %3218 = vmatpush.msrb.mxu2 %v11610_v40 }
 0x63d   :  { %3179 = vmatpush.msrb.mxu0 %v11611_v48 }
 0x63e   :  { %3219 = vmatpush.msrb.mxu2 %v11612_v6 }
 0x63f   :  { %3180 = vmatpush.msrb.mxu0 %v11613_v24 }
 0x640   :  { %3220 = vmatpush.msrb.mxu2 %v11614_v1 }
 0x641   :  { %3181 = vmatpush.msrb.mxu0 %v11615_v38 }
 0x642   :  { %3221 = vmatpush.msrb.mxu2 %v11616_v32 }
 0x643   :  { %3182 = vmatpush.msrb.mxu0 %v11617_v51 }
 0x644   :  { %3222 = vmatpush.msrb.mxu2 %v11618_v46 }
 0x645   :  { %3183 = vmatpush.msrb.mxu0 %v11619_v9 }
 0x646   :  { %3223 = vmatpush.msrb.mxu2 %v11620_v10 }
 0x647   :  { %3184 = vmatpush.msrb.mxu0 %v11621_v35  ;;  %v2744_v20 = vpop.f32.mrf.mxu1 }
 0x648   :  { %3224 = vmatpush.msrb.mxu2 %v11622_v19 }
 0x649   :  { %3185 = vmatpush.msrb.mxu0 %v11623_v43 }
 0x64a   :  { %3225 = vmatpush.msrb.mxu2 %v11624_v54 }
 0x64b   :  { %3186 = vmatpush.msrb.mxu0 %v11625_v29 }
 0x64c   :  { %3226 = vmatpush.msrb.mxu2 %v11626_v41 }
 0x64d   :  { %3187 = vmatpush.msrb.mxu0 %v11627_v33  ;;  %v2784_v36 = vpop.f32.mrf.mxu3 }
 0x64e   :  { %3227 = vmatpush.msrb.mxu2 %v11628_v26 }
 0x64f   :  { %3188 = vmatpush.msrb.mxu0 %v11629_v60  ;;  %v2824_v3 = vpop.f32.mrf.mxu1 }
 0x650   :  { %3228 = vmatpush.msrb.mxu2 %v11630_v2 }
 0x651   :  { %3189 = vmatpush.msrb.mxu0 %v11631_v14 }
 0x652   :  { %3229 = vmatpush.msrb.mxu2 %v11632_v47 }
 0x655   :  { %v2864_v16 = vpop.f32.mrf.mxu3 }
 0x66f   :  { %v2724_v50 = vpop.f32.mrf.mxu0 }
 0x670   :  { %v2725_v0 = vadd.f32 %v2724_v50, %v11633_v59  ;;  %v2969_v9 = vpop.f32.mrf.mxu1 }
 0x671   :  { %v3016_v60 = vrot.slane %v2969_v9, 6 }
 0x672   :  { %v2745_v37 = vadd.f32 %v2744_v20, %v2725_v0  ;;  %v3370_v0 = vld [vmem:[%s10063_s0 + $0x38] sm:$0xff] }
 0x674   :  { %v3367_v23 = vmul.f32 -1.442695, %v2745_v37 }
 0x675   :  { %v2764_v28 = vpop.f32.mrf.mxu2 }
 0x676   :  { %3586 = vpow2.f32 %v3367_v23  ;;  %v2765_v56 = vadd.f32 %v2764_v28, %v11634_v27 }
 0x677   :  { %v2804_v21 = vpop.f32.mrf.mxu0  ;;  %v3009_v10 = vpop.f32.mrf.mxu3 }
 0x678   :  { %v2785_v61 = vadd.f32 %v2784_v36, %v2765_v56  ;;  %v2805_v63 = vadd.f32 %v2804_v21, %v11636_v7  ;;  %v3018_v2 = vrot.slane %v3009_v10, 2 }
 0x67a   :  { %v3368_v25 = vmul.f32 -1.442695, %v2785_v61  ;;  %v2825_v55 = vadd.f32 %v2824_v3, %v2805_v63 }
 0x67c   :  { %v3587_v34 = vpop.eup %3586  ;;  %3588 = vpow2.f32 %v3368_v25 }
 0x67d   :  { %v2870_v45 = vadd.f32 1.0, %v3587_v34 }
 0x67e   :  { %v2844_v5 = vpop.f32.mrf.mxu2 }
 0x67f   :  { %3590 = vrcp.f32 %v2870_v45  ;;  %v2845_v44 = vadd.f32 %v2844_v5, %v11635_v13  ;;  %v2882_v52 = vand.u32 2147483648, %v2870_v45  ;;  %vm2876_vm4 = vweird.f32 %v2870_v45 }
 0x680   :  { %v2880_v4 = vand.u32 2147483647, %v2870_v45 }
 0x681   :  { %v2865_v22 = vadd.f32 %v2864_v16, %v2845_v44  ;;  %v2883_v1 = vor.u32 1.1754944e-38, %v2882_v52 }
 0x682   :  { %v3589_v62 = vpop.eup %3588  ;;  %vm2881_vm8 = vcmp.eq.f32.partialorder %v2880_v4, 8.507059e+37 }
 0x683   :  { %v2889_v57 = vadd.f32 1.0, %v3589_v62  ;;  %v3369_v53 = vmul.f32 -1.442695, %v2865_v22 }
 0x685   :  { %v3591_v17 = vpop.eup %3590  ;;  %3592 = vrcp.f32 %v2889_v57  ;;  %v2901_v40 = vand.u32 2147483648, %v2889_v57  ;;  %v2899_v24 = vand.u32 2147483647, %v2889_v57  ;;  %vm2895_vm7 = vweird.f32 %v2889_v57 }
 0x686   :  { %v2872_v11 = vmul.f32 %v3591_v17, %v2870_v45  ;;  %3594 = vpow2.f32 %v3369_v53  ;;  %vm2877_vm3 = vweird.f32 %v3591_v17 }
 0x687   :  { %3596 = vtanh.f32 %v2825_v55  ;;  %vm2878_vm5 = vmor %vm2876_vm4, %vm2877_vm3  ;;  %v2902_v32 = vor.u32 1.1754944e-38, %v2901_v40  ;;  %vm2900_vm10 = vcmp.eq.f32.partialorder %v2899_v24, 8.507059e+37 }
 0x688   :  { %v2873_v18 = vsub.f32 1.0, %v2872_v11 }
 0x68a   :  { %v2874_v15 = vmul.f32 %v3591_v17, %v2873_v18 }
 0x68b   :  { %v3593_v31 = vpop.eup %3592 }
 0x68c   :  { %v3595_v58 = vpop.eup %3594  ;;  %v2891_v30 = vmul.f32 %v3593_v31, %v2889_v57  ;;  %v2875_v39 = vadd.f32 %v3591_v17, %v2874_v15  ;;  %vm2896_vm6 = vweird.f32 %v3593_v31 }
 0x68d   :  { %v2909_v8 = vadd.f32 1.0, %v3595_v58  ;;  %vm2897_vm9 = vmor %vm2895_vm7, %vm2896_vm6  ;;  %v3597_v46 = vpop.eup %3596 }
 0x68e   :  { %v2892_v12 = vsub.f32 1.0, %v2891_v30  ;;  %v2879_v6 = vsel %vm2878_vm5, %v3591_v17, %v2875_v39 }
 0x68f   :  { %3598 = vrcp.f32 %v2909_v8  ;;  %v2884_v51 = vsel %vm2881_vm8, %v2883_v1, %v2879_v6  ;;  %v2949_v33 = vpop.f32.mrf.mxu0  ;;  %v2921_v23 = vand.u32 2147483648, %v2909_v8  ;;  %v2919_v36 = vand.u32 2147483647, %v2909_v8 }
 0x690   :  { %v2893_v48 = vmul.f32 %v3593_v31, %v2892_v12  ;;  %v2926_v29 = vmul.f32 %v3597_v46, %v2884_v51  ;;  %v3019_v20 = vsel %vm179_vm0, %v2949_v33, %v3016_v60  ;;  %vm2915_vm12 = vweird.f32 %v2909_v8 }
 0x691   :  { %v2922_v44 = vor.u32 1.1754944e-38, %v2921_v23  ;;  %vm2920_vm0 = vcmp.eq.f32.partialorder %v2919_v36, 8.507059e+37 }
 0x692   :  { %v2894_v38 = vadd.f32 %v3593_v31, %v2893_v48 }
 0x694   :  { %v2898_v35 = vsel %vm2897_vm9, %v3593_v31, %v2894_v38 }
 0x695   :  { %v3599_v19 = vpop.eup %3598  ;;  %v2903_v43 = vsel %vm2900_vm10, %v2902_v32, %v2898_v35 }
 0x696   :  { %v2925_v54 = vmul.f32 %v2903_v43, %v9771_v49  ;;  %v2911_v41 = vmul.f32 %v3599_v19, %v2909_v8  ;;  %v2989_v26 = vpop.f32.mrf.mxu2  ;;  %vm2916_vm11 = vweird.f32 %v3599_v19 }
 0x697   :  { %v3017_v14 = vrot.slane %v2989_v26, 4  ;;  %vm2917_vm13 = vmor %vm2915_vm12, %vm2916_vm11 }
 0x698   :  { %v10043_v47 = vadd.f32 %v2926_v29, %v2925_v54  ;;  %v2912_v50 = vsub.f32 1.0, %v2911_v41 }
 0x699   :  { %v3020_v37 = vsel %vm181_vm1, %v3017_v14, %v3018_v2 }
 0x69a   :  { %3600 = vtanh.f32 %v10043_v47  ;;  %v3021_v49 = vsel %vm183_vm2, %v3019_v20, %v3020_v37  ;;  %v2913_v28 = vmul.f32 %v3599_v19, %v2912_v50 }
 0x69b   :  { %v3023_v56 = vadd.f32 %v3370_v0, %v3021_v49 }
 0x69c   :  { %v2914_v61 = vadd.f32 %v3599_v19, %v2913_v28 }
 0x69d   :  { %v3371_v25 = vmul.f32 -1.442695, %v3023_v56  ;;  %v3044_v34 = vrot.slane %v3023_v56, 2  ;;  %v3068_v45 = vrot.slane %v3023_v56, 6  ;;  %v3065_v58 = vrot.slane %v3023_v56, 4 }
 0x69e   :  { %v2918_v5 = vsel %vm2917_vm13, %v3599_v19, %v2914_v61 }
 0x69f   :  { %3602 = vpow2.f32 %v3371_v25  ;;  %v3372_v16 = vmul.f32 -1.442695, %v3044_v34  ;;  %v3373_v62 = vmul.f32 -1.442695, %v3068_v45  ;;  %v2923_v57 = vsel %vm2920_vm0, %v2922_v44, %v2918_v5 }
 0x6a0   :  { %v3601_v22 = vpop.eup %3600 }
 0x6a1   :  { %3604 = vpow2.f32 %v3372_v16  ;;  %v2929_v21 = vmul.f32 %v3601_v22, %v2923_v57 }
 0x6a2   :  { %3606 = vpow2.f32 %v3373_v62 }
 0x6a3   :  { %3130 = vmatmul.f32.vlgmr.msra.gmra.mxu1 %v2929_v21  ;;  %3170 = vmatmul.f32.vlgmr.msra.gmra.mxu3 %v2929_v21 }
 0x6a5   :  { %v3603_v53 = vpop.eup %3602 }
 0x6a6   :  { %v3027_v17 = vadd.f32 1.0, %v3603_v53 }
 0x6a7   :  { %v3605_v11 = vpop.eup %3604 }
 0x6a8   :  { %v3607_v63 = vpop.eup %3606  ;;  %3608 = vrcp.f32 %v3027_v17  ;;  %v3049_v18 = vadd.f32 1.0, %v3605_v11  ;;  %v3039_v8 = vand.u32 2147483648, %v3027_v17  ;;  %v3037_v40 = vand.u32 2147483647, %v3027_v17 }
 0x6a9   :  { %v3073_v3 = vadd.f32 1.0, %v3607_v63  ;;  %vm3033_vm2 = vweird.f32 %v3027_v17 }
 0x6aa   :  { %3610 = vrcp.f32 %v3049_v18  ;;  %v3061_v6 = vand.u32 2147483648, %v3049_v18  ;;  %v3059_v38 = vand.u32 2147483647, %v3049_v18  ;;  %v3040_v32 = vor.u32 1.1754944e-38, %v3039_v8 }
 0x6ab   :  { %3612 = vrcp.f32 %v3073_v3  ;;  %3210 = vmatmul.f32.vlgmr.msrb.gmra.mxu1 %v2929_v21  ;;  %3250 = vmatmul.f32.vlgmr.msrb.gmra.mxu3 %v2929_v21  ;;  %vm3038_vm3 = vcmp.eq.f32.partialorder %v3037_v40, 8.507059e+37  ;;  %vm3055_vm4 = vweird.f32 %v3049_v18  ;;  %v3085_v2 = vand.u32 2147483648, %v3073_v3 }
 0x6ac   :  { %3614 = vtanh.f32 %v3065_v58  ;;  %v3062_v35 = vor.u32 1.1754944e-38, %v3061_v6  ;;  %vm3060_vm6 = vcmp.eq.f32.partialorder %v3059_v38, 8.507059e+37  ;;  %vm3079_vm8 = vweird.f32 %v3073_v3 }
 0x6ad   :  { %v3083_v14 = vand.u32 2147483647, %v3073_v3  ;;  %v3086_v0 = vor.u32 1.1754944e-38, %v3085_v2 }
 0x6ae   :  { %v3609_v55 = vpop.eup %3608 }
 0x6af   :  { %v3029_v15 = vmul.f32 %v3609_v55, %v3027_v17  ;;  %vm3034_vm1 = vweird.f32 %v3609_v55  ;;  %vm3084_vm10 = vcmp.eq.f32.partialorder %v3083_v14, 8.507059e+37 }
 0x6b0   :  { %v3611_v31 = vpop.eup %3610  ;;  %vm3035_vm15 = vmor %vm3033_vm2, %vm3034_vm1 }
 0x6b1   :  { %v3613_v30 = vpop.eup %3612  ;;  %v3030_v39 = vsub.f32 1.0, %v3029_v15  ;;  %v3051_v52 = vmul.f32 %v3611_v31, %v3049_v18  ;;  %vm3056_vm14 = vweird.f32 %v3611_v31 }
 0x6b2   :  { %v3075_v12 = vmul.f32 %v3613_v30, %v3073_v3  ;;  %vm3057_vm5 = vmor %vm3055_vm4, %vm3056_vm14  ;;  %v3615_v43 = vpop.eup %3614  ;;  %vm3080_vm7 = vweird.f32 %v3613_v30 }
 0x6b3   :  { %v3031_v4 = vmul.f32 %v3609_v55, %v3030_v39  ;;  %v3052_v48 = vsub.f32 1.0, %v3051_v52  ;;  %vm3081_vm9 = vmor %vm3079_vm8, %vm3080_vm7 }
 0x6b4   :  { %v3076_v51 = vsub.f32 1.0, %v3075_v12 }
 0x6b5   :  { %v3032_v24 = vadd.f32 %v3609_v55, %v3031_v4  ;;  %v3053_v1 = vmul.f32 %v3611_v31, %v3052_v48 }
 0x6b6   :  { %v3077_v29 = vmul.f32 %v3613_v30, %v3076_v51 }
 0x6b7   :  { %v3036_v46 = vsel %vm3035_vm15, %v3609_v55, %v3032_v24  ;;  %v3054_v9 = vadd.f32 %v3611_v31, %v3053_v1 }
 0x6b8   :  { %v3041_v10 = vsel %vm3038_vm3, %v3040_v32, %v3036_v46  ;;  %v3078_v60 = vadd.f32 %v3613_v30, %v3077_v29 }
 0x6b9   :  { %v3058_v19 = vsel %vm3057_vm5, %v3611_v31, %v3054_v9  ;;  %v3090_v33 = vmul.f32 %v3615_v43, %v3041_v10 }
 0x6ba   :  { %v3063_v54 = vsel %vm3060_vm6, %v3062_v35, %v3058_v19  ;;  %v3082_v50 = vsel %vm3081_vm9, %v3613_v30, %v3078_v60 }
 0x6bb   :  { %v3089_v41 = vmul.f32 %v3063_v54, %v9821_v42  ;;  %v3087_v37 = vsel %vm3084_vm10, %v3086_v0, %v3082_v50 }
 0x6bd   :  { %v3091_v26 = vadd.f32 %v3090_v33, %v3089_v41 }
 0x6bf   :  { %3616 = vtanh.f32 %v3091_v26 }
 0x6c5   :  { %v3617_v20 = vpop.eup %3616 }
 0x6c6   :  { %v3093_v23 = vmul.f32 %v3617_v20, %v3087_v37 }
 0x6c8   :  { %3110 = vmatmul.f32.vlgmr.msra.gmra.mxu0 %v3093_v23  ;;  %3150 = vmatmul.f32.vlgmr.msra.gmra.mxu2 %v3093_v23 }
 0x6d0   :  { %3190 = vmatmul.f32.vlgmr.msrb.gmra.mxu0 %v3093_v23  ;;  %3230 = vmatmul.f32.vlgmr.msrb.gmra.mxu2 %v3093_v23 }
 0x720   :  { %v3131_v28 = vpop.f32.mrf.mxu1 }
 0x726   :  { %v3171_v61 = vpop.f32.mrf.mxu3 }
 0x728   :  { %v3211_v15 = vpop.f32.mrf.mxu1 }
 0x72e   :  { %v3251_v57 = vpop.f32.mrf.mxu3 }
 0x745   :  { %v3111_v42 = vpop.f32.mrf.mxu0 }
 0x746   :  { %v3112_v49 = vadd.f32 %v3111_v42, %v11633_v59 }
 0x748   :  { %v3132_v56 = vadd.f32 %v3131_v28, %v3112_v49 }
 0x74a   :  { %v3374_v36 = vmul.f32 -1.442695, %v3132_v56 }
 0x74b   :  { %v3151_v25 = vpop.f32.mrf.mxu2 }
 0x74c   :  { %3618 = vpow2.f32 %v3374_v36  ;;  %v3152_v34 = vadd.f32 %v3151_v25, %v11634_v27 }
 0x74d   :  { %v3191_v11 = vpop.f32.mrf.mxu0 }
 0x74e   :  { %v3172_v45 = vadd.f32 %v3171_v61, %v3152_v34  ;;  %v3192_v27 = vadd.f32 %v3191_v11, %v11636_v7 }
 0x750   :  { %v3375_v5 = vmul.f32 -1.442695, %v3172_v45  ;;  %v3212_v30 = vadd.f32 %v3211_v15, %v3192_v27 }
 0x752   :  { %v3619_v44 = vpop.eup %3618  ;;  %3620 = vpow2.f32 %v3375_v5 }
 0x753   :  { %v3257_v16 = vadd.f32 1.0, %v3619_v44  ;;  %v3231_v62 = vpop.f32.mrf.mxu2 }
 0x754   :  { %v3232_v22 = vadd.f32 %v3231_v62, %v11635_v13 }
 0x755   :  { %3622 = vrcp.f32 %v3257_v16  ;;  %v3269_v8 = vand.u32 2147483648, %v3257_v16  ;;  %vm3263_vm12 = vweird.f32 %v3257_v16  ;;  %v3267_v4 = vand.u32 2147483647, %v3257_v16 }
 0x756   :  { %v3252_v21 = vadd.f32 %v3251_v57, %v3232_v22 }
 0x757   :  { %v3270_v24 = vor.u32 1.1754944e-38, %v3269_v8  ;;  %vm3268_vm2 = vcmp.eq.f32.partialorder %v3267_v4, 8.507059e+37 }
 0x758   :  { %v3621_v59 = vpop.eup %3620  ;;  %v3376_v53 = vmul.f32 -1.442695, %v3252_v21 }
 0x759   :  { %v3276_v17 = vadd.f32 1.0, %v3621_v59 }
 0x75a   :  { %3624 = vpow2.f32 %v3376_v53 }
 0x75b   :  { %v3623_v63 = vpop.eup %3622  ;;  %3626 = vrcp.f32 %v3276_v17  ;;  %v3288_v40 = vand.u32 2147483648, %v3276_v17  ;;  %v3286_v6 = vand.u32 2147483647, %v3276_v17  ;;  %vm3282_vm1 = vweird.f32 %v3276_v17 }
 0x75c   :  { %v3259_v18 = vmul.f32 %v3623_v63, %v3257_v16  ;;  %vm3264_vm11 = vweird.f32 %v3623_v63 }
 0x75d   :  { %vm3265_vm13 = vmor %vm3263_vm12, %vm3264_vm11  ;;  %v3289_v32 = vor.u32 1.1754944e-38, %v3288_v40  ;;  %vm3287_vm15 = vcmp.eq.f32.partialorder %v3286_v6, 8.507059e+37 }
 0x75e   :  { %v3260_v3 = vsub.f32 1.0, %v3259_v18 }
 0x760   :  { %v3625_v55 = vpop.eup %3624  ;;  %v3261_v31 = vmul.f32 %v3623_v63, %v3260_v3 }
 0x761   :  { %v3627_v58 = vpop.eup %3626  ;;  %v3296_v13 = vadd.f32 1.0, %v3625_v55 }
 0x762   :  { %v3278_v39 = vmul.f32 %v3627_v58, %v3276_v17  ;;  %v3262_v52 = vadd.f32 %v3623_v63, %v3261_v31  ;;  %vm3283_vm0 = vweird.f32 %v3627_v58 }
 0x763   :  { %3628 = vrcp.f32 %v3296_v13  ;;  %vm3284_vm14 = vmor %vm3282_vm1, %vm3283_vm0  ;;  %v3308_v26 = vand.u32 2147483648, %v3296_v13  ;;  %vm3302_vm4 = vweird.f32 %v3296_v13  ;;  %v3306_v60 = vand.u32 2147483647, %v3296_v13 }
 0x764   :  { %v3279_v12 = vsub.f32 1.0, %v3278_v39  ;;  %3630 = vtanh.f32 %v3212_v30  ;;  %v3266_v7 = vsel %vm3265_vm13, %v3623_v63, %v3262_v52 }
 0x765   :  { %v3271_v51 = vsel %vm3268_vm2, %v3270_v24, %v3266_v7  ;;  %v3309_v14 = vor.u32 1.1754944e-38, %v3308_v26  ;;  %vm3307_vm6 = vcmp.eq.f32.partialorder %v3306_v60, 8.507059e+37 }
 0x766   :  { %v3280_v48 = vmul.f32 %v3627_v58, %v3279_v12 }
 0x768   :  { %v3281_v1 = vadd.f32 %v3627_v58, %v3280_v48 }
 0x769   :  { %v3629_v38 = vpop.eup %3628 }
 0x76a   :  { %v3285_v46 = vsel %vm3284_vm14, %v3627_v58, %v3281_v1  ;;  %v3298_v9 = vmul.f32 %v3629_v38, %v3296_v13  ;;  %v3631_v10 = vpop.eup %3630  ;;  %vm3303_vm3 = vweird.f32 %v3629_v38 }
 0x76b   :  { %v3290_v35 = vsel %vm3287_vm15, %v3289_v32, %v3285_v46  ;;  %v3313_v43 = vmul.f32 %v3631_v10, %v3271_v51  ;;  %vm3304_vm5 = vmor %vm3302_vm4, %vm3303_vm3 }
 0x76c   :  { %v3312_v19 = vmul.f32 %v3290_v35, %v10043_v47  ;;  %v3299_v54 = vsub.f32 1.0, %v3298_v9 }
 0x76e   :  { %v3314_v29 = vadd.f32 %v3313_v43, %v3312_v19  ;;  %v3300_v41 = vmul.f32 %v3629_v38, %v3299_v54 }
 0x770   :  { %3632 = vtanh.f32 %v3314_v29  ;;  %v3301_v33 = vadd.f32 %v3629_v38, %v3300_v41 }
 0x772   :  { %v3305_v2 = vsel %vm3304_vm5, %v3629_v38, %v3301_v33 }
 0x773   :  { %v3310_v0 = vsel %vm3307_vm6, %v3309_v14, %v3305_v2 }
 0x776   :  { %v3633_v50 = vpop.eup %3632 }
 0x777   :  { %v3316_v20 = vmul.f32 %v3633_v50, %v3310_v0 }
 0x779   :  { %3317 = vst [vmem:[%s10065_s4] sm:$0x3] %v3316_v20 }

</bundles_post_ra>
